<compile_context>
chip_gen: v6e
topology: v6e:2x2x1
jax: 0.10.0
libtpu: 0.0.40
codegen_flags: <defaults>
</compile_context>

<pallas_src>
import functools

import jax
import jax.numpy as jnp
from jax.experimental import pallas as pl
from jax.experimental.pallas import tpu as pltpu


def _ceil_to(x, m):
    return (x + m - 1) // m * m


# --------------------------------------------------------------------------- #
# Weight hard-quantization (exact f32, plain XLA — it is a Cout x K = 8x36 tensor;
# a dedicated kernel launch + HBM round-trip would cost more than it computes).
# --------------------------------------------------------------------------- #
def _quantize_weight(weight_oihw, num_bits, clip_val):
    w = weight_oihw.astype(jnp.float32)
    gamma = (2.0 ** num_bits - 1.0) / (2.0 ** (num_bits - 1))
    half = clip_val / 2.0
    n = (2.0 ** num_bits - 1.0) / clip_val
    scaling = gamma * jnp.mean(jnp.abs(w), axis=(1, 2, 3), keepdims=True)
    safe = jnp.where(scaling == 0.0, 1.0, scaling)      # guard all-zero channels
    scaled = w / safe
    clipped = jnp.clip(scaled, -half, half)
    return scaling * (jnp.round((clipped + half) * n) / n - half)


# --------------------------------------------------------------------------- #
# Fused conv kernel: one image per grid step, tap-accumulation in f32 on the VPU.
#   w_ref : (K, Cout, Ho, 1)  f32 quantized weight, pre-broadcast along Ho so the
#           multiply below is the canonical (M,1)*(M,N) lane broadcast.
#   x_ref : (1, Cin*s*s, Hph, Wph) bf16 padded / stride-phase-split input image.
#   o_ref : (1, Cout, Ho, Wo) f32 — final NCHW block, no post-processing needed.
# --------------------------------------------------------------------------- #
def _fused_qconv_kernel(w_ref, x_ref, o_ref, *, cin, kh_size, kw_size, stride, ho, wo):
    s = stride
    x = x_ref[...].astype(jnp.float32)                 # single bf16->f32 convert
    acc = None
    k = 0
    for ci in range(cin):
        for kh in range(kh_size):
            for kw in range(kw_size):
                # phase-split addressing: padded pixel (ho*s+kh, wo*s+kw) lives in
                # channel-phase cp at row r0+ho, col c0+wo (all offsets static).
                cp = ci * s * s + (kh % s) * s + (kw % s)
                r0 = kh // s
                c0 = kw // s
                x_tap = x[0:1, cp, r0:r0 + ho, c0:c0 + wo]      # (1, Ho, Wo)
                term = w_ref[k] * x_tap                         # (Cout,Ho,1)*(1,Ho,Wo)
                acc = term if acc is None else acc + term       # f32 accumulate
                k += 1
    o_ref[0] = acc                                              # (Cout, Ho, Wo)


def hard_quantize_conv_forward(
    x_nchw,
    weight_oihw,
    *,
    num_bits,
    stride=1,
    padding=1,
    groups=1,
    clip_val=2.0,
    compute_dtype=jnp.bfloat16,
):
    """Pallas equivalent of HardQuantizeConv.forward. NCHW f32 in, NCHW f32 out."""
    if groups != 1:
        # TODO(synk): grouped convolution (groups > 1) not implemented; the module
        # defaults to groups=1 and that is the only path exercised here.
        raise NotImplementedError("groups != 1 is not supported")

    N, Cin, H, W = x_nchw.shape
    Cout, Cin_w, KH, KW = weight_oihw.shape
    assert Cin_w == Cin, "channel mismatch"
    s = int(stride)
    Hp, Wp = H + 2 * padding, W + 2 * padding
    Ho = (Hp - KH) // s + 1
    Wo = (Wp - KW) // s + 1
    K = Cin * KH * KW

    # ---- exact-f32 quantized weight, laid out for canonical in-kernel broadcasts
    wq = _quantize_weight(weight_oihw, float(num_bits), float(clip_val))
    wq_k = jnp.transpose(wq.reshape(Cout, K))                   # (K, Cout), k = ci*KH*KW+kh*KW+kw
    wq_b = jnp.broadcast_to(wq_k[:, :, None, None], (K, Cout, Ho, 1))   # ~18 KiB

    # ---- pad + bf16 cast + (stride>1) phase split: tiny, single-pass XLA plumbing.
    # Phase split means the kernel only ever takes *contiguous* static slices,
    # even for stride > 1 (no strided loads, no in-kernel gathers).
    Hp2, Wp2 = _ceil_to(Hp, s), _ceil_to(Wp, s)
    x_pad = jnp.pad(
        x_nchw.astype(compute_dtype),
        ((0, 0), (0, 0), (padding, padding + Hp2 - Hp), (padding, padding + Wp2 - Wp)),
    )
    Hph, Wph = Hp2 // s, Wp2 // s
    x_ph = x_pad.reshape(N, Cin, Hph, s, Wph, s)
    x_ph = x_ph.transpose(0, 1, 3, 5, 2, 4).reshape(N, Cin * s * s, Hph, Wph)

    kernel = functools.partial(
        _fused_qconv_kernel,
        cin=Cin, kh_size=KH, kw_size=KW, stride=s, ho=Ho, wo=Wo,
    )

    # grid = (N,): whole image per step (VMEM per step is a few MiB at most).
    # No cross-step state -> safe to mark the axis "parallel" (v7x: 2 TCs, N>=2).
    return pl.pallas_call(
        kernel,
        out_shape=jax.ShapeDtypeStruct((N, Cout, Ho, Wo), jnp.float32),
        grid=(N,),
        in_specs=[
            pl.BlockSpec((K, Cout, Ho, 1), lambda n: (0, 0, 0, 0)),       # resident weight
            pl.BlockSpec((1, Cin * s * s, Hph, Wph), lambda n: (n, 0, 0, 0)),
        ],
        out_specs=pl.BlockSpec((1, Cout, Ho, Wo), lambda n: (n, 0, 0, 0)),
        compiler_params=pltpu.CompilerParams(
            dimension_semantics=("parallel",),
        ),
    )(wq_b, x_ph)


# --------------------------------------------------------------------------- #
# Pure-JAX f32 reference (sanity check only; not part of the kernel path).
# --------------------------------------------------------------------------- #
def _reference_forward(x, w, *, num_bits, stride, padding, clip_val=2.0):
    wq = _quantize_weight(w, float(num_bits), float(clip_val))
    return jax.lax.conv_general_dilated(
        x, wq,
        window_strides=(stride, stride),
        padding=[(padding, padding), (padding, padding)],
        dimension_numbers=("NCHW", "OIHW", "NCHW"),
    )


if __name__ == "__main__":
    key = jax.random.PRNGKey(0)
    k_x, k_w = jax.random.split(key, 2)

    # Small shapes consistent with the module: batch=2, in_chn=4, out_chn=8, spatial=16.
    N, Cin, H, W = 2, 4, 16, 16
    Cout, num_bits = 8, 4

    x = jax.random.normal(k_x, (N, Cin, H, W), jnp.float32)
    # Same init distribution as the module: (rand - 0.5) * 0.001
    weight = (jax.random.uniform(k_w, (Cout, Cin, 3, 3), jnp.float32) - 0.5) * 0.001

    # stride=1 path
    out_s1 = hard_quantize_conv_forward(x, weight, num_bits=num_bits, stride=1)
    jax.block_until_ready(out_s1)
    assert out_s1.shape == (N, Cout, H, W)

    # stride=2 path (stride handled via the phase split; kernel slices stay contiguous)
    out_s2 = hard_quantize_conv_forward(x, weight, num_bits=num_bits, stride=2)
    jax.block_until_ready(out_s2)
    assert out_s2.shape == (N, Cout, (H + 2 - 3) // 2 + 1, (W + 2 - 3) // 2 + 1)

    # Numerical check vs a pure-JAX f32 reference.  Weights are exact f32 (on the
    # quantization grid); the only error source is the bf16 activation cast, so a
    # 2% of max-magnitude tolerance is very loose.
    for out, s in ((out_s1, 1), (out_s2, 2)):
        ref = _reference_forward(x, weight, num_bits=num_bits, stride=s, padding=1)
        err = float(jnp.max(jnp.abs(out - ref)))
        scale = float(jnp.max(jnp.abs(ref))) + 1e-12
        assert err <= 0.02 * scale + 1e-6, f"stride={s}: err={err}, scale={scale}"

    print("KERNEL_OK")
</pallas_src>

<mosaic_0001>
module attributes {stable_mosaic.version = 11 : i64} {
  func.func @_fused_qconv_kernel(%arg0: i32, %arg1: memref<36x8x16x1xf32, #tpu.memory_space<vmem>>, %arg2: memref<1x4x18x18xbf16, #tpu.memory_space<vmem>>, %arg3: memref<1x8x16x16xf32, #tpu.memory_space<vmem>>) attributes {dimension_semantics = [#tpu.dimension_semantics<parallel>], iteration_bounds = array<i64: 2>, scalar_prefetch = 0 : i64, scratch_operands = 0 : i64, tpu.core_type = #tpu.core_type<tc>, window_params = [{pipeline_mode = #tpu.pipeline_mode<synchronous>, transform_indices = @transform_0, window_bounds = array<i64: 36, 8, 16, 1>}, {transform_indices = @transform_1, window_bounds = array<i64: 1, 4, 18, 18>}, {transform_indices = @transform_2, window_bounds = array<i64: 1, 8, 16, 16>}]} {
    %c0 = arith.constant 0 : index
    %c0_0 = arith.constant 0 : index
    %c0_1 = arith.constant 0 : index
    %c0_2 = arith.constant 0 : index
    %0 = vector.load %arg2[%c0, %c0_0, %c0_1, %c0_2] : memref<1x4x18x18xbf16, #tpu.memory_space<vmem>>, vector<1x4x18x18xbf16>
    %1 = arith.extf %0 : vector<1x4x18x18xbf16> to vector<1x4x18x18xf32>
    %2 = vector.extract_strided_slice %1 {offsets = [0, 0, 0, 0], sizes = [1, 1, 16, 16], strides = [1, 1, 1, 1]} : vector<1x4x18x18xf32> to vector<1x1x16x16xf32>
    %3 = vector.shape_cast %2 : vector<1x1x16x16xf32> to vector<1x16x16xf32>
    %c0_3 = arith.constant 0 : index
    %c0_4 = arith.constant 0 : index
    %c0_5 = arith.constant 0 : index
    %c0_6 = arith.constant 0 : index
    %4 = vector.load %arg1[%c0_3, %c0_4, %c0_5, %c0_6] : memref<36x8x16x1xf32, #tpu.memory_space<vmem>>, vector<1x8x16x1xf32>
    %5 = vector.shape_cast %4 : vector<1x8x16x1xf32> to vector<8x16x1xf32>
    %6 = vector.broadcast %5 : vector<8x16x1xf32> to vector<8x16x16xf32>
    %7 = vector.broadcast %3 : vector<1x16x16xf32> to vector<8x16x16xf32>
    %8 = arith.mulf %6, %7 : vector<8x16x16xf32>
    %9 = vector.extract_strided_slice %1 {offsets = [0, 0, 0, 1], sizes = [1, 1, 16, 16], strides = [1, 1, 1, 1]} : vector<1x4x18x18xf32> to vector<1x1x16x16xf32>
    %10 = vector.shape_cast %9 : vector<1x1x16x16xf32> to vector<1x16x16xf32>
    %c1 = arith.constant 1 : index
    %c0_7 = arith.constant 0 : index
    %c0_8 = arith.constant 0 : index
    %c0_9 = arith.constant 0 : index
    %11 = vector.load %arg1[%c1, %c0_7, %c0_8, %c0_9] : memref<36x8x16x1xf32, #tpu.memory_space<vmem>>, vector<1x8x16x1xf32>
    %12 = vector.shape_cast %11 : vector<1x8x16x1xf32> to vector<8x16x1xf32>
    %13 = vector.broadcast %12 : vector<8x16x1xf32> to vector<8x16x16xf32>
    %14 = vector.broadcast %10 : vector<1x16x16xf32> to vector<8x16x16xf32>
    %15 = arith.mulf %13, %14 : vector<8x16x16xf32>
    %16 = arith.addf %8, %15 : vector<8x16x16xf32>
    %17 = vector.extract_strided_slice %1 {offsets = [0, 0, 0, 2], sizes = [1, 1, 16, 16], strides = [1, 1, 1, 1]} : vector<1x4x18x18xf32> to vector<1x1x16x16xf32>
    %18 = vector.shape_cast %17 : vector<1x1x16x16xf32> to vector<1x16x16xf32>
    %c2 = arith.constant 2 : index
    %c0_10 = arith.constant 0 : index
    %c0_11 = arith.constant 0 : index
    %c0_12 = arith.constant 0 : index
    %19 = vector.load %arg1[%c2, %c0_10, %c0_11, %c0_12] : memref<36x8x16x1xf32, #tpu.memory_space<vmem>>, vector<1x8x16x1xf32>
    %20 = vector.shape_cast %19 : vector<1x8x16x1xf32> to vector<8x16x1xf32>
    %21 = vector.broadcast %20 : vector<8x16x1xf32> to vector<8x16x16xf32>
    %22 = vector.broadcast %18 : vector<1x16x16xf32> to vector<8x16x16xf32>
    %23 = arith.mulf %21, %22 : vector<8x16x16xf32>
    %24 = arith.addf %16, %23 : vector<8x16x16xf32>
    %25 = vector.extract_strided_slice %1 {offsets = [0, 0, 1, 0], sizes = [1, 1, 16, 16], strides = [1, 1, 1, 1]} : vector<1x4x18x18xf32> to vector<1x1x16x16xf32>
    %26 = vector.shape_cast %25 : vector<1x1x16x16xf32> to vector<1x16x16xf32>
    %c3 = arith.constant 3 : index
    %c0_13 = arith.constant 0 : index
    %c0_14 = arith.constant 0 : index
    %c0_15 = arith.constant 0 : index
    %27 = vector.load %arg1[%c3, %c0_13, %c0_14, %c0_15] : memref<36x8x16x1xf32, #tpu.memory_space<vmem>>, vector<1x8x16x1xf32>
    %28 = vector.shape_cast %27 : vector<1x8x16x1xf32> to vector<8x16x1xf32>
    %29 = vector.broadcast %28 : vector<8x16x1xf32> to vector<8x16x16xf32>
    %30 = vector.broadcast %26 : vector<1x16x16xf32> to vector<8x16x16xf32>
    %31 = arith.mulf %29, %30 : vector<8x16x16xf32>
    %32 = arith.addf %24, %31 : vector<8x16x16xf32>
    %33 = vector.extract_strided_slice %1 {offsets = [0, 0, 1, 1], sizes = [1, 1, 16, 16], strides = [1, 1, 1, 1]} : vector<1x4x18x18xf32> to vector<1x1x16x16xf32>
    %34 = vector.shape_cast %33 : vector<1x1x16x16xf32> to vector<1x16x16xf32>
    %c4 = arith.constant 4 : index
    %c0_16 = arith.constant 0 : index
    %c0_17 = arith.constant 0 : index
    %c0_18 = arith.constant 0 : index
    %35 = vector.load %arg1[%c4, %c0_16, %c0_17, %c0_18] : memref<36x8x16x1xf32, #tpu.memory_space<vmem>>, vector<1x8x16x1xf32>
    %36 = vector.shape_cast %35 : vector<1x8x16x1xf32> to vector<8x16x1xf32>
    %37 = vector.broadcast %36 : vector<8x16x1xf32> to vector<8x16x16xf32>
    %38 = vector.broadcast %34 : vector<1x16x16xf32> to vector<8x16x16xf32>
    %39 = arith.mulf %37, %38 : vector<8x16x16xf32>
    %40 = arith.addf %32, %39 : vector<8x16x16xf32>
    %41 = vector.extract_strided_slice %1 {offsets = [0, 0, 1, 2], sizes = [1, 1, 16, 16], strides = [1, 1, 1, 1]} : vector<1x4x18x18xf32> to vector<1x1x16x16xf32>
    %42 = vector.shape_cast %41 : vector<1x1x16x16xf32> to vector<1x16x16xf32>
    %c5 = arith.constant 5 : index
    %c0_19 = arith.constant 0 : index
    %c0_20 = arith.constant 0 : index
    %c0_21 = arith.constant 0 : index
    %43 = vector.load %arg1[%c5, %c0_19, %c0_20, %c0_21] : memref<36x8x16x1xf32, #tpu.memory_space<vmem>>, vector<1x8x16x1xf32>
    %44 = vector.shape_cast %43 : vector<1x8x16x1xf32> to vector<8x16x1xf32>
    %45 = vector.broadcast %44 : vector<8x16x1xf32> to vector<8x16x16xf32>
    %46 = vector.broadcast %42 : vector<1x16x16xf32> to vector<8x16x16xf32>
    %47 = arith.mulf %45, %46 : vector<8x16x16xf32>
    %48 = arith.addf %40, %47 : vector<8x16x16xf32>
    %49 = vector.extract_strided_slice %1 {offsets = [0, 0, 2, 0], sizes = [1, 1, 16, 16], strides = [1, 1, 1, 1]} : vector<1x4x18x18xf32> to vector<1x1x16x16xf32>
    %50 = vector.shape_cast %49 : vector<1x1x16x16xf32> to vector<1x16x16xf32>
    %c6 = arith.constant 6 : index
    %c0_22 = arith.constant 0 : index
    %c0_23 = arith.constant 0 : index
    %c0_24 = arith.constant 0 : index
    %51 = vector.load %arg1[%c6, %c0_22, %c0_23, %c0_24] : memref<36x8x16x1xf32, #tpu.memory_space<vmem>>, vector<1x8x16x1xf32>
    %52 = vector.shape_cast %51 : vector<1x8x16x1xf32> to vector<8x16x1xf32>
    %53 = vector.broadcast %52 : vector<8x16x1xf32> to vector<8x16x16xf32>
    %54 = vector.broadcast %50 : vector<1x16x16xf32> to vector<8x16x16xf32>
    %55 = arith.mulf %53, %54 : vector<8x16x16xf32>
    %56 = arith.addf %48, %55 : vector<8x16x16xf32>
    %57 = vector.extract_strided_slice %1 {offsets = [0, 0, 2, 1], sizes = [1, 1, 16, 16], strides = [1, 1, 1, 1]} : vector<1x4x18x18xf32> to vector<1x1x16x16xf32>
    %58 = vector.shape_cast %57 : vector<1x1x16x16xf32> to vector<1x16x16xf32>
    %c7 = arith.constant 7 : index
    %c0_25 = arith.constant 0 : index
    %c0_26 = arith.constant 0 : index
    %c0_27 = arith.constant 0 : index
    %59 = vector.load %arg1[%c7, %c0_25, %c0_26, %c0_27] : memref<36x8x16x1xf32, #tpu.memory_space<vmem>>, vector<1x8x16x1xf32>
    %60 = vector.shape_cast %59 : vector<1x8x16x1xf32> to vector<8x16x1xf32>
    %61 = vector.broadcast %60 : vector<8x16x1xf32> to vector<8x16x16xf32>
    %62 = vector.broadcast %58 : vector<1x16x16xf32> to vector<8x16x16xf32>
    %63 = arith.mulf %61, %62 : vector<8x16x16xf32>
    %64 = arith.addf %56, %63 : vector<8x16x16xf32>
    %65 = vector.extract_strided_slice %1 {offsets = [0, 0, 2, 2], sizes = [1, 1, 16, 16], strides = [1, 1, 1, 1]} : vector<1x4x18x18xf32> to vector<1x1x16x16xf32>
    %66 = vector.shape_cast %65 : vector<1x1x16x16xf32> to vector<1x16x16xf32>
    %c8 = arith.constant 8 : index
    %c0_28 = arith.constant 0 : index
    %c0_29 = arith.constant 0 : index
    %c0_30 = arith.constant 0 : index
    %67 = vector.load %arg1[%c8, %c0_28, %c0_29, %c0_30] : memref<36x8x16x1xf32, #tpu.memory_space<vmem>>, vector<1x8x16x1xf32>
    %68 = vector.shape_cast %67 : vector<1x8x16x1xf32> to vector<8x16x1xf32>
    %69 = vector.broadcast %68 : vector<8x16x1xf32> to vector<8x16x16xf32>
    %70 = vector.broadcast %66 : vector<1x16x16xf32> to vector<8x16x16xf32>
    %71 = arith.mulf %69, %70 : vector<8x16x16xf32>
    %72 = arith.addf %64, %71 : vector<8x16x16xf32>
    %73 = vector.extract_strided_slice %1 {offsets = [0, 1, 0, 0], sizes = [1, 1, 16, 16], strides = [1, 1, 1, 1]} : vector<1x4x18x18xf32> to vector<1x1x16x16xf32>
    %74 = vector.shape_cast %73 : vector<1x1x16x16xf32> to vector<1x16x16xf32>
    %c9 = arith.constant 9 : index
    %c0_31 = arith.constant 0 : index
    %c0_32 = arith.constant 0 : index
    %c0_33 = arith.constant 0 : index
    %75 = vector.load %arg1[%c9, %c0_31, %c0_32, %c0_33] : memref<36x8x16x1xf32, #tpu.memory_space<vmem>>, vector<1x8x16x1xf32>
    %76 = vector.shape_cast %75 : vector<1x8x16x1xf32> to vector<8x16x1xf32>
    %77 = vector.broadcast %76 : vector<8x16x1xf32> to vector<8x16x16xf32>
    %78 = vector.broadcast %74 : vector<1x16x16xf32> to vector<8x16x16xf32>
    %79 = arith.mulf %77, %78 : vector<8x16x16xf32>
    %80 = arith.addf %72, %79 : vector<8x16x16xf32>
    %81 = vector.extract_strided_slice %1 {offsets = [0, 1, 0, 1], sizes = [1, 1, 16, 16], strides = [1, 1, 1, 1]} : vector<1x4x18x18xf32> to vector<1x1x16x16xf32>
    %82 = vector.shape_cast %81 : vector<1x1x16x16xf32> to vector<1x16x16xf32>
    %c10 = arith.constant 10 : index
    %c0_34 = arith.constant 0 : index
    %c0_35 = arith.constant 0 : index
    %c0_36 = arith.constant 0 : index
    %83 = vector.load %arg1[%c10, %c0_34, %c0_35, %c0_36] : memref<36x8x16x1xf32, #tpu.memory_space<vmem>>, vector<1x8x16x1xf32>
    %84 = vector.shape_cast %83 : vector<1x8x16x1xf32> to vector<8x16x1xf32>
    %85 = vector.broadcast %84 : vector<8x16x1xf32> to vector<8x16x16xf32>
    %86 = vector.broadcast %82 : vector<1x16x16xf32> to vector<8x16x16xf32>
    %87 = arith.mulf %85, %86 : vector<8x16x16xf32>
    %88 = arith.addf %80, %87 : vector<8x16x16xf32>
    %89 = vector.extract_strided_slice %1 {offsets = [0, 1, 0, 2], sizes = [1, 1, 16, 16], strides = [1, 1, 1, 1]} : vector<1x4x18x18xf32> to vector<1x1x16x16xf32>
    %90 = vector.shape_cast %89 : vector<1x1x16x16xf32> to vector<1x16x16xf32>
    %c11 = arith.constant 11 : index
    %c0_37 = arith.constant 0 : index
    %c0_38 = arith.constant 0 : index
    %c0_39 = arith.constant 0 : index
    %91 = vector.load %arg1[%c11, %c0_37, %c0_38, %c0_39] : memref<36x8x16x1xf32, #tpu.memory_space<vmem>>, vector<1x8x16x1xf32>
    %92 = vector.shape_cast %91 : vector<1x8x16x1xf32> to vector<8x16x1xf32>
    %93 = vector.broadcast %92 : vector<8x16x1xf32> to vector<8x16x16xf32>
    %94 = vector.broadcast %90 : vector<1x16x16xf32> to vector<8x16x16xf32>
    %95 = arith.mulf %93, %94 : vector<8x16x16xf32>
    %96 = arith.addf %88, %95 : vector<8x16x16xf32>
    %97 = vector.extract_strided_slice %1 {offsets = [0, 1, 1, 0], sizes = [1, 1, 16, 16], strides = [1, 1, 1, 1]} : vector<1x4x18x18xf32> to vector<1x1x16x16xf32>
    %98 = vector.shape_cast %97 : vector<1x1x16x16xf32> to vector<1x16x16xf32>
    %c12 = arith.constant 12 : index
    %c0_40 = arith.constant 0 : index
    %c0_41 = arith.constant 0 : index
    %c0_42 = arith.constant 0 : index
    %99 = vector.load %arg1[%c12, %c0_40, %c0_41, %c0_42] : memref<36x8x16x1xf32, #tpu.memory_space<vmem>>, vector<1x8x16x1xf32>
    %100 = vector.shape_cast %99 : vector<1x8x16x1xf32> to vector<8x16x1xf32>
    %101 = vector.broadcast %100 : vector<8x16x1xf32> to vector<8x16x16xf32>
    %102 = vector.broadcast %98 : vector<1x16x16xf32> to vector<8x16x16xf32>
    %103 = arith.mulf %101, %102 : vector<8x16x16xf32>
    %104 = arith.addf %96, %103 : vector<8x16x16xf32>
    %105 = vector.extract_strided_slice %1 {offsets = [0, 1, 1, 1], sizes = [1, 1, 16, 16], strides = [1, 1, 1, 1]} : vector<1x4x18x18xf32> to vector<1x1x16x16xf32>
    %106 = vector.shape_cast %105 : vector<1x1x16x16xf32> to vector<1x16x16xf32>
    %c13 = arith.constant 13 : index
    %c0_43 = arith.constant 0 : index
    %c0_44 = arith.constant 0 : index
    %c0_45 = arith.constant 0 : index
    %107 = vector.load %arg1[%c13, %c0_43, %c0_44, %c0_45] : memref<36x8x16x1xf32, #tpu.memory_space<vmem>>, vector<1x8x16x1xf32>
    %108 = vector.shape_cast %107 : vector<1x8x16x1xf32> to vector<8x16x1xf32>
    %109 = vector.broadcast %108 : vector<8x16x1xf32> to vector<8x16x16xf32>
    %110 = vector.broadcast %106 : vector<1x16x16xf32> to vector<8x16x16xf32>
    %111 = arith.mulf %109, %110 : vector<8x16x16xf32>
    %112 = arith.addf %104, %111 : vector<8x16x16xf32>
    %113 = vector.extract_strided_slice %1 {offsets = [0, 1, 1, 2], sizes = [1, 1, 16, 16], strides = [1, 1, 1, 1]} : vector<1x4x18x18xf32> to vector<1x1x16x16xf32>
    %114 = vector.shape_cast %113 : vector<1x1x16x16xf32> to vector<1x16x16xf32>
    %c14 = arith.constant 14 : index
    %c0_46 = arith.constant 0 : index
    %c0_47 = arith.constant 0 : index
    %c0_48 = arith.constant 0 : index
    %115 = vector.load %arg1[%c14, %c0_46, %c0_47, %c0_48] : memref<36x8x16x1xf32, #tpu.memory_space<vmem>>, vector<1x8x16x1xf32>
    %116 = vector.shape_cast %115 : vector<1x8x16x1xf32> to vector<8x16x1xf32>
    %117 = vector.broadcast %116 : vector<8x16x1xf32> to vector<8x16x16xf32>
    %118 = vector.broadcast %114 : vector<1x16x16xf32> to vector<8x16x16xf32>
    %119 = arith.mulf %117, %118 : vector<8x16x16xf32>
    %120 = arith.addf %112, %119 : vector<8x16x16xf32>
    %121 = vector.extract_strided_slice %1 {offsets = [0, 1, 2, 0], sizes = [1, 1, 16, 16], strides = [1, 1, 1, 1]} : vector<1x4x18x18xf32> to vector<1x1x16x16xf32>
    %122 = vector.shape_cast %121 : vector<1x1x16x16xf32> to vector<1x16x16xf32>
    %c15 = arith.constant 15 : index
    %c0_49 = arith.constant 0 : index
    %c0_50 = arith.constant 0 : index
    %c0_51 = arith.constant 0 : index
    %123 = vector.load %arg1[%c15, %c0_49, %c0_50, %c0_51] : memref<36x8x16x1xf32, #tpu.memory_space<vmem>>, vector<1x8x16x1xf32>
    %124 = vector.shape_cast %123 : vector<1x8x16x1xf32> to vector<8x16x1xf32>
    %125 = vector.broadcast %124 : vector<8x16x1xf32> to vector<8x16x16xf32>
    %126 = vector.broadcast %122 : vector<1x16x16xf32> to vector<8x16x16xf32>
    %127 = arith.mulf %125, %126 : vector<8x16x16xf32>
    %128 = arith.addf %120, %127 : vector<8x16x16xf32>
    %129 = vector.extract_strided_slice %1 {offsets = [0, 1, 2, 1], sizes = [1, 1, 16, 16], strides = [1, 1, 1, 1]} : vector<1x4x18x18xf32> to vector<1x1x16x16xf32>
    %130 = vector.shape_cast %129 : vector<1x1x16x16xf32> to vector<1x16x16xf32>
    %c16 = arith.constant 16 : index
    %c0_52 = arith.constant 0 : index
    %c0_53 = arith.constant 0 : index
    %c0_54 = arith.constant 0 : index
    %131 = vector.load %arg1[%c16, %c0_52, %c0_53, %c0_54] : memref<36x8x16x1xf32, #tpu.memory_space<vmem>>, vector<1x8x16x1xf32>
    %132 = vector.shape_cast %131 : vector<1x8x16x1xf32> to vector<8x16x1xf32>
    %133 = vector.broadcast %132 : vector<8x16x1xf32> to vector<8x16x16xf32>
    %134 = vector.broadcast %130 : vector<1x16x16xf32> to vector<8x16x16xf32>
    %135 = arith.mulf %133, %134 : vector<8x16x16xf32>
    %136 = arith.addf %128, %135 : vector<8x16x16xf32>
    %137 = vector.extract_strided_slice %1 {offsets = [0, 1, 2, 2], sizes = [1, 1, 16, 16], strides = [1, 1, 1, 1]} : vector<1x4x18x18xf32> to vector<1x1x16x16xf32>
    %138 = vector.shape_cast %137 : vector<1x1x16x16xf32> to vector<1x16x16xf32>
    %c17 = arith.constant 17 : index
    %c0_55 = arith.constant 0 : index
    %c0_56 = arith.constant 0 : index
    %c0_57 = arith.constant 0 : index
    %139 = vector.load %arg1[%c17, %c0_55, %c0_56, %c0_57] : memref<36x8x16x1xf32, #tpu.memory_space<vmem>>, vector<1x8x16x1xf32>
    %140 = vector.shape_cast %139 : vector<1x8x16x1xf32> to vector<8x16x1xf32>
    %141 = vector.broadcast %140 : vector<8x16x1xf32> to vector<8x16x16xf32>
    %142 = vector.broadcast %138 : vector<1x16x16xf32> to vector<8x16x16xf32>
    %143 = arith.mulf %141, %142 : vector<8x16x16xf32>
    %144 = arith.addf %136, %143 : vector<8x16x16xf32>
    %145 = vector.extract_strided_slice %1 {offsets = [0, 2, 0, 0], sizes = [1, 1, 16, 16], strides = [1, 1, 1, 1]} : vector<1x4x18x18xf32> to vector<1x1x16x16xf32>
    %146 = vector.shape_cast %145 : vector<1x1x16x16xf32> to vector<1x16x16xf32>
    %c18 = arith.constant 18 : index
    %c0_58 = arith.constant 0 : index
    %c0_59 = arith.constant 0 : index
    %c0_60 = arith.constant 0 : index
    %147 = vector.load %arg1[%c18, %c0_58, %c0_59, %c0_60] : memref<36x8x16x1xf32, #tpu.memory_space<vmem>>, vector<1x8x16x1xf32>
    %148 = vector.shape_cast %147 : vector<1x8x16x1xf32> to vector<8x16x1xf32>
    %149 = vector.broadcast %148 : vector<8x16x1xf32> to vector<8x16x16xf32>
    %150 = vector.broadcast %146 : vector<1x16x16xf32> to vector<8x16x16xf32>
    %151 = arith.mulf %149, %150 : vector<8x16x16xf32>
    %152 = arith.addf %144, %151 : vector<8x16x16xf32>
    %153 = vector.extract_strided_slice %1 {offsets = [0, 2, 0, 1], sizes = [1, 1, 16, 16], strides = [1, 1, 1, 1]} : vector<1x4x18x18xf32> to vector<1x1x16x16xf32>
    %154 = vector.shape_cast %153 : vector<1x1x16x16xf32> to vector<1x16x16xf32>
    %c19 = arith.constant 19 : index
    %c0_61 = arith.constant 0 : index
    %c0_62 = arith.constant 0 : index
    %c0_63 = arith.constant 0 : index
    %155 = vector.load %arg1[%c19, %c0_61, %c0_62, %c0_63] : memref<36x8x16x1xf32, #tpu.memory_space<vmem>>, vector<1x8x16x1xf32>
    %156 = vector.shape_cast %155 : vector<1x8x16x1xf32> to vector<8x16x1xf32>
    %157 = vector.broadcast %156 : vector<8x16x1xf32> to vector<8x16x16xf32>
    %158 = vector.broadcast %154 : vector<1x16x16xf32> to vector<8x16x16xf32>
    %159 = arith.mulf %157, %158 : vector<8x16x16xf32>
    %160 = arith.addf %152, %159 : vector<8x16x16xf32>
    %161 = vector.extract_strided_slice %1 {offsets = [0, 2, 0, 2], sizes = [1, 1, 16, 16], strides = [1, 1, 1, 1]} : vector<1x4x18x18xf32> to vector<1x1x16x16xf32>
    %162 = vector.shape_cast %161 : vector<1x1x16x16xf32> to vector<1x16x16xf32>
    %c20 = arith.constant 20 : index
    %c0_64 = arith.constant 0 : index
    %c0_65 = arith.constant 0 : index
    %c0_66 = arith.constant 0 : index
    %163 = vector.load %arg1[%c20, %c0_64, %c0_65, %c0_66] : memref<36x8x16x1xf32, #tpu.memory_space<vmem>>, vector<1x8x16x1xf32>
    %164 = vector.shape_cast %163 : vector<1x8x16x1xf32> to vector<8x16x1xf32>
    %165 = vector.broadcast %164 : vector<8x16x1xf32> to vector<8x16x16xf32>
    %166 = vector.broadcast %162 : vector<1x16x16xf32> to vector<8x16x16xf32>
    %167 = arith.mulf %165, %166 : vector<8x16x16xf32>
    %168 = arith.addf %160, %167 : vector<8x16x16xf32>
    %169 = vector.extract_strided_slice %1 {offsets = [0, 2, 1, 0], sizes = [1, 1, 16, 16], strides = [1, 1, 1, 1]} : vector<1x4x18x18xf32> to vector<1x1x16x16xf32>
    %170 = vector.shape_cast %169 : vector<1x1x16x16xf32> to vector<1x16x16xf32>
    %c21 = arith.constant 21 : index
    %c0_67 = arith.constant 0 : index
    %c0_68 = arith.constant 0 : index
    %c0_69 = arith.constant 0 : index
    %171 = vector.load %arg1[%c21, %c0_67, %c0_68, %c0_69] : memref<36x8x16x1xf32, #tpu.memory_space<vmem>>, vector<1x8x16x1xf32>
    %172 = vector.shape_cast %171 : vector<1x8x16x1xf32> to vector<8x16x1xf32>
    %173 = vector.broadcast %172 : vector<8x16x1xf32> to vector<8x16x16xf32>
    %174 = vector.broadcast %170 : vector<1x16x16xf32> to vector<8x16x16xf32>
    %175 = arith.mulf %173, %174 : vector<8x16x16xf32>
    %176 = arith.addf %168, %175 : vector<8x16x16xf32>
    %177 = vector.extract_strided_slice %1 {offsets = [0, 2, 1, 1], sizes = [1, 1, 16, 16], strides = [1, 1, 1, 1]} : vector<1x4x18x18xf32> to vector<1x1x16x16xf32>
    %178 = vector.shape_cast %177 : vector<1x1x16x16xf32> to vector<1x16x16xf32>
    %c22 = arith.constant 22 : index
    %c0_70 = arith.constant 0 : index
    %c0_71 = arith.constant 0 : index
    %c0_72 = arith.constant 0 : index
    %179 = vector.load %arg1[%c22, %c0_70, %c0_71, %c0_72] : memref<36x8x16x1xf32, #tpu.memory_space<vmem>>, vector<1x8x16x1xf32>
    %180 = vector.shape_cast %179 : vector<1x8x16x1xf32> to vector<8x16x1xf32>
    %181 = vector.broadcast %180 : vector<8x16x1xf32> to vector<8x16x16xf32>
    %182 = vector.broadcast %178 : vector<1x16x16xf32> to vector<8x16x16xf32>
    %183 = arith.mulf %181, %182 : vector<8x16x16xf32>
    %184 = arith.addf %176, %183 : vector<8x16x16xf32>
    %185 = vector.extract_strided_slice %1 {offsets = [0, 2, 1, 2], sizes = [1, 1, 16, 16], strides = [1, 1, 1, 1]} : vector<1x4x18x18xf32> to vector<1x1x16x16xf32>
    %186 = vector.shape_cast %185 : vector<1x1x16x16xf32> to vector<1x16x16xf32>
    %c23 = arith.constant 23 : index
    %c0_73 = arith.constant 0 : index
    %c0_74 = arith.constant 0 : index
    %c0_75 = arith.constant 0 : index
    %187 = vector.load %arg1[%c23, %c0_73, %c0_74, %c0_75] : memref<36x8x16x1xf32, #tpu.memory_space<vmem>>, vector<1x8x16x1xf32>
    %188 = vector.shape_cast %187 : vector<1x8x16x1xf32> to vector<8x16x1xf32>
    %189 = vector.broadcast %188 : vector<8x16x1xf32> to vector<8x16x16xf32>
    %190 = vector.broadcast %186 : vector<1x16x16xf32> to vector<8x16x16xf32>
    %191 = arith.mulf %189, %190 : vector<8x16x16xf32>
    %192 = arith.addf %184, %191 : vector<8x16x16xf32>
    %193 = vector.extract_strided_slice %1 {offsets = [0, 2, 2, 0], sizes = [1, 1, 16, 16], strides = [1, 1, 1, 1]} : vector<1x4x18x18xf32> to vector<1x1x16x16xf32>
    %194 = vector.shape_cast %193 : vector<1x1x16x16xf32> to vector<1x16x16xf32>
    %c24 = arith.constant 24 : index
    %c0_76 = arith.constant 0 : index
    %c0_77 = arith.constant 0 : index
    %c0_78 = arith.constant 0 : index
    %195 = vector.load %arg1[%c24, %c0_76, %c0_77, %c0_78] : memref<36x8x16x1xf32, #tpu.memory_space<vmem>>, vector<1x8x16x1xf32>
    %196 = vector.shape_cast %195 : vector<1x8x16x1xf32> to vector<8x16x1xf32>
    %197 = vector.broadcast %196 : vector<8x16x1xf32> to vector<8x16x16xf32>
    %198 = vector.broadcast %194 : vector<1x16x16xf32> to vector<8x16x16xf32>
    %199 = arith.mulf %197, %198 : vector<8x16x16xf32>
    %200 = arith.addf %192, %199 : vector<8x16x16xf32>
    %201 = vector.extract_strided_slice %1 {offsets = [0, 2, 2, 1], sizes = [1, 1, 16, 16], strides = [1, 1, 1, 1]} : vector<1x4x18x18xf32> to vector<1x1x16x16xf32>
    %202 = vector.shape_cast %201 : vector<1x1x16x16xf32> to vector<1x16x16xf32>
    %c25 = arith.constant 25 : index
    %c0_79 = arith.constant 0 : index
    %c0_80 = arith.constant 0 : index
    %c0_81 = arith.constant 0 : index
    %203 = vector.load %arg1[%c25, %c0_79, %c0_80, %c0_81] : memref<36x8x16x1xf32, #tpu.memory_space<vmem>>, vector<1x8x16x1xf32>
    %204 = vector.shape_cast %203 : vector<1x8x16x1xf32> to vector<8x16x1xf32>
    %205 = vector.broadcast %204 : vector<8x16x1xf32> to vector<8x16x16xf32>
    %206 = vector.broadcast %202 : vector<1x16x16xf32> to vector<8x16x16xf32>
    %207 = arith.mulf %205, %206 : vector<8x16x16xf32>
    %208 = arith.addf %200, %207 : vector<8x16x16xf32>
    %209 = vector.extract_strided_slice %1 {offsets = [0, 2, 2, 2], sizes = [1, 1, 16, 16], strides = [1, 1, 1, 1]} : vector<1x4x18x18xf32> to vector<1x1x16x16xf32>
    %210 = vector.shape_cast %209 : vector<1x1x16x16xf32> to vector<1x16x16xf32>
    %c26 = arith.constant 26 : index
    %c0_82 = arith.constant 0 : index
    %c0_83 = arith.constant 0 : index
    %c0_84 = arith.constant 0 : index
    %211 = vector.load %arg1[%c26, %c0_82, %c0_83, %c0_84] : memref<36x8x16x1xf32, #tpu.memory_space<vmem>>, vector<1x8x16x1xf32>
    %212 = vector.shape_cast %211 : vector<1x8x16x1xf32> to vector<8x16x1xf32>
    %213 = vector.broadcast %212 : vector<8x16x1xf32> to vector<8x16x16xf32>
    %214 = vector.broadcast %210 : vector<1x16x16xf32> to vector<8x16x16xf32>
    %215 = arith.mulf %213, %214 : vector<8x16x16xf32>
    %216 = arith.addf %208, %215 : vector<8x16x16xf32>
    %217 = vector.extract_strided_slice %1 {offsets = [0, 3, 0, 0], sizes = [1, 1, 16, 16], strides = [1, 1, 1, 1]} : vector<1x4x18x18xf32> to vector<1x1x16x16xf32>
    %218 = vector.shape_cast %217 : vector<1x1x16x16xf32> to vector<1x16x16xf32>
    %c27 = arith.constant 27 : index
    %c0_85 = arith.constant 0 : index
    %c0_86 = arith.constant 0 : index
    %c0_87 = arith.constant 0 : index
    %219 = vector.load %arg1[%c27, %c0_85, %c0_86, %c0_87] : memref<36x8x16x1xf32, #tpu.memory_space<vmem>>, vector<1x8x16x1xf32>
    %220 = vector.shape_cast %219 : vector<1x8x16x1xf32> to vector<8x16x1xf32>
    %221 = vector.broadcast %220 : vector<8x16x1xf32> to vector<8x16x16xf32>
    %222 = vector.broadcast %218 : vector<1x16x16xf32> to vector<8x16x16xf32>
    %223 = arith.mulf %221, %222 : vector<8x16x16xf32>
    %224 = arith.addf %216, %223 : vector<8x16x16xf32>
    %225 = vector.extract_strided_slice %1 {offsets = [0, 3, 0, 1], sizes = [1, 1, 16, 16], strides = [1, 1, 1, 1]} : vector<1x4x18x18xf32> to vector<1x1x16x16xf32>
    %226 = vector.shape_cast %225 : vector<1x1x16x16xf32> to vector<1x16x16xf32>
    %c28 = arith.constant 28 : index
    %c0_88 = arith.constant 0 : index
    %c0_89 = arith.constant 0 : index
    %c0_90 = arith.constant 0 : index
    %227 = vector.load %arg1[%c28, %c0_88, %c0_89, %c0_90] : memref<36x8x16x1xf32, #tpu.memory_space<vmem>>, vector<1x8x16x1xf32>
    %228 = vector.shape_cast %227 : vector<1x8x16x1xf32> to vector<8x16x1xf32>
    %229 = vector.broadcast %228 : vector<8x16x1xf32> to vector<8x16x16xf32>
    %230 = vector.broadcast %226 : vector<1x16x16xf32> to vector<8x16x16xf32>
    %231 = arith.mulf %229, %230 : vector<8x16x16xf32>
    %232 = arith.addf %224, %231 : vector<8x16x16xf32>
    %233 = vector.extract_strided_slice %1 {offsets = [0, 3, 0, 2], sizes = [1, 1, 16, 16], strides = [1, 1, 1, 1]} : vector<1x4x18x18xf32> to vector<1x1x16x16xf32>
    %234 = vector.shape_cast %233 : vector<1x1x16x16xf32> to vector<1x16x16xf32>
    %c29 = arith.constant 29 : index
    %c0_91 = arith.constant 0 : index
    %c0_92 = arith.constant 0 : index
    %c0_93 = arith.constant 0 : index
    %235 = vector.load %arg1[%c29, %c0_91, %c0_92, %c0_93] : memref<36x8x16x1xf32, #tpu.memory_space<vmem>>, vector<1x8x16x1xf32>
    %236 = vector.shape_cast %235 : vector<1x8x16x1xf32> to vector<8x16x1xf32>
    %237 = vector.broadcast %236 : vector<8x16x1xf32> to vector<8x16x16xf32>
    %238 = vector.broadcast %234 : vector<1x16x16xf32> to vector<8x16x16xf32>
    %239 = arith.mulf %237, %238 : vector<8x16x16xf32>
    %240 = arith.addf %232, %239 : vector<8x16x16xf32>
    %241 = vector.extract_strided_slice %1 {offsets = [0, 3, 1, 0], sizes = [1, 1, 16, 16], strides = [1, 1, 1, 1]} : vector<1x4x18x18xf32> to vector<1x1x16x16xf32>
    %242 = vector.shape_cast %241 : vector<1x1x16x16xf32> to vector<1x16x16xf32>
    %c30 = arith.constant 30 : index
    %c0_94 = arith.constant 0 : index
    %c0_95 = arith.constant 0 : index
    %c0_96 = arith.constant 0 : index
    %243 = vector.load %arg1[%c30, %c0_94, %c0_95, %c0_96] : memref<36x8x16x1xf32, #tpu.memory_space<vmem>>, vector<1x8x16x1xf32>
    %244 = vector.shape_cast %243 : vector<1x8x16x1xf32> to vector<8x16x1xf32>
    %245 = vector.broadcast %244 : vector<8x16x1xf32> to vector<8x16x16xf32>
    %246 = vector.broadcast %242 : vector<1x16x16xf32> to vector<8x16x16xf32>
    %247 = arith.mulf %245, %246 : vector<8x16x16xf32>
    %248 = arith.addf %240, %247 : vector<8x16x16xf32>
    %249 = vector.extract_strided_slice %1 {offsets = [0, 3, 1, 1], sizes = [1, 1, 16, 16], strides = [1, 1, 1, 1]} : vector<1x4x18x18xf32> to vector<1x1x16x16xf32>
    %250 = vector.shape_cast %249 : vector<1x1x16x16xf32> to vector<1x16x16xf32>
    %c31 = arith.constant 31 : index
    %c0_97 = arith.constant 0 : index
    %c0_98 = arith.constant 0 : index
    %c0_99 = arith.constant 0 : index
    %251 = vector.load %arg1[%c31, %c0_97, %c0_98, %c0_99] : memref<36x8x16x1xf32, #tpu.memory_space<vmem>>, vector<1x8x16x1xf32>
    %252 = vector.shape_cast %251 : vector<1x8x16x1xf32> to vector<8x16x1xf32>
    %253 = vector.broadcast %252 : vector<8x16x1xf32> to vector<8x16x16xf32>
    %254 = vector.broadcast %250 : vector<1x16x16xf32> to vector<8x16x16xf32>
    %255 = arith.mulf %253, %254 : vector<8x16x16xf32>
    %256 = arith.addf %248, %255 : vector<8x16x16xf32>
    %257 = vector.extract_strided_slice %1 {offsets = [0, 3, 1, 2], sizes = [1, 1, 16, 16], strides = [1, 1, 1, 1]} : vector<1x4x18x18xf32> to vector<1x1x16x16xf32>
    %258 = vector.shape_cast %257 : vector<1x1x16x16xf32> to vector<1x16x16xf32>
    %c32 = arith.constant 32 : index
    %c0_100 = arith.constant 0 : index
    %c0_101 = arith.constant 0 : index
    %c0_102 = arith.constant 0 : index
    %259 = vector.load %arg1[%c32, %c0_100, %c0_101, %c0_102] : memref<36x8x16x1xf32, #tpu.memory_space<vmem>>, vector<1x8x16x1xf32>
    %260 = vector.shape_cast %259 : vector<1x8x16x1xf32> to vector<8x16x1xf32>
    %261 = vector.broadcast %260 : vector<8x16x1xf32> to vector<8x16x16xf32>
    %262 = vector.broadcast %258 : vector<1x16x16xf32> to vector<8x16x16xf32>
    %263 = arith.mulf %261, %262 : vector<8x16x16xf32>
    %264 = arith.addf %256, %263 : vector<8x16x16xf32>
    %265 = vector.extract_strided_slice %1 {offsets = [0, 3, 2, 0], sizes = [1, 1, 16, 16], strides = [1, 1, 1, 1]} : vector<1x4x18x18xf32> to vector<1x1x16x16xf32>
    %266 = vector.shape_cast %265 : vector<1x1x16x16xf32> to vector<1x16x16xf32>
    %c33 = arith.constant 33 : index
    %c0_103 = arith.constant 0 : index
    %c0_104 = arith.constant 0 : index
    %c0_105 = arith.constant 0 : index
    %267 = vector.load %arg1[%c33, %c0_103, %c0_104, %c0_105] : memref<36x8x16x1xf32, #tpu.memory_space<vmem>>, vector<1x8x16x1xf32>
    %268 = vector.shape_cast %267 : vector<1x8x16x1xf32> to vector<8x16x1xf32>
    %269 = vector.broadcast %268 : vector<8x16x1xf32> to vector<8x16x16xf32>
    %270 = vector.broadcast %266 : vector<1x16x16xf32> to vector<8x16x16xf32>
    %271 = arith.mulf %269, %270 : vector<8x16x16xf32>
    %272 = arith.addf %264, %271 : vector<8x16x16xf32>
    %273 = vector.extract_strided_slice %1 {offsets = [0, 3, 2, 1], sizes = [1, 1, 16, 16], strides = [1, 1, 1, 1]} : vector<1x4x18x18xf32> to vector<1x1x16x16xf32>
    %274 = vector.shape_cast %273 : vector<1x1x16x16xf32> to vector<1x16x16xf32>
    %c34 = arith.constant 34 : index
    %c0_106 = arith.constant 0 : index
    %c0_107 = arith.constant 0 : index
    %c0_108 = arith.constant 0 : index
    %275 = vector.load %arg1[%c34, %c0_106, %c0_107, %c0_108] : memref<36x8x16x1xf32, #tpu.memory_space<vmem>>, vector<1x8x16x1xf32>
    %276 = vector.shape_cast %275 : vector<1x8x16x1xf32> to vector<8x16x1xf32>
    %277 = vector.broadcast %276 : vector<8x16x1xf32> to vector<8x16x16xf32>
    %278 = vector.broadcast %274 : vector<1x16x16xf32> to vector<8x16x16xf32>
    %279 = arith.mulf %277, %278 : vector<8x16x16xf32>
    %280 = arith.addf %272, %279 : vector<8x16x16xf32>
    %281 = vector.extract_strided_slice %1 {offsets = [0, 3, 2, 2], sizes = [1, 1, 16, 16], strides = [1, 1, 1, 1]} : vector<1x4x18x18xf32> to vector<1x1x16x16xf32>
    %282 = vector.shape_cast %281 : vector<1x1x16x16xf32> to vector<1x16x16xf32>
    %c35 = arith.constant 35 : index
    %c0_109 = arith.constant 0 : index
    %c0_110 = arith.constant 0 : index
    %c0_111 = arith.constant 0 : index
    %283 = vector.load %arg1[%c35, %c0_109, %c0_110, %c0_111] : memref<36x8x16x1xf32, #tpu.memory_space<vmem>>, vector<1x8x16x1xf32>
    %284 = vector.shape_cast %283 : vector<1x8x16x1xf32> to vector<8x16x1xf32>
    %285 = vector.broadcast %284 : vector<8x16x1xf32> to vector<8x16x16xf32>
    %286 = vector.broadcast %282 : vector<1x16x16xf32> to vector<8x16x16xf32>
    %287 = arith.mulf %285, %286 : vector<8x16x16xf32>
    %288 = arith.addf %280, %287 : vector<8x16x16xf32>
    %c0_112 = arith.constant 0 : index
    %c0_113 = arith.constant 0 : index
    %c0_114 = arith.constant 0 : index
    %c0_115 = arith.constant 0 : index
    %289 = vector.load %arg3[%c0_112, %c0_113, %c0_114, %c0_115] : memref<1x8x16x16xf32, #tpu.memory_space<vmem>>, vector<1x8x16x16xf32>
    %290 = vector.shape_cast %289 : vector<1x8x16x16xf32> to vector<8x16x16xf32>
    %291 = vector.shape_cast %288 : vector<8x16x16xf32> to vector<1x8x16x16xf32>
    tpu.vector_store %arg3[%c0_112, %c0_113, %c0_114, %c0_115], %291 {strides = array<i32>} : memref<1x8x16x16xf32, #tpu.memory_space<vmem>>, vector<1x8x16x16xf32>,
    return
  }
  func.func @transform_0(%arg0: i32) -> (i32, i32, i32, i32) {
    %c0_i32 = arith.constant 0 : i32
    %c0_i32_0 = arith.constant 0 : i32
    %c0_i32_1 = arith.constant 0 : i32
    %c0_i32_2 = arith.constant 0 : i32
    %c0_i32_3 = arith.constant 0 : i32
    return %c0_i32, %c0_i32_0, %c0_i32_1, %c0_i32_2 : i32, i32, i32, i32
  }
  func.func @transform_1(%arg0: i32) -> (i32, i32, i32, i32) {
    %c0_i32 = arith.constant 0 : i32
    %c0_i32_0 = arith.constant 0 : i32
    %c0_i32_1 = arith.constant 0 : i32
    %c0_i32_2 = arith.constant 0 : i32
    return %arg0, %c0_i32, %c0_i32_0, %c0_i32_1 : i32, i32, i32, i32
  }
  func.func @transform_2(%arg0: i32) -> (i32, i32, i32, i32) {
    %c0_i32 = arith.constant 0 : i32
    %c0_i32_0 = arith.constant 0 : i32
    %c0_i32_1 = arith.constant 0 : i32
    %c0_i32_2 = arith.constant 0 : i32
    return %arg0, %c0_i32, %c0_i32_0, %c0_i32_1 : i32, i32, i32, i32
  }
}

</mosaic_0001>

<bundles_post_ra>
// kernel: tpu_custom_call.1
= control target key start
LH: loop header
LB: loop body
LE: loop exit
PB: predicated region body
PF: predicated region fallthrough
CT: control target
= control target key end

     0   :  { %7 = vsyncpa [#allocation3], 0  ;;  %s10694_s0 = inlined_call_operand.vmem [shape: f32[36,8,16,1], index: 0, kind: input, shape index: {}]   ;;  %s10695_s1 = inlined_call_operand.vmem [shape: bf16[2,4,18,18], index: 1, kind: input, shape index: {}]   ;;  %s10696_s2 = inlined_call_operand.hbm [shape: f32[2,8,16,16], index: 2, kind: output, shape index: {}]  }
   0x1   :  { %9 = vsyncpa [#allocation3 + $0x1], 0  ;;  %s6355_s9 = smov 0   ;;  %s6357_s10 = smov 0  }
   0x2   :  { %s6359_s11 = smov 0   ;;  %s6361_s12 = smov 0  }
   0x3 LB: > { %s6376_s13 = sadd.s32 4294967295, %s6332_s12   ;;  %s5564_s14 = sadd.s32 4294967294, %s6332_s12   ;;  %s6332_s12 = sphi %s6361_s12, %s11725_s12   ;;  %s6328_s11 = sphi %s6359_s11, %s11724_s11   ;;  %s6324_s10 = sphi %s6357_s10, %s11723_s10   ;;  %s6320_s9 = sphi %s6355_s9, %s11722_s9  }
   0x4   : > { %s6380_s15 = sadd.s32 1, %s6332_s12   ;;  %s69_s16 = sadd.s32 1, %s6328_s11 }
   0x5   : > { %s66_s17 = ssub.s32 %s6332_s12, %s6380_s15  ;;  %p79_p0 = scmp.ne.s32.totalorder %s6328_s11, %s6324_s10 }
   0x6   : > { %p67_p1 = scmp.eq.s32.totalorder %s66_s17, 0  ;;  %p80_p2 = scmp.eq.s32.totalorder %s6376_s13, 1 }
   0x7   : > { %p85_p3 = scmp.ne.s32.totalorder %s6324_s10, %s6320_s9  ;;  %p86_p4 = scmp.eq.s32.totalorder %s5564_s14, 1 }
   0x8   : > { %s6391_s18 = scalar_select %p67_p1, %s6328_s11, %s69_s16  }
   0x9   : > { %p6393_p5 = por %p80_p2, %p79_p0  ;;  %p6397_p6 = por %p86_p4, %p85_p3 }
   0xa   : > { %p5567_p7 = scmp.ge.s32.totalorder %s6332_s12, 1  ;;  %p115_p8 = scmp.lt.s32.totalorder %s6332_s12, 3 }
   0xc   : > { %p116_p9 = pnand %p5567_p7, %p115_p8 }
   0xe   : > { %119 = sbr.rel (%p116_p9) target bundleno = 2240 (0x8c0), region = 28 }
  0x13   : > { %v168_v0 = vld [vmem:[%s10694_s0 + $0x10] sm:$0xff]  ;;  %v166_v1 = vld [vmem:[%s10694_s0] sm:$0xff]  ;;  %v6334_v2 = vmov 0   ;;  %v169_v3 = vld [vmem:[%s10694_s0 + $0x18] sm:$0xff]  ;;  %p137_p10 = scmp.lt.s32.totalorder %s6376_s13, 1  ;;  %s6335_s27 = smov 127  }
  0x14   : > { %6191 = vset.pattern.permute.xlu1 %v6334_v2  ;;  %6190 = vset.pattern.permute.xlu0 %v6334_v2  ;;  %v167_v4 = vld [vmem:[%s10694_s0 + $0x8] sm:$0xff]  ;;  %v170_v6 = vld [vmem:[%s10694_s0 + $0x20] sm:$0xff]  ;;  %v173_v7 = vld [vmem:[%s10694_s0 + $0x38] sm:$0xff]  ;;  %s6336_s28 = smov 126   ;;  %vm764_vm0 = vcmask 1046528   ;;  %vm1171_vm1 = vcmask 1045504  }
  0x15   : > { %194 = vperm.xlu1 %6191, %v168_v0   ;;  %184 = vperm.xlu0 %6190, %v166_v1   ;;  %v171_v5 = vld [vmem:[%s10694_s0 + $0x28] sm:$0xff]  ;;  %v172_v8 = vld [vmem:[%s10694_s0 + $0x30] sm:$0xff]  ;;  %v174_v10 = vld [vmem:[%s10694_s0 + $0x40] sm:$0xff]  ;;  %s138_s22 = scalar_select %p137_p10, %s6376_s13, 1  ;;  %vm5471_vm2 = vcmask 130048  }
  0x16   : > { %v175_v9 = vld [vmem:[%s10694_s0 + $0x48] sm:$0xff]  ;;  %v177_v11 = vld [vmem:[%s10694_s0 + $0x58] sm:$0xff]  ;;  %v176_v12 = vld [vmem:[%s10694_s0 + $0x50] sm:$0xff]  ;;  %s6135_s8 = sshll.u32 %s6376_s13, 11 }
  0x17   : > { %v179_v13 = vld [vmem:[%s10694_s0 + $0x68] sm:$0xff]  ;;  %v178_v14 = vld [vmem:[%s10694_s0 + $0x60] sm:$0xff]  ;;  %v181_v15 = vld [vmem:[%s10694_s0 + $0x78] sm:$0xff]  ;;  %s6145_s23 = smul.u32 48, %s138_s22  ;;  %s10645_s17 = scalar_lea.hbm %s10696_s2, %s6135_s8 }
  0x18   : > { %v180_v16 = vld [vmem:[%s10694_s0 + $0x70] sm:$0xff]  ;;  %v5571_v17 = vld [vmem:[%s10694_s0 + $0x88] sm:$0xff]  ;;  %v5570_v18 = vld [vmem:[%s10694_s0 + $0x80] sm:$0xff] }
  0x19   : > { %199 = vperm.xlu1 %6191, %v169_v3   ;;  %189 = vperm.xlu0 %6190, %v167_v4   ;;  %v5573_v19 = vld [vmem:[%s10694_s0 + $0x98] sm:$0xff]  ;;  %v5572_v20 = vld [vmem:[%s10694_s0 + $0x90] sm:$0xff]  ;;  %v5575_v21 = vld [vmem:[%s10694_s0 + $0xa8] sm:$0xff]  ;;  %s6580_s26 = scalar_lea.vmem %s10695_s1, %s6145_s23  ;;  %s6337_s23 = smov [#allocation2]  }
  0x1a   : > { %v5574_v22 = vld [vmem:[%s10694_s0 + $0xa0] sm:$0xff]  ;;  %v5577_v23 = vld [vmem:[%s10694_s0 + $0xb8] sm:$0xff]  ;;  %v5576_v24 = vld [vmem:[%s10694_s0 + $0xb0] sm:$0xff]  ;;  %s6276_s24 = sshll.u32 %s6337_s23, 4  ;;  %s6277_s24 = int_to_ptr.vmem [resolvable:$false] %s6276_s24 }
  0x1b   : > { %v5579_v25 = vld [vmem:[%s10694_s0 + $0xc8] sm:$0xff]  ;;  %v5578_v26 = vld [vmem:[%s10694_s0 + $0xc0] sm:$0xff]  ;;  %v5581_v27 = vld [vmem:[%s10694_s0 + $0xd8] sm:$0xff] }
  0x1c   : > { %v5580_v28 = vld [vmem:[%s10694_s0 + $0xd0] sm:$0xff]  ;;  %v5583_v29 = vld [vmem:[%s10694_s0 + $0xe8] sm:$0xff]  ;;  %v5582_v30 = vld [vmem:[%s10694_s0 + $0xe0] sm:$0xff] }
  0x1d   : > { %209 = vperm.xlu1 %6191, %v171_v5   ;;  %204 = vperm.xlu0 %6190, %v170_v6   ;;  %v5585_v31 = vld [vmem:[%s10694_s0 + $0xf8] sm:$0xff]  ;;  %v5584_v32 = vld [vmem:[%s10694_s0 + $0xf0] sm:$0xff]  ;;  %v5587_v33 = vld [vmem:[%s10694_s0 + $0x108] sm:$0xff] }
  0x1e   : > { %v5586_v34 = vld [vmem:[%s10694_s0 + $0x100] sm:$0xff]  ;;  %v5589_v35 = vld [vmem:[%s10694_s0 + $0x118] sm:$0xff]  ;;  %v5588_v36 = vld [vmem:[%s10694_s0 + $0x110] sm:$0xff] }
  0x1f   : > { %v5591_v37 = vld [vmem:[%s10694_s0 + $0x128] sm:$0xff]  ;;  %v5590_v38 = vld [vmem:[%s10694_s0 + $0x120] sm:$0xff]  ;;  %v5593_v39 = vld [vmem:[%s10694_s0 + $0x138] sm:$0xff] }
  0x20   : > { %v5592_v40 = vld [vmem:[%s10694_s0 + $0x130] sm:$0xff]  ;;  %v5595_v41 = vld [vmem:[%s10694_s0 + $0x148] sm:$0xff]  ;;  %v5594_v42 = vld [vmem:[%s10694_s0 + $0x140] sm:$0xff] }
  0x21   : > { %219 = vperm.xlu1 %6191, %v173_v7   ;;  %214 = vperm.xlu0 %6190, %v172_v8   ;;  %v5597_v43 = vld [vmem:[%s10694_s0 + $0x158] sm:$0xff]  ;;  %v5596_v44 = vld [vmem:[%s10694_s0 + $0x150] sm:$0xff]  ;;  %v5599_v45 = vld [vmem:[%s10694_s0 + $0x168] sm:$0xff] }
  0x22   : > { %v5598_v46 = vld [vmem:[%s10694_s0 + $0x160] sm:$0xff]  ;;  %v5601_v47 = vld [vmem:[%s10694_s0 + $0x178] sm:$0xff]  ;;  %v5600_v48 = vld [vmem:[%s10694_s0 + $0x170] sm:$0xff] }
  0x23   : > { %v6137_v63 = vld [vmem:[%s6580_s26] sm:$0xff]  }
  0x24   : > { %v6587_v2 = vunpack.c.l.bf16 %v6137_v63  ;;  %v6589_v3 = vunpack.c.h.bf16 %v6137_v63 }
  0x25   : > { %229 = vperm.xlu1 %6191, %v175_v9   ;;  %224 = vperm.xlu0 %6190, %v174_v10  }
  0x29   : > { %239 = vperm.xlu1 %6191, %v177_v11   ;;  %234 = vperm.xlu0 %6190, %v176_v12  }
  0x2d   : > { %249 = vperm.xlu1 %6191, %v179_v13   ;;  %244 = vperm.xlu0 %6190, %v178_v14  }
  0x31   : > { %259 = vperm.xlu1 %6191, %v181_v15   ;;  %254 = vperm.xlu0 %6190, %v180_v16  }
  0x35   : > { %302 = vperm.xlu1 %6191, %v5571_v17   ;;  %297 = vperm.xlu0 %6190, %v5570_v18  }
  0x39   : > { %312 = vperm.xlu1 %6191, %v5573_v19   ;;  %307 = vperm.xlu0 %6190, %v5572_v20  }
  0x3d   : > { %322 = vperm.xlu1 %6191, %v5575_v21   ;;  %317 = vperm.xlu0 %6190, %v5574_v22  }
  0x41   : > { %332 = vperm.xlu1 %6191, %v5577_v23   ;;  %327 = vperm.xlu0 %6190, %v5576_v24  }
  0x45   : > { %342 = vperm.xlu1 %6191, %v5579_v25   ;;  %337 = vperm.xlu0 %6190, %v5578_v26  }
  0x49   : > { %352 = vperm.xlu1 %6191, %v5581_v27   ;;  %347 = vperm.xlu0 %6190, %v5580_v28  }
  0x4d   : > { %362 = vperm.xlu1 %6191, %v5583_v29   ;;  %357 = vperm.xlu0 %6190, %v5582_v30  }
  0x51   : > { %372 = vperm.xlu1 %6191, %v5585_v31   ;;  %367 = vperm.xlu0 %6190, %v5584_v32  }
  0x55   : > { %495 = vperm.xlu1 %6191, %v5587_v33   ;;  %490 = vperm.xlu0 %6190, %v5586_v34  }
  0x59   : > { %505 = vperm.xlu1 %6191, %v5589_v35   ;;  %500 = vperm.xlu0 %6190, %v5588_v36  }
  0x5d   : > { %515 = vperm.xlu1 %6191, %v5591_v37   ;;  %510 = vperm.xlu0 %6190, %v5590_v38  }
  0x61   : > { %525 = vperm.xlu1 %6191, %v5593_v39   ;;  %520 = vperm.xlu0 %6190, %v5592_v40  }
  0x65   : > { %535 = vperm.xlu1 %6191, %v5595_v41   ;;  %530 = vperm.xlu0 %6190, %v5594_v42  }
  0x69   : > { %545 = vperm.xlu1 %6191, %v5597_v43   ;;  %540 = vperm.xlu0 %6190, %v5596_v44  }
  0x6d   : > { %555 = vperm.xlu1 %6191, %v5599_v45   ;;  %550 = vperm.xlu0 %6190, %v5598_v46  }
  0x71   : > { %565 = vperm.xlu1 %6191, %v5601_v47   ;;  %560 = vperm.xlu0 %6190, %v5600_v48  }
  0x90   : > { %v6547_v49 = vpop.permute.xlu1 %194  ;;  %v6549_v50 = vpop.permute.xlu0 %184 }
  0x94   : > { %v6551_v51 = vpop.permute.xlu1 %199  ;;  %v6553_v52 = vpop.permute.xlu0 %189 }
  0x98   : > { %v6555_v53 = vpop.permute.xlu1 %209  ;;  %v6557_v54 = vpop.permute.xlu0 %204 }
  0x9c   : > { %v6559_v55 = vpop.permute.xlu1 %219  ;;  %v6561_v56 = vpop.permute.xlu0 %214 }
  0xa0   : > { %v6564_v57 = vpop.permute.xlu1 %229  ;;  %v6566_v58 = vpop.permute.xlu0 %224 }
  0xa4   : > { %v6569_v59 = vpop.permute.xlu1 %239  ;;  %v6571_v60 = vpop.permute.xlu0 %234 }
  0xa8   : > { %v6573_v61 = vpop.permute.xlu1 %249  ;;  %v6575_v62 = vpop.permute.xlu0 %244 }
  0xac   : > { %v6583_v0 = vpop.permute.xlu1 %259  ;;  %v6585_v1 = vpop.permute.xlu0 %254 }
  0xb0   : > { %v303_v4 = vpop.permute.xlu1 %302  ;;  %v298_v5 = vpop.permute.xlu0 %297 }
  0xb1   : > { %v376_v6 = vmul.f32 %v6589_v3, %v303_v4  ;;  %v375_v7 = vmul.f32 %v6587_v2, %v298_v5 }
  0xb3   : > { %409 = vrot.lane.b32.xlu1 %v376_v6, %s6335_s27  ;;  %407 = vrot.lane.b32.xlu0 %v375_v7, %s6335_s27 }
  0xb4   : > { %v313_v8 = vpop.permute.xlu1 %312  ;;  %v308_v9 = vpop.permute.xlu0 %307 }
  0xb5   : > { %v378_v10 = vmul.f32 %v6589_v3, %v313_v8  ;;  %v377_v11 = vmul.f32 %v6587_v2, %v308_v9 }
  0xb7   : > { %413 = vrot.lane.b32.xlu1 %v378_v10, %s6335_s27  ;;  %411 = vrot.lane.b32.xlu0 %v377_v11, %s6335_s27 }
  0xb8   : > { %v323_v12 = vpop.permute.xlu1 %322  ;;  %v318_v13 = vpop.permute.xlu0 %317 }
  0xb9   : > { %v380_v14 = vmul.f32 %v6589_v3, %v323_v12  ;;  %v379_v15 = vmul.f32 %v6587_v2, %v318_v13 }
  0xbb   : > { %417 = vrot.lane.b32.xlu1 %v380_v14, %s6335_s27  ;;  %415 = vrot.lane.b32.xlu0 %v379_v15, %s6335_s27 }
  0xbc   : > { %v333_v16 = vpop.permute.xlu1 %332  ;;  %v328_v17 = vpop.permute.xlu0 %327 }
  0xbd   : > { %v382_v18 = vmul.f32 %v6589_v3, %v333_v16  ;;  %v381_v19 = vmul.f32 %v6587_v2, %v328_v17 }
  0xbf   : > { %421 = vrot.lane.b32.xlu1 %v382_v18, %s6335_s27  ;;  %419 = vrot.lane.b32.xlu0 %v381_v19, %s6335_s27 }
  0xc0   : > { %v343_v20 = vpop.permute.xlu1 %342  ;;  %v338_v21 = vpop.permute.xlu0 %337 }
  0xc1   : > { %v384_v22 = vmul.f32 %v6589_v3, %v343_v20  ;;  %v383_v23 = vmul.f32 %v6587_v2, %v338_v21 }
  0xc3   : > { %425 = vrot.lane.b32.xlu1 %v384_v22, %s6335_s27  ;;  %423 = vrot.lane.b32.xlu0 %v383_v23, %s6335_s27  ;;  %v5603_v22 = vld [vmem:[%s10694_s0 + $0x188] sm:$0xff]  ;;  %v5602_v23 = vld [vmem:[%s10694_s0 + $0x180] sm:$0xff] }
  0xc4   : > { %v353_v24 = vpop.permute.xlu1 %352  ;;  %v348_v25 = vpop.permute.xlu0 %347 }
  0xc5   : > { %v386_v26 = vmul.f32 %v6589_v3, %v353_v24  ;;  %v385_v27 = vmul.f32 %v6587_v2, %v348_v25  ;;  %v5605_v24 = vld [vmem:[%s10694_s0 + $0x198] sm:$0xff]  ;;  %v5604_v25 = vld [vmem:[%s10694_s0 + $0x190] sm:$0xff] }
  0xc7   : > { %429 = vrot.lane.b32.xlu1 %v386_v26, %s6335_s27  ;;  %427 = vrot.lane.b32.xlu0 %v385_v27, %s6335_s27  ;;  %v5607_v26 = vld [vmem:[%s10694_s0 + $0x1a8] sm:$0xff]  ;;  %v5606_v27 = vld [vmem:[%s10694_s0 + $0x1a0] sm:$0xff] }
  0xc8   : > { %v363_v28 = vpop.permute.xlu1 %362  ;;  %v358_v29 = vpop.permute.xlu0 %357 }
  0xc9   : > { %v388_v30 = vmul.f32 %v6589_v3, %v363_v28  ;;  %v387_v31 = vmul.f32 %v6587_v2, %v358_v29  ;;  %v5609_v28 = vld [vmem:[%s10694_s0 + $0x1b8] sm:$0xff]  ;;  %v5608_v29 = vld [vmem:[%s10694_s0 + $0x1b0] sm:$0xff] }
  0xcb   : > { %433 = vrot.lane.b32.xlu1 %v388_v30, %s6335_s27  ;;  %431 = vrot.lane.b32.xlu0 %v387_v31, %s6335_s27  ;;  %v5611_v30 = vld [vmem:[%s10694_s0 + $0x1c8] sm:$0xff]  ;;  %v5610_v31 = vld [vmem:[%s10694_s0 + $0x1c0] sm:$0xff] }
  0xcc   : > { %v373_v32 = vpop.permute.xlu1 %372  ;;  %v368_v33 = vpop.permute.xlu0 %367 }
  0xcd   : > { %v390_v34 = vmul.f32 %v6589_v3, %v373_v32  ;;  %v389_v35 = vmul.f32 %v6587_v2, %v368_v33  ;;  %v5613_v32 = vld [vmem:[%s10694_s0 + $0x1d8] sm:$0xff]  ;;  %v5612_v33 = vld [vmem:[%s10694_s0 + $0x1d0] sm:$0xff] }
  0xcf   : > { %437 = vrot.lane.b32.xlu1 %v390_v34, %s6335_s27  ;;  %435 = vrot.lane.b32.xlu0 %v389_v35, %s6335_s27  ;;  %v5615_v34 = vld [vmem:[%s10694_s0 + $0x1e8] sm:$0xff]  ;;  %v5614_v35 = vld [vmem:[%s10694_s0 + $0x1e0] sm:$0xff] }
  0xd0   : > { %v496_v36 = vpop.permute.xlu1 %495  ;;  %v491_v37 = vpop.permute.xlu0 %490 }
  0xd1   : > { %v569_v38 = vmul.f32 %v6589_v3, %v496_v36  ;;  %v568_v39 = vmul.f32 %v6587_v2, %v491_v37  ;;  %v5617_v36 = vld [vmem:[%s10694_s0 + $0x1f8] sm:$0xff]  ;;  %v5616_v37 = vld [vmem:[%s10694_s0 + $0x1f0] sm:$0xff] }
  0xd3   : > { %602 = vrot.lane.b32.xlu1 %v569_v38, %s6336_s28  ;;  %600 = vrot.lane.b32.xlu0 %v568_v39, %s6336_s28  ;;  %v5619_v38 = vld [vmem:[%s10694_s0 + $0x208] sm:$0xff]  ;;  %v5618_v39 = vld [vmem:[%s10694_s0 + $0x200] sm:$0xff] }
  0xd4   : > { %v506_v40 = vpop.permute.xlu1 %505  ;;  %v501_v41 = vpop.permute.xlu0 %500 }
  0xd5   : > { %v571_v42 = vmul.f32 %v6589_v3, %v506_v40  ;;  %v570_v43 = vmul.f32 %v6587_v2, %v501_v41  ;;  %v5621_v40 = vld [vmem:[%s10694_s0 + $0x218] sm:$0xff]  ;;  %v5620_v41 = vld [vmem:[%s10694_s0 + $0x210] sm:$0xff] }
  0xd7   : > { %606 = vrot.lane.b32.xlu1 %v571_v42, %s6336_s28  ;;  %604 = vrot.lane.b32.xlu0 %v570_v43, %s6336_s28  ;;  %v5623_v42 = vld [vmem:[%s10694_s0 + $0x228] sm:$0xff]  ;;  %v5622_v43 = vld [vmem:[%s10694_s0 + $0x220] sm:$0xff] }
  0xd8   : > { %v516_v44 = vpop.permute.xlu1 %515  ;;  %v511_v45 = vpop.permute.xlu0 %510 }
  0xd9   : > { %v573_v46 = vmul.f32 %v6589_v3, %v516_v44  ;;  %v572_v47 = vmul.f32 %v6587_v2, %v511_v45  ;;  %v5625_v44 = vld [vmem:[%s10694_s0 + $0x238] sm:$0xff]  ;;  %v5624_v45 = vld [vmem:[%s10694_s0 + $0x230] sm:$0xff] }
  0xdb   : > { %610 = vrot.lane.b32.xlu1 %v573_v46, %s6336_s28  ;;  %608 = vrot.lane.b32.xlu0 %v572_v47, %s6336_s28  ;;  %v5627_v46 = vld [vmem:[%s10694_s0 + $0x248] sm:$0xff]  ;;  %v5626_v47 = vld [vmem:[%s10694_s0 + $0x240] sm:$0xff] }
  0xdc   : > { %v526_v48 = vpop.permute.xlu1 %525  ;;  %v521_v63 = vpop.permute.xlu0 %520 }
  0xdd   : > { %v575_v4 = vmul.f32 %v6589_v3, %v526_v48  ;;  %v574_v5 = vmul.f32 %v6587_v2, %v521_v63  ;;  %v6734_v48 = vld [vmem:[%s6580_s26 + $0x8] sm:$0x1]  ;;  %v5629_v63 = vld [vmem:[%s10694_s0 + $0x258] sm:$0xff] }
  0xdf   : > { %614 = vrot.lane.b32.xlu1 %v575_v4, %s6336_s28  ;;  %612 = vrot.lane.b32.xlu0 %v574_v5, %s6336_s28  ;;  %v5628_v4 = vld [vmem:[%s10694_s0 + $0x250] sm:$0xff]  ;;  %v10697_v5 = vunpack.c.l.bf16 %v6734_v48 }
  0xe0   : > { %v536_v6 = vpop.permute.xlu1 %535  ;;  %v531_v7 = vpop.permute.xlu0 %530 }
  0xe1   : > { %v577_v8 = vmul.f32 %v6589_v3, %v536_v6  ;;  %v576_v9 = vmul.f32 %v6587_v2, %v531_v7 }
  0xe3   : > { %618 = vrot.lane.b32.xlu1 %v577_v8, %s6336_s28  ;;  %616 = vrot.lane.b32.xlu0 %v576_v9, %s6336_s28  ;;  %v5631_v8 = vld [vmem:[%s10694_s0 + $0x268] sm:$0xff]  ;;  %v5630_v9 = vld [vmem:[%s10694_s0 + $0x260] sm:$0xff] }
  0xe4   : > { %v546_v10 = vpop.permute.xlu1 %545  ;;  %v541_v11 = vpop.permute.xlu0 %540 }
  0xe5   : > { %v579_v12 = vmul.f32 %v6589_v3, %v546_v10  ;;  %v578_v13 = vmul.f32 %v6587_v2, %v541_v11  ;;  %v765_v10 = vrot.slane %v6587_v2, 1  ;;  %v766_v11 = vrot.slane %v6589_v3, 1 }
  0xe7   : > { %622 = vrot.lane.b32.xlu1 %v579_v12, %s6336_s28  ;;  %620 = vrot.lane.b32.xlu0 %v578_v13, %s6336_s28  ;;  %v768_v12 = vrot.slane %v10697_v5, 1  ;;  %v5669_v5 = vld [vmem:[%s10694_s0 + $0x398] sm:$0xff] }
  0xe8   : > { %v556_v14 = vpop.permute.xlu1 %555  ;;  %v551_v15 = vpop.permute.xlu0 %550 }
  0xe9   : > { %v581_v16 = vmul.f32 %v6589_v3, %v556_v14  ;;  %v580_v17 = vmul.f32 %v6587_v2, %v551_v15  ;;  %v5633_v15 = vld [vmem:[%s10694_s0 + $0x278] sm:$0xff] }
  0xeb   : > { %626 = vrot.lane.b32.xlu1 %v581_v16, %s6336_s28  ;;  %624 = vrot.lane.b32.xlu0 %v580_v17, %s6336_s28  ;;  %v5632_v16 = vld [vmem:[%s10694_s0 + $0x270] sm:$0xff]  ;;  %v6768_v17 = vsel %vm764_vm0, %v765_v10, %v766_v11 }
  0xec   : > { %v566_v18 = vpop.permute.xlu1 %565  ;;  %v561_v19 = vpop.permute.xlu0 %560 }
  0xed   : > { %v583_v20 = vmul.f32 %v6589_v3, %v566_v18  ;;  %v582_v21 = vmul.f32 %v6587_v2, %v561_v19  ;;  %v6771_v18 = vsel %vm764_vm0, %v766_v11, %v768_v12  ;;  %v5649_v11 = vld [vmem:[%s10694_s0 + $0x2f8] sm:$0xff] }
  0xef   : > { %630 = vrot.lane.b32.xlu1 %v583_v20, %s6336_s28  ;;  %628 = vrot.lane.b32.xlu0 %v582_v21, %s6336_s28  ;;  %v6192_v21 = vpack.i.bf16 %v6771_v18, %v6768_v17 }
  0xf3   : > { %688 = vperm.xlu1 %6191, %v5603_v22   ;;  %683 = vperm.xlu0 %6190, %v5602_v23   ;;  %v5634_v22 = vld [vmem:[%s10694_s0 + $0x280] sm:$0xff] }
  0xf7   : > { %698 = vperm.xlu1 %6191, %v5605_v24   ;;  %693 = vperm.xlu0 %6190, %v5604_v25   ;;  %v5636_v25 = vld [vmem:[%s10694_s0 + $0x290] sm:$0xff] }
  0xfb   : > { %708 = vperm.xlu1 %6191, %v5607_v26   ;;  %703 = vperm.xlu0 %6190, %v5606_v27   ;;  %v5635_v26 = vld [vmem:[%s10694_s0 + $0x288] sm:$0xff] }
  0xff   : > { %718 = vperm.xlu1 %6191, %v5609_v28   ;;  %713 = vperm.xlu0 %6190, %v5608_v29   ;;  %v5638_v29 = vld [vmem:[%s10694_s0 + $0x2a0] sm:$0xff] }
 0x103   : > { %728 = vperm.xlu1 %6191, %v5611_v30   ;;  %723 = vperm.xlu0 %6190, %v5610_v31   ;;  %v5637_v30 = vld [vmem:[%s10694_s0 + $0x298] sm:$0xff] }
 0x107   : > { %738 = vperm.xlu1 %6191, %v5613_v32   ;;  %733 = vperm.xlu0 %6190, %v5612_v33   ;;  %v5640_v33 = vld [vmem:[%s10694_s0 + $0x2b0] sm:$0xff] }
 0x10b   : > { %748 = vperm.xlu1 %6191, %v5615_v34   ;;  %743 = vperm.xlu0 %6190, %v5614_v35   ;;  %v5639_v34 = vld [vmem:[%s10694_s0 + $0x2a8] sm:$0xff] }
 0x10f   : > { %758 = vperm.xlu1 %6191, %v5617_v36   ;;  %753 = vperm.xlu0 %6190, %v5616_v37   ;;  %v5642_v37 = vld [vmem:[%s10694_s0 + $0x2c0] sm:$0xff] }
 0x113   : > { %828 = vperm.xlu1 %6191, %v5619_v38   ;;  %823 = vperm.xlu0 %6190, %v5618_v39   ;;  %v5641_v38 = vld [vmem:[%s10694_s0 + $0x2b8] sm:$0xff] }
 0x117   : > { %838 = vperm.xlu1 %6191, %v5621_v40   ;;  %833 = vperm.xlu0 %6190, %v5620_v41   ;;  %v5644_v41 = vld [vmem:[%s10694_s0 + $0x2d0] sm:$0xff] }
 0x11b   : > { %848 = vperm.xlu1 %6191, %v5623_v42   ;;  %843 = vperm.xlu0 %6190, %v5622_v43   ;;  %v5643_v42 = vld [vmem:[%s10694_s0 + $0x2c8] sm:$0xff] }
 0x11f   : > { %858 = vperm.xlu1 %6191, %v5625_v44   ;;  %853 = vperm.xlu0 %6190, %v5624_v45   ;;  %v5646_v45 = vld [vmem:[%s10694_s0 + $0x2e0] sm:$0xff] }
 0x123   : > { %868 = vperm.xlu1 %6191, %v5627_v46   ;;  %863 = vperm.xlu0 %6190, %v5626_v47   ;;  %v5645_v46 = vld [vmem:[%s10694_s0 + $0x2d8] sm:$0xff] }
 0x125   : > { %v6743_v6 = vpop.permute.xlu1 %409  ;;  %v6745_v7 = vpop.permute.xlu0 %407 }
 0x127   : > { %878 = vperm.xlu1 %6191, %v5629_v63   ;;  %873 = vperm.xlu0 %6190, %v5628_v4   ;;  %v5648_v4 = vld [vmem:[%s10694_s0 + $0x2f0] sm:$0xff] }
 0x129   : > { %v6757_v13 = vpop.permute.xlu1 %413  ;;  %v6759_v14 = vpop.permute.xlu0 %411 }
 0x12b   : > { %888 = vperm.xlu1 %6191, %v5631_v8   ;;  %883 = vperm.xlu0 %6190, %v5630_v9   ;;  %v5647_v8 = vld [vmem:[%s10694_s0 + $0x2e8] sm:$0xff] }
 0x12d   : > { %v6773_v19 = vpop.permute.xlu1 %417  ;;  %v6775_v20 = vpop.permute.xlu0 %415 }
 0x12f   : > { %898 = vperm.xlu1 %6191, %v5633_v15   ;;  %893 = vperm.xlu0 %6190, %v5632_v16   ;;  %v5651_v16 = vld [vmem:[%s10694_s0 + $0x308] sm:$0xff] }
 0x131   : > { %v6782_v23 = vpop.permute.xlu1 %421  ;;  %v6784_v24 = vpop.permute.xlu0 %419 }
 0x133   : > { %958 = vperm.xlu1 %6191, %v5634_v22   ;;  %6193 = vrot.lane.b32.xlu0 %v6192_v21, %s6335_s27  ;;  %v5650_v22 = vld [vmem:[%s10694_s0 + $0x300] sm:$0xff] }
 0x135   : > { %v6793_v27 = vpop.permute.xlu1 %425  ;;  %v6795_v28 = vpop.permute.xlu0 %423 }
 0x137   : > { %968 = vperm.xlu1 %6191, %v5636_v25   ;;  %963 = vperm.xlu0 %6190, %v5635_v26  }
 0x139   : > { %v6803_v31 = vpop.permute.xlu1 %429  ;;  %v6805_v32 = vpop.permute.xlu0 %427 }
 0x13b   : > { %978 = vperm.xlu1 %6191, %v5638_v29   ;;  %973 = vperm.xlu0 %6190, %v5637_v30   ;;  %v5653_v29 = vld [vmem:[%s10694_s0 + $0x318] sm:$0xff]  ;;  %v5655_v30 = vld [vmem:[%s10694_s0 + $0x328] sm:$0xff] }
 0x13d   : > { %v6813_v35 = vpop.permute.xlu1 %433  ;;  %v6815_v36 = vpop.permute.xlu0 %431 }
 0x13f   : > { %988 = vperm.xlu1 %6191, %v5640_v33   ;;  %983 = vperm.xlu0 %6190, %v5639_v34   ;;  %v5654_v33 = vld [vmem:[%s10694_s0 + $0x320] sm:$0xff] }
 0x141   : > { %v6823_v39 = vpop.permute.xlu1 %437  ;;  %v6825_v40 = vpop.permute.xlu0 %435 }
 0x143   : > { %998 = vperm.xlu1 %6191, %v5642_v37   ;;  %993 = vperm.xlu0 %6190, %v5641_v38   ;;  %v5657_v38 = vld [vmem:[%s10694_s0 + $0x338] sm:$0xff] }
 0x145   : > { %v6833_v43 = vpop.permute.xlu1 %602  ;;  %v6835_v44 = vpop.permute.xlu0 %600 }
 0x147   : > { %1008 = vperm.xlu1 %6191, %v5644_v41   ;;  %1003 = vperm.xlu0 %6190, %v5643_v42   ;;  %v5656_v41 = vld [vmem:[%s10694_s0 + $0x330] sm:$0xff] }
 0x149   : > { %v6843_v47 = vpop.permute.xlu1 %606  ;;  %v6845_v63 = vpop.permute.xlu0 %604 }
 0x14b   : > { %1018 = vperm.xlu1 %6191, %v5646_v45   ;;  %1013 = vperm.xlu0 %6190, %v5645_v46   ;;  %v5659_v46 = vld [vmem:[%s10694_s0 + $0x348] sm:$0xff] }
 0x14d   : > { %v6853_v9 = vpop.permute.xlu1 %610  ;;  %v6855_v10 = vpop.permute.xlu0 %608 }
 0x14f   : > { %1028 = vperm.xlu1 %6191, %v5648_v4   ;;  %1023 = vperm.xlu0 %6190, %v5647_v8   ;;  %v5658_v4 = vld [vmem:[%s10694_s0 + $0x340] sm:$0xff]  ;;  %v5661_v8 = vld [vmem:[%s10694_s0 + $0x358] sm:$0xff] }
 0x151   : > { %v6860_v12 = vpop.permute.xlu1 %614  ;;  %v6862_v15 = vpop.permute.xlu0 %612 }
 0x153   : > { %6198 = vrot.lane.b32.xlu1 %v6192_v21, %s6336_s28  ;;  %1033 = vperm.xlu0 %6190, %v5649_v11   ;;  %v5652_v21 = vld [vmem:[%s10694_s0 + $0x310] sm:$0xff] }
 0x154   : > { %v5660_v11 = vld [vmem:[%s10694_s0 + $0x350] sm:$0xff] }
 0x155   : > { %v6871_v25 = vpop.permute.xlu1 %618  ;;  %v6873_v26 = vpop.permute.xlu0 %616 }
 0x157   : > { %1098 = vperm.xlu1 %6191, %v5651_v16   ;;  %1093 = vperm.xlu0 %6190, %v5650_v22  }
 0x159   : > { %v6887_v34 = vpop.permute.xlu1 %622  ;;  %v6889_v37 = vpop.permute.xlu0 %620 }
 0x15a   : > { %10754 = vst [vmem:[#allocation5_spill] sm:$0xff] %v6889_v37 }
 0x15b   : > { %1108 = vperm.xlu1 %6191, %v5653_v29   ;;  %1103 = vperm.xlu0 %6190, %v5652_v21   ;;  %v5663_v29 = vld [vmem:[%s10694_s0 + $0x368] sm:$0xff]  ;;  %v5662_v21 = vld [vmem:[%s10694_s0 + $0x360] sm:$0xff] }
 0x15d   : > { %v6897_v42 = vpop.permute.xlu1 %626  ;;  %v6899_v45 = vpop.permute.xlu0 %624 }
 0x15e   : > { %10755 = vst [vmem:[#allocation6_spill] sm:$0xff] %v6897_v42  ;;  %10756 = vst [vmem:[#allocation7_spill] sm:$0xff] %v6899_v45 }
 0x15f   : > { %1118 = vperm.xlu1 %6191, %v5655_v30   ;;  %1113 = vperm.xlu0 %6190, %v5654_v33  }
 0x161   : > { %v6913_v16 = vpop.permute.xlu1 %630  ;;  %v6915_v22 = vpop.permute.xlu0 %628 }
 0x162   : > { %10757 = vst [vmem:[#allocation8_spill] sm:$0xff] %v6913_v16  ;;  %10758 = vst [vmem:[#allocation9_spill] sm:$0xff] %v6915_v22 }
 0x163   : > { %1128 = vperm.xlu1 %6191, %v5657_v38   ;;  %1123 = vperm.xlu0 %6190, %v5656_v41   ;;  %v5665_v38 = vld [vmem:[%s10694_s0 + $0x378] sm:$0xff]  ;;  %v5664_v41 = vld [vmem:[%s10694_s0 + $0x370] sm:$0xff] }
 0x167   : > { %1138 = vperm.xlu1 %6191, %v5659_v46   ;;  %1133 = vperm.xlu0 %6190, %v5658_v4  }
 0x16b   : > { %1148 = vperm.xlu1 %6191, %v5661_v8   ;;  %1143 = vperm.xlu0 %6190, %v5660_v11   ;;  %v5667_v8 = vld [vmem:[%s10694_s0 + $0x388] sm:$0xff]  ;;  %v5666_v11 = vld [vmem:[%s10694_s0 + $0x380] sm:$0xff] }
 0x16e   : > { %v6923_v30 = vpop.permute.xlu1 %688  ;;  %v6925_v33 = vpop.permute.xlu0 %683 }
 0x16f   : > { %1158 = vperm.xlu1 %6191, %v5663_v29   ;;  %1153 = vperm.xlu0 %6190, %v5662_v21  }
 0x172   : > { %v6933_v46 = vpop.permute.xlu1 %698  ;;  %v6935_v4 = vpop.permute.xlu0 %693 }
 0x173   : > { %1168 = vperm.xlu1 %6191, %v5665_v38   ;;  %1163 = vperm.xlu0 %6190, %v5664_v41   ;;  %v5668_v38 = vld [vmem:[%s10694_s0 + $0x390] sm:$0xff] }
 0x176   : > { %v6943_v29 = vpop.permute.xlu1 %708  ;;  %v6945_v21 = vpop.permute.xlu0 %703 }
 0x177   : > { %10759 = vst [vmem:[#allocation10_spill] sm:$0xff] %v6943_v29  ;;  %10760 = vst [vmem:[#allocation11_spill] sm:$0xff] %v6945_v21  ;;  %1235 = vperm.xlu1 %6191, %v5667_v8   ;;  %1230 = vperm.xlu0 %6190, %v5666_v11   ;;  %v5671_v21 = vld [vmem:[%s10694_s0 + $0x3a8] sm:$0xff]  ;;  %v5670_v8 = vld [vmem:[%s10694_s0 + $0x3a0] sm:$0xff]  ;;  %v10771_v29 = vunpack.c.l.bf16 %v6734_v48 }
 0x179   : > { %v1175_v45 = vrot.slane %v10771_v29, 2 }
 0x17a   : > { %v6953_v41 = vpop.permute.xlu1 %718  ;;  %v6955_v22 = vpop.permute.xlu0 %713 }
 0x17b   : > { %10761 = vst [vmem:[#allocation12_spill] sm:$0xff] %v6953_v41  ;;  %10762 = vst [vmem:[#allocation13_spill] sm:$0xff] %v6955_v22  ;;  %1245 = vperm.xlu1 %6191, %v5669_v5   ;;  %1240 = vperm.xlu0 %6190, %v5668_v38   ;;  %v5673_v22 = vld [vmem:[%s10694_s0 + $0x3b8] sm:$0xff]  ;;  %v5672_v5 = vld [vmem:[%s10694_s0 + $0x3b0] sm:$0xff] }
 0x17e   : > { %v6963_v11 = vpop.permute.xlu1 %728  ;;  %v6965_v16 = vpop.permute.xlu0 %723 }
 0x17f   : > { %10763 = vst [vmem:[#allocation14_spill] sm:$0xff] %v6963_v11  ;;  %10764 = vst [vmem:[#allocation15_spill] sm:$0xff] %v6965_v16  ;;  %1255 = vperm.xlu1 %6191, %v5671_v21   ;;  %1250 = vperm.xlu0 %6190, %v5670_v8   ;;  %v5675_v16 = vld [vmem:[%s10694_s0 + $0x3c8] sm:$0xff]  ;;  %v5674_v21 = vld [vmem:[%s10694_s0 + $0x3c0] sm:$0xff] }
 0x182   : > { %v6973_v38 = vpop.permute.xlu1 %738  ;;  %v6975_v41 = vpop.permute.xlu0 %733 }
 0x183   : > { %10765 = vst [vmem:[#allocation16_spill] sm:$0xff] %v6973_v38  ;;  %10766 = vst [vmem:[#allocation17_spill] sm:$0xff] %v6975_v41  ;;  %1265 = vperm.xlu1 %6191, %v5673_v22   ;;  %1260 = vperm.xlu0 %6190, %v5672_v5   ;;  %v5677_v41 = vld [vmem:[%s10694_s0 + $0x3d8] sm:$0xff]  ;;  %v5676_v22 = vld [vmem:[%s10694_s0 + $0x3d0] sm:$0xff] }
 0x186   : > { %v6983_v8 = vpop.permute.xlu1 %748  ;;  %v6985_v11 = vpop.permute.xlu0 %743 }
 0x187   : > { %10767 = vst [vmem:[#allocation18_spill] sm:$0xff] %v6983_v8  ;;  %10768 = vst [vmem:[#allocation19_spill] sm:$0xff] %v6985_v11  ;;  %1275 = vperm.xlu1 %6191, %v5675_v16   ;;  %1270 = vperm.xlu0 %6190, %v5674_v21   ;;  %v5679_v11 = vld [vmem:[%s10694_s0 + $0x3e8] sm:$0xff]  ;;  %v5678_v16 = vld [vmem:[%s10694_s0 + $0x3e0] sm:$0xff]  ;;  %v1172_v21 = vrot.slane %v6587_v2, 2  ;;  %v1173_v8 = vrot.slane %v6589_v3, 2 }
 0x189   : > { %v7018_v42 = vsel %vm1171_vm1, %v1172_v21, %v1173_v8  ;;  %v7021_v48 = vsel %vm1171_vm1, %v1173_v8, %v1175_v45  ;;  %v5684_v45 = vld [vmem:[%s10694_s0 + $0x410] sm:$0xff] }
 0x18a   : > { %v6993_v5 = vpop.permute.xlu1 %758  ;;  %v6995_v38 = vpop.permute.xlu0 %753  ;;  %10774 = vst [vmem:[#allocation24_spill] sm:$0xff] %v7018_v42  ;;  %10775 = vst [vmem:[#allocation25_spill] sm:$0xff] %v7021_v48 }
 0x18b   : > { %10769 = vst [vmem:[#allocation20_spill] sm:$0xff] %v6993_v5  ;;  %10770 = vst [vmem:[#allocation21_spill] sm:$0xff] %v6995_v38  ;;  %1285 = vperm.xlu1 %6191, %v5677_v41   ;;  %1280 = vperm.xlu0 %6190, %v5676_v22   ;;  %v5681_v22 = vld [vmem:[%s10694_s0 + $0x3f8] sm:$0xff]  ;;  %v5680_v38 = vld [vmem:[%s10694_s0 + $0x3f0] sm:$0xff] }
 0x18e   : > { %v7007_v5 = vpop.permute.xlu1 %828  ;;  %v7009_v41 = vpop.permute.xlu0 %823 }
 0x18f   : > { %10772 = vst [vmem:[#allocation22_spill] sm:$0xff] %v7007_v5  ;;  %10773 = vst [vmem:[#allocation23_spill] sm:$0xff] %v7009_v41  ;;  %1295 = vperm.xlu1 %6191, %v5679_v11   ;;  %1290 = vperm.xlu0 %6190, %v5678_v16   ;;  %v6202_v11 = vpack.i.bf16 %v7021_v48, %v7018_v42  ;;  %v5682_v16 = vld [vmem:[%s10694_s0 + $0x400] sm:$0xff]  ;;  %v5685_v42 = vld [vmem:[%s10694_s0 + $0x418] sm:$0xff] }
 0x192   : > { %v7023_v29 = vpop.permute.xlu1 %838  ;;  %v7025_v5 = vpop.permute.xlu0 %833 }
 0x193   : > { %10776 = vst [vmem:[#allocation26_spill] sm:$0xff] %v7023_v29  ;;  %10777 = vst [vmem:[#allocation27_spill] sm:$0xff] %v7025_v5  ;;  %1305 = vperm.xlu1 %6191, %v5681_v22   ;;  %1300 = vperm.xlu0 %6190, %v5680_v38   ;;  %v5683_v38 = vld [vmem:[%s10694_s0 + $0x408] sm:$0xff] }
 0x194   : > { %v5699_v5 = vld [vmem:[%s10694_s0 + $0x488] sm:$0xff] }
 0x196   : > { %v7032_v41 = vpop.permute.xlu1 %848  ;;  %v7034_v21 = vpop.permute.xlu0 %843 }
 0x197   : > { %10778 = vst [vmem:[#allocation28_spill] sm:$0xff] %v7032_v41  ;;  %10779 = vst [vmem:[#allocation29_spill] sm:$0xff] %v7034_v21  ;;  %1365 = vperm.xlu1 %6191, %v5682_v16   ;;  %6203 = vrot.lane.b32.xlu0 %v6202_v11, %s6335_s27  ;;  %v5686_v16 = vld [vmem:[%s10694_s0 + $0x420] sm:$0xff] }
 0x19a   : > { %v7043_v8 = vpop.permute.xlu1 %858  ;;  %v7045_v22 = vpop.permute.xlu0 %853 }
 0x19b   : > { %10780 = vst [vmem:[#allocation30_spill] sm:$0xff] %v7043_v8  ;;  %10781 = vst [vmem:[#allocation31_spill] sm:$0xff] %v7045_v22  ;;  %1375 = vperm.xlu1 %6191, %v5684_v45   ;;  %1370 = vperm.xlu0 %6190, %v5683_v38   ;;  %v5688_v22 = vld [vmem:[%s10694_s0 + $0x430] sm:$0xff]  ;;  %v5687_v45 = vld [vmem:[%s10694_s0 + $0x428] sm:$0xff] }
 0x19e   : > { %v7053_v48 = vpop.permute.xlu1 %868  ;;  %v7055_v21 = vpop.permute.xlu0 %863 }
 0x19f   : > { %10782 = vst [vmem:[#allocation32_spill] sm:$0xff] %v7053_v48  ;;  %10783 = vst [vmem:[#allocation33_spill] sm:$0xff] %v7055_v21  ;;  %1385 = vperm.xlu1 %6191, %v5686_v16   ;;  %1380 = vperm.xlu0 %6190, %v5685_v42   ;;  %v5690_v21 = vld [vmem:[%s10694_s0 + $0x440] sm:$0xff]  ;;  %v5689_v42 = vld [vmem:[%s10694_s0 + $0x438] sm:$0xff] }
 0x1a2   : > { %v7063_v38 = vpop.permute.xlu1 %878  ;;  %v7065_v8 = vpop.permute.xlu0 %873 }
 0x1a3   : > { %10784 = vst [vmem:[#allocation34_spill] sm:$0xff] %v7063_v38  ;;  %10785 = vst [vmem:[#allocation35_spill] sm:$0xff] %v7065_v8  ;;  %1395 = vperm.xlu1 %6191, %v5688_v22   ;;  %1390 = vperm.xlu0 %6190, %v5687_v45   ;;  %v5692_v8 = vld [vmem:[%s10694_s0 + $0x450] sm:$0xff]  ;;  %v5691_v22 = vld [vmem:[%s10694_s0 + $0x448] sm:$0xff] }
 0x1a6   : > { %v7073_v16 = vpop.permute.xlu1 %888  ;;  %v7075_v48 = vpop.permute.xlu0 %883 }
 0x1a7   : > { %10786 = vst [vmem:[#allocation36_spill] sm:$0xff] %v7073_v16  ;;  %10787 = vst [vmem:[#allocation37_spill] sm:$0xff] %v7075_v48  ;;  %1405 = vperm.xlu1 %6191, %v5690_v21   ;;  %1400 = vperm.xlu0 %6190, %v5689_v42   ;;  %v5694_v48 = vld [vmem:[%s10694_s0 + $0x460] sm:$0xff]  ;;  %v5693_v21 = vld [vmem:[%s10694_s0 + $0x458] sm:$0xff] }
 0x1aa   : > { %v7083_v45 = vpop.permute.xlu1 %898  ;;  %v7085_v38 = vpop.permute.xlu0 %893 }
 0x1ab   : > { %10788 = vst [vmem:[#allocation38_spill] sm:$0xff] %v7083_v45  ;;  %10789 = vst [vmem:[#allocation39_spill] sm:$0xff] %v7085_v38  ;;  %1415 = vperm.xlu1 %6191, %v5692_v8   ;;  %1410 = vperm.xlu0 %6190, %v5691_v22   ;;  %v5696_v38 = vld [vmem:[%s10694_s0 + $0x470] sm:$0xff]  ;;  %v5695_v8 = vld [vmem:[%s10694_s0 + $0x468] sm:$0xff] }
 0x1ae   : > { %v7093_v42 = vpop.permute.xlu1 %958  ;;  %v7095_v16 = vpop.permute.xlu0 %6193 }
 0x1af   : > { %10790 = vst [vmem:[#allocation40_spill] sm:$0xff] %v7093_v42  ;;  %10791 = vst [vmem:[#allocation41_spill] sm:$0xff] %v7095_v16  ;;  %1425 = vperm.xlu1 %6191, %v5694_v48   ;;  %1420 = vperm.xlu0 %6190, %v5693_v21   ;;  %v5697_v42 = vld [vmem:[%s10694_s0 + $0x478] sm:$0xff] }
 0x1b2   : > { %v7103_v22 = vpop.permute.xlu1 %968  ;;  %v7105_v41 = vpop.permute.xlu0 %963 }
 0x1b3   : > { %10792 = vst [vmem:[#allocation42_spill] sm:$0xff] %v7103_v22  ;;  %10793 = vst [vmem:[#allocation43_spill] sm:$0xff] %v7105_v41  ;;  %1435 = vperm.xlu1 %6191, %v5696_v38   ;;  %1430 = vperm.xlu0 %6190, %v5695_v8   ;;  %v5698_v38 = vld [vmem:[%s10694_s0 + $0x480] sm:$0xff]  ;;  %v5713_v41 = vld [vmem:[%s10694_s0 + $0x4f8] sm:$0xff] }
 0x1b6   : > { %v7110_v48 = vpop.permute.xlu1 %978  ;;  %v7112_v21 = vpop.permute.xlu0 %973 }
 0x1b7   : > { %10794 = vst [vmem:[#allocation44_spill] sm:$0xff] %v7110_v48  ;;  %10795 = vst [vmem:[#allocation45_spill] sm:$0xff] %v7112_v21  ;;  %6208 = vrot.lane.b32.xlu1 %v6202_v11, %s6336_s28  ;;  %1440 = vperm.xlu0 %6190, %v5697_v42   ;;  %v5701_v48 = vld [vmem:[%s10694_s0 + $0x498] sm:$0xff]  ;;  %v5700_v11 = vld [vmem:[%s10694_s0 + $0x490] sm:$0xff] }
 0x1ba   : > { %v7121_v8 = vpop.permute.xlu1 %988  ;;  %v7123_v22 = vpop.permute.xlu0 %983 }
 0x1bb   : > { %10796 = vst [vmem:[#allocation46_spill] sm:$0xff] %v7121_v8  ;;  %10797 = vst [vmem:[#allocation47_spill] sm:$0xff] %v7123_v22  ;;  %1505 = vperm.xlu1 %6191, %v5699_v5   ;;  %1500 = vperm.xlu0 %6190, %v5698_v38   ;;  %v5703_v8 = vld [vmem:[%s10694_s0 + $0x4a8] sm:$0xff]  ;;  %v5702_v5 = vld [vmem:[%s10694_s0 + $0x4a0] sm:$0xff] }
 0x1be   : > { %v7131_v42 = vpop.permute.xlu1 %998  ;;  %v7133_v21 = vpop.permute.xlu0 %993 }
 0x1bf   : > { %10798 = vst [vmem:[#allocation48_spill] sm:$0xff] %v7131_v42  ;;  %10799 = vst [vmem:[#allocation49_spill] sm:$0xff] %v7133_v21  ;;  %1515 = vperm.xlu1 %6191, %v5701_v48   ;;  %1510 = vperm.xlu0 %6190, %v5700_v11   ;;  %v5705_v42 = vld [vmem:[%s10694_s0 + $0x4b8] sm:$0xff]  ;;  %v5704_v48 = vld [vmem:[%s10694_s0 + $0x4b0] sm:$0xff] }
 0x1c2   : > { %v7141_v38 = vpop.permute.xlu1 %1008  ;;  %v7143_v22 = vpop.permute.xlu0 %1003 }
 0x1c3   : > { %10800 = vst [vmem:[#allocation50_spill] sm:$0xff] %v7141_v38  ;;  %10801 = vst [vmem:[#allocation51_spill] sm:$0xff] %v7143_v22  ;;  %1525 = vperm.xlu1 %6191, %v5703_v8   ;;  %1520 = vperm.xlu0 %6190, %v5702_v5   ;;  %v5707_v38 = vld [vmem:[%s10694_s0 + $0x4c8] sm:$0xff]  ;;  %v5706_v8 = vld [vmem:[%s10694_s0 + $0x4c0] sm:$0xff] }
 0x1c6   : > { %v7151_v11 = vpop.permute.xlu1 %1018  ;;  %v7153_v21 = vpop.permute.xlu0 %1013 }
 0x1c7   : > { %10802 = vst [vmem:[#allocation52_spill] sm:$0xff] %v7151_v11  ;;  %10803 = vst [vmem:[#allocation53_spill] sm:$0xff] %v7153_v21  ;;  %1535 = vperm.xlu1 %6191, %v5705_v42   ;;  %1530 = vperm.xlu0 %6190, %v5704_v48   ;;  %v5709_v11 = vld [vmem:[%s10694_s0 + $0x4d8] sm:$0xff]  ;;  %v5708_v42 = vld [vmem:[%s10694_s0 + $0x4d0] sm:$0xff] }
 0x1ca   : > { %v7161_v5 = vpop.permute.xlu1 %1028  ;;  %v7163_v22 = vpop.permute.xlu0 %1023 }
 0x1cb   : > { %10804 = vst [vmem:[#allocation54_spill] sm:$0xff] %v7161_v5  ;;  %10805 = vst [vmem:[#allocation55_spill] sm:$0xff] %v7163_v22  ;;  %1545 = vperm.xlu1 %6191, %v5707_v38   ;;  %1540 = vperm.xlu0 %6190, %v5706_v8   ;;  %v5711_v5 = vld [vmem:[%s10694_s0 + $0x4e8] sm:$0xff]  ;;  %v5710_v38 = vld [vmem:[%s10694_s0 + $0x4e0] sm:$0xff] }
 0x1ce   : > { %v7171_v48 = vpop.permute.xlu1 %6198  ;;  %v7173_v21 = vpop.permute.xlu0 %1033 }
 0x1cf   : > { %10806 = vst [vmem:[#allocation56_spill] sm:$0xff] %v7171_v48  ;;  %10807 = vst [vmem:[#allocation57_spill] sm:$0xff] %v7173_v21  ;;  %1555 = vperm.xlu1 %6191, %v5709_v11   ;;  %1550 = vperm.xlu0 %6190, %v5708_v42   ;;  %v5712_v11 = vld [vmem:[%s10694_s0 + $0x4f0] sm:$0xff] }
 0x1d2   : > { %v7181_v8 = vpop.permute.xlu1 %1098  ;;  %v7183_v22 = vpop.permute.xlu0 %1093 }
 0x1d3   : > { %10808 = vst [vmem:[#allocation58_spill] sm:$0xff] %v7181_v8  ;;  %10809 = vst [vmem:[#allocation59_spill] sm:$0xff] %v7183_v22  ;;  %1565 = vperm.xlu1 %6191, %v5711_v5   ;;  %1560 = vperm.xlu0 %6190, %v5710_v38   ;;  %v5715_v22 = vld [vmem:[%s10694_s0 + $0x508] sm:$0xff]  ;;  %v5714_v5 = vld [vmem:[%s10694_s0 + $0x500] sm:$0xff] }
 0x1d6   : > { %v7191_v42 = vpop.permute.xlu1 %1108  ;;  %v7193_v21 = vpop.permute.xlu0 %1103 }
 0x1d7   : > { %10810 = vst [vmem:[#allocation60_spill] sm:$0xff] %v7191_v42  ;;  %10811 = vst [vmem:[#allocation61_spill] sm:$0xff] %v7193_v21  ;;  %1575 = vperm.xlu1 %6191, %v5713_v41   ;;  %1570 = vperm.xlu0 %6190, %v5712_v11   ;;  %v5717_v21 = vld [vmem:[%s10694_s0 + $0x518] sm:$0xff]  ;;  %v5716_v41 = vld [vmem:[%s10694_s0 + $0x510] sm:$0xff] }
 0x1da   : > { %v7201_v38 = vpop.permute.xlu1 %1118  ;;  %v7203_v8 = vpop.permute.xlu0 %1113 }
 0x1db   : > { %10812 = vst [vmem:[#allocation62_spill] sm:$0xff] %v7201_v38  ;;  %10813 = vst [vmem:[#allocation63_spill] sm:$0xff] %v7203_v8  ;;  %1634 = vperm.xlu1 %6191, %v5715_v22   ;;  %1629 = vperm.xlu0 %6190, %v5714_v5   ;;  %v5719_v8 = vld [vmem:[%s10694_s0 + $0x528] sm:$0xff]  ;;  %v5718_v22 = vld [vmem:[%s10694_s0 + $0x520] sm:$0xff] }
 0x1de   : > { %v7211_v11 = vpop.permute.xlu1 %1128  ;;  %v7213_v42 = vpop.permute.xlu0 %1123 }
 0x1df   : > { %10814 = vst [vmem:[#allocation64_spill] sm:$0xff] %v7211_v11  ;;  %10815 = vst [vmem:[#allocation65_spill] sm:$0xff] %v7213_v42  ;;  %1644 = vperm.xlu1 %6191, %v5717_v21   ;;  %1639 = vperm.xlu0 %6190, %v5716_v41   ;;  %v5721_v42 = vld [vmem:[%s10694_s0 + $0x538] sm:$0xff]  ;;  %v5720_v21 = vld [vmem:[%s10694_s0 + $0x530] sm:$0xff] }
 0x1e2   : > { %v7221_v5 = vpop.permute.xlu1 %1138  ;;  %v7223_v38 = vpop.permute.xlu0 %1133 }
 0x1e3   : > { %10816 = vst [vmem:[#allocation66_spill] sm:$0xff] %v7221_v5  ;;  %10817 = vst [vmem:[#allocation67_spill] sm:$0xff] %v7223_v38  ;;  %1654 = vperm.xlu1 %6191, %v5719_v8   ;;  %1649 = vperm.xlu0 %6190, %v5718_v22   ;;  %v5723_v38 = vld [vmem:[%s10694_s0 + $0x548] sm:$0xff]  ;;  %v5722_v8 = vld [vmem:[%s10694_s0 + $0x540] sm:$0xff] }
 0x1e6   : > { %v7231_v41 = vpop.permute.xlu1 %1148  ;;  %v7233_v11 = vpop.permute.xlu0 %1143 }
 0x1e7   : > { %10818 = vst [vmem:[#allocation68_spill] sm:$0xff] %v7231_v41  ;;  %10819 = vst [vmem:[#allocation69_spill] sm:$0xff] %v7233_v11  ;;  %1664 = vperm.xlu1 %6191, %v5721_v42   ;;  %1659 = vperm.xlu0 %6190, %v5720_v21   ;;  %v5725_v11 = vld [vmem:[%s10694_s0 + $0x558] sm:$0xff]  ;;  %v5724_v42 = vld [vmem:[%s10694_s0 + $0x550] sm:$0xff] }
 0x1ea   : > { %v7241_v22 = vpop.permute.xlu1 %1158  ;;  %v7243_v5 = vpop.permute.xlu0 %1153 }
 0x1eb   : > { %10820 = vst [vmem:[#allocation70_spill] sm:$0xff] %v7241_v22  ;;  %10821 = vst [vmem:[#allocation71_spill] sm:$0xff] %v7243_v5  ;;  %1674 = vperm.xlu1 %6191, %v5723_v38   ;;  %1669 = vperm.xlu0 %6190, %v5722_v8   ;;  %v5727_v5 = vld [vmem:[%s10694_s0 + $0x568] sm:$0xff]  ;;  %v5726_v38 = vld [vmem:[%s10694_s0 + $0x560] sm:$0xff] }
 0x1ee   : > { %v7251_v21 = vpop.permute.xlu1 %1168  ;;  %v7253_v41 = vpop.permute.xlu0 %1163 }
 0x1ef   : > { %10822 = vst [vmem:[#allocation72_spill] sm:$0xff] %v7251_v21  ;;  %10823 = vst [vmem:[#allocation73_spill] sm:$0xff] %v7253_v41  ;;  %1684 = vperm.xlu1 %6191, %v5725_v11   ;;  %1679 = vperm.xlu0 %6190, %v5724_v42   ;;  %v5729_v41 = vld [vmem:[%s10694_s0 + $0x578] sm:$0xff]  ;;  %v5728_v11 = vld [vmem:[%s10694_s0 + $0x570] sm:$0xff] }
 0x1f2   : > { %v7261_v8 = vpop.permute.xlu1 %1235  ;;  %v7263_v22 = vpop.permute.xlu0 %1230 }
 0x1f3   : > { %10824 = vst [vmem:[#allocation74_spill] sm:$0xff] %v7261_v8  ;;  %10825 = vst [vmem:[#allocation75_spill] sm:$0xff] %v7263_v22  ;;  %1694 = vperm.xlu1 %6191, %v5727_v5   ;;  %1689 = vperm.xlu0 %6190, %v5726_v38  }
 0x1f6   : > { %v7271_v42 = vpop.permute.xlu1 %1245  ;;  %v7273_v21 = vpop.permute.xlu0 %1240 }
 0x1f7   : > { %10826 = vst [vmem:[#allocation76_spill] sm:$0xff] %v7271_v42  ;;  %10827 = vst [vmem:[#allocation77_spill] sm:$0xff] %v7273_v21  ;;  %1704 = vperm.xlu1 %6191, %v5729_v41   ;;  %1699 = vperm.xlu0 %6190, %v5728_v11  }
 0x1fa   : > { %v7275_v48 = vpop.permute.xlu1 %1255  ;;  %v7277_v8 = vpop.permute.xlu0 %1250 }
 0x1fb   : > { %10828 = vst [vmem:[#allocation78_spill] sm:$0xff] %v7275_v48  ;;  %10829 = vst [vmem:[#allocation79_spill] sm:$0xff] %v7277_v8 }
 0x1fe   : > { %v7279_v5 = vpop.permute.xlu1 %1265  ;;  %v7281_v38 = vpop.permute.xlu0 %1260 }
 0x1ff   : > { %10830 = vst [vmem:[#allocation80_spill] sm:$0xff] %v7279_v5  ;;  %10831 = vst [vmem:[#allocation81_spill] sm:$0xff] %v7281_v38 }
 0x202   : > { %v7283_v22 = vpop.permute.xlu1 %1275  ;;  %v7285_v29 = vpop.permute.xlu0 %1270 }
 0x203   : > { %10832 = vst [vmem:[#allocation82_spill] sm:$0xff] %v7283_v22  ;;  %10833 = vst [vmem:[#allocation83_spill] sm:$0xff] %v7285_v29 }
 0x206   : > { %v7287_v45 = vpop.permute.xlu1 %1285  ;;  %v7289_v16 = vpop.permute.xlu0 %1280 }
 0x207   : > { %10834 = vst [vmem:[#allocation84_spill] sm:$0xff] %v7287_v45  ;;  %10835 = vst [vmem:[#allocation85_spill] sm:$0xff] %v7289_v16 }
 0x20a   : > { %v7291_v42 = vpop.permute.xlu1 %1295  ;;  %v7293_v41 = vpop.permute.xlu0 %1290 }
 0x20b   : > { %10836 = vst [vmem:[#allocation86_spill] sm:$0xff] %v7291_v42  ;;  %10837 = vst [vmem:[#allocation87_spill] sm:$0xff] %v7293_v41 }
 0x20e   : > { %v7295_v11 = vpop.permute.xlu1 %1305  ;;  %v7297_v48 = vpop.permute.xlu0 %1300 }
 0x20f   : > { %10838 = vst [vmem:[#allocation88_spill] sm:$0xff] %v7295_v11  ;;  %10839 = vst [vmem:[#allocation89_spill] sm:$0xff] %v7297_v48 }
 0x212   : > { %v7299_v8 = vpop.permute.xlu1 %1365  ;;  %v7301_v5 = vpop.permute.xlu0 %6203 }
 0x213   : > { %10840 = vst [vmem:[#allocation90_spill] sm:$0xff] %v7299_v8  ;;  %10841 = vst [vmem:[#allocation91_spill] sm:$0xff] %v7301_v5 }
 0x216   : > { %v7303_v38 = vpop.permute.xlu1 %1375  ;;  %v7305_v22 = vpop.permute.xlu0 %1370 }
 0x217   : > { %10842 = vst [vmem:[#allocation92_spill] sm:$0xff] %v7303_v38  ;;  %10843 = vst [vmem:[#allocation93_spill] sm:$0xff] %v7305_v22 }
 0x21a   : > { %v7307_v29 = vpop.permute.xlu1 %1385  ;;  %v7309_v45 = vpop.permute.xlu0 %1380 }
 0x21b   : > { %10844 = vst [vmem:[#allocation94_spill] sm:$0xff] %v7307_v29  ;;  %10845 = vst [vmem:[#allocation95_spill] sm:$0xff] %v7309_v45 }
 0x21e   : > { %v7311_v16 = vpop.permute.xlu1 %1395  ;;  %v7313_v42 = vpop.permute.xlu0 %1390 }
 0x21f   : > { %10846 = vst [vmem:[#allocation96_spill] sm:$0xff] %v7311_v16  ;;  %10847 = vst [vmem:[#allocation97_spill] sm:$0xff] %v7313_v42 }
 0x222   : > { %v7315_v41 = vpop.permute.xlu1 %1405  ;;  %v7317_v21 = vpop.permute.xlu0 %1400 }
 0x223   : > { %10848 = vst [vmem:[#allocation98_spill] sm:$0xff] %v7315_v41  ;;  %10849 = vst [vmem:[#allocation99_spill] sm:$0xff] %v7317_v21 }
 0x226   : > { %v7319_v48 = vpop.permute.xlu1 %1415  ;;  %v7321_v8 = vpop.permute.xlu0 %1410 }
 0x227   : > { %10850 = vst [vmem:[#allocation100_spill] sm:$0xff] %v7319_v48  ;;  %10851 = vst [vmem:[#allocation101_spill] sm:$0xff] %v7321_v8 }
 0x22a   : > { %v7323_v11 = vpop.permute.xlu1 %1425  ;;  %v7325_v38 = vpop.permute.xlu0 %1420 }
 0x22b   : > { %10852 = vst [vmem:[#allocation102_spill] sm:$0xff] %v7323_v11  ;;  %10853 = vst [vmem:[#allocation103_spill] sm:$0xff] %v7325_v38 }
 0x22e   : > { %v7327_v22 = vpop.permute.xlu1 %1435  ;;  %v7329_v29 = vpop.permute.xlu0 %1430 }
 0x22f   : > { %10854 = vst [vmem:[#allocation104_spill] sm:$0xff] %v7327_v22  ;;  %10855 = vst [vmem:[#allocation105_spill] sm:$0xff] %v7329_v29 }
 0x232   : > { %v7331_v45 = vpop.permute.xlu1 %6208  ;;  %v7333_v16 = vpop.permute.xlu0 %1440 }
 0x233   : > { %10856 = vst [vmem:[#allocation106_spill] sm:$0xff] %v7331_v45  ;;  %10857 = vst [vmem:[#allocation107_spill] sm:$0xff] %v7333_v16 }
 0x236   : > { %v7335_v41 = vpop.permute.xlu1 %1505  ;;  %v7337_v21 = vpop.permute.xlu0 %1500 }
 0x237   : > { %10858 = vst [vmem:[#allocation108_spill] sm:$0xff] %v7335_v41  ;;  %10859 = vst [vmem:[#allocation109_spill] sm:$0xff] %v7337_v21 }
 0x23a   : > { %v7339_v48 = vpop.permute.xlu1 %1515  ;;  %v7341_v8 = vpop.permute.xlu0 %1510 }
 0x23b   : > { %10860 = vst [vmem:[#allocation110_spill] sm:$0xff] %v7339_v48  ;;  %10861 = vst [vmem:[#allocation111_spill] sm:$0xff] %v7341_v8  ;;  %v146_v8 = vld [vmem:[%s6580_s26 + $0xc] sm:$0xff]  }
 0x23e   : > { %v7343_v11 = vpop.permute.xlu1 %1525  ;;  %v7345_v38 = vpop.permute.xlu0 %1520 }
 0x23f   : > { %10862 = vst [vmem:[#allocation112_spill] sm:$0xff] %v7343_v11  ;;  %10863 = vst [vmem:[#allocation113_spill] sm:$0xff] %v7345_v38 }
 0x242   : > { %v7347_v22 = vpop.permute.xlu1 %1535  ;;  %v7349_v29 = vpop.permute.xlu0 %1530 }
 0x243   : > { %10864 = vst [vmem:[#allocation114_spill] sm:$0xff] %v7347_v22  ;;  %10865 = vst [vmem:[#allocation115_spill] sm:$0xff] %v7349_v29  ;;  %v7368_v22 = vunpack.c.h.bf16 %v146_v8  ;;  %v7370_v29 = vunpack.c.l.bf16 %v146_v8 }
 0x245   : > { %10874 = vst [vmem:[#allocation124_spill] sm:$0xff] %v7368_v22  ;;  %10875 = vst [vmem:[#allocation125_spill] sm:$0xff] %v7370_v29 }
 0x246   : > { %v7351_v42 = vpop.permute.xlu1 %1545  ;;  %v7353_v45 = vpop.permute.xlu0 %1540 }
 0x247   : > { %10866 = vst [vmem:[#allocation116_spill] sm:$0xff] %v7351_v42  ;;  %10867 = vst [vmem:[#allocation117_spill] sm:$0xff] %v7353_v45 }
 0x24a   : > { %v7355_v16 = vpop.permute.xlu1 %1555  ;;  %v7357_v41 = vpop.permute.xlu0 %1550 }
 0x24b   : > { %10868 = vst [vmem:[#allocation118_spill] sm:$0xff] %v7355_v16  ;;  %10869 = vst [vmem:[#allocation119_spill] sm:$0xff] %v7357_v41 }
 0x24e   : > { %v7359_v21 = vpop.permute.xlu1 %1565  ;;  %v7361_v48 = vpop.permute.xlu0 %1560 }
 0x24f   : > { %10870 = vst [vmem:[#allocation120_spill] sm:$0xff] %v7359_v21  ;;  %10871 = vst [vmem:[#allocation121_spill] sm:$0xff] %v7361_v48 }
 0x252   : > { %v7364_v11 = vpop.permute.xlu1 %1575  ;;  %v7366_v38 = vpop.permute.xlu0 %1570 }
 0x253   : > { %10872 = vst [vmem:[#allocation122_spill] sm:$0xff] %v7364_v11  ;;  %10873 = vst [vmem:[#allocation123_spill] sm:$0xff] %v7366_v38 }
 0x256   : > { %v1635_v42 = vpop.permute.xlu1 %1634  ;;  %v1630_v5 = vpop.permute.xlu0 %1629 }
 0x257   : > { %v1708_v45 = vmul.f32 %v1635_v42, %v7368_v22  ;;  %v1707_v16 = vmul.f32 %v1630_v5, %v7370_v29 }
 0x259   : > { %1741 = vrot.lane.b32.xlu1 %v1708_v45, %s6335_s27  ;;  %1739 = vrot.lane.b32.xlu0 %v1707_v16, %s6335_s27 }
 0x25a   : > { %v1645_v48 = vpop.permute.xlu1 %1644  ;;  %v1640_v11 = vpop.permute.xlu0 %1639 }
 0x25b   : > { %v1710_v21 = vmul.f32 %v1645_v48, %v7368_v22  ;;  %v1709_v38 = vmul.f32 %v1640_v11, %v7370_v29 }
 0x25d   : > { %1745 = vrot.lane.b32.xlu1 %v1710_v21, %s6335_s27  ;;  %1743 = vrot.lane.b32.xlu0 %v1709_v38, %s6335_s27 }
 0x25e   : > { %v1655_v8 = vpop.permute.xlu1 %1654  ;;  %v1650_v41 = vpop.permute.xlu0 %1649 }
 0x25f   : > { %v1712_v42 = vmul.f32 %v1655_v8, %v7368_v22  ;;  %v1711_v5 = vmul.f32 %v1650_v41, %v7370_v29 }
 0x261   : > { %1749 = vrot.lane.b32.xlu1 %v1712_v42, %s6335_s27  ;;  %1747 = vrot.lane.b32.xlu0 %v1711_v5, %s6335_s27 }
 0x262   : > { %v1665_v16 = vpop.permute.xlu1 %1664  ;;  %v1660_v48 = vpop.permute.xlu0 %1659 }
 0x263   : > { %v1714_v45 = vmul.f32 %v1665_v16, %v7368_v22  ;;  %v1713_v11 = vmul.f32 %v1660_v48, %v7370_v29 }
 0x265   : > { %1753 = vrot.lane.b32.xlu1 %v1714_v45, %s6335_s27  ;;  %1751 = vrot.lane.b32.xlu0 %v1713_v11, %s6335_s27 }
 0x266   : > { %v1675_v21 = vpop.permute.xlu1 %1674  ;;  %v1670_v8 = vpop.permute.xlu0 %1669 }
 0x267   : > { %v1716_v38 = vmul.f32 %v1675_v21, %v7368_v22  ;;  %v1715_v41 = vmul.f32 %v1670_v8, %v7370_v29 }
 0x269   : > { %1757 = vrot.lane.b32.xlu1 %v1716_v38, %s6335_s27  ;;  %1755 = vrot.lane.b32.xlu0 %v1715_v41, %s6335_s27 }
 0x26a   : > { %v1685_v42 = vpop.permute.xlu1 %1684  ;;  %v1680_v16 = vpop.permute.xlu0 %1679 }
 0x26b   : > { %v1718_v5 = vmul.f32 %v1685_v42, %v7368_v22  ;;  %v1717_v48 = vmul.f32 %v1680_v16, %v7370_v29 }
 0x26d   : > { %1761 = vrot.lane.b32.xlu1 %v1718_v5, %s6335_s27  ;;  %1759 = vrot.lane.b32.xlu0 %v1717_v48, %s6335_s27  ;;  %v5731_v5 = vld [vmem:[%s10694_s0 + $0x588] sm:$0xff]  ;;  %v5730_v48 = vld [vmem:[%s10694_s0 + $0x580] sm:$0xff] }
 0x26e   : > { %v1695_v45 = vpop.permute.xlu1 %1694  ;;  %v1690_v21 = vpop.permute.xlu0 %1689 }
 0x26f   : > { %v1720_v11 = vmul.f32 %v1695_v45, %v7368_v22  ;;  %v1719_v8 = vmul.f32 %v1690_v21, %v7370_v29  ;;  %v5733_v45 = vld [vmem:[%s10694_s0 + $0x598] sm:$0xff]  ;;  %v5735_v21 = vld [vmem:[%s10694_s0 + $0x5a8] sm:$0xff] }
 0x271   : > { %1765 = vrot.lane.b32.xlu1 %v1720_v11, %s6335_s27  ;;  %1763 = vrot.lane.b32.xlu0 %v1719_v8, %s6335_s27  ;;  %v5732_v11 = vld [vmem:[%s10694_s0 + $0x590] sm:$0xff]  ;;  %v5734_v8 = vld [vmem:[%s10694_s0 + $0x5a0] sm:$0xff] }
 0x272   : > { %v1705_v38 = vpop.permute.xlu1 %1704  ;;  %v1700_v42 = vpop.permute.xlu0 %1699 }
 0x273   : > { %v1722_v41 = vmul.f32 %v1705_v38, %v7368_v22  ;;  %v1721_v16 = vmul.f32 %v1700_v42, %v7370_v29  ;;  %v5737_v38 = vld [vmem:[%s10694_s0 + $0x5b8] sm:$0xff]  ;;  %v5739_v42 = vld [vmem:[%s10694_s0 + $0x5c8] sm:$0xff] }
 0x275   : > { %1769 = vrot.lane.b32.xlu1 %v1722_v41, %s6335_s27  ;;  %1767 = vrot.lane.b32.xlu0 %v1721_v16, %s6335_s27  ;;  %v5736_v41 = vld [vmem:[%s10694_s0 + $0x5b0] sm:$0xff]  ;;  %v5738_v16 = vld [vmem:[%s10694_s0 + $0x5c0] sm:$0xff] }
 0x279   : > { %1827 = vperm.xlu1 %6191, %v5731_v5   ;;  %1822 = vperm.xlu0 %6190, %v5730_v48   ;;  %v5741_v5 = vld [vmem:[%s10694_s0 + $0x5d8] sm:$0xff]  ;;  %v5740_v48 = vld [vmem:[%s10694_s0 + $0x5d0] sm:$0xff] }
 0x27d   : > { %1837 = vperm.xlu1 %6191, %v5733_v45   ;;  %1832 = vperm.xlu0 %6190, %v5732_v11   ;;  %v5743_v45 = vld [vmem:[%s10694_s0 + $0x5e8] sm:$0xff]  ;;  %v5742_v11 = vld [vmem:[%s10694_s0 + $0x5e0] sm:$0xff] }
 0x281   : > { %1847 = vperm.xlu1 %6191, %v5735_v21   ;;  %1842 = vperm.xlu0 %6190, %v5734_v8   ;;  %v5745_v21 = vld [vmem:[%s10694_s0 + $0x5f8] sm:$0xff]  ;;  %v5744_v8 = vld [vmem:[%s10694_s0 + $0x5f0] sm:$0xff] }
 0x285   : > { %1857 = vperm.xlu1 %6191, %v5737_v38   ;;  %1852 = vperm.xlu0 %6190, %v5736_v41  }
 0x289   : > { %1867 = vperm.xlu1 %6191, %v5739_v42   ;;  %1862 = vperm.xlu0 %6190, %v5738_v16  }
 0x28d   : > { %1877 = vperm.xlu1 %6191, %v5741_v5   ;;  %1872 = vperm.xlu0 %6190, %v5740_v48  }
 0x291   : > { %1887 = vperm.xlu1 %6191, %v5743_v45   ;;  %1882 = vperm.xlu0 %6190, %v5742_v11  }
 0x295   : > { %1897 = vperm.xlu1 %6191, %v5745_v21   ;;  %1892 = vperm.xlu0 %6190, %v5744_v8  }
 0x2cb   : > { %v7452_v38 = vpop.permute.xlu1 %1741  ;;  %v7454_v41 = vpop.permute.xlu0 %1739 }
 0x2cc   : > { %10876 = vst [vmem:[#allocation126_spill] sm:$0xff] %v7452_v38  ;;  %10877 = vst [vmem:[#allocation127_spill] sm:$0xff] %v7454_v41 }
 0x2cf   : > { %v7456_v42 = vpop.permute.xlu1 %1745  ;;  %v7458_v16 = vpop.permute.xlu0 %1743 }
 0x2d0   : > { %10878 = vst [vmem:[#allocation128_spill] sm:$0xff] %v7456_v42  ;;  %10879 = vst [vmem:[#allocation129_spill] sm:$0xff] %v7458_v16 }
 0x2d3   : > { %v7460_v5 = vpop.permute.xlu1 %1749  ;;  %v7462_v48 = vpop.permute.xlu0 %1747 }
 0x2d4   : > { %10880 = vst [vmem:[#allocation130_spill] sm:$0xff] %v7460_v5  ;;  %10881 = vst [vmem:[#allocation131_spill] sm:$0xff] %v7462_v48 }
 0x2d7   : > { %v7464_v45 = vpop.permute.xlu1 %1753  ;;  %v7466_v11 = vpop.permute.xlu0 %1751 }
 0x2d8   : > { %10882 = vst [vmem:[#allocation132_spill] sm:$0xff] %v7464_v45  ;;  %10883 = vst [vmem:[#allocation133_spill] sm:$0xff] %v7466_v11 }
 0x2db   : > { %v7468_v37 = vpop.permute.xlu1 %1757  ;;  %v7470_v21 = vpop.permute.xlu0 %1755 }
 0x2dc   : > { %10884 = vst [vmem:[#allocation134_spill] sm:$0xff] %v7468_v37  ;;  %10885 = vst [vmem:[#allocation135_spill] sm:$0xff] %v7470_v21 }
 0x2df   : > { %v7472_v8 = vpop.permute.xlu1 %1761  ;;  %v7474_v38 = vpop.permute.xlu0 %1759 }
 0x2e0   : > { %10886 = vst [vmem:[#allocation136_spill] sm:$0xff] %v7472_v8  ;;  %10887 = vst [vmem:[#allocation137_spill] sm:$0xff] %v7474_v38 }
 0x2e3   : > { %v7476_v41 = vpop.permute.xlu1 %1765  ;;  %v7478_v42 = vpop.permute.xlu0 %1763 }
 0x2e4   : > { %10888 = vst [vmem:[#allocation138_spill] sm:$0xff] %v7476_v41  ;;  %10889 = vst [vmem:[#allocation139_spill] sm:$0xff] %v7478_v42 }
 0x2e7   : > { %v7480_v16 = vpop.permute.xlu1 %1769  ;;  %v7482_v5 = vpop.permute.xlu0 %1767 }
 0x2e8   : > { %10890 = vst [vmem:[#allocation140_spill] sm:$0xff] %v7480_v16  ;;  %10891 = vst [vmem:[#allocation141_spill] sm:$0xff] %v7482_v5 }
 0x2f4   : > { %v1828_v48 = vpop.permute.xlu1 %1827  ;;  %v1823_v11 = vpop.permute.xlu0 %1822 }
 0x2f5   : > { %v1901_v45 = vmul.f32 %v1828_v48, %v7368_v22  ;;  %v1900_v37 = vmul.f32 %v1823_v11, %v7370_v29 }
 0x2f7   : > { %1934 = vrot.lane.b32.xlu1 %v1901_v45, %s6336_s28  ;;  %1932 = vrot.lane.b32.xlu0 %v1900_v37, %s6336_s28 }
 0x2f8   : > { %v1838_v8 = vpop.permute.xlu1 %1837  ;;  %v1833_v41 = vpop.permute.xlu0 %1832 }
 0x2f9   : > { %v1903_v38 = vmul.f32 %v1838_v8, %v7368_v22  ;;  %v1902_v42 = vmul.f32 %v1833_v41, %v7370_v29 }
 0x2fb   : > { %1938 = vrot.lane.b32.xlu1 %v1903_v38, %s6336_s28  ;;  %1936 = vrot.lane.b32.xlu0 %v1902_v42, %s6336_s28 }
 0x2fc   : > { %v1848_v5 = vpop.permute.xlu1 %1847  ;;  %v1843_v16 = vpop.permute.xlu0 %1842 }
 0x2fd   : > { %v1905_v48 = vmul.f32 %v1848_v5, %v7368_v22  ;;  %v1904_v11 = vmul.f32 %v1843_v16, %v7370_v29 }
 0x2ff   : > { %1942 = vrot.lane.b32.xlu1 %v1905_v48, %s6336_s28  ;;  %1940 = vrot.lane.b32.xlu0 %v1904_v11, %s6336_s28 }
 0x300   : > { %v1858_v37 = vpop.permute.xlu1 %1857  ;;  %v1853_v8 = vpop.permute.xlu0 %1852 }
 0x301   : > { %v1907_v45 = vmul.f32 %v1858_v37, %v7368_v22  ;;  %v1906_v41 = vmul.f32 %v1853_v8, %v7370_v29 }
 0x303   : > { %1946 = vrot.lane.b32.xlu1 %v1907_v45, %s6336_s28  ;;  %1944 = vrot.lane.b32.xlu0 %v1906_v41, %s6336_s28 }
 0x304   : > { %v1868_v38 = vpop.permute.xlu1 %1867  ;;  %v1863_v5 = vpop.permute.xlu0 %1862 }
 0x305   : > { %v1909_v42 = vmul.f32 %v1868_v38, %v7368_v22  ;;  %v1908_v16 = vmul.f32 %v1863_v5, %v7370_v29 }
 0x307   : > { %1950 = vrot.lane.b32.xlu1 %v1909_v42, %s6336_s28  ;;  %1948 = vrot.lane.b32.xlu0 %v1908_v16, %s6336_s28 }
 0x308   : > { %v1878_v48 = vpop.permute.xlu1 %1877  ;;  %v1873_v37 = vpop.permute.xlu0 %1872 }
 0x309   : > { %v1911_v11 = vmul.f32 %v1878_v48, %v7368_v22  ;;  %v1910_v8 = vmul.f32 %v1873_v37, %v7370_v29 }
 0x30b   : > { %1954 = vrot.lane.b32.xlu1 %v1911_v11, %s6336_s28  ;;  %1952 = vrot.lane.b32.xlu0 %v1910_v8, %s6336_s28  ;;  %v5747_v11 = vld [vmem:[%s10694_s0 + $0x608] sm:$0xff]  ;;  %v5746_v8 = vld [vmem:[%s10694_s0 + $0x600] sm:$0xff] }
 0x30c   : > { %v1888_v45 = vpop.permute.xlu1 %1887  ;;  %v1883_v38 = vpop.permute.xlu0 %1882 }
 0x30d   : > { %v1913_v41 = vmul.f32 %v1888_v45, %v7368_v22  ;;  %v1912_v5 = vmul.f32 %v1883_v38, %v7370_v29  ;;  %v5749_v45 = vld [vmem:[%s10694_s0 + $0x618] sm:$0xff]  ;;  %v5751_v38 = vld [vmem:[%s10694_s0 + $0x628] sm:$0xff] }
 0x30f   : > { %1958 = vrot.lane.b32.xlu1 %v1913_v41, %s6336_s28  ;;  %1956 = vrot.lane.b32.xlu0 %v1912_v5, %s6336_s28  ;;  %v5748_v41 = vld [vmem:[%s10694_s0 + $0x610] sm:$0xff]  ;;  %v5750_v5 = vld [vmem:[%s10694_s0 + $0x620] sm:$0xff] }
 0x310   : > { %v1898_v42 = vpop.permute.xlu1 %1897  ;;  %v1893_v48 = vpop.permute.xlu0 %1892 }
 0x311   : > { %v1915_v16 = vmul.f32 %v1898_v42, %v7368_v22  ;;  %v1914_v37 = vmul.f32 %v1893_v48, %v7370_v29  ;;  %v5753_v42 = vld [vmem:[%s10694_s0 + $0x638] sm:$0xff]  ;;  %v5755_v48 = vld [vmem:[%s10694_s0 + $0x648] sm:$0xff] }
 0x313   : > { %1962 = vrot.lane.b32.xlu1 %v1915_v16, %s6336_s28  ;;  %1960 = vrot.lane.b32.xlu0 %v1914_v37, %s6336_s28  ;;  %v5752_v16 = vld [vmem:[%s10694_s0 + $0x630] sm:$0xff]  ;;  %v5754_v37 = vld [vmem:[%s10694_s0 + $0x640] sm:$0xff] }
 0x317   : > { %2020 = vperm.xlu1 %6191, %v5747_v11   ;;  %2015 = vperm.xlu0 %6190, %v5746_v8   ;;  %v5757_v11 = vld [vmem:[%s10694_s0 + $0x658] sm:$0xff]  ;;  %v5756_v8 = vld [vmem:[%s10694_s0 + $0x650] sm:$0xff] }
 0x31b   : > { %2030 = vperm.xlu1 %6191, %v5749_v45   ;;  %2025 = vperm.xlu0 %6190, %v5748_v41   ;;  %v5759_v45 = vld [vmem:[%s10694_s0 + $0x668] sm:$0xff]  ;;  %v5758_v41 = vld [vmem:[%s10694_s0 + $0x660] sm:$0xff] }
 0x31f   : > { %2040 = vperm.xlu1 %6191, %v5751_v38   ;;  %2035 = vperm.xlu0 %6190, %v5750_v5   ;;  %v5761_v38 = vld [vmem:[%s10694_s0 + $0x678] sm:$0xff]  ;;  %v5760_v5 = vld [vmem:[%s10694_s0 + $0x670] sm:$0xff] }
 0x323   : > { %2050 = vperm.xlu1 %6191, %v5753_v42   ;;  %2045 = vperm.xlu0 %6190, %v5752_v16   ;;  %v5763_v42 = vld [vmem:[%s10694_s0 + $0x688] sm:$0xff]  ;;  %v5762_v16 = vld [vmem:[%s10694_s0 + $0x680] sm:$0xff] }
 0x327   : > { %2060 = vperm.xlu1 %6191, %v5755_v48   ;;  %2055 = vperm.xlu0 %6190, %v5754_v37   ;;  %v5765_v48 = vld [vmem:[%s10694_s0 + $0x698] sm:$0xff]  ;;  %v5764_v37 = vld [vmem:[%s10694_s0 + $0x690] sm:$0xff] }
 0x32b   : > { %2070 = vperm.xlu1 %6191, %v5757_v11   ;;  %2065 = vperm.xlu0 %6190, %v5756_v8   ;;  %v5767_v11 = vld [vmem:[%s10694_s0 + $0x6a8] sm:$0xff]  ;;  %v5766_v8 = vld [vmem:[%s10694_s0 + $0x6a0] sm:$0xff] }
 0x32f   : > { %2080 = vperm.xlu1 %6191, %v5759_v45   ;;  %2075 = vperm.xlu0 %6190, %v5758_v41   ;;  %v5769_v45 = vld [vmem:[%s10694_s0 + $0x6b8] sm:$0xff]  ;;  %v5768_v41 = vld [vmem:[%s10694_s0 + $0x6b0] sm:$0xff] }
 0x333   : > { %2090 = vperm.xlu1 %6191, %v5761_v38   ;;  %2085 = vperm.xlu0 %6190, %v5760_v5   ;;  %v5771_v38 = vld [vmem:[%s10694_s0 + $0x6c8] sm:$0xff]  ;;  %v5770_v5 = vld [vmem:[%s10694_s0 + $0x6c0] sm:$0xff] }
 0x337   : > { %2159 = vperm.xlu1 %6191, %v5763_v42   ;;  %2154 = vperm.xlu0 %6190, %v5762_v16   ;;  %v7595_v42 = vld [vmem:[%s6580_s26 + $0x14] sm:$0x1]  ;;  %v5773_v16 = vld [vmem:[%s10694_s0 + $0x6d8] sm:$0xff] }
 0x33b   : > { %2169 = vperm.xlu1 %6191, %v5765_v48   ;;  %2164 = vperm.xlu0 %6190, %v5764_v37   ;;  %v5772_v48 = vld [vmem:[%s10694_s0 + $0x6d0] sm:$0xff]  ;;  %v10706_v37 = vunpack.c.l.bf16 %v7595_v42 }
 0x33f   : > { %2179 = vperm.xlu1 %6191, %v5767_v11   ;;  %2174 = vperm.xlu0 %6190, %v5766_v8   ;;  %v5775_v11 = vld [vmem:[%s10694_s0 + $0x6e8] sm:$0xff]  ;;  %v5774_v8 = vld [vmem:[%s10694_s0 + $0x6e0] sm:$0xff] }
 0x343   : > { %2189 = vperm.xlu1 %6191, %v5769_v45   ;;  %2184 = vperm.xlu0 %6190, %v5768_v41   ;;  %v2096_v45 = vrot.slane %v7370_v29, 1  ;;  %v2097_v41 = vrot.slane %v7368_v22, 1 }
 0x347   : > { %2199 = vperm.xlu1 %6191, %v5771_v38   ;;  %2194 = vperm.xlu0 %6190, %v5770_v5   ;;  %v2099_v38 = vrot.slane %v10706_v37, 1  ;;  %v5777_v5 = vld [vmem:[%s10694_s0 + $0x6f8] sm:$0xff]  ;;  %v5790_v37 = vld [vmem:[%s10694_s0 + $0x760] sm:$0xff] }
 0x349   : > { %v7624_v21 = vsel %vm764_vm0, %v2097_v41, %v2099_v38  ;;  %v5782_v38 = vld [vmem:[%s10694_s0 + $0x720] sm:$0xff] }
 0x34a   : > { %10893 = vst [vmem:[#allocation143_spill] sm:$0xff] %v7624_v21 }
 0x34b   : > { %2209 = vperm.xlu1 %6191, %v5773_v16   ;;  %2204 = vperm.xlu0 %6190, %v5772_v48   ;;  %v5776_v16 = vld [vmem:[%s10694_s0 + $0x6f0] sm:$0xff]  ;;  %v7621_v48 = vsel %vm764_vm0, %v2096_v45, %v2097_v41  ;;  %v5779_v41 = vld [vmem:[%s10694_s0 + $0x708] sm:$0xff] }
 0x34c   : > { %10892 = vst [vmem:[#allocation142_spill] sm:$0xff] %v7621_v48  ;;  %v5780_v45 = vld [vmem:[%s10694_s0 + $0x710] sm:$0xff] }
 0x34f   : > { %2219 = vperm.xlu1 %6191, %v5775_v11   ;;  %2214 = vperm.xlu0 %6190, %v5774_v8   ;;  %v5778_v11 = vld [vmem:[%s10694_s0 + $0x700] sm:$0xff]  ;;  %v6212_v8 = vpack.i.bf16 %v7624_v21, %v7621_v48  ;;  %v5792_v21 = vld [vmem:[%s10694_s0 + $0x770] sm:$0xff] }
 0x353   : > { %2229 = vperm.xlu1 %6191, %v5777_v5   ;;  %2224 = vperm.xlu0 %6190, %v5776_v16   ;;  %v5781_v5 = vld [vmem:[%s10694_s0 + $0x718] sm:$0xff]  ;;  %v5784_v16 = vld [vmem:[%s10694_s0 + $0x730] sm:$0xff] }
 0x357   : > { %2289 = vperm.xlu1 %6191, %v5778_v11   ;;  %6213 = vrot.lane.b32.xlu0 %v6212_v8, %s6335_s27  ;;  %v5783_v11 = vld [vmem:[%s10694_s0 + $0x728] sm:$0xff] }
 0x35b   : > { %2299 = vperm.xlu1 %6191, %v5780_v45   ;;  %2294 = vperm.xlu0 %6190, %v5779_v41   ;;  %v5786_v45 = vld [vmem:[%s10694_s0 + $0x740] sm:$0xff]  ;;  %v5785_v41 = vld [vmem:[%s10694_s0 + $0x738] sm:$0xff] }
 0x35f   : > { %2309 = vperm.xlu1 %6191, %v5782_v38   ;;  %2304 = vperm.xlu0 %6190, %v5781_v5   ;;  %v5788_v38 = vld [vmem:[%s10694_s0 + $0x750] sm:$0xff] }
 0x363   : > { %2319 = vperm.xlu1 %6191, %v5784_v16   ;;  %2314 = vperm.xlu0 %6190, %v5783_v11   ;;  %v5787_v16 = vld [vmem:[%s10694_s0 + $0x748] sm:$0xff] }
 0x367   : > { %2329 = vperm.xlu1 %6191, %v5786_v45   ;;  %2324 = vperm.xlu0 %6190, %v5785_v41   ;;  %v5789_v41 = vld [vmem:[%s10694_s0 + $0x758] sm:$0xff] }
 0x369   : > { %v7659_v5 = vpop.permute.xlu1 %1934  ;;  %v7664_v11 = vpop.permute.xlu0 %1932 }
 0x36a   : > { %10894 = vst [vmem:[#allocation144_spill] sm:$0xff] %v7659_v5  ;;  %10895 = vst [vmem:[#allocation145_spill] sm:$0xff] %v7664_v11 }
 0x36b   : > { %2339 = vperm.xlu1 %6191, %v5788_v38   ;;  %2334 = vperm.xlu0 %6190, %v5787_v16   ;;  %v5791_v16 = vld [vmem:[%s10694_s0 + $0x768] sm:$0xff] }
 0x36d   : > { %v7669_v45 = vpop.permute.xlu1 %1938  ;;  %v7674_v48 = vpop.permute.xlu0 %1936 }
 0x36e   : > { %10896 = vst [vmem:[#allocation146_spill] sm:$0xff] %v7669_v45  ;;  %10897 = vst [vmem:[#allocation147_spill] sm:$0xff] %v7674_v48  ;;  %v5793_v48 = vld [vmem:[%s10694_s0 + $0x778] sm:$0xff]  ;;  %v10926_v45 = vunpack.c.l.bf16 %v7595_v42 }
 0x36f   : > { %2349 = vperm.xlu1 %6191, %v5790_v37   ;;  %2344 = vperm.xlu0 %6190, %v5789_v41  }
 0x370   : > { %v2505_v5 = vrot.slane %v10926_v45, 2 }
 0x371   : > { %v7679_v38 = vpop.permute.xlu1 %1942  ;;  %v7684_v11 = vpop.permute.xlu0 %1940 }
 0x372   : > { %10898 = vst [vmem:[#allocation148_spill] sm:$0xff] %v7679_v38  ;;  %10899 = vst [vmem:[#allocation149_spill] sm:$0xff] %v7684_v11  ;;  %v5795_v38 = vld [vmem:[%s10694_s0 + $0x788] sm:$0xff] }
 0x373   : > { %2359 = vperm.xlu1 %6191, %v5792_v21   ;;  %2354 = vperm.xlu0 %6190, %v5791_v16   ;;  %v5794_v21 = vld [vmem:[%s10694_s0 + $0x780] sm:$0xff] }
 0x375   : > { %v7689_v37 = vpop.permute.xlu1 %1946  ;;  %v7691_v41 = vpop.permute.xlu0 %1944 }
 0x376   : > { %10900 = vst [vmem:[#allocation150_spill] sm:$0xff] %v7689_v37  ;;  %10901 = vst [vmem:[#allocation151_spill] sm:$0xff] %v7691_v41  ;;  %v5797_v37 = vld [vmem:[%s10694_s0 + $0x798] sm:$0xff] }
 0x377   : > { %6218 = vrot.lane.b32.xlu1 %v6212_v8, %s6336_s28  ;;  %2364 = vperm.xlu0 %6190, %v5793_v48   ;;  %v5796_v48 = vld [vmem:[%s10694_s0 + $0x790] sm:$0xff]  ;;  %v5799_v8 = vld [vmem:[%s10694_s0 + $0x7a8] sm:$0xff] }
 0x379   : > { %v7700_v16 = vpop.permute.xlu1 %1950  ;;  %v7705_v41 = vpop.permute.xlu0 %1948 }
 0x37a   : > { %10902 = vst [vmem:[#allocation152_spill] sm:$0xff] %v7700_v16  ;;  %10903 = vst [vmem:[#allocation153_spill] sm:$0xff] %v7705_v41  ;;  %v5801_v41 = vld [vmem:[%s10694_s0 + $0x7b8] sm:$0xff] }
 0x37b   : > { %2429 = vperm.xlu1 %6191, %v5795_v38   ;;  %2424 = vperm.xlu0 %6190, %v5794_v21   ;;  %v5798_v38 = vld [vmem:[%s10694_s0 + $0x7a0] sm:$0xff] }
 0x37d   : > { %v7716_v21 = vpop.permute.xlu1 %1954  ;;  %v7718_v16 = vpop.permute.xlu0 %1952 }
 0x37e   : > { %10904 = vst [vmem:[#allocation154_spill] sm:$0xff] %v7716_v21  ;;  %10905 = vst [vmem:[#allocation155_spill] sm:$0xff] %v7718_v16  ;;  %v5803_v21 = vld [vmem:[%s10694_s0 + $0x7c8] sm:$0xff] }
 0x37f   : > { %2439 = vperm.xlu1 %6191, %v5797_v37   ;;  %2434 = vperm.xlu0 %6190, %v5796_v48   ;;  %v5800_v37 = vld [vmem:[%s10694_s0 + $0x7b0] sm:$0xff] }
 0x381   : > { %v7726_v48 = vpop.permute.xlu1 %1958  ;;  %v7731_v11 = vpop.permute.xlu0 %1956 }
 0x382   : > { %10906 = vst [vmem:[#allocation156_spill] sm:$0xff] %v7726_v48  ;;  %10907 = vst [vmem:[#allocation157_spill] sm:$0xff] %v7731_v11  ;;  %v5807_v11 = vld [vmem:[%s10694_s0 + $0x7e8] sm:$0xff] }
 0x383   : > { %2449 = vperm.xlu1 %6191, %v5799_v8   ;;  %2444 = vperm.xlu0 %6190, %v5798_v38   ;;  %v5802_v8 = vld [vmem:[%s10694_s0 + $0x7c0] sm:$0xff]  ;;  %v5805_v38 = vld [vmem:[%s10694_s0 + $0x7d8] sm:$0xff] }
 0x385   : > { %v7744_v48 = vpop.permute.xlu0 %1960 }
 0x386   : > { %10909 = vst [vmem:[#allocation159_spill] sm:$0xff] %v7744_v48  ;;  %v5809_v48 = vld [vmem:[%s10694_s0 + $0x7f8] sm:$0xff] }
 0x387   : > { %2459 = vperm.xlu1 %6191, %v5801_v41   ;;  %2454 = vperm.xlu0 %6190, %v5800_v37   ;;  %v5804_v41 = vld [vmem:[%s10694_s0 + $0x7d0] sm:$0xff]  ;;  %v7742_v37 = vpop.permute.xlu1 %1962 }
 0x388   : > { %10908 = vst [vmem:[#allocation158_spill] sm:$0xff] %v7742_v37 }
 0x38b   : > { %2469 = vperm.xlu1 %6191, %v5803_v21   ;;  %2464 = vperm.xlu0 %6190, %v5802_v8   ;;  %v5806_v21 = vld [vmem:[%s10694_s0 + $0x7e0] sm:$0xff] }
 0x38f   : > { %2479 = vperm.xlu1 %6191, %v5805_v38   ;;  %2474 = vperm.xlu0 %6190, %v5804_v41   ;;  %v5808_v38 = vld [vmem:[%s10694_s0 + $0x7f0] sm:$0xff] }
 0x392   : > { %v7752_v8 = vpop.permute.xlu1 %2020  ;;  %v7754_v16 = vpop.permute.xlu0 %2015 }
 0x393   : > { %10910 = vst [vmem:[#allocation160_spill] sm:$0xff] %v7752_v8  ;;  %10911 = vst [vmem:[#allocation161_spill] sm:$0xff] %v7754_v16  ;;  %2489 = vperm.xlu1 %6191, %v5807_v11   ;;  %2484 = vperm.xlu0 %6190, %v5806_v21   ;;  %v5811_v16 = vld [vmem:[%s10694_s0 + $0x808] sm:$0xff]  ;;  %v5810_v11 = vld [vmem:[%s10694_s0 + $0x800] sm:$0xff] }
 0x396   : > { %v7762_v41 = vpop.permute.xlu1 %2030  ;;  %v7764_v37 = vpop.permute.xlu0 %2025 }
 0x397   : > { %10912 = vst [vmem:[#allocation162_spill] sm:$0xff] %v7762_v41  ;;  %10913 = vst [vmem:[#allocation163_spill] sm:$0xff] %v7764_v37  ;;  %2499 = vperm.xlu1 %6191, %v5809_v48   ;;  %2494 = vperm.xlu0 %6190, %v5808_v38   ;;  %v5813_v37 = vld [vmem:[%s10694_s0 + $0x818] sm:$0xff]  ;;  %v5812_v48 = vld [vmem:[%s10694_s0 + $0x810] sm:$0xff] }
 0x39a   : > { %v7772_v21 = vpop.permute.xlu1 %2040  ;;  %v7774_v8 = vpop.permute.xlu0 %2035 }
 0x39b   : > { %10914 = vst [vmem:[#allocation164_spill] sm:$0xff] %v7772_v21  ;;  %10915 = vst [vmem:[#allocation165_spill] sm:$0xff] %v7774_v8  ;;  %2565 = vperm.xlu1 %6191, %v5811_v16   ;;  %2560 = vperm.xlu0 %6190, %v5810_v11   ;;  %v5815_v8 = vld [vmem:[%s10694_s0 + $0x828] sm:$0xff]  ;;  %v5814_v16 = vld [vmem:[%s10694_s0 + $0x820] sm:$0xff] }
 0x39e   : > { %v7782_v38 = vpop.permute.xlu1 %2050  ;;  %v7784_v41 = vpop.permute.xlu0 %2045 }
 0x39f   : > { %10916 = vst [vmem:[#allocation166_spill] sm:$0xff] %v7782_v38  ;;  %10917 = vst [vmem:[#allocation167_spill] sm:$0xff] %v7784_v41  ;;  %2575 = vperm.xlu1 %6191, %v5813_v37   ;;  %2570 = vperm.xlu0 %6190, %v5812_v48   ;;  %v5817_v41 = vld [vmem:[%s10694_s0 + $0x838] sm:$0xff]  ;;  %v5816_v37 = vld [vmem:[%s10694_s0 + $0x830] sm:$0xff] }
 0x3a2   : > { %v7792_v11 = vpop.permute.xlu1 %2060  ;;  %v7794_v21 = vpop.permute.xlu0 %2055 }
 0x3a3   : > { %10918 = vst [vmem:[#allocation168_spill] sm:$0xff] %v7792_v11  ;;  %10919 = vst [vmem:[#allocation169_spill] sm:$0xff] %v7794_v21  ;;  %2585 = vperm.xlu1 %6191, %v5815_v8   ;;  %2580 = vperm.xlu0 %6190, %v5814_v16   ;;  %v5819_v21 = vld [vmem:[%s10694_s0 + $0x848] sm:$0xff]  ;;  %v5818_v8 = vld [vmem:[%s10694_s0 + $0x840] sm:$0xff] }
 0x3a6   : > { %v7802_v48 = vpop.permute.xlu1 %2070  ;;  %v7804_v38 = vpop.permute.xlu0 %2065 }
 0x3a7   : > { %10920 = vst [vmem:[#allocation170_spill] sm:$0xff] %v7802_v48  ;;  %10921 = vst [vmem:[#allocation171_spill] sm:$0xff] %v7804_v38  ;;  %2595 = vperm.xlu1 %6191, %v5817_v41   ;;  %2590 = vperm.xlu0 %6190, %v5816_v37   ;;  %v5821_v38 = vld [vmem:[%s10694_s0 + $0x858] sm:$0xff]  ;;  %v5820_v41 = vld [vmem:[%s10694_s0 + $0x850] sm:$0xff] }
 0x3aa   : > { %v7812_v16 = vpop.permute.xlu1 %2080  ;;  %v7814_v11 = vpop.permute.xlu0 %2075 }
 0x3ab   : > { %10922 = vst [vmem:[#allocation172_spill] sm:$0xff] %v7812_v16  ;;  %10923 = vst [vmem:[#allocation173_spill] sm:$0xff] %v7814_v11  ;;  %2605 = vperm.xlu1 %6191, %v5819_v21   ;;  %2600 = vperm.xlu0 %6190, %v5818_v8   ;;  %v5823_v11 = vld [vmem:[%s10694_s0 + $0x868] sm:$0xff]  ;;  %v5822_v21 = vld [vmem:[%s10694_s0 + $0x860] sm:$0xff]  ;;  %v2502_v8 = vrot.slane %v7370_v29, 2  ;;  %v2503_v16 = vrot.slane %v7368_v22, 2 }
 0x3ad   : > { %v7847_v29 = vsel %vm1171_vm1, %v2502_v8, %v2503_v16  ;;  %v7850_v42 = vsel %vm1171_vm1, %v2503_v16, %v2505_v5  ;;  %v5828_v5 = vld [vmem:[%s10694_s0 + $0x890] sm:$0xff]  ;;  %v5827_v16 = vld [vmem:[%s10694_s0 + $0x888] sm:$0xff] }
 0x3ae   : > { %v7822_v37 = vpop.permute.xlu1 %2090  ;;  %v7824_v48 = vpop.permute.xlu0 %2085  ;;  %10929 = vst [vmem:[#allocation178_spill] sm:$0xff] %v7847_v29  ;;  %10930 = vst [vmem:[#allocation179_spill] sm:$0xff] %v7850_v42 }
 0x3af   : > { %10924 = vst [vmem:[#allocation174_spill] sm:$0xff] %v7822_v37  ;;  %10925 = vst [vmem:[#allocation175_spill] sm:$0xff] %v7824_v48  ;;  %2615 = vperm.xlu1 %6191, %v5821_v38   ;;  %2610 = vperm.xlu0 %6190, %v5820_v41   ;;  %v5825_v38 = vld [vmem:[%s10694_s0 + $0x878] sm:$0xff]  ;;  %v5824_v41 = vld [vmem:[%s10694_s0 + $0x870] sm:$0xff] }
 0x3b2   : > { %v7836_v37 = vpop.permute.xlu1 %2159  ;;  %v7838_v48 = vpop.permute.xlu0 %2154 }
 0x3b3   : > { %10927 = vst [vmem:[#allocation176_spill] sm:$0xff] %v7836_v37  ;;  %10928 = vst [vmem:[#allocation177_spill] sm:$0xff] %v7838_v48  ;;  %2625 = vperm.xlu1 %6191, %v5823_v11   ;;  %2620 = vperm.xlu0 %6190, %v5822_v21   ;;  %v5826_v11 = vld [vmem:[%s10694_s0 + $0x880] sm:$0xff]  ;;  %v6222_v21 = vpack.i.bf16 %v7850_v42, %v7847_v29  ;;  %v5829_v29 = vld [vmem:[%s10694_s0 + $0x898] sm:$0xff] }
 0x3b6   : > { %v7852_v45 = vpop.permute.xlu1 %2169  ;;  %v7854_v37 = vpop.permute.xlu0 %2164 }
 0x3b7   : > { %10931 = vst [vmem:[#allocation180_spill] sm:$0xff] %v7852_v45  ;;  %10932 = vst [vmem:[#allocation181_spill] sm:$0xff] %v7854_v37  ;;  %2635 = vperm.xlu1 %6191, %v5825_v38   ;;  %2630 = vperm.xlu0 %6190, %v5824_v41   ;;  %v5843_v37 = vld [vmem:[%s10694_s0 + $0x908] sm:$0xff] }
 0x3ba   : > { %v7861_v48 = vpop.permute.xlu1 %2179  ;;  %v7863_v8 = vpop.permute.xlu0 %2174 }
 0x3bb   : > { %10933 = vst [vmem:[#allocation182_spill] sm:$0xff] %v7861_v48  ;;  %10934 = vst [vmem:[#allocation183_spill] sm:$0xff] %v7863_v8  ;;  %2695 = vperm.xlu1 %6191, %v5826_v11   ;;  %6223 = vrot.lane.b32.xlu0 %v6222_v21, %s6335_s27  ;;  %v5830_v11 = vld [vmem:[%s10694_s0 + $0x8a0] sm:$0xff] }
 0x3be   : > { %v7872_v38 = vpop.permute.xlu1 %2189  ;;  %v7874_v41 = vpop.permute.xlu0 %2184 }
 0x3bf   : > { %10935 = vst [vmem:[#allocation184_spill] sm:$0xff] %v7872_v38  ;;  %10936 = vst [vmem:[#allocation185_spill] sm:$0xff] %v7874_v41  ;;  %2705 = vperm.xlu1 %6191, %v5828_v5   ;;  %2700 = vperm.xlu0 %6190, %v5827_v16   ;;  %v5832_v41 = vld [vmem:[%s10694_s0 + $0x8b0] sm:$0xff]  ;;  %v5831_v5 = vld [vmem:[%s10694_s0 + $0x8a8] sm:$0xff] }
 0x3c2   : > { %v7882_v42 = vpop.permute.xlu1 %2199  ;;  %v7884_v8 = vpop.permute.xlu0 %2194 }
 0x3c3   : > { %10937 = vst [vmem:[#allocation186_spill] sm:$0xff] %v7882_v42  ;;  %10938 = vst [vmem:[#allocation187_spill] sm:$0xff] %v7884_v8  ;;  %2715 = vperm.xlu1 %6191, %v5830_v11   ;;  %2710 = vperm.xlu0 %6190, %v5829_v29   ;;  %v5834_v8 = vld [vmem:[%s10694_s0 + $0x8c0] sm:$0xff]  ;;  %v5833_v29 = vld [vmem:[%s10694_s0 + $0x8b8] sm:$0xff] }
 0x3c6   : > { %v7892_v16 = vpop.permute.xlu1 %2209  ;;  %v7894_v38 = vpop.permute.xlu0 %2204 }
 0x3c7   : > { %10939 = vst [vmem:[#allocation188_spill] sm:$0xff] %v7892_v16  ;;  %10940 = vst [vmem:[#allocation189_spill] sm:$0xff] %v7894_v38  ;;  %2725 = vperm.xlu1 %6191, %v5832_v41   ;;  %2720 = vperm.xlu0 %6190, %v5831_v5   ;;  %v5836_v38 = vld [vmem:[%s10694_s0 + $0x8d0] sm:$0xff]  ;;  %v5835_v41 = vld [vmem:[%s10694_s0 + $0x8c8] sm:$0xff] }
 0x3ca   : > { %v7902_v11 = vpop.permute.xlu1 %2219  ;;  %v7904_v42 = vpop.permute.xlu0 %2214 }
 0x3cb   : > { %10941 = vst [vmem:[#allocation190_spill] sm:$0xff] %v7902_v11  ;;  %10942 = vst [vmem:[#allocation191_spill] sm:$0xff] %v7904_v42  ;;  %2735 = vperm.xlu1 %6191, %v5834_v8   ;;  %2730 = vperm.xlu0 %6190, %v5833_v29   ;;  %v5838_v42 = vld [vmem:[%s10694_s0 + $0x8e0] sm:$0xff]  ;;  %v5837_v8 = vld [vmem:[%s10694_s0 + $0x8d8] sm:$0xff] }
 0x3ce   : > { %v7912_v5 = vpop.permute.xlu1 %2229  ;;  %v7914_v16 = vpop.permute.xlu0 %2224 }
 0x3cf   : > { %10943 = vst [vmem:[#allocation192_spill] sm:$0xff] %v7912_v5  ;;  %10944 = vst [vmem:[#allocation193_spill] sm:$0xff] %v7914_v16  ;;  %2745 = vperm.xlu1 %6191, %v5836_v38   ;;  %2740 = vperm.xlu0 %6190, %v5835_v41   ;;  %v5840_v16 = vld [vmem:[%s10694_s0 + $0x8f0] sm:$0xff]  ;;  %v5839_v38 = vld [vmem:[%s10694_s0 + $0x8e8] sm:$0xff] }
 0x3d2   : > { %v7922_v29 = vpop.permute.xlu1 %2289  ;;  %v7924_v11 = vpop.permute.xlu0 %6213 }
 0x3d3   : > { %10945 = vst [vmem:[#allocation194_spill] sm:$0xff] %v7922_v29  ;;  %10946 = vst [vmem:[#allocation195_spill] sm:$0xff] %v7924_v11  ;;  %2755 = vperm.xlu1 %6191, %v5838_v42   ;;  %2750 = vperm.xlu0 %6190, %v5837_v8   ;;  %v5841_v29 = vld [vmem:[%s10694_s0 + $0x8f8] sm:$0xff] }
 0x3d6   : > { %v7932_v41 = vpop.permute.xlu1 %2299  ;;  %v7934_v48 = vpop.permute.xlu0 %2294 }
 0x3d7   : > { %10947 = vst [vmem:[#allocation196_spill] sm:$0xff] %v7932_v41  ;;  %10948 = vst [vmem:[#allocation197_spill] sm:$0xff] %v7934_v48  ;;  %2765 = vperm.xlu1 %6191, %v5840_v16   ;;  %2760 = vperm.xlu0 %6190, %v5839_v38   ;;  %v5842_v16 = vld [vmem:[%s10694_s0 + $0x900] sm:$0xff] }
 0x3da   : > { %v7939_v42 = vpop.permute.xlu1 %2309  ;;  %v7941_v8 = vpop.permute.xlu0 %2304 }
 0x3db   : > { %10949 = vst [vmem:[#allocation198_spill] sm:$0xff] %v7939_v42  ;;  %10950 = vst [vmem:[#allocation199_spill] sm:$0xff] %v7941_v8  ;;  %6228 = vrot.lane.b32.xlu1 %v6222_v21, %s6336_s28  ;;  %2770 = vperm.xlu0 %6190, %v5841_v29   ;;  %v5845_v42 = vld [vmem:[%s10694_s0 + $0x918] sm:$0xff]  ;;  %v5844_v21 = vld [vmem:[%s10694_s0 + $0x910] sm:$0xff] }
 0x3de   : > { %v7950_v38 = vpop.permute.xlu1 %2319  ;;  %v7952_v41 = vpop.permute.xlu0 %2314 }
 0x3df   : > { %10951 = vst [vmem:[#allocation200_spill] sm:$0xff] %v7950_v38  ;;  %10952 = vst [vmem:[#allocation201_spill] sm:$0xff] %v7952_v41  ;;  %2835 = vperm.xlu1 %6191, %v5843_v37   ;;  %2830 = vperm.xlu0 %6190, %v5842_v16   ;;  %v5847_v38 = vld [vmem:[%s10694_s0 + $0x928] sm:$0xff]  ;;  %v5846_v37 = vld [vmem:[%s10694_s0 + $0x920] sm:$0xff] }
 0x3e2   : > { %v7960_v29 = vpop.permute.xlu1 %2329  ;;  %v7962_v8 = vpop.permute.xlu0 %2324 }
 0x3e3   : > { %10953 = vst [vmem:[#allocation202_spill] sm:$0xff] %v7960_v29  ;;  %10954 = vst [vmem:[#allocation203_spill] sm:$0xff] %v7962_v8  ;;  %2845 = vperm.xlu1 %6191, %v5845_v42   ;;  %2840 = vperm.xlu0 %6190, %v5844_v21   ;;  %v5849_v29 = vld [vmem:[%s10694_s0 + $0x938] sm:$0xff]  ;;  %v5848_v42 = vld [vmem:[%s10694_s0 + $0x930] sm:$0xff] }
 0x3e6   : > { %v7970_v16 = vpop.permute.xlu1 %2339  ;;  %v7972_v41 = vpop.permute.xlu0 %2334 }
 0x3e7   : > { %10955 = vst [vmem:[#allocation204_spill] sm:$0xff] %v7970_v16  ;;  %10956 = vst [vmem:[#allocation205_spill] sm:$0xff] %v7972_v41  ;;  %2855 = vperm.xlu1 %6191, %v5847_v38   ;;  %2850 = vperm.xlu0 %6190, %v5846_v37   ;;  %v5851_v16 = vld [vmem:[%s10694_s0 + $0x948] sm:$0xff]  ;;  %v5850_v38 = vld [vmem:[%s10694_s0 + $0x940] sm:$0xff] }
 0x3ea   : > { %v7980_v21 = vpop.permute.xlu1 %2349  ;;  %v7982_v8 = vpop.permute.xlu0 %2344 }
 0x3eb   : > { %10957 = vst [vmem:[#allocation206_spill] sm:$0xff] %v7980_v21  ;;  %10958 = vst [vmem:[#allocation207_spill] sm:$0xff] %v7982_v8  ;;  %2865 = vperm.xlu1 %6191, %v5849_v29   ;;  %2860 = vperm.xlu0 %6190, %v5848_v42   ;;  %v5853_v21 = vld [vmem:[%s10694_s0 + $0x958] sm:$0xff]  ;;  %v5852_v29 = vld [vmem:[%s10694_s0 + $0x950] sm:$0xff] }
 0x3ee   : > { %v7990_v37 = vpop.permute.xlu1 %2359  ;;  %v7992_v41 = vpop.permute.xlu0 %2354 }
 0x3ef   : > { %10959 = vst [vmem:[#allocation208_spill] sm:$0xff] %v7990_v37  ;;  %10960 = vst [vmem:[#allocation209_spill] sm:$0xff] %v7992_v41  ;;  %2875 = vperm.xlu1 %6191, %v5851_v16   ;;  %2870 = vperm.xlu0 %6190, %v5850_v38   ;;  %v5855_v37 = vld [vmem:[%s10694_s0 + $0x968] sm:$0xff]  ;;  %v5854_v16 = vld [vmem:[%s10694_s0 + $0x960] sm:$0xff] }
 0x3f2   : > { %v8000_v42 = vpop.permute.xlu1 %6218  ;;  %v8002_v8 = vpop.permute.xlu0 %2364 }
 0x3f3   : > { %10961 = vst [vmem:[#allocation210_spill] sm:$0xff] %v8000_v42  ;;  %10962 = vst [vmem:[#allocation211_spill] sm:$0xff] %v8002_v8  ;;  %2885 = vperm.xlu1 %6191, %v5853_v21   ;;  %2880 = vperm.xlu0 %6190, %v5852_v29   ;;  %v5857_v8 = vld [vmem:[%s10694_s0 + $0x978] sm:$0xff]  ;;  %v5856_v21 = vld [vmem:[%s10694_s0 + $0x970] sm:$0xff] }
 0x3f6   : > { %v8010_v38 = vpop.permute.xlu1 %2429  ;;  %v8012_v41 = vpop.permute.xlu0 %2424 }
 0x3f7   : > { %10963 = vst [vmem:[#allocation212_spill] sm:$0xff] %v8010_v38  ;;  %10964 = vst [vmem:[#allocation213_spill] sm:$0xff] %v8012_v41  ;;  %2895 = vperm.xlu1 %6191, %v5855_v37   ;;  %2890 = vperm.xlu0 %6190, %v5854_v16   ;;  %v5859_v41 = vld [vmem:[%s10694_s0 + $0x988] sm:$0xff]  ;;  %v5858_v37 = vld [vmem:[%s10694_s0 + $0x980] sm:$0xff] }
 0x3fa   : > { %v8020_v29 = vpop.permute.xlu1 %2439  ;;  %v8022_v48 = vpop.permute.xlu0 %2434 }
 0x3fb   : > { %10965 = vst [vmem:[#allocation214_spill] sm:$0xff] %v8020_v29  ;;  %10966 = vst [vmem:[#allocation215_spill] sm:$0xff] %v8022_v48  ;;  %2905 = vperm.xlu1 %6191, %v5857_v8   ;;  %2900 = vperm.xlu0 %6190, %v5856_v21   ;;  %v5861_v48 = vld [vmem:[%s10694_s0 + $0x998] sm:$0xff]  ;;  %v5860_v8 = vld [vmem:[%s10694_s0 + $0x990] sm:$0xff] }
 0x3fe   : > { %v8030_v16 = vpop.permute.xlu1 %2449  ;;  %v8032_v38 = vpop.permute.xlu0 %2444 }
 0x3ff   : > { %10967 = vst [vmem:[#allocation216_spill] sm:$0xff] %v8030_v16  ;;  %10968 = vst [vmem:[#allocation217_spill] sm:$0xff] %v8032_v38  ;;  %2964 = vperm.xlu1 %6191, %v5859_v41   ;;  %2959 = vperm.xlu0 %6190, %v5858_v37   ;;  %v5863_v38 = vld [vmem:[%s10694_s0 + $0x9a8] sm:$0xff]  ;;  %v5862_v41 = vld [vmem:[%s10694_s0 + $0x9a0] sm:$0xff] }
 0x402   : > { %v8040_v21 = vpop.permute.xlu1 %2459  ;;  %v8042_v29 = vpop.permute.xlu0 %2454 }
 0x403   : > { %10969 = vst [vmem:[#allocation218_spill] sm:$0xff] %v8040_v21  ;;  %10970 = vst [vmem:[#allocation219_spill] sm:$0xff] %v8042_v29  ;;  %2974 = vperm.xlu1 %6191, %v5861_v48   ;;  %2969 = vperm.xlu0 %6190, %v5860_v8   ;;  %v5865_v29 = vld [vmem:[%s10694_s0 + $0x9b8] sm:$0xff]  ;;  %v5864_v48 = vld [vmem:[%s10694_s0 + $0x9b0] sm:$0xff] }
 0x406   : > { %v8050_v37 = vpop.permute.xlu1 %2469  ;;  %v8052_v16 = vpop.permute.xlu0 %2464 }
 0x407   : > { %10971 = vst [vmem:[#allocation220_spill] sm:$0xff] %v8050_v37  ;;  %10972 = vst [vmem:[#allocation221_spill] sm:$0xff] %v8052_v16  ;;  %2984 = vperm.xlu1 %6191, %v5863_v38   ;;  %2979 = vperm.xlu0 %6190, %v5862_v41   ;;  %v5867_v16 = vld [vmem:[%s10694_s0 + $0x9c8] sm:$0xff]  ;;  %v5866_v38 = vld [vmem:[%s10694_s0 + $0x9c0] sm:$0xff] }
 0x40a   : > { %v8060_v8 = vpop.permute.xlu1 %2479  ;;  %v8062_v21 = vpop.permute.xlu0 %2474 }
 0x40b   : > { %10973 = vst [vmem:[#allocation222_spill] sm:$0xff] %v8060_v8  ;;  %10974 = vst [vmem:[#allocation223_spill] sm:$0xff] %v8062_v21  ;;  %2994 = vperm.xlu1 %6191, %v5865_v29   ;;  %2989 = vperm.xlu0 %6190, %v5864_v48   ;;  %v5869_v21 = vld [vmem:[%s10694_s0 + $0x9d8] sm:$0xff]  ;;  %v5868_v29 = vld [vmem:[%s10694_s0 + $0x9d0] sm:$0xff] }
 0x40e   : > { %v8070_v41 = vpop.permute.xlu1 %2489  ;;  %v8072_v37 = vpop.permute.xlu0 %2484 }
 0x40f   : > { %10975 = vst [vmem:[#allocation224_spill] sm:$0xff] %v8070_v41  ;;  %10976 = vst [vmem:[#allocation225_spill] sm:$0xff] %v8072_v37  ;;  %3004 = vperm.xlu1 %6191, %v5867_v16   ;;  %2999 = vperm.xlu0 %6190, %v5866_v38   ;;  %v5871_v37 = vld [vmem:[%s10694_s0 + $0x9e8] sm:$0xff]  ;;  %v5870_v16 = vld [vmem:[%s10694_s0 + $0x9e0] sm:$0xff] }
 0x412   : > { %v8080_v48 = vpop.permute.xlu1 %2499  ;;  %v8082_v8 = vpop.permute.xlu0 %2494 }
 0x413   : > { %10977 = vst [vmem:[#allocation226_spill] sm:$0xff] %v8080_v48  ;;  %10978 = vst [vmem:[#allocation227_spill] sm:$0xff] %v8082_v8  ;;  %3014 = vperm.xlu1 %6191, %v5869_v21   ;;  %3009 = vperm.xlu0 %6190, %v5868_v29   ;;  %v5873_v8 = vld [vmem:[%s10694_s0 + $0x9f8] sm:$0xff]  ;;  %v5872_v21 = vld [vmem:[%s10694_s0 + $0x9f0] sm:$0xff] }
 0x416   : > { %v8090_v38 = vpop.permute.xlu1 %2565  ;;  %v8092_v41 = vpop.permute.xlu0 %2560 }
 0x417   : > { %10979 = vst [vmem:[#allocation228_spill] sm:$0xff] %v8090_v38  ;;  %10980 = vst [vmem:[#allocation229_spill] sm:$0xff] %v8092_v41  ;;  %3024 = vperm.xlu1 %6191, %v5871_v37   ;;  %3019 = vperm.xlu0 %6190, %v5870_v16  }
 0x41a   : > { %v8100_v29 = vpop.permute.xlu1 %2575  ;;  %v8102_v48 = vpop.permute.xlu0 %2570 }
 0x41b   : > { %10981 = vst [vmem:[#allocation230_spill] sm:$0xff] %v8100_v29  ;;  %10982 = vst [vmem:[#allocation231_spill] sm:$0xff] %v8102_v48  ;;  %3034 = vperm.xlu1 %6191, %v5873_v8   ;;  %3029 = vperm.xlu0 %6190, %v5872_v21  }
 0x41e   : > { %v8104_v42 = vpop.permute.xlu1 %2585  ;;  %v8106_v38 = vpop.permute.xlu0 %2580 }
 0x41f   : > { %10983 = vst [vmem:[#allocation232_spill] sm:$0xff] %v8104_v42  ;;  %10984 = vst [vmem:[#allocation233_spill] sm:$0xff] %v8106_v38 }
 0x422   : > { %v8108_v37 = vpop.permute.xlu1 %2595  ;;  %v8110_v16 = vpop.permute.xlu0 %2590 }
 0x423   : > { %10985 = vst [vmem:[#allocation234_spill] sm:$0xff] %v8108_v37  ;;  %10986 = vst [vmem:[#allocation235_spill] sm:$0xff] %v8110_v16 }
 0x426   : > { %v8112_v41 = vpop.permute.xlu1 %2605  ;;  %v8114_v45 = vpop.permute.xlu0 %2600 }
 0x427   : > { %10987 = vst [vmem:[#allocation236_spill] sm:$0xff] %v8112_v41  ;;  %10988 = vst [vmem:[#allocation237_spill] sm:$0xff] %v8114_v45 }
 0x42a   : > { %v8116_v5 = vpop.permute.xlu1 %2615  ;;  %v8118_v11 = vpop.permute.xlu0 %2610 }
 0x42b   : > { %10989 = vst [vmem:[#allocation238_spill] sm:$0xff] %v8116_v5  ;;  %10990 = vst [vmem:[#allocation239_spill] sm:$0xff] %v8118_v11 }
 0x42e   : > { %v8120_v29 = vpop.permute.xlu1 %2625  ;;  %v8122_v8 = vpop.permute.xlu0 %2620 }
 0x42f   : > { %10991 = vst [vmem:[#allocation240_spill] sm:$0xff] %v8120_v29  ;;  %10992 = vst [vmem:[#allocation241_spill] sm:$0xff] %v8122_v8 }
 0x432   : > { %v8124_v21 = vpop.permute.xlu1 %2635  ;;  %v8126_v42 = vpop.permute.xlu0 %2630 }
 0x433   : > { %10993 = vst [vmem:[#allocation242_spill] sm:$0xff] %v8124_v21  ;;  %10994 = vst [vmem:[#allocation243_spill] sm:$0xff] %v8126_v42 }
 0x436   : > { %v8128_v38 = vpop.permute.xlu1 %2695  ;;  %v8130_v37 = vpop.permute.xlu0 %6223 }
 0x437   : > { %10995 = vst [vmem:[#allocation244_spill] sm:$0xff] %v8128_v38  ;;  %10996 = vst [vmem:[#allocation245_spill] sm:$0xff] %v8130_v37 }
 0x43a   : > { %v8132_v16 = vpop.permute.xlu1 %2705  ;;  %v8134_v41 = vpop.permute.xlu0 %2700 }
 0x43b   : > { %10997 = vst [vmem:[#allocation246_spill] sm:$0xff] %v8132_v16  ;;  %10998 = vst [vmem:[#allocation247_spill] sm:$0xff] %v8134_v41 }
 0x43e   : > { %v8136_v45 = vpop.permute.xlu1 %2715  ;;  %v8138_v5 = vpop.permute.xlu0 %2710 }
 0x43f   : > { %10999 = vst [vmem:[#allocation248_spill] sm:$0xff] %v8136_v45  ;;  %11000 = vst [vmem:[#allocation249_spill] sm:$0xff] %v8138_v5 }
 0x442   : > { %v8140_v11 = vpop.permute.xlu1 %2725  ;;  %v8142_v29 = vpop.permute.xlu0 %2720 }
 0x443   : > { %11001 = vst [vmem:[#allocation250_spill] sm:$0xff] %v8140_v11  ;;  %11002 = vst [vmem:[#allocation251_spill] sm:$0xff] %v8142_v29 }
 0x446   : > { %v8144_v8 = vpop.permute.xlu1 %2735  ;;  %v8146_v48 = vpop.permute.xlu0 %2730 }
 0x447   : > { %11003 = vst [vmem:[#allocation252_spill] sm:$0xff] %v8144_v8  ;;  %11004 = vst [vmem:[#allocation253_spill] sm:$0xff] %v8146_v48 }
 0x44a   : > { %v8148_v42 = vpop.permute.xlu1 %2745  ;;  %v8150_v38 = vpop.permute.xlu0 %2740 }
 0x44b   : > { %11005 = vst [vmem:[#allocation254_spill] sm:$0xff] %v8148_v42  ;;  %11006 = vst [vmem:[#allocation255_spill] sm:$0xff] %v8150_v38 }
 0x44e   : > { %v8152_v21 = vpop.permute.xlu1 %2755  ;;  %v8154_v16 = vpop.permute.xlu0 %2750 }
 0x44f   : > { %11007 = vst [vmem:[#allocation256_spill] sm:$0xff] %v8152_v21  ;;  %11008 = vst [vmem:[#allocation257_spill] sm:$0xff] %v8154_v16 }
 0x452   : > { %v8156_v41 = vpop.permute.xlu1 %2765  ;;  %v8158_v45 = vpop.permute.xlu0 %2760 }
 0x453   : > { %11009 = vst [vmem:[#allocation258_spill] sm:$0xff] %v8156_v41  ;;  %11010 = vst [vmem:[#allocation259_spill] sm:$0xff] %v8158_v45 }
 0x456   : > { %v8160_v5 = vpop.permute.xlu1 %6228  ;;  %v8162_v11 = vpop.permute.xlu0 %2770 }
 0x457   : > { %11011 = vst [vmem:[#allocation260_spill] sm:$0xff] %v8160_v5  ;;  %11012 = vst [vmem:[#allocation261_spill] sm:$0xff] %v8162_v11 }
 0x45a   : > { %v8164_v8 = vpop.permute.xlu1 %2835  ;;  %v8166_v48 = vpop.permute.xlu0 %2830 }
 0x45b   : > { %11013 = vst [vmem:[#allocation262_spill] sm:$0xff] %v8164_v8  ;;  %11014 = vst [vmem:[#allocation263_spill] sm:$0xff] %v8166_v48 }
 0x45e   : > { %v8168_v42 = vpop.permute.xlu1 %2845  ;;  %v8170_v38 = vpop.permute.xlu0 %2840 }
 0x45f   : > { %11015 = vst [vmem:[#allocation264_spill] sm:$0xff] %v8168_v42  ;;  %11016 = vst [vmem:[#allocation265_spill] sm:$0xff] %v8170_v38  ;;  %v6144_v38 = vld [vmem:[%s6580_s26 + $0x18] sm:$0xff]  }
 0x462   : > { %v8172_v21 = vpop.permute.xlu1 %2855  ;;  %v8174_v16 = vpop.permute.xlu0 %2850 }
 0x463   : > { %11017 = vst [vmem:[#allocation266_spill] sm:$0xff] %v8172_v21  ;;  %11018 = vst [vmem:[#allocation267_spill] sm:$0xff] %v8174_v16 }
 0x466   : > { %v8176_v41 = vpop.permute.xlu1 %2865  ;;  %v8178_v45 = vpop.permute.xlu0 %2860 }
 0x467   : > { %11019 = vst [vmem:[#allocation268_spill] sm:$0xff] %v8176_v41  ;;  %11020 = vst [vmem:[#allocation269_spill] sm:$0xff] %v8178_v45  ;;  %v8197_v41 = vunpack.c.h.bf16 %v6144_v38  ;;  %v8199_v45 = vunpack.c.l.bf16 %v6144_v38 }
 0x469   : > { %11029 = vst [vmem:[#allocation278_spill] sm:$0xff] %v8197_v41  ;;  %11030 = vst [vmem:[#allocation279_spill] sm:$0xff] %v8199_v45 }
 0x46a   : > { %v8180_v29 = vpop.permute.xlu1 %2875  ;;  %v8182_v5 = vpop.permute.xlu0 %2870 }
 0x46b   : > { %11021 = vst [vmem:[#allocation270_spill] sm:$0xff] %v8180_v29  ;;  %11022 = vst [vmem:[#allocation271_spill] sm:$0xff] %v8182_v5 }
 0x46e   : > { %v8184_v11 = vpop.permute.xlu1 %2885  ;;  %v8186_v8 = vpop.permute.xlu0 %2880 }
 0x46f   : > { %11023 = vst [vmem:[#allocation272_spill] sm:$0xff] %v8184_v11  ;;  %11024 = vst [vmem:[#allocation273_spill] sm:$0xff] %v8186_v8 }
 0x472   : > { %v8188_v48 = vpop.permute.xlu1 %2895  ;;  %v8190_v42 = vpop.permute.xlu0 %2890 }
 0x473   : > { %11025 = vst [vmem:[#allocation274_spill] sm:$0xff] %v8188_v48  ;;  %11026 = vst [vmem:[#allocation275_spill] sm:$0xff] %v8190_v42 }
 0x476   : > { %v8193_v21 = vpop.permute.xlu1 %2905  ;;  %v8195_v16 = vpop.permute.xlu0 %2900 }
 0x477   : > { %11027 = vst [vmem:[#allocation276_spill] sm:$0xff] %v8193_v21  ;;  %11028 = vst [vmem:[#allocation277_spill] sm:$0xff] %v8195_v16 }
 0x47a   : > { %v2965_v29 = vpop.permute.xlu1 %2964  ;;  %v2960_v37 = vpop.permute.xlu0 %2959 }
 0x47b   : > { %v3038_v5 = vmul.f32 %v8197_v41, %v2965_v29  ;;  %v3037_v11 = vmul.f32 %v8199_v45, %v2960_v37 }
 0x47d   : > { %3071 = vrot.lane.b32.xlu1 %v3038_v5, %s6335_s27  ;;  %3069 = vrot.lane.b32.xlu0 %v3037_v11, %s6335_s27 }
 0x47e   : > { %v2975_v42 = vpop.permute.xlu1 %2974  ;;  %v2970_v21 = vpop.permute.xlu0 %2969 }
 0x47f   : > { %v3040_v48 = vmul.f32 %v8197_v41, %v2975_v42  ;;  %v3039_v16 = vmul.f32 %v8199_v45, %v2970_v21 }
 0x481   : > { %3075 = vrot.lane.b32.xlu1 %v3040_v48, %s6335_s27  ;;  %3073 = vrot.lane.b32.xlu0 %v3039_v16, %s6335_s27 }
 0x482   : > { %v2985_v38 = vpop.permute.xlu1 %2984  ;;  %v2980_v8 = vpop.permute.xlu0 %2979 }
 0x483   : > { %v3042_v29 = vmul.f32 %v8197_v41, %v2985_v38  ;;  %v3041_v37 = vmul.f32 %v8199_v45, %v2980_v8 }
 0x485   : > { %3079 = vrot.lane.b32.xlu1 %v3042_v29, %s6335_s27  ;;  %3077 = vrot.lane.b32.xlu0 %v3041_v37, %s6335_s27 }
 0x486   : > { %v2995_v11 = vpop.permute.xlu1 %2994  ;;  %v2990_v42 = vpop.permute.xlu0 %2989 }
 0x487   : > { %v3044_v5 = vmul.f32 %v8197_v41, %v2995_v11  ;;  %v3043_v21 = vmul.f32 %v8199_v45, %v2990_v42 }
 0x489   : > { %3083 = vrot.lane.b32.xlu1 %v3044_v5, %s6335_s27  ;;  %3081 = vrot.lane.b32.xlu0 %v3043_v21, %s6335_s27 }
 0x48a   : > { %v3005_v48 = vpop.permute.xlu1 %3004  ;;  %v3000_v38 = vpop.permute.xlu0 %2999 }
 0x48b   : > { %v3046_v16 = vmul.f32 %v8197_v41, %v3005_v48  ;;  %v3045_v8 = vmul.f32 %v8199_v45, %v3000_v38 }
 0x48d   : > { %3087 = vrot.lane.b32.xlu1 %v3046_v16, %s6335_s27  ;;  %3085 = vrot.lane.b32.xlu0 %v3045_v8, %s6335_s27 }
 0x48e   : > { %v3015_v29 = vpop.permute.xlu1 %3014  ;;  %v3010_v11 = vpop.permute.xlu0 %3009 }
 0x48f   : > { %v3048_v37 = vmul.f32 %v8197_v41, %v3015_v29  ;;  %v3047_v42 = vmul.f32 %v8199_v45, %v3010_v11 }
 0x491   : > { %3091 = vrot.lane.b32.xlu1 %v3048_v37, %s6335_s27  ;;  %3089 = vrot.lane.b32.xlu0 %v3047_v42, %s6335_s27  ;;  %v5875_v37 = vld [vmem:[%s10694_s0 + $0xa08] sm:$0xff]  ;;  %v5874_v42 = vld [vmem:[%s10694_s0 + $0xa00] sm:$0xff] }
 0x492   : > { %v3025_v5 = vpop.permute.xlu1 %3024  ;;  %v3020_v48 = vpop.permute.xlu0 %3019 }
 0x493   : > { %v3050_v21 = vmul.f32 %v8197_v41, %v3025_v5  ;;  %v3049_v38 = vmul.f32 %v8199_v45, %v3020_v48  ;;  %v5877_v5 = vld [vmem:[%s10694_s0 + $0xa18] sm:$0xff]  ;;  %v5879_v48 = vld [vmem:[%s10694_s0 + $0xa28] sm:$0xff] }
 0x495   : > { %3095 = vrot.lane.b32.xlu1 %v3050_v21, %s6335_s27  ;;  %3093 = vrot.lane.b32.xlu0 %v3049_v38, %s6335_s27  ;;  %v5876_v21 = vld [vmem:[%s10694_s0 + $0xa10] sm:$0xff]  ;;  %v5878_v38 = vld [vmem:[%s10694_s0 + $0xa20] sm:$0xff] }
 0x496   : > { %v3035_v16 = vpop.permute.xlu1 %3034  ;;  %v3030_v29 = vpop.permute.xlu0 %3029 }
 0x497   : > { %v3052_v8 = vmul.f32 %v8197_v41, %v3035_v16  ;;  %v3051_v11 = vmul.f32 %v8199_v45, %v3030_v29  ;;  %v5881_v16 = vld [vmem:[%s10694_s0 + $0xa38] sm:$0xff]  ;;  %v5883_v29 = vld [vmem:[%s10694_s0 + $0xa48] sm:$0xff] }
 0x499   : > { %3099 = vrot.lane.b32.xlu1 %v3052_v8, %s6335_s27  ;;  %3097 = vrot.lane.b32.xlu0 %v3051_v11, %s6335_s27  ;;  %v5880_v8 = vld [vmem:[%s10694_s0 + $0xa30] sm:$0xff]  ;;  %v5882_v11 = vld [vmem:[%s10694_s0 + $0xa40] sm:$0xff] }
 0x49d   : > { %3157 = vperm.xlu1 %6191, %v5875_v37   ;;  %3152 = vperm.xlu0 %6190, %v5874_v42   ;;  %v5885_v37 = vld [vmem:[%s10694_s0 + $0xa58] sm:$0xff]  ;;  %v5884_v42 = vld [vmem:[%s10694_s0 + $0xa50] sm:$0xff] }
 0x4a1   : > { %3167 = vperm.xlu1 %6191, %v5877_v5   ;;  %3162 = vperm.xlu0 %6190, %v5876_v21   ;;  %v5887_v5 = vld [vmem:[%s10694_s0 + $0xa68] sm:$0xff]  ;;  %v5886_v21 = vld [vmem:[%s10694_s0 + $0xa60] sm:$0xff] }
 0x4a5   : > { %3177 = vperm.xlu1 %6191, %v5879_v48   ;;  %3172 = vperm.xlu0 %6190, %v5878_v38   ;;  %v5889_v48 = vld [vmem:[%s10694_s0 + $0xa78] sm:$0xff]  ;;  %v5888_v38 = vld [vmem:[%s10694_s0 + $0xa70] sm:$0xff] }
 0x4a9   : > { %3187 = vperm.xlu1 %6191, %v5881_v16   ;;  %3182 = vperm.xlu0 %6190, %v5880_v8  }
 0x4ad   : > { %3197 = vperm.xlu1 %6191, %v5883_v29   ;;  %3192 = vperm.xlu0 %6190, %v5882_v11  }
 0x4b1   : > { %3207 = vperm.xlu1 %6191, %v5885_v37   ;;  %3202 = vperm.xlu0 %6190, %v5884_v42  }
 0x4b5   : > { %3217 = vperm.xlu1 %6191, %v5887_v5   ;;  %3212 = vperm.xlu0 %6190, %v5886_v21  }
 0x4b9   : > { %3227 = vperm.xlu1 %6191, %v5889_v48   ;;  %3222 = vperm.xlu0 %6190, %v5888_v38  }
 0x4ef   : > { %v8281_v16 = vpop.permute.xlu1 %3071  ;;  %v8283_v8 = vpop.permute.xlu0 %3069 }
 0x4f0   : > { %11031 = vst [vmem:[#allocation280_spill] sm:$0xff] %v8281_v16  ;;  %11032 = vst [vmem:[#allocation281_spill] sm:$0xff] %v8283_v8 }
 0x4f3   : > { %v8285_v29 = vpop.permute.xlu1 %3075  ;;  %v8287_v11 = vpop.permute.xlu0 %3073 }
 0x4f4   : > { %11033 = vst [vmem:[#allocation282_spill] sm:$0xff] %v8285_v29  ;;  %11034 = vst [vmem:[#allocation283_spill] sm:$0xff] %v8287_v11 }
 0x4f7   : > { %v8289_v37 = vpop.permute.xlu1 %3079  ;;  %v8291_v42 = vpop.permute.xlu0 %3077 }
 0x4f8   : > { %11035 = vst [vmem:[#allocation284_spill] sm:$0xff] %v8289_v37  ;;  %11036 = vst [vmem:[#allocation285_spill] sm:$0xff] %v8291_v42 }
 0x4fb   : > { %v8293_v5 = vpop.permute.xlu1 %3083  ;;  %v8295_v21 = vpop.permute.xlu0 %3081 }
 0x4fc   : > { %11037 = vst [vmem:[#allocation286_spill] sm:$0xff] %v8293_v5  ;;  %11038 = vst [vmem:[#allocation287_spill] sm:$0xff] %v8295_v21 }
 0x4ff   : > { %v8297_v22 = vpop.permute.xlu1 %3087  ;;  %v8299_v48 = vpop.permute.xlu0 %3085 }
 0x500   : > { %11039 = vst [vmem:[#allocation288_spill] sm:$0xff] %v8297_v22  ;;  %11040 = vst [vmem:[#allocation289_spill] sm:$0xff] %v8299_v48 }
 0x503   : > { %v8301_v38 = vpop.permute.xlu1 %3091  ;;  %v8303_v16 = vpop.permute.xlu0 %3089 }
 0x504   : > { %11041 = vst [vmem:[#allocation290_spill] sm:$0xff] %v8301_v38  ;;  %11042 = vst [vmem:[#allocation291_spill] sm:$0xff] %v8303_v16 }
 0x507   : > { %v8305_v8 = vpop.permute.xlu1 %3095  ;;  %v8307_v29 = vpop.permute.xlu0 %3093 }
 0x508   : > { %11043 = vst [vmem:[#allocation292_spill] sm:$0xff] %v8305_v8  ;;  %11044 = vst [vmem:[#allocation293_spill] sm:$0xff] %v8307_v29 }
 0x50b   : > { %v8309_v11 = vpop.permute.xlu1 %3099  ;;  %v8311_v37 = vpop.permute.xlu0 %3097 }
 0x50c   : > { %11045 = vst [vmem:[#allocation294_spill] sm:$0xff] %v8309_v11  ;;  %11046 = vst [vmem:[#allocation295_spill] sm:$0xff] %v8311_v37 }
 0x518   : > { %v3158_v42 = vpop.permute.xlu1 %3157  ;;  %v3153_v21 = vpop.permute.xlu0 %3152 }
 0x519   : > { %v3231_v5 = vmul.f32 %v8197_v41, %v3158_v42  ;;  %v3230_v22 = vmul.f32 %v8199_v45, %v3153_v21 }
 0x51b   : > { %3264 = vrot.lane.b32.xlu1 %v3231_v5, %s6336_s28  ;;  %3262 = vrot.lane.b32.xlu0 %v3230_v22, %s6336_s28 }
 0x51c   : > { %v3168_v38 = vpop.permute.xlu1 %3167  ;;  %v3163_v8 = vpop.permute.xlu0 %3162 }
 0x51d   : > { %v3233_v16 = vmul.f32 %v8197_v41, %v3168_v38  ;;  %v3232_v29 = vmul.f32 %v8199_v45, %v3163_v8 }
 0x51f   : > { %3268 = vrot.lane.b32.xlu1 %v3233_v16, %s6336_s28  ;;  %3266 = vrot.lane.b32.xlu0 %v3232_v29, %s6336_s28 }
 0x520   : > { %v3178_v37 = vpop.permute.xlu1 %3177  ;;  %v3173_v11 = vpop.permute.xlu0 %3172 }
 0x521   : > { %v3235_v42 = vmul.f32 %v8197_v41, %v3178_v37  ;;  %v3234_v21 = vmul.f32 %v8199_v45, %v3173_v11 }
 0x523   : > { %3272 = vrot.lane.b32.xlu1 %v3235_v42, %s6336_s28  ;;  %3270 = vrot.lane.b32.xlu0 %v3234_v21, %s6336_s28 }
 0x524   : > { %v3188_v22 = vpop.permute.xlu1 %3187  ;;  %v3183_v38 = vpop.permute.xlu0 %3182 }
 0x525   : > { %v3237_v5 = vmul.f32 %v8197_v41, %v3188_v22  ;;  %v3236_v8 = vmul.f32 %v8199_v45, %v3183_v38 }
 0x527   : > { %3276 = vrot.lane.b32.xlu1 %v3237_v5, %s6336_s28  ;;  %3274 = vrot.lane.b32.xlu0 %v3236_v8, %s6336_s28 }
 0x528   : > { %v3198_v16 = vpop.permute.xlu1 %3197  ;;  %v3193_v37 = vpop.permute.xlu0 %3192 }
 0x529   : > { %v3239_v29 = vmul.f32 %v8197_v41, %v3198_v16  ;;  %v3238_v11 = vmul.f32 %v8199_v45, %v3193_v37 }
 0x52b   : > { %3280 = vrot.lane.b32.xlu1 %v3239_v29, %s6336_s28  ;;  %3278 = vrot.lane.b32.xlu0 %v3238_v11, %s6336_s28 }
 0x52c   : > { %v3208_v42 = vpop.permute.xlu1 %3207  ;;  %v3203_v22 = vpop.permute.xlu0 %3202 }
 0x52d   : > { %v3241_v21 = vmul.f32 %v8197_v41, %v3208_v42  ;;  %v3240_v38 = vmul.f32 %v8199_v45, %v3203_v22 }
 0x52f   : > { %3284 = vrot.lane.b32.xlu1 %v3241_v21, %s6336_s28  ;;  %3282 = vrot.lane.b32.xlu0 %v3240_v38, %s6336_s28  ;;  %v5891_v21 = vld [vmem:[%s10694_s0 + $0xa88] sm:$0xff]  ;;  %v5890_v38 = vld [vmem:[%s10694_s0 + $0xa80] sm:$0xff] }
 0x530   : > { %v3218_v5 = vpop.permute.xlu1 %3217  ;;  %v3213_v16 = vpop.permute.xlu0 %3212 }
 0x531   : > { %v3243_v8 = vmul.f32 %v8197_v41, %v3218_v5  ;;  %v3242_v37 = vmul.f32 %v8199_v45, %v3213_v16  ;;  %v5893_v5 = vld [vmem:[%s10694_s0 + $0xa98] sm:$0xff]  ;;  %v5895_v16 = vld [vmem:[%s10694_s0 + $0xaa8] sm:$0xff] }
 0x533   : > { %3288 = vrot.lane.b32.xlu1 %v3243_v8, %s6336_s28  ;;  %3286 = vrot.lane.b32.xlu0 %v3242_v37, %s6336_s28  ;;  %v5892_v8 = vld [vmem:[%s10694_s0 + $0xa90] sm:$0xff]  ;;  %v5894_v37 = vld [vmem:[%s10694_s0 + $0xaa0] sm:$0xff] }
 0x534   : > { %v3228_v29 = vpop.permute.xlu1 %3227  ;;  %v3223_v42 = vpop.permute.xlu0 %3222 }
 0x535   : > { %v3245_v11 = vmul.f32 %v8197_v41, %v3228_v29  ;;  %v3244_v22 = vmul.f32 %v8199_v45, %v3223_v42  ;;  %v5897_v29 = vld [vmem:[%s10694_s0 + $0xab8] sm:$0xff]  ;;  %v5899_v42 = vld [vmem:[%s10694_s0 + $0xac8] sm:$0xff] }
 0x537   : > { %3292 = vrot.lane.b32.xlu1 %v3245_v11, %s6336_s28  ;;  %3290 = vrot.lane.b32.xlu0 %v3244_v22, %s6336_s28  ;;  %v5896_v11 = vld [vmem:[%s10694_s0 + $0xab0] sm:$0xff]  ;;  %v5898_v22 = vld [vmem:[%s10694_s0 + $0xac0] sm:$0xff] }
 0x53b   : > { %3350 = vperm.xlu1 %6191, %v5891_v21   ;;  %3345 = vperm.xlu0 %6190, %v5890_v38   ;;  %v5901_v21 = vld [vmem:[%s10694_s0 + $0xad8] sm:$0xff]  ;;  %v5900_v38 = vld [vmem:[%s10694_s0 + $0xad0] sm:$0xff] }
 0x53f   : > { %3360 = vperm.xlu1 %6191, %v5893_v5   ;;  %3355 = vperm.xlu0 %6190, %v5892_v8   ;;  %v5903_v5 = vld [vmem:[%s10694_s0 + $0xae8] sm:$0xff]  ;;  %v5902_v8 = vld [vmem:[%s10694_s0 + $0xae0] sm:$0xff] }
 0x543   : > { %3370 = vperm.xlu1 %6191, %v5895_v16   ;;  %3365 = vperm.xlu0 %6190, %v5894_v37   ;;  %v5905_v16 = vld [vmem:[%s10694_s0 + $0xaf8] sm:$0xff]  ;;  %v5904_v37 = vld [vmem:[%s10694_s0 + $0xaf0] sm:$0xff] }
 0x547   : > { %3380 = vperm.xlu1 %6191, %v5897_v29   ;;  %3375 = vperm.xlu0 %6190, %v5896_v11   ;;  %v5907_v29 = vld [vmem:[%s10694_s0 + $0xb08] sm:$0xff]  ;;  %v5906_v11 = vld [vmem:[%s10694_s0 + $0xb00] sm:$0xff] }
 0x54b   : > { %3390 = vperm.xlu1 %6191, %v5899_v42   ;;  %3385 = vperm.xlu0 %6190, %v5898_v22   ;;  %v5909_v42 = vld [vmem:[%s10694_s0 + $0xb18] sm:$0xff]  ;;  %v5908_v22 = vld [vmem:[%s10694_s0 + $0xb10] sm:$0xff] }
 0x54f   : > { %3400 = vperm.xlu1 %6191, %v5901_v21   ;;  %3395 = vperm.xlu0 %6190, %v5900_v38   ;;  %v5911_v21 = vld [vmem:[%s10694_s0 + $0xb28] sm:$0xff]  ;;  %v5910_v38 = vld [vmem:[%s10694_s0 + $0xb20] sm:$0xff] }
 0x553   : > { %3410 = vperm.xlu1 %6191, %v5903_v5   ;;  %3405 = vperm.xlu0 %6190, %v5902_v8   ;;  %v5913_v5 = vld [vmem:[%s10694_s0 + $0xb38] sm:$0xff]  ;;  %v5912_v8 = vld [vmem:[%s10694_s0 + $0xb30] sm:$0xff] }
 0x557   : > { %3420 = vperm.xlu1 %6191, %v5905_v16   ;;  %3415 = vperm.xlu0 %6190, %v5904_v37   ;;  %v5915_v16 = vld [vmem:[%s10694_s0 + $0xb48] sm:$0xff]  ;;  %v5914_v37 = vld [vmem:[%s10694_s0 + $0xb40] sm:$0xff] }
 0x55b   : > { %3489 = vperm.xlu1 %6191, %v5907_v29   ;;  %3484 = vperm.xlu0 %6190, %v5906_v11   ;;  %v8424_v29 = vld [vmem:[%s6580_s26 + $0x20] sm:$0x1]  ;;  %v5917_v11 = vld [vmem:[%s10694_s0 + $0xb58] sm:$0xff] }
 0x55f   : > { %3499 = vperm.xlu1 %6191, %v5909_v42   ;;  %3494 = vperm.xlu0 %6190, %v5908_v22   ;;  %v5916_v42 = vld [vmem:[%s10694_s0 + $0xb50] sm:$0xff]  ;;  %v10723_v22 = vunpack.c.l.bf16 %v8424_v29 }
 0x563   : > { %3509 = vperm.xlu1 %6191, %v5911_v21   ;;  %3504 = vperm.xlu0 %6190, %v5910_v38   ;;  %v5919_v21 = vld [vmem:[%s10694_s0 + $0xb68] sm:$0xff]  ;;  %v5918_v38 = vld [vmem:[%s10694_s0 + $0xb60] sm:$0xff] }
 0x567   : > { %3519 = vperm.xlu1 %6191, %v5913_v5   ;;  %3514 = vperm.xlu0 %6190, %v5912_v8   ;;  %v3426_v5 = vrot.slane %v8199_v45, 1  ;;  %v3427_v8 = vrot.slane %v8197_v41, 1 }
 0x56b   : > { %3529 = vperm.xlu1 %6191, %v5915_v16   ;;  %3524 = vperm.xlu0 %6190, %v5914_v37   ;;  %v3429_v16 = vrot.slane %v10723_v22, 1  ;;  %v5921_v37 = vld [vmem:[%s10694_s0 + $0xb78] sm:$0xff]  ;;  %v5934_v22 = vld [vmem:[%s10694_s0 + $0xbe0] sm:$0xff] }
 0x56d   : > { %v8453_v48 = vsel %vm764_vm0, %v3427_v8, %v3429_v16  ;;  %v5926_v16 = vld [vmem:[%s10694_s0 + $0xba0] sm:$0xff] }
 0x56e   : > { %11048 = vst [vmem:[#allocation297_spill] sm:$0xff] %v8453_v48 }
 0x56f   : > { %3539 = vperm.xlu1 %6191, %v5917_v11   ;;  %3534 = vperm.xlu0 %6190, %v5916_v42   ;;  %v5920_v11 = vld [vmem:[%s10694_s0 + $0xb70] sm:$0xff]  ;;  %v8450_v42 = vsel %vm764_vm0, %v3426_v5, %v3427_v8  ;;  %v5923_v8 = vld [vmem:[%s10694_s0 + $0xb88] sm:$0xff] }
 0x570   : > { %11047 = vst [vmem:[#allocation296_spill] sm:$0xff] %v8450_v42  ;;  %v5924_v5 = vld [vmem:[%s10694_s0 + $0xb90] sm:$0xff] }
 0x573   : > { %3549 = vperm.xlu1 %6191, %v5919_v21   ;;  %3544 = vperm.xlu0 %6190, %v5918_v38   ;;  %v5922_v21 = vld [vmem:[%s10694_s0 + $0xb80] sm:$0xff]  ;;  %v6232_v38 = vpack.i.bf16 %v8453_v48, %v8450_v42  ;;  %v5936_v48 = vld [vmem:[%s10694_s0 + $0xbf0] sm:$0xff] }
 0x577   : > { %3559 = vperm.xlu1 %6191, %v5921_v37   ;;  %3554 = vperm.xlu0 %6190, %v5920_v11   ;;  %v5925_v37 = vld [vmem:[%s10694_s0 + $0xb98] sm:$0xff]  ;;  %v5928_v11 = vld [vmem:[%s10694_s0 + $0xbb0] sm:$0xff] }
 0x57b   : > { %3619 = vperm.xlu1 %6191, %v5922_v21   ;;  %6233 = vrot.lane.b32.xlu0 %v6232_v38, %s6335_s27  ;;  %v5927_v21 = vld [vmem:[%s10694_s0 + $0xba8] sm:$0xff] }
 0x57f   : > { %3629 = vperm.xlu1 %6191, %v5924_v5   ;;  %3624 = vperm.xlu0 %6190, %v5923_v8   ;;  %v5930_v5 = vld [vmem:[%s10694_s0 + $0xbc0] sm:$0xff]  ;;  %v5929_v8 = vld [vmem:[%s10694_s0 + $0xbb8] sm:$0xff] }
 0x583   : > { %3639 = vperm.xlu1 %6191, %v5926_v16   ;;  %3634 = vperm.xlu0 %6190, %v5925_v37   ;;  %v5932_v16 = vld [vmem:[%s10694_s0 + $0xbd0] sm:$0xff] }
 0x587   : > { %3649 = vperm.xlu1 %6191, %v5928_v11   ;;  %3644 = vperm.xlu0 %6190, %v5927_v21   ;;  %v5931_v11 = vld [vmem:[%s10694_s0 + $0xbc8] sm:$0xff] }
 0x58b   : > { %3659 = vperm.xlu1 %6191, %v5930_v5   ;;  %3654 = vperm.xlu0 %6190, %v5929_v8   ;;  %v5933_v8 = vld [vmem:[%s10694_s0 + $0xbd8] sm:$0xff] }
 0x58d   : > { %v8488_v37 = vpop.permute.xlu1 %3264  ;;  %v8493_v21 = vpop.permute.xlu0 %3262 }
 0x58e   : > { %11049 = vst [vmem:[#allocation298_spill] sm:$0xff] %v8488_v37  ;;  %11050 = vst [vmem:[#allocation299_spill] sm:$0xff] %v8493_v21 }
 0x58f   : > { %3669 = vperm.xlu1 %6191, %v5932_v16   ;;  %3664 = vperm.xlu0 %6190, %v5931_v11   ;;  %v5935_v11 = vld [vmem:[%s10694_s0 + $0xbe8] sm:$0xff] }
 0x591   : > { %v8498_v5 = vpop.permute.xlu1 %3268  ;;  %v8503_v42 = vpop.permute.xlu0 %3266 }
 0x592   : > { %11051 = vst [vmem:[#allocation300_spill] sm:$0xff] %v8498_v5  ;;  %11052 = vst [vmem:[#allocation301_spill] sm:$0xff] %v8503_v42  ;;  %v5937_v42 = vld [vmem:[%s10694_s0 + $0xbf8] sm:$0xff] }
 0x593   : > { %3679 = vperm.xlu1 %6191, %v5934_v22   ;;  %3674 = vperm.xlu0 %6190, %v5933_v8  }
 0x595   : > { %v8508_v16 = vpop.permute.xlu1 %3272  ;;  %v8513_v21 = vpop.permute.xlu0 %3270 }
 0x596   : > { %11053 = vst [vmem:[#allocation302_spill] sm:$0xff] %v8508_v16  ;;  %11054 = vst [vmem:[#allocation303_spill] sm:$0xff] %v8513_v21  ;;  %v5939_v16 = vld [vmem:[%s10694_s0 + $0xc08] sm:$0xff] }
 0x597   : > { %3689 = vperm.xlu1 %6191, %v5936_v48   ;;  %3684 = vperm.xlu0 %6190, %v5935_v11   ;;  %v5938_v48 = vld [vmem:[%s10694_s0 + $0xc00] sm:$0xff] }
 0x599   : > { %v8518_v22 = vpop.permute.xlu1 %3276  ;;  %v8520_v8 = vpop.permute.xlu0 %3274 }
 0x59a   : > { %11055 = vst [vmem:[#allocation304_spill] sm:$0xff] %v8518_v22  ;;  %11056 = vst [vmem:[#allocation305_spill] sm:$0xff] %v8520_v8  ;;  %v5941_v22 = vld [vmem:[%s10694_s0 + $0xc18] sm:$0xff] }
 0x59b   : > { %6238 = vrot.lane.b32.xlu1 %v6232_v38, %s6336_s28  ;;  %3694 = vperm.xlu0 %6190, %v5937_v42   ;;  %v5940_v42 = vld [vmem:[%s10694_s0 + $0xc10] sm:$0xff]  ;;  %v5943_v38 = vld [vmem:[%s10694_s0 + $0xc28] sm:$0xff] }
 0x59d   : > { %v8529_v11 = vpop.permute.xlu1 %3280  ;;  %v8534_v8 = vpop.permute.xlu0 %3278 }
 0x59e   : > { %11057 = vst [vmem:[#allocation306_spill] sm:$0xff] %v8529_v11  ;;  %11058 = vst [vmem:[#allocation307_spill] sm:$0xff] %v8534_v8  ;;  %v5945_v8 = vld [vmem:[%s10694_s0 + $0xc38] sm:$0xff] }
 0x59f   : > { %3759 = vperm.xlu1 %6191, %v5939_v16   ;;  %3754 = vperm.xlu0 %6190, %v5938_v48   ;;  %v5942_v16 = vld [vmem:[%s10694_s0 + $0xc20] sm:$0xff] }
 0x5a1   : > { %v8545_v48 = vpop.permute.xlu1 %3284  ;;  %v8547_v11 = vpop.permute.xlu0 %3282 }
 0x5a2   : > { %11059 = vst [vmem:[#allocation308_spill] sm:$0xff] %v8545_v48  ;;  %11060 = vst [vmem:[#allocation309_spill] sm:$0xff] %v8547_v11  ;;  %v5947_v48 = vld [vmem:[%s10694_s0 + $0xc48] sm:$0xff] }
 0x5a3   : > { %3769 = vperm.xlu1 %6191, %v5941_v22   ;;  %3764 = vperm.xlu0 %6190, %v5940_v42   ;;  %v5944_v22 = vld [vmem:[%s10694_s0 + $0xc30] sm:$0xff] }
 0x5a5   : > { %v8555_v42 = vpop.permute.xlu1 %3288  ;;  %v8560_v21 = vpop.permute.xlu0 %3286 }
 0x5a6   : > { %11061 = vst [vmem:[#allocation310_spill] sm:$0xff] %v8555_v42  ;;  %11062 = vst [vmem:[#allocation311_spill] sm:$0xff] %v8560_v21  ;;  %v5951_v21 = vld [vmem:[%s10694_s0 + $0xc68] sm:$0xff] }
 0x5a7   : > { %3779 = vperm.xlu1 %6191, %v5943_v38   ;;  %3774 = vperm.xlu0 %6190, %v5942_v16   ;;  %v5946_v38 = vld [vmem:[%s10694_s0 + $0xc40] sm:$0xff]  ;;  %v5949_v16 = vld [vmem:[%s10694_s0 + $0xc58] sm:$0xff] }
 0x5a9   : > { %v8573_v42 = vpop.permute.xlu0 %3290 }
 0x5aa   : > { %11064 = vst [vmem:[#allocation313_spill] sm:$0xff] %v8573_v42  ;;  %v5953_v42 = vld [vmem:[%s10694_s0 + $0xc78] sm:$0xff] }
 0x5ab   : > { %3789 = vperm.xlu1 %6191, %v5945_v8   ;;  %3784 = vperm.xlu0 %6190, %v5944_v22   ;;  %v5948_v8 = vld [vmem:[%s10694_s0 + $0xc50] sm:$0xff]  ;;  %v8571_v22 = vpop.permute.xlu1 %3292 }
 0x5ac   : > { %11063 = vst [vmem:[#allocation312_spill] sm:$0xff] %v8571_v22 }
 0x5af   : > { %3799 = vperm.xlu1 %6191, %v5947_v48   ;;  %3794 = vperm.xlu0 %6190, %v5946_v38   ;;  %v5950_v48 = vld [vmem:[%s10694_s0 + $0xc60] sm:$0xff] }
 0x5b3   : > { %3809 = vperm.xlu1 %6191, %v5949_v16   ;;  %3804 = vperm.xlu0 %6190, %v5948_v8   ;;  %v5952_v16 = vld [vmem:[%s10694_s0 + $0xc70] sm:$0xff] }
 0x5b6   : > { %v8581_v38 = vpop.permute.xlu1 %3350  ;;  %v8583_v11 = vpop.permute.xlu0 %3345 }
 0x5b7   : > { %11065 = vst [vmem:[#allocation314_spill] sm:$0xff] %v8581_v38  ;;  %11066 = vst [vmem:[#allocation315_spill] sm:$0xff] %v8583_v11  ;;  %3819 = vperm.xlu1 %6191, %v5951_v21   ;;  %3814 = vperm.xlu0 %6190, %v5950_v48   ;;  %v5955_v11 = vld [vmem:[%s10694_s0 + $0xc88] sm:$0xff]  ;;  %v5954_v21 = vld [vmem:[%s10694_s0 + $0xc80] sm:$0xff]  ;;  %v11081_v38 = vunpack.c.l.bf16 %v8424_v29 }
 0x5b9   : > { %v3835_v37 = vrot.slane %v11081_v38, 2 }
 0x5ba   : > { %v8591_v8 = vpop.permute.xlu1 %3360  ;;  %v8593_v22 = vpop.permute.xlu0 %3355 }
 0x5bb   : > { %11067 = vst [vmem:[#allocation316_spill] sm:$0xff] %v8591_v8  ;;  %11068 = vst [vmem:[#allocation317_spill] sm:$0xff] %v8593_v22  ;;  %3829 = vperm.xlu1 %6191, %v5953_v42   ;;  %3824 = vperm.xlu0 %6190, %v5952_v16   ;;  %v5957_v22 = vld [vmem:[%s10694_s0 + $0xc98] sm:$0xff]  ;;  %v5956_v42 = vld [vmem:[%s10694_s0 + $0xc90] sm:$0xff] }
 0x5be   : > { %v8601_v48 = vpop.permute.xlu1 %3370  ;;  %v8603_v5 = vpop.permute.xlu0 %3365 }
 0x5bf   : > { %11069 = vst [vmem:[#allocation318_spill] sm:$0xff] %v8601_v48  ;;  %11070 = vst [vmem:[#allocation319_spill] sm:$0xff] %v8603_v5  ;;  %3895 = vperm.xlu1 %6191, %v5955_v11   ;;  %3890 = vperm.xlu0 %6190, %v5954_v21   ;;  %v5959_v5 = vld [vmem:[%s10694_s0 + $0xca8] sm:$0xff]  ;;  %v5958_v11 = vld [vmem:[%s10694_s0 + $0xca0] sm:$0xff] }
 0x5c2   : > { %v8611_v16 = vpop.permute.xlu1 %3380  ;;  %v8613_v8 = vpop.permute.xlu0 %3375 }
 0x5c3   : > { %11071 = vst [vmem:[#allocation320_spill] sm:$0xff] %v8611_v16  ;;  %11072 = vst [vmem:[#allocation321_spill] sm:$0xff] %v8613_v8  ;;  %3905 = vperm.xlu1 %6191, %v5957_v22   ;;  %3900 = vperm.xlu0 %6190, %v5956_v42   ;;  %v5961_v8 = vld [vmem:[%s10694_s0 + $0xcb8] sm:$0xff]  ;;  %v5960_v22 = vld [vmem:[%s10694_s0 + $0xcb0] sm:$0xff] }
 0x5c6   : > { %v8621_v21 = vpop.permute.xlu1 %3390  ;;  %v8623_v48 = vpop.permute.xlu0 %3385 }
 0x5c7   : > { %11073 = vst [vmem:[#allocation322_spill] sm:$0xff] %v8621_v21  ;;  %11074 = vst [vmem:[#allocation323_spill] sm:$0xff] %v8623_v48  ;;  %3915 = vperm.xlu1 %6191, %v5959_v5   ;;  %3910 = vperm.xlu0 %6190, %v5958_v11   ;;  %v5963_v48 = vld [vmem:[%s10694_s0 + $0xcc8] sm:$0xff]  ;;  %v5962_v5 = vld [vmem:[%s10694_s0 + $0xcc0] sm:$0xff] }
 0x5ca   : > { %v8631_v42 = vpop.permute.xlu1 %3400  ;;  %v8633_v16 = vpop.permute.xlu0 %3395 }
 0x5cb   : > { %11075 = vst [vmem:[#allocation324_spill] sm:$0xff] %v8631_v42  ;;  %11076 = vst [vmem:[#allocation325_spill] sm:$0xff] %v8633_v16  ;;  %3925 = vperm.xlu1 %6191, %v5961_v8   ;;  %3920 = vperm.xlu0 %6190, %v5960_v22   ;;  %v5965_v16 = vld [vmem:[%s10694_s0 + $0xcd8] sm:$0xff]  ;;  %v5964_v8 = vld [vmem:[%s10694_s0 + $0xcd0] sm:$0xff] }
 0x5ce   : > { %v8641_v11 = vpop.permute.xlu1 %3410  ;;  %v8643_v21 = vpop.permute.xlu0 %3405 }
 0x5cf   : > { %11077 = vst [vmem:[#allocation326_spill] sm:$0xff] %v8641_v11  ;;  %11078 = vst [vmem:[#allocation327_spill] sm:$0xff] %v8643_v21  ;;  %3935 = vperm.xlu1 %6191, %v5963_v48   ;;  %3930 = vperm.xlu0 %6190, %v5962_v5   ;;  %v5967_v21 = vld [vmem:[%s10694_s0 + $0xce8] sm:$0xff]  ;;  %v5966_v48 = vld [vmem:[%s10694_s0 + $0xce0] sm:$0xff]  ;;  %v3832_v5 = vrot.slane %v8199_v45, 2  ;;  %v3833_v11 = vrot.slane %v8197_v41, 2 }
 0x5d1   : > { %v8676_v45 = vsel %vm1171_vm1, %v3832_v5, %v3833_v11  ;;  %v8679_v29 = vsel %vm1171_vm1, %v3833_v11, %v3835_v37  ;;  %v5972_v37 = vld [vmem:[%s10694_s0 + $0xd10] sm:$0xff]  ;;  %v5971_v11 = vld [vmem:[%s10694_s0 + $0xd08] sm:$0xff] }
 0x5d2   : > { %v8651_v22 = vpop.permute.xlu1 %3420  ;;  %v8653_v42 = vpop.permute.xlu0 %3415  ;;  %11084 = vst [vmem:[#allocation332_spill] sm:$0xff] %v8676_v45  ;;  %11085 = vst [vmem:[#allocation333_spill] sm:$0xff] %v8679_v29 }
 0x5d3   : > { %11079 = vst [vmem:[#allocation328_spill] sm:$0xff] %v8651_v22  ;;  %11080 = vst [vmem:[#allocation329_spill] sm:$0xff] %v8653_v42  ;;  %3945 = vperm.xlu1 %6191, %v5965_v16   ;;  %3940 = vperm.xlu0 %6190, %v5964_v8   ;;  %v5969_v16 = vld [vmem:[%s10694_s0 + $0xcf8] sm:$0xff]  ;;  %v5968_v8 = vld [vmem:[%s10694_s0 + $0xcf0] sm:$0xff] }
 0x5d6   : > { %v8665_v22 = vpop.permute.xlu1 %3489  ;;  %v8667_v42 = vpop.permute.xlu0 %3484 }
 0x5d7   : > { %11082 = vst [vmem:[#allocation330_spill] sm:$0xff] %v8665_v22  ;;  %11083 = vst [vmem:[#allocation331_spill] sm:$0xff] %v8667_v42  ;;  %3955 = vperm.xlu1 %6191, %v5967_v21   ;;  %3950 = vperm.xlu0 %6190, %v5966_v48   ;;  %v5970_v21 = vld [vmem:[%s10694_s0 + $0xd00] sm:$0xff]  ;;  %v6242_v48 = vpack.i.bf16 %v8679_v29, %v8676_v45  ;;  %v5973_v45 = vld [vmem:[%s10694_s0 + $0xd18] sm:$0xff] }
 0x5da   : > { %v8681_v38 = vpop.permute.xlu1 %3499  ;;  %v8683_v22 = vpop.permute.xlu0 %3494 }
 0x5db   : > { %11086 = vst [vmem:[#allocation334_spill] sm:$0xff] %v8681_v38  ;;  %11087 = vst [vmem:[#allocation335_spill] sm:$0xff] %v8683_v22  ;;  %3965 = vperm.xlu1 %6191, %v5969_v16   ;;  %3960 = vperm.xlu0 %6190, %v5968_v8   ;;  %v5987_v22 = vld [vmem:[%s10694_s0 + $0xd88] sm:$0xff] }
 0x5de   : > { %v8690_v42 = vpop.permute.xlu1 %3509  ;;  %v8692_v5 = vpop.permute.xlu0 %3504 }
 0x5df   : > { %11088 = vst [vmem:[#allocation336_spill] sm:$0xff] %v8690_v42  ;;  %11089 = vst [vmem:[#allocation337_spill] sm:$0xff] %v8692_v5  ;;  %4025 = vperm.xlu1 %6191, %v5970_v21   ;;  %6243 = vrot.lane.b32.xlu0 %v6242_v48, %s6335_s27  ;;  %v5974_v21 = vld [vmem:[%s10694_s0 + $0xd20] sm:$0xff] }
 0x5e2   : > { %v8701_v16 = vpop.permute.xlu1 %3519  ;;  %v8703_v8 = vpop.permute.xlu0 %3514 }
 0x5e3   : > { %11090 = vst [vmem:[#allocation338_spill] sm:$0xff] %v8701_v16  ;;  %11091 = vst [vmem:[#allocation339_spill] sm:$0xff] %v8703_v8  ;;  %4035 = vperm.xlu1 %6191, %v5972_v37   ;;  %4030 = vperm.xlu0 %6190, %v5971_v11   ;;  %v5976_v8 = vld [vmem:[%s10694_s0 + $0xd30] sm:$0xff]  ;;  %v5975_v37 = vld [vmem:[%s10694_s0 + $0xd28] sm:$0xff] }
 0x5e6   : > { %v8711_v29 = vpop.permute.xlu1 %3529  ;;  %v8713_v5 = vpop.permute.xlu0 %3524 }
 0x5e7   : > { %11092 = vst [vmem:[#allocation340_spill] sm:$0xff] %v8711_v29  ;;  %11093 = vst [vmem:[#allocation341_spill] sm:$0xff] %v8713_v5  ;;  %4045 = vperm.xlu1 %6191, %v5974_v21   ;;  %4040 = vperm.xlu0 %6190, %v5973_v45   ;;  %v5978_v5 = vld [vmem:[%s10694_s0 + $0xd40] sm:$0xff]  ;;  %v5977_v45 = vld [vmem:[%s10694_s0 + $0xd38] sm:$0xff] }
 0x5ea   : > { %v8721_v11 = vpop.permute.xlu1 %3539  ;;  %v8723_v16 = vpop.permute.xlu0 %3534 }
 0x5eb   : > { %11094 = vst [vmem:[#allocation342_spill] sm:$0xff] %v8721_v11  ;;  %11095 = vst [vmem:[#allocation343_spill] sm:$0xff] %v8723_v16  ;;  %4055 = vperm.xlu1 %6191, %v5976_v8   ;;  %4050 = vperm.xlu0 %6190, %v5975_v37   ;;  %v5980_v16 = vld [vmem:[%s10694_s0 + $0xd50] sm:$0xff]  ;;  %v5979_v8 = vld [vmem:[%s10694_s0 + $0xd48] sm:$0xff] }
 0x5ee   : > { %v8731_v21 = vpop.permute.xlu1 %3549  ;;  %v8733_v29 = vpop.permute.xlu0 %3544 }
 0x5ef   : > { %11096 = vst [vmem:[#allocation344_spill] sm:$0xff] %v8731_v21  ;;  %11097 = vst [vmem:[#allocation345_spill] sm:$0xff] %v8733_v29  ;;  %4065 = vperm.xlu1 %6191, %v5978_v5   ;;  %4060 = vperm.xlu0 %6190, %v5977_v45   ;;  %v5982_v29 = vld [vmem:[%s10694_s0 + $0xd60] sm:$0xff]  ;;  %v5981_v5 = vld [vmem:[%s10694_s0 + $0xd58] sm:$0xff] }
 0x5f2   : > { %v8741_v37 = vpop.permute.xlu1 %3559  ;;  %v8743_v11 = vpop.permute.xlu0 %3554 }
 0x5f3   : > { %11098 = vst [vmem:[#allocation346_spill] sm:$0xff] %v8741_v37  ;;  %11099 = vst [vmem:[#allocation347_spill] sm:$0xff] %v8743_v11  ;;  %4075 = vperm.xlu1 %6191, %v5980_v16   ;;  %4070 = vperm.xlu0 %6190, %v5979_v8   ;;  %v5984_v11 = vld [vmem:[%s10694_s0 + $0xd70] sm:$0xff]  ;;  %v5983_v16 = vld [vmem:[%s10694_s0 + $0xd68] sm:$0xff] }
 0x5f6   : > { %v8751_v45 = vpop.permute.xlu1 %3619  ;;  %v8753_v21 = vpop.permute.xlu0 %6233 }
 0x5f7   : > { %11100 = vst [vmem:[#allocation348_spill] sm:$0xff] %v8751_v45  ;;  %11101 = vst [vmem:[#allocation349_spill] sm:$0xff] %v8753_v21  ;;  %4085 = vperm.xlu1 %6191, %v5982_v29   ;;  %4080 = vperm.xlu0 %6190, %v5981_v5   ;;  %v5985_v45 = vld [vmem:[%s10694_s0 + $0xd78] sm:$0xff] }
 0x5fa   : > { %v8761_v8 = vpop.permute.xlu1 %3629  ;;  %v8763_v42 = vpop.permute.xlu0 %3624 }
 0x5fb   : > { %11102 = vst [vmem:[#allocation350_spill] sm:$0xff] %v8761_v8  ;;  %11103 = vst [vmem:[#allocation351_spill] sm:$0xff] %v8763_v42  ;;  %4095 = vperm.xlu1 %6191, %v5984_v11   ;;  %4090 = vperm.xlu0 %6190, %v5983_v16   ;;  %v5986_v11 = vld [vmem:[%s10694_s0 + $0xd80] sm:$0xff] }
 0x5fe   : > { %v8768_v29 = vpop.permute.xlu1 %3639  ;;  %v8770_v5 = vpop.permute.xlu0 %3634 }
 0x5ff   : > { %11104 = vst [vmem:[#allocation352_spill] sm:$0xff] %v8768_v29  ;;  %11105 = vst [vmem:[#allocation353_spill] sm:$0xff] %v8770_v5  ;;  %6248 = vrot.lane.b32.xlu1 %v6242_v48, %s6336_s28  ;;  %4100 = vperm.xlu0 %6190, %v5985_v45   ;;  %v5989_v29 = vld [vmem:[%s10694_s0 + $0xd98] sm:$0xff]  ;;  %v5988_v48 = vld [vmem:[%s10694_s0 + $0xd90] sm:$0xff] }
 0x600   : > { %v6001_v5 = vld [vmem:[%s10694_s0 + $0xdf8] sm:$0xff] }
 0x602   : > { %v8779_v16 = vpop.permute.xlu1 %3649  ;;  %v8781_v42 = vpop.permute.xlu0 %3644 }
 0x603   : > { %11106 = vst [vmem:[#allocation354_spill] sm:$0xff] %v8779_v16  ;;  %11107 = vst [vmem:[#allocation355_spill] sm:$0xff] %v8781_v42  ;;  %4165 = vperm.xlu1 %6191, %v5987_v22   ;;  %4160 = vperm.xlu0 %6190, %v5986_v11   ;;  %v5991_v16 = vld [vmem:[%s10694_s0 + $0xda8] sm:$0xff]  ;;  %v5990_v22 = vld [vmem:[%s10694_s0 + $0xda0] sm:$0xff] }
 0x606   : > { %v8789_v45 = vpop.permute.xlu1 %3659  ;;  %v8791_v8 = vpop.permute.xlu0 %3654 }
 0x607   : > { %11108 = vst [vmem:[#allocation356_spill] sm:$0xff] %v8789_v45  ;;  %11109 = vst [vmem:[#allocation357_spill] sm:$0xff] %v8791_v8  ;;  %4175 = vperm.xlu1 %6191, %v5989_v29   ;;  %4170 = vperm.xlu0 %6190, %v5988_v48   ;;  %v5993_v45 = vld [vmem:[%s10694_s0 + $0xdb8] sm:$0xff]  ;;  %v5992_v29 = vld [vmem:[%s10694_s0 + $0xdb0] sm:$0xff] }
 0x60a   : > { %v8799_v11 = vpop.permute.xlu1 %3669  ;;  %v8801_v42 = vpop.permute.xlu0 %3664 }
 0x60b   : > { %11110 = vst [vmem:[#allocation358_spill] sm:$0xff] %v8799_v11  ;;  %11111 = vst [vmem:[#allocation359_spill] sm:$0xff] %v8801_v42  ;;  %4185 = vperm.xlu1 %6191, %v5991_v16   ;;  %4180 = vperm.xlu0 %6190, %v5990_v22   ;;  %v5995_v11 = vld [vmem:[%s10694_s0 + $0xdc8] sm:$0xff]  ;;  %v5994_v16 = vld [vmem:[%s10694_s0 + $0xdc0] sm:$0xff] }
 0x60e   : > { %v8809_v48 = vpop.permute.xlu1 %3679  ;;  %v8811_v8 = vpop.permute.xlu0 %3674 }
 0x60f   : > { %11112 = vst [vmem:[#allocation360_spill] sm:$0xff] %v8809_v48  ;;  %11113 = vst [vmem:[#allocation361_spill] sm:$0xff] %v8811_v8  ;;  %4195 = vperm.xlu1 %6191, %v5993_v45   ;;  %4190 = vperm.xlu0 %6190, %v5992_v29   ;;  %v5997_v48 = vld [vmem:[%s10694_s0 + $0xdd8] sm:$0xff]  ;;  %v5996_v45 = vld [vmem:[%s10694_s0 + $0xdd0] sm:$0xff] }
 0x612   : > { %v8819_v22 = vpop.permute.xlu1 %3689  ;;  %v8821_v42 = vpop.permute.xlu0 %3684 }
 0x613   : > { %11114 = vst [vmem:[#allocation362_spill] sm:$0xff] %v8819_v22  ;;  %11115 = vst [vmem:[#allocation363_spill] sm:$0xff] %v8821_v42  ;;  %4205 = vperm.xlu1 %6191, %v5995_v11   ;;  %4200 = vperm.xlu0 %6190, %v5994_v16   ;;  %v5999_v22 = vld [vmem:[%s10694_s0 + $0xde8] sm:$0xff]  ;;  %v5998_v11 = vld [vmem:[%s10694_s0 + $0xde0] sm:$0xff] }
 0x616   : > { %v8829_v29 = vpop.permute.xlu1 %6238  ;;  %v8831_v8 = vpop.permute.xlu0 %3694 }
 0x617   : > { %11116 = vst [vmem:[#allocation364_spill] sm:$0xff] %v8829_v29  ;;  %11117 = vst [vmem:[#allocation365_spill] sm:$0xff] %v8831_v8  ;;  %4215 = vperm.xlu1 %6191, %v5997_v48   ;;  %4210 = vperm.xlu0 %6190, %v5996_v45   ;;  %v6000_v48 = vld [vmem:[%s10694_s0 + $0xdf0] sm:$0xff] }
 0x61a   : > { %v8839_v16 = vpop.permute.xlu1 %3759  ;;  %v8841_v42 = vpop.permute.xlu0 %3754 }
 0x61b   : > { %11118 = vst [vmem:[#allocation366_spill] sm:$0xff] %v8839_v16  ;;  %11119 = vst [vmem:[#allocation367_spill] sm:$0xff] %v8841_v42  ;;  %4225 = vperm.xlu1 %6191, %v5999_v22   ;;  %4220 = vperm.xlu0 %6190, %v5998_v11   ;;  %v6003_v42 = vld [vmem:[%s10694_s0 + $0xe08] sm:$0xff]  ;;  %v6002_v22 = vld [vmem:[%s10694_s0 + $0xe00] sm:$0xff] }
 0x61e   : > { %v8849_v45 = vpop.permute.xlu1 %3769  ;;  %v8851_v8 = vpop.permute.xlu0 %3764 }
 0x61f   : > { %11120 = vst [vmem:[#allocation368_spill] sm:$0xff] %v8849_v45  ;;  %11121 = vst [vmem:[#allocation369_spill] sm:$0xff] %v8851_v8  ;;  %4235 = vperm.xlu1 %6191, %v6001_v5   ;;  %4230 = vperm.xlu0 %6190, %v6000_v48   ;;  %v6005_v8 = vld [vmem:[%s10694_s0 + $0xe18] sm:$0xff]  ;;  %v6004_v5 = vld [vmem:[%s10694_s0 + $0xe10] sm:$0xff] }
 0x622   : > { %v8859_v11 = vpop.permute.xlu1 %3779  ;;  %v8861_v16 = vpop.permute.xlu0 %3774 }
 0x623   : > { %11122 = vst [vmem:[#allocation370_spill] sm:$0xff] %v8859_v11  ;;  %11123 = vst [vmem:[#allocation371_spill] sm:$0xff] %v8861_v16  ;;  %4294 = vperm.xlu1 %6191, %v6003_v42   ;;  %4289 = vperm.xlu0 %6190, %v6002_v22   ;;  %v6007_v16 = vld [vmem:[%s10694_s0 + $0xe28] sm:$0xff]  ;;  %v6006_v42 = vld [vmem:[%s10694_s0 + $0xe20] sm:$0xff] }
 0x626   : > { %v8869_v48 = vpop.permute.xlu1 %3789  ;;  %v8871_v45 = vpop.permute.xlu0 %3784 }
 0x627   : > { %11124 = vst [vmem:[#allocation372_spill] sm:$0xff] %v8869_v48  ;;  %11125 = vst [vmem:[#allocation373_spill] sm:$0xff] %v8871_v45  ;;  %4304 = vperm.xlu1 %6191, %v6005_v8   ;;  %4299 = vperm.xlu0 %6190, %v6004_v5   ;;  %v6009_v45 = vld [vmem:[%s10694_s0 + $0xe38] sm:$0xff]  ;;  %v6008_v8 = vld [vmem:[%s10694_s0 + $0xe30] sm:$0xff] }
 0x62a   : > { %v8879_v22 = vpop.permute.xlu1 %3799  ;;  %v8881_v11 = vpop.permute.xlu0 %3794 }
 0x62b   : > { %11126 = vst [vmem:[#allocation374_spill] sm:$0xff] %v8879_v22  ;;  %11127 = vst [vmem:[#allocation375_spill] sm:$0xff] %v8881_v11  ;;  %4314 = vperm.xlu1 %6191, %v6007_v16   ;;  %4309 = vperm.xlu0 %6190, %v6006_v42   ;;  %v6011_v11 = vld [vmem:[%s10694_s0 + $0xe48] sm:$0xff]  ;;  %v6010_v16 = vld [vmem:[%s10694_s0 + $0xe40] sm:$0xff] }
 0x62e   : > { %v8889_v5 = vpop.permute.xlu1 %3809  ;;  %v8891_v48 = vpop.permute.xlu0 %3804 }
 0x62f   : > { %11128 = vst [vmem:[#allocation376_spill] sm:$0xff] %v8889_v5  ;;  %11129 = vst [vmem:[#allocation377_spill] sm:$0xff] %v8891_v48  ;;  %4324 = vperm.xlu1 %6191, %v6009_v45   ;;  %4319 = vperm.xlu0 %6190, %v6008_v8   ;;  %v6013_v48 = vld [vmem:[%s10694_s0 + $0xe58] sm:$0xff]  ;;  %v6012_v45 = vld [vmem:[%s10694_s0 + $0xe50] sm:$0xff] }
 0x632   : > { %v8899_v42 = vpop.permute.xlu1 %3819  ;;  %v8901_v22 = vpop.permute.xlu0 %3814 }
 0x633   : > { %11130 = vst [vmem:[#allocation378_spill] sm:$0xff] %v8899_v42  ;;  %11131 = vst [vmem:[#allocation379_spill] sm:$0xff] %v8901_v22  ;;  %4334 = vperm.xlu1 %6191, %v6011_v11   ;;  %4329 = vperm.xlu0 %6190, %v6010_v16   ;;  %v6015_v22 = vld [vmem:[%s10694_s0 + $0xe68] sm:$0xff]  ;;  %v6014_v11 = vld [vmem:[%s10694_s0 + $0xe60] sm:$0xff] }
 0x636   : > { %v8909_v8 = vpop.permute.xlu1 %3829  ;;  %v8911_v5 = vpop.permute.xlu0 %3824 }
 0x637   : > { %11132 = vst [vmem:[#allocation380_spill] sm:$0xff] %v8909_v8  ;;  %11133 = vst [vmem:[#allocation381_spill] sm:$0xff] %v8911_v5  ;;  %4344 = vperm.xlu1 %6191, %v6013_v48   ;;  %4339 = vperm.xlu0 %6190, %v6012_v45   ;;  %v6017_v5 = vld [vmem:[%s10694_s0 + $0xe78] sm:$0xff]  ;;  %v6016_v48 = vld [vmem:[%s10694_s0 + $0xe70] sm:$0xff] }
 0x63a   : > { %v8919_v16 = vpop.permute.xlu1 %3895  ;;  %v8921_v42 = vpop.permute.xlu0 %3890 }
 0x63b   : > { %11134 = vst [vmem:[#allocation382_spill] sm:$0xff] %v8919_v16  ;;  %11135 = vst [vmem:[#allocation383_spill] sm:$0xff] %v8921_v42  ;;  %4354 = vperm.xlu1 %6191, %v6015_v22   ;;  %4349 = vperm.xlu0 %6190, %v6014_v11  }
 0x63e   : > { %v8929_v45 = vpop.permute.xlu1 %3905  ;;  %v8931_v8 = vpop.permute.xlu0 %3900 }
 0x63f   : > { %11136 = vst [vmem:[#allocation384_spill] sm:$0xff] %v8929_v45  ;;  %11137 = vst [vmem:[#allocation385_spill] sm:$0xff] %v8931_v8  ;;  %4364 = vperm.xlu1 %6191, %v6017_v5   ;;  %4359 = vperm.xlu0 %6190, %v6016_v48  }
 0x642   : > { %v8933_v29 = vpop.permute.xlu1 %3915  ;;  %v8935_v16 = vpop.permute.xlu0 %3910 }
 0x643   : > { %11138 = vst [vmem:[#allocation386_spill] sm:$0xff] %v8933_v29  ;;  %11139 = vst [vmem:[#allocation387_spill] sm:$0xff] %v8935_v16 }
 0x646   : > { %v8937_v22 = vpop.permute.xlu1 %3925  ;;  %v8939_v11 = vpop.permute.xlu0 %3920 }
 0x647   : > { %11140 = vst [vmem:[#allocation388_spill] sm:$0xff] %v8937_v22  ;;  %11141 = vst [vmem:[#allocation389_spill] sm:$0xff] %v8939_v11 }
 0x64a   : > { %v8941_v42 = vpop.permute.xlu1 %3935  ;;  %v8943_v38 = vpop.permute.xlu0 %3930 }
 0x64b   : > { %11142 = vst [vmem:[#allocation390_spill] sm:$0xff] %v8941_v42  ;;  %11143 = vst [vmem:[#allocation391_spill] sm:$0xff] %v8943_v38 }
 0x64e   : > { %v8945_v37 = vpop.permute.xlu1 %3945  ;;  %v8947_v21 = vpop.permute.xlu0 %3940 }
 0x64f   : > { %11144 = vst [vmem:[#allocation392_spill] sm:$0xff] %v8945_v37  ;;  %11145 = vst [vmem:[#allocation393_spill] sm:$0xff] %v8947_v21 }
 0x652   : > { %v8949_v45 = vpop.permute.xlu1 %3955  ;;  %v8951_v5 = vpop.permute.xlu0 %3950 }
 0x653   : > { %11146 = vst [vmem:[#allocation394_spill] sm:$0xff] %v8949_v45  ;;  %11147 = vst [vmem:[#allocation395_spill] sm:$0xff] %v8951_v5 }
 0x656   : > { %v8953_v48 = vpop.permute.xlu1 %3965  ;;  %v8955_v29 = vpop.permute.xlu0 %3960 }
 0x657   : > { %11148 = vst [vmem:[#allocation396_spill] sm:$0xff] %v8953_v48  ;;  %11149 = vst [vmem:[#allocation397_spill] sm:$0xff] %v8955_v29 }
 0x65a   : > { %v8957_v16 = vpop.permute.xlu1 %4025  ;;  %v8959_v22 = vpop.permute.xlu0 %6243 }
 0x65b   : > { %11150 = vst [vmem:[#allocation398_spill] sm:$0xff] %v8957_v16  ;;  %11151 = vst [vmem:[#allocation399_spill] sm:$0xff] %v8959_v22 }
 0x65e   : > { %v8961_v11 = vpop.permute.xlu1 %4035  ;;  %v8963_v42 = vpop.permute.xlu0 %4030 }
 0x65f   : > { %11152 = vst [vmem:[#allocation400_spill] sm:$0xff] %v8961_v11  ;;  %11153 = vst [vmem:[#allocation401_spill] sm:$0xff] %v8963_v42 }
 0x662   : > { %v8965_v38 = vpop.permute.xlu1 %4045  ;;  %v8967_v37 = vpop.permute.xlu0 %4040 }
 0x663   : > { %11154 = vst [vmem:[#allocation402_spill] sm:$0xff] %v8965_v38  ;;  %11155 = vst [vmem:[#allocation403_spill] sm:$0xff] %v8967_v37 }
 0x666   : > { %v8969_v21 = vpop.permute.xlu1 %4055  ;;  %v8971_v45 = vpop.permute.xlu0 %4050 }
 0x667   : > { %11156 = vst [vmem:[#allocation404_spill] sm:$0xff] %v8969_v21  ;;  %11157 = vst [vmem:[#allocation405_spill] sm:$0xff] %v8971_v45 }
 0x66a   : > { %v8973_v5 = vpop.permute.xlu1 %4065  ;;  %v8975_v8 = vpop.permute.xlu0 %4060 }
 0x66b   : > { %11158 = vst [vmem:[#allocation406_spill] sm:$0xff] %v8973_v5  ;;  %11159 = vst [vmem:[#allocation407_spill] sm:$0xff] %v8975_v8 }
 0x66e   : > { %v8977_v29 = vpop.permute.xlu1 %4075  ;;  %v8979_v16 = vpop.permute.xlu0 %4070 }
 0x66f   : > { %11160 = vst [vmem:[#allocation408_spill] sm:$0xff] %v8977_v29  ;;  %11161 = vst [vmem:[#allocation409_spill] sm:$0xff] %v8979_v16 }
 0x672   : > { %v8981_v48 = vpop.permute.xlu1 %4085  ;;  %v8983_v11 = vpop.permute.xlu0 %4080 }
 0x673   : > { %11162 = vst [vmem:[#allocation410_spill] sm:$0xff] %v8981_v48  ;;  %11163 = vst [vmem:[#allocation411_spill] sm:$0xff] %v8983_v11 }
 0x676   : > { %v8985_v42 = vpop.permute.xlu1 %4095  ;;  %v8987_v38 = vpop.permute.xlu0 %4090 }
 0x677   : > { %11164 = vst [vmem:[#allocation412_spill] sm:$0xff] %v8985_v42  ;;  %11165 = vst [vmem:[#allocation413_spill] sm:$0xff] %v8987_v38 }
 0x67a   : > { %v8989_v37 = vpop.permute.xlu1 %6248  ;;  %v8991_v21 = vpop.permute.xlu0 %4100 }
 0x67b   : > { %11166 = vst [vmem:[#allocation414_spill] sm:$0xff] %v8989_v37  ;;  %11167 = vst [vmem:[#allocation415_spill] sm:$0xff] %v8991_v21 }
 0x67e   : > { %v8993_v5 = vpop.permute.xlu1 %4165  ;;  %v8995_v8 = vpop.permute.xlu0 %4160 }
 0x67f   : > { %11168 = vst [vmem:[#allocation416_spill] sm:$0xff] %v8993_v5  ;;  %11169 = vst [vmem:[#allocation417_spill] sm:$0xff] %v8995_v8 }
 0x682   : > { %v8997_v29 = vpop.permute.xlu1 %4175  ;;  %v8999_v16 = vpop.permute.xlu0 %4170 }
 0x683   : > { %11170 = vst [vmem:[#allocation418_spill] sm:$0xff] %v8997_v29  ;;  %11171 = vst [vmem:[#allocation419_spill] sm:$0xff] %v8999_v16  ;;  %v152_v16 = vld [vmem:[%s6580_s26 + $0x24] sm:$0xff]  }
 0x686   : > { %v9001_v48 = vpop.permute.xlu1 %4185  ;;  %v9003_v11 = vpop.permute.xlu0 %4180 }
 0x687   : > { %11172 = vst [vmem:[#allocation420_spill] sm:$0xff] %v9001_v48  ;;  %11173 = vst [vmem:[#allocation421_spill] sm:$0xff] %v9003_v11 }
 0x68a   : > { %v9005_v42 = vpop.permute.xlu1 %4195  ;;  %v9007_v38 = vpop.permute.xlu0 %4190 }
 0x68b   : > { %11174 = vst [vmem:[#allocation422_spill] sm:$0xff] %v9005_v42  ;;  %11175 = vst [vmem:[#allocation423_spill] sm:$0xff] %v9007_v38  ;;  %v9026_v42 = vunpack.c.h.bf16 %v152_v16  ;;  %v9028_v38 = vunpack.c.l.bf16 %v152_v16 }
 0x68e   : > { %v9009_v45 = vpop.permute.xlu1 %4205  ;;  %v9011_v37 = vpop.permute.xlu0 %4200 }
 0x68f   : > { %11176 = vst [vmem:[#allocation424_spill] sm:$0xff] %v9009_v45  ;;  %11177 = vst [vmem:[#allocation425_spill] sm:$0xff] %v9011_v37 }
 0x692   : > { %v9013_v21 = vpop.permute.xlu1 %4215  ;;  %v9015_v5 = vpop.permute.xlu0 %4210 }
 0x693   : > { %11178 = vst [vmem:[#allocation426_spill] sm:$0xff] %v9013_v21  ;;  %11179 = vst [vmem:[#allocation427_spill] sm:$0xff] %v9015_v5 }
 0x696   : > { %v9017_v8 = vpop.permute.xlu1 %4225  ;;  %v9019_v29 = vpop.permute.xlu0 %4220 }
 0x697   : > { %11180 = vst [vmem:[#allocation428_spill] sm:$0xff] %v9017_v8  ;;  %11181 = vst [vmem:[#allocation429_spill] sm:$0xff] %v9019_v29 }
 0x69a   : > { %v9022_v48 = vpop.permute.xlu1 %4235  ;;  %v9024_v11 = vpop.permute.xlu0 %4230 }
 0x69b   : > { %11182 = vst [vmem:[#allocation430_spill] sm:$0xff] %v9022_v48  ;;  %11183 = vst [vmem:[#allocation431_spill] sm:$0xff] %v9024_v11 }
 0x69e   : > { %v4295_v45 = vpop.permute.xlu1 %4294  ;;  %v4290_v22 = vpop.permute.xlu0 %4289 }
 0x69f   : > { %v4368_v37 = vmul.f32 %v4295_v45, %v9026_v42  ;;  %v4367_v21 = vmul.f32 %v4290_v22, %v9028_v38 }
 0x6a1   : > { %4401 = vrot.lane.b32.xlu1 %v4368_v37, %s6335_s27  ;;  %4399 = vrot.lane.b32.xlu0 %v4367_v21, %s6335_s27 }
 0x6a2   : > { %v4305_v29 = vpop.permute.xlu1 %4304  ;;  %v4300_v48 = vpop.permute.xlu0 %4299 }
 0x6a3   : > { %v4370_v8 = vmul.f32 %v4305_v29, %v9026_v42  ;;  %v4369_v11 = vmul.f32 %v4300_v48, %v9028_v38 }
 0x6a5   : > { %4405 = vrot.lane.b32.xlu1 %v4370_v8, %s6335_s27  ;;  %4403 = vrot.lane.b32.xlu0 %v4369_v11, %s6335_s27 }
 0x6a6   : > { %v4315_v16 = vpop.permute.xlu1 %4314  ;;  %v4310_v5 = vpop.permute.xlu0 %4309 }
 0x6a7   : > { %v4372_v45 = vmul.f32 %v4315_v16, %v9026_v42  ;;  %v4371_v22 = vmul.f32 %v4310_v5, %v9028_v38 }
 0x6a9   : > { %4409 = vrot.lane.b32.xlu1 %v4372_v45, %s6335_s27  ;;  %4407 = vrot.lane.b32.xlu0 %v4371_v22, %s6335_s27 }
 0x6aa   : > { %v4325_v21 = vpop.permute.xlu1 %4324  ;;  %v4320_v29 = vpop.permute.xlu0 %4319 }
 0x6ab   : > { %v4374_v37 = vmul.f32 %v4325_v21, %v9026_v42  ;;  %v4373_v48 = vmul.f32 %v4320_v29, %v9028_v38 }
 0x6ad   : > { %4413 = vrot.lane.b32.xlu1 %v4374_v37, %s6335_s27  ;;  %4411 = vrot.lane.b32.xlu0 %v4373_v48, %s6335_s27 }
 0x6ae   : > { %v4335_v8 = vpop.permute.xlu1 %4334  ;;  %v4330_v16 = vpop.permute.xlu0 %4329 }
 0x6af   : > { %v4376_v11 = vmul.f32 %v4335_v8, %v9026_v42  ;;  %v4375_v5 = vmul.f32 %v4330_v16, %v9028_v38 }
 0x6b1   : > { %4417 = vrot.lane.b32.xlu1 %v4376_v11, %s6335_s27  ;;  %4415 = vrot.lane.b32.xlu0 %v4375_v5, %s6335_s27 }
 0x6b2   : > { %v4345_v45 = vpop.permute.xlu1 %4344  ;;  %v4340_v21 = vpop.permute.xlu0 %4339 }
 0x6b3   : > { %v4378_v22 = vmul.f32 %v4345_v45, %v9026_v42  ;;  %v4377_v29 = vmul.f32 %v4340_v21, %v9028_v38 }
 0x6b5   : > { %4421 = vrot.lane.b32.xlu1 %v4378_v22, %s6335_s27  ;;  %4419 = vrot.lane.b32.xlu0 %v4377_v29, %s6335_s27  ;;  %v6019_v22 = vld [vmem:[%s10694_s0 + $0xe88] sm:$0xff]  ;;  %v6018_v29 = vld [vmem:[%s10694_s0 + $0xe80] sm:$0xff] }
 0x6b6   : > { %v4355_v37 = vpop.permute.xlu1 %4354  ;;  %v4350_v8 = vpop.permute.xlu0 %4349 }
 0x6b7   : > { %v4380_v48 = vmul.f32 %v4355_v37, %v9026_v42  ;;  %v4379_v16 = vmul.f32 %v4350_v8, %v9028_v38  ;;  %v6021_v37 = vld [vmem:[%s10694_s0 + $0xe98] sm:$0xff]  ;;  %v6023_v8 = vld [vmem:[%s10694_s0 + $0xea8] sm:$0xff] }
 0x6b9   : > { %4425 = vrot.lane.b32.xlu1 %v4380_v48, %s6335_s27  ;;  %4423 = vrot.lane.b32.xlu0 %v4379_v16, %s6335_s27  ;;  %v6020_v48 = vld [vmem:[%s10694_s0 + $0xe90] sm:$0xff]  ;;  %v6022_v16 = vld [vmem:[%s10694_s0 + $0xea0] sm:$0xff] }
 0x6ba   : > { %v4365_v11 = vpop.permute.xlu1 %4364  ;;  %v4360_v45 = vpop.permute.xlu0 %4359 }
 0x6bb   : > { %v4382_v5 = vmul.f32 %v4365_v11, %v9026_v42  ;;  %v4381_v21 = vmul.f32 %v4360_v45, %v9028_v38  ;;  %v6025_v11 = vld [vmem:[%s10694_s0 + $0xeb8] sm:$0xff]  ;;  %v6027_v45 = vld [vmem:[%s10694_s0 + $0xec8] sm:$0xff] }
 0x6bd   : > { %4429 = vrot.lane.b32.xlu1 %v4382_v5, %s6335_s27  ;;  %4427 = vrot.lane.b32.xlu0 %v4381_v21, %s6335_s27  ;;  %v6024_v5 = vld [vmem:[%s10694_s0 + $0xeb0] sm:$0xff]  ;;  %v6026_v21 = vld [vmem:[%s10694_s0 + $0xec0] sm:$0xff] }
 0x6c1   : > { %4487 = vperm.xlu1 %6191, %v6019_v22   ;;  %4482 = vperm.xlu0 %6190, %v6018_v29   ;;  %v6029_v22 = vld [vmem:[%s10694_s0 + $0xed8] sm:$0xff]  ;;  %v6028_v29 = vld [vmem:[%s10694_s0 + $0xed0] sm:$0xff] }
 0x6c5   : > { %4497 = vperm.xlu1 %6191, %v6021_v37   ;;  %4492 = vperm.xlu0 %6190, %v6020_v48   ;;  %v6031_v37 = vld [vmem:[%s10694_s0 + $0xee8] sm:$0xff]  ;;  %v6030_v48 = vld [vmem:[%s10694_s0 + $0xee0] sm:$0xff] }
 0x6c9   : > { %4507 = vperm.xlu1 %6191, %v6023_v8   ;;  %4502 = vperm.xlu0 %6190, %v6022_v16   ;;  %v6033_v8 = vld [vmem:[%s10694_s0 + $0xef8] sm:$0xff]  ;;  %v6032_v16 = vld [vmem:[%s10694_s0 + $0xef0] sm:$0xff] }
 0x6cd   : > { %4517 = vperm.xlu1 %6191, %v6025_v11   ;;  %4512 = vperm.xlu0 %6190, %v6024_v5  }
 0x6d1   : > { %4527 = vperm.xlu1 %6191, %v6027_v45   ;;  %4522 = vperm.xlu0 %6190, %v6026_v21  }
 0x6d5   : > { %4537 = vperm.xlu1 %6191, %v6029_v22   ;;  %4532 = vperm.xlu0 %6190, %v6028_v29  }
 0x6d9   : > { %4547 = vperm.xlu1 %6191, %v6031_v37   ;;  %4542 = vperm.xlu0 %6190, %v6030_v48  }
 0x6dd   : > { %4557 = vperm.xlu1 %6191, %v6033_v8   ;;  %4552 = vperm.xlu0 %6190, %v6032_v16  }
 0x713   : > { %v9110_v11 = vpop.permute.xlu1 %4401  ;;  %v9112_v5 = vpop.permute.xlu0 %4399 }
 0x714   : > { %11184 = vst [vmem:[#allocation432_spill] sm:$0xff] %v9110_v11  ;;  %11185 = vst [vmem:[#allocation433_spill] sm:$0xff] %v9112_v5 }
 0x717   : > { %v9114_v45 = vpop.permute.xlu1 %4405  ;;  %v9116_v21 = vpop.permute.xlu0 %4403 }
 0x718   : > { %11186 = vst [vmem:[#allocation434_spill] sm:$0xff] %v9114_v45  ;;  %11187 = vst [vmem:[#allocation435_spill] sm:$0xff] %v9116_v21 }
 0x71b   : > { %v9118_v22 = vpop.permute.xlu1 %4409  ;;  %v9120_v29 = vpop.permute.xlu0 %4407 }
 0x71c   : > { %11188 = vst [vmem:[#allocation436_spill] sm:$0xff] %v9118_v22  ;;  %11189 = vst [vmem:[#allocation437_spill] sm:$0xff] %v9120_v29 }
 0x71f   : > { %v9122_v37 = vpop.permute.xlu1 %4413  ;;  %v9124_v48 = vpop.permute.xlu0 %4411 }
 0x720   : > { %11190 = vst [vmem:[#allocation438_spill] sm:$0xff] %v9122_v37  ;;  %11191 = vst [vmem:[#allocation439_spill] sm:$0xff] %v9124_v48 }
 0x723   : > { %v9126_v41 = vpop.permute.xlu1 %4417  ;;  %v9128_v8 = vpop.permute.xlu0 %4415 }
 0x724   : > { %11192 = vst [vmem:[#allocation440_spill] sm:$0xff] %v9126_v41  ;;  %11193 = vst [vmem:[#allocation441_spill] sm:$0xff] %v9128_v8 }
 0x727   : > { %v9130_v16 = vpop.permute.xlu1 %4421  ;;  %v9132_v11 = vpop.permute.xlu0 %4419 }
 0x728   : > { %11194 = vst [vmem:[#allocation442_spill] sm:$0xff] %v9130_v16  ;;  %11195 = vst [vmem:[#allocation443_spill] sm:$0xff] %v9132_v11 }
 0x72b   : > { %v9134_v5 = vpop.permute.xlu1 %4425  ;;  %v9136_v45 = vpop.permute.xlu0 %4423 }
 0x72c   : > { %11196 = vst [vmem:[#allocation444_spill] sm:$0xff] %v9134_v5  ;;  %11197 = vst [vmem:[#allocation445_spill] sm:$0xff] %v9136_v45 }
 0x72f   : > { %v9138_v21 = vpop.permute.xlu1 %4429  ;;  %v9140_v22 = vpop.permute.xlu0 %4427 }
 0x730   : > { %11198 = vst [vmem:[#allocation446_spill] sm:$0xff] %v9138_v21  ;;  %11199 = vst [vmem:[#allocation447_spill] sm:$0xff] %v9140_v22  ;;  %v264_v22 = vmul.f32 %v6587_v2, %v6547_v49 }
 0x73c   : > { %v4488_v29 = vpop.permute.xlu1 %4487  ;;  %v4483_v48 = vpop.permute.xlu0 %4482 }
 0x73d   : > { %v4561_v37 = vmul.f32 %v4488_v29, %v9026_v42  ;;  %v4560_v41 = vmul.f32 %v4483_v48, %v9028_v38  ;;  %v262_v29 = vmul.f32 %v6587_v2, %v6549_v50  ;;  %v265_v48 = vmul.f32 %v6589_v3, %v6551_v51 }
 0x73e   : > { %v269_v50 = vmul.f32 %v6589_v3, %v6559_v55  ;;  %v268_v51 = vmul.f32 %v6587_v2, %v6561_v56  ;;  %v275_v55 = vmul.f32 %v6589_v3, %v6573_v61  ;;  %v274_v56 = vmul.f32 %v6587_v2, %v6575_v62 }
 0x73f   : > { %4594 = vrot.lane.b32.xlu1 %v4561_v37, %s6336_s28  ;;  %4592 = vrot.lane.b32.xlu0 %v4560_v41, %s6336_s28  ;;  %v263_v37 = vmul.f32 %v6589_v3, %v6553_v52  ;;  %v458_v61 = vadd.f32 %v6757_v13, %v265_v48 }
 0x740   : > { %v4498_v16 = vpop.permute.xlu1 %4497  ;;  %v4493_v5 = vpop.permute.xlu0 %4492 }
 0x741   : > { %v4563_v11 = vmul.f32 %v4498_v16, %v9026_v42  ;;  %v4562_v45 = vmul.f32 %v4493_v5, %v9028_v38  ;;  %v267_v5 = vmul.f32 %v6589_v3, %v6555_v53  ;;  %v270_v53 = vmul.f32 %v6587_v2, %v6566_v58 }
 0x742   : > { %v276_v58 = vmul.f32 %v6587_v2, %v6585_v1  ;;  %v462_v1 = vadd.f32 %v6782_v23, %v269_v50 }
 0x743   : > { %4598 = vrot.lane.b32.xlu1 %v4563_v11, %s6336_s28  ;;  %4596 = vrot.lane.b32.xlu0 %v4562_v45, %s6336_s28  ;;  %v266_v11 = vmul.f32 %v6587_v2, %v6557_v54  ;;  %v271_v45 = vmul.f32 %v6589_v3, %v6564_v57  ;;  %v273_v54 = vmul.f32 %v6589_v3, %v6569_v59 }
 0x744   : > { %v4508_v41 = vpop.permute.xlu1 %4507  ;;  %v4503_v16 = vpop.permute.xlu0 %4502  ;;  %v277_v57 = vmul.f32 %v6589_v3, %v6583_v0  ;;  %v460_v8 = vadd.f32 %v6773_v19, %v267_v5  ;;  %v461_v3 = vadd.f32 %v6784_v24, %v268_v51  ;;  %v468_v19 = vadd.f32 %v6813_v35, %v275_v55  ;;  %v11201_v5 = vld [vmem:[#allocation6_spill] sm:$0xff] }
 0x745   : > { %v4565_v49 = vmul.f32 %v4508_v41, %v9026_v42  ;;  %v4564_v52 = vmul.f32 %v4503_v16, %v9028_v38  ;;  %v272_v41 = vmul.f32 %v6587_v2, %v6571_v60  ;;  %v456_v16 = vadd.f32 %v6743_v6, %v263_v37 }
 0x746   : > { %v455_v60 = vadd.f32 %v6745_v7, %v262_v29  ;;  %v459_v0 = vadd.f32 %v6775_v20, %v266_v11  ;;  %v464_v6 = vadd.f32 %v6793_v27, %v271_v45  ;;  %v463_v7 = vadd.f32 %v6795_v28, %v270_v53  ;;  %v11202_v11 = vld [vmem:[#allocation7_spill] sm:$0xff]  ;;  %v11204_v45 = vld [vmem:[#allocation8_spill] sm:$0xff]  ;;  %v11205_v53 = vld [vmem:[#allocation9_spill] sm:$0xff] }
 0x747   : > { %4602 = vrot.lane.b32.xlu1 %v4565_v49, %s6336_s28  ;;  %4600 = vrot.lane.b32.xlu0 %v4564_v52, %s6336_s28  ;;  %v457_v49 = vadd.f32 %v6759_v14, %v264_v22  ;;  %v466_v13 = vadd.f32 %v6803_v31, %v273_v54  ;;  %v465_v14 = vadd.f32 %v6805_v32, %v272_v41 }
 0x748   : > { %v4518_v59 = vpop.permute.xlu1 %4517  ;;  %v4513_v62 = vpop.permute.xlu0 %4512  ;;  %v467_v20 = vadd.f32 %v6815_v36, %v274_v56  ;;  %v470_v23 = vadd.f32 %v6823_v39, %v277_v57  ;;  %v469_v24 = vadd.f32 %v6825_v40, %v276_v58  ;;  %v649_v27 = vadd.f32 %v6833_v43, %v456_v16  ;;  %v11206_v56 = vld [vmem:[#allocation11_spill] sm:$0xff]  ;;  %v11207_v58 = vld [vmem:[#allocation12_spill] sm:$0xff] }
 0x749   : > { %v4567_v21 = vmul.f32 %v4518_v59, %v9026_v42  ;;  %v4566_v2 = vmul.f32 %v4513_v62, %v9028_v38  ;;  %v648_v28 = vadd.f32 %v6835_v44, %v455_v60  ;;  %v651_v32 = vadd.f32 %v6843_v47, %v458_v61  ;;  %v11208_v60 = vld [vmem:[#allocation13_spill] sm:$0xff] }
 0x74a   : > { %v650_v35 = vadd.f32 %v6845_v63, %v457_v49  ;;  %v653_v36 = vadd.f32 %v6853_v9, %v460_v8  ;;  %v652_v29 = vadd.f32 %v6855_v10, %v459_v0  ;;  %v655_v48 = vadd.f32 %v6860_v12, %v462_v1  ;;  %v11209_v49 = vld [vmem:[#allocation14_spill] sm:$0xff]  ;;  %v11210_v0 = vld [vmem:[#allocation41_spill] sm:$0xff] }
 0x74b   : > { %4606 = vrot.lane.b32.xlu1 %v4567_v21, %s6336_s28  ;;  %4604 = vrot.lane.b32.xlu0 %v4566_v2, %s6336_s28  ;;  %v773_v40 = vmul.f32 %v6771_v18, %v6923_v30  ;;  %v772_v43 = vmul.f32 %v6768_v17, %v6925_v33  ;;  %v654_v44 = vadd.f32 %v6862_v15, %v461_v3  ;;  %v11200_v33 = vld [vmem:[#allocation5_spill] sm:$0xff]  ;;  %v6196_v1 = vunpack.i.h.bf16 %v11210_v0 }
 0x74c   : > { %v4528_v22 = vpop.permute.xlu1 %4527  ;;  %v4523_v21 = vpop.permute.xlu0 %4522  ;;  %v657_v47 = vadd.f32 %v6871_v25, %v464_v6  ;;  %v775_v63 = vmul.f32 %v6771_v18, %v6933_v46  ;;  %v774_v9 = vmul.f32 %v6768_v17, %v6935_v4  ;;  %v656_v12 = vadd.f32 %v6873_v26, %v463_v7  ;;  %v11203_v46 = vld [vmem:[#allocation10_spill] sm:$0xff]  ;;  %v11211_v7 = vld [vmem:[#allocation15_spill] sm:$0xff] }
 0x74d   : > { %v4569_v31 = vmul.f32 %v4528_v22, %v9026_v42  ;;  %v4568_v39 = vmul.f32 %v4523_v21, %v9028_v38  ;;  %v659_v30 = vadd.f32 %v6887_v34, %v466_v13  ;;  %v658_v8 = vadd.f32 %v11200_v33, %v465_v14  ;;  %v11213_v22 = vld [vmem:[#allocation17_spill] sm:$0xff]  ;;  %v11218_v33 = vld [vmem:[#allocation38_spill] sm:$0xff] }
 0x74e   : > { %v661_v25 = vadd.f32 %v11201_v5, %v468_v19  ;;  %v660_v50 = vadd.f32 %v11202_v11, %v467_v20  ;;  %v777_v51 = vmul.f32 %v6771_v18, %v11203_v46  ;;  %v663_v52 = vadd.f32 %v11204_v45, %v470_v23  ;;  %v11212_v20 = vld [vmem:[#allocation16_spill] sm:$0xff]  ;;  %v11219_v11 = vld [vmem:[#allocation22_spill] sm:$0xff] }
 0x74f   : > { %4610 = vrot.lane.b32.xlu1 %v4569_v31, %s6336_s28  ;;  %4608 = vrot.lane.b32.xlu0 %v4568_v39, %s6336_s28  ;;  %v662_v26 = vadd.f32 %v11205_v53, %v469_v24  ;;  %v789_v54 = vadd.f32 %v773_v40, %v649_v27  ;;  %v788_v34 = vadd.f32 %v772_v43, %v648_v28  ;;  %v6195_v14 = vunpack.i.l.bf16 %v11210_v0  ;;  %v11214_v27 = vld [vmem:[#allocation18_spill] sm:$0xff]  ;;  %v11215_v31 = vld [vmem:[#allocation20_spill] sm:$0xff]  ;;  %v11217_v40 = vld [vmem:[#allocation21_spill] sm:$0xff] }
 0x750   : > { %v4538_v10 = vpop.permute.xlu1 %4537  ;;  %v4533_v15 = vpop.permute.xlu0 %4532  ;;  %v9239_v41 = vadd.f32 %v775_v63, %v651_v32  ;;  %v9241_v55 = vadd.f32 %v774_v9, %v650_v35  ;;  %v776_v57 = vmul.f32 %v6768_v17, %v11206_v56  ;;  %v779_v16 = vmul.f32 %v6771_v18, %v11207_v58  ;;  %v11221_v56 = vld [vmem:[#allocation26_spill] sm:$0xff]  ;;  %v11222_v58 = vld [vmem:[#allocation27_spill] sm:$0xff] }
 0x751   : > { %v4571_v37 = vmul.f32 %v4538_v10, %v9026_v42  ;;  %v4570_v4 = vmul.f32 %v4533_v15, %v9028_v38  ;;  %v778_v61 = vmul.f32 %v6768_v17, %v11208_v60  ;;  %v781_v62 = vmul.f32 %v6771_v18, %v11209_v49  ;;  %v11223_v60 = vld [vmem:[#allocation28_spill] sm:$0xff] }
 0x752   : > { %v793_v6 = vadd.f32 %v777_v51, %v653_v36  ;;  %v780_v13 = vmul.f32 %v6768_v17, %v11211_v7  ;;  %v783_v23 = vmul.f32 %v6771_v18, %v11212_v20  ;;  %v782_v24 = vmul.f32 %v6768_v17, %v11213_v22  ;;  %v11216_v36 = vld [vmem:[#allocation19_spill] sm:$0xff]  ;;  %v11229_v20 = vld [vmem:[#allocation33_spill] sm:$0xff]  ;;  %v11230_v22 = vld [vmem:[#allocation34_spill] sm:$0xff] }
 0x753   : > { %4614 = vrot.lane.b32.xlu1 %v4571_v37, %s6336_s28  ;;  %4612 = vrot.lane.b32.xlu0 %v4570_v4, %s6336_s28  ;;  %v785_v28 = vmul.f32 %v6771_v18, %v11214_v27  ;;  %v787_v21 = vmul.f32 %v6771_v18, %v11215_v31  ;;  %v792_v32 = vadd.f32 %v776_v57, %v652_v29  ;;  %v11231_v27 = vld [vmem:[#allocation35_spill] sm:$0xff]  ;;  %v11232_v31 = vld [vmem:[#allocation36_spill] sm:$0xff] }
 0x754   : > { %v4548_v59 = vpop.permute.xlu1 %4547  ;;  %v4543_v3 = vpop.permute.xlu0 %4542  ;;  %v795_v35 = vadd.f32 %v779_v16, %v655_v48  ;;  %v784_v39 = vmul.f32 %v6768_v17, %v11216_v36  ;;  %v786_v43 = vmul.f32 %v6768_v17, %v11217_v40  ;;  %v794_v9 = vadd.f32 %v778_v61, %v654_v44  ;;  %v11220_v48 = vld [vmem:[#allocation23_spill] sm:$0xff]  ;;  %v11233_v36 = vld [vmem:[#allocation37_spill] sm:$0xff]  ;;  %v6037_v40 = vld [vmem:[%s10694_s0 + $0xf18] sm:$0xff] }
 0x755   : > { %v4573_v2 = vmul.f32 %v4548_v59, %v9026_v42  ;;  %v4572_v19 = vmul.f32 %v4543_v3, %v9028_v38  ;;  %v797_v10 = vadd.f32 %v781_v62, %v657_v47  ;;  %v922_v37 = vmul.f32 %v6196_v1, %v11218_v33 }
 0x756   : > { %v796_v5 = vadd.f32 %v780_v13, %v656_v12  ;;  %v908_v29 = vmul.f32 %v6196_v1, %v11219_v11  ;;  %v907_v46 = vmul.f32 %v6195_v14, %v11220_v48  ;;  %v799_v4 = vadd.f32 %v783_v23, %v659_v30  ;;  %v6035_v12 = vld [vmem:[%s10694_s0 + $0xf08] sm:$0xff]  ;;  %v11228_v13 = vld [vmem:[#allocation32_spill] sm:$0xff]  ;;  %v11236_v11 = vld [vmem:[#allocation43_spill] sm:$0xff] }
 0x757   : > { %4618 = vrot.lane.b32.xlu1 %v4573_v2, %s6336_s28  ;;  %4616 = vrot.lane.b32.xlu0 %v4572_v19, %s6336_s28  ;;  %v798_v45 = vadd.f32 %v782_v24, %v658_v8  ;;  %v801_v17 = vadd.f32 %v785_v28, %v661_v25  ;;  %v803_v53 = vadd.f32 %v787_v21, %v663_v52  ;;  %v11224_v8 = vld [vmem:[#allocation29_spill] sm:$0xff]  ;;  %v11225_v52 = vld [vmem:[#allocation30_spill] sm:$0xff]  ;;  %v11227_v2 = vld [vmem:[#allocation31_spill] sm:$0xff] }
 0x758   : > { %v4558_v63 = vpop.permute.xlu1 %4557  ;;  %v4553_v18 = vpop.permute.xlu0 %4552  ;;  %v800_v44 = vadd.f32 %v784_v39, %v660_v50  ;;  %v802_v47 = vadd.f32 %v786_v43, %v662_v26  ;;  %v910_v57 = vmul.f32 %v6196_v1, %v11221_v56  ;;  %v909_v16 = vmul.f32 %v6195_v14, %v11222_v58  ;;  %v6034_v50 = vld [vmem:[%s10694_s0 + $0xf00] sm:$0xff]  ;;  %v11226_v26 = vld [vmem:[#allocation56_spill] sm:$0xff]  ;;  %v6039_v58 = vld [vmem:[%s10694_s0 + $0xf28] sm:$0xff] }
 0x759   : > { %v4575_v15 = vmul.f32 %v4558_v63, %v9026_v42  ;;  %v4574_v51 = vmul.f32 %v4553_v18, %v9028_v38  ;;  %v938_v59 = vadd.f32 %v922_v37, %v803_v53  ;;  %v912_v30 = vmul.f32 %v6196_v1, %v11223_v60  ;;  %v11240_v60 = vld [vmem:[#allocation47_spill] sm:$0xff] }
 0x75a   : > { %v911_v25 = vmul.f32 %v6195_v14, %v11224_v8  ;;  %v914_v61 = vmul.f32 %v6196_v1, %v11225_v52  ;;  %v6201_v49 = vunpack.i.h.bf16 %v11226_v26  ;;  %v924_v62 = vadd.f32 %v908_v29, %v789_v54  ;;  %v11234_v54 = vld [vmem:[#allocation39_spill] sm:$0xff] }
 0x75b   : > { %4622 = vrot.lane.b32.xlu1 %v4575_v15, %s6336_s28  ;;  %4620 = vrot.lane.b32.xlu0 %v4574_v51, %s6336_s28  ;;  %v923_v0 = vadd.f32 %v907_v46, %v788_v34  ;;  %v913_v3 = vmul.f32 %v6195_v14, %v11227_v2  ;;  %v9293_v7 = vunpack.i.l.bf16 %v11226_v26  ;;  %v916_v19 = vmul.f32 %v6196_v1, %v11228_v13  ;;  %v6036_v15 = vld [vmem:[%s10694_s0 + $0xf10] sm:$0xff]  ;;  %v11237_v46 = vld [vmem:[#allocation40_spill] sm:$0xff] }
 0x75c   : > { %v915_v23 = vmul.f32 %v6195_v14, %v11229_v20  ;;  %v918_v24 = vmul.f32 %v6196_v1, %v11230_v22  ;;  %v917_v28 = vmul.f32 %v6195_v14, %v11231_v27  ;;  %v920_v21 = vmul.f32 %v6196_v1, %v11232_v31  ;;  %v11235_v1 = vld [vmem:[#allocation57_spill] sm:$0xff]  ;;  %v11246_v26 = vld [vmem:[#allocation24_spill] sm:$0xff] }
 0x75d   : > { %v919_v39 = vmul.f32 %v6195_v14, %v11233_v36  ;;  %v921_v34 = vmul.f32 %v6195_v14, %v11234_v54  ;;  %v926_v43 = vadd.f32 %v910_v57, %v9239_v41  ;;  %v925_v63 = vadd.f32 %v909_v16, %v9241_v55  ;;  %v11238_v16 = vld [vmem:[#allocation45_spill] sm:$0xff]  ;;  %v6041_v31 = vld [vmem:[%s10694_s0 + $0xf38] sm:$0xff] }
 0x75e   : > { %v928_v33 = vadd.f32 %v912_v30, %v793_v6  ;;  %v927_v37 = vadd.f32 %v911_v25, %v792_v32  ;;  %v1057_v18 = vmul.f32 %v6201_v49, %v11235_v1  ;;  %v1043_v29 = vmul.f32 %v6201_v49, %v11236_v11  ;;  %v11243_v30 = vld [vmem:[#allocation25_spill] sm:$0xff] }
 0x75f   : > { %4680 = vperm.xlu1 %6191, %v6035_v12   ;;  %4675 = vperm.xlu0 %6190, %v6034_v50   ;;  %v930_v14 = vadd.f32 %v914_v61, %v795_v35  ;;  %v929_v48 = vadd.f32 %v913_v3, %v794_v9  ;;  %v1042_v51 = vmul.f32 %v9293_v7, %v11237_v46  ;;  %v11239_v9 = vld [vmem:[#allocation42_spill] sm:$0xff]  ;;  %v11244_v25 = vld [vmem:[#allocation49_spill] sm:$0xff]  ;;  %v11245_v50 = vld [vmem:[#allocation59_spill] sm:$0xff] }
 0x760   : > { %v932_v53 = vadd.f32 %v916_v19, %v797_v10  ;;  %v931_v56 = vadd.f32 %v915_v23, %v796_v5  ;;  %v934_v41 = vadd.f32 %v918_v24, %v799_v4  ;;  %v933_v55 = vadd.f32 %v917_v28, %v798_v45  ;;  %v11241_v5 = vld [vmem:[#allocation44_spill] sm:$0xff]  ;;  %v6038_v45 = vld [vmem:[%s10694_s0 + $0xf20] sm:$0xff]  ;;  %v11247_v3 = vld [vmem:[#allocation46_spill] sm:$0xff] }
 0x761   : > { %v936_v6 = vadd.f32 %v920_v21, %v801_v17  ;;  %v935_v32 = vadd.f32 %v919_v39, %v800_v44  ;;  %v9314_v57 = vadd.f32 %v921_v34, %v802_v47  ;;  %v1045_v35 = vmul.f32 %v6201_v49, %v11238_v16  ;;  %v11242_v47 = vld [vmem:[#allocation58_spill] sm:$0xff]  ;;  %v11248_v19 = vld [vmem:[#allocation51_spill] sm:$0xff]  ;;  %v11249_v23 = vld [vmem:[#allocation60_spill] sm:$0xff] }
 0x762   : > { %v1044_v12 = vmul.f32 %v9293_v7, %v11239_v9  ;;  %v1047_v10 = vmul.f32 %v6201_v49, %v11240_v60  ;;  %v1046_v4 = vmul.f32 %v9293_v7, %v11241_v5  ;;  %v9328_v17 = vadd.f32 %v1057_v18, %v938_v59  ;;  %v11250_v22 = vld [vmem:[#allocation61_spill] sm:$0xff]  ;;  %v11251_v24 = vld [vmem:[#allocation48_spill] sm:$0xff]  ;;  %v11253_v39 = vld [vmem:[#allocation50_spill] sm:$0xff] }
 0x763   : > { %4690 = vperm.xlu1 %6191, %v6037_v40   ;;  %4685 = vperm.xlu0 %6190, %v6036_v15   ;;  %v1059_v44 = vadd.f32 %v1043_v29, %v924_v62  ;;  %v1180_v8 = vmul.f32 %v11243_v30, %v11242_v47  ;;  %v1049_v52 = vmul.f32 %v6201_v49, %v11244_v25  ;;  %v11252_v28 = vld [vmem:[#allocation53_spill] sm:$0xff]  ;;  %v11254_v34 = vld [vmem:[#allocation55_spill] sm:$0xff]  ;;  %v11261_v47 = vld [vmem:[#allocation66_spill] sm:$0xff] }
 0x764   : > { %v1058_v61 = vadd.f32 %v1042_v51, %v923_v0  ;;  %v1179_v2 = vmul.f32 %v11246_v26, %v11245_v50  ;;  %v1048_v13 = vmul.f32 %v9293_v7, %v11247_v3  ;;  %v1051_v20 = vmul.f32 %v6201_v49, %v11248_v19  ;;  %v6040_v15 = vld [vmem:[%s10694_s0 + $0xf30] sm:$0xff] }
 0x765   : > { %v1182_v59 = vmul.f32 %v11243_v30, %v11249_v23  ;;  %v1181_v62 = vmul.f32 %v11246_v26, %v11250_v22  ;;  %v1050_v27 = vmul.f32 %v9293_v7, %v11251_v24  ;;  %v1053_v0 = vmul.f32 %v6201_v49, %v11252_v28  ;;  %v11258_v5 = vld [vmem:[#allocation63_spill] sm:$0xff] }
 0x766   : > { %v1061_v21 = vadd.f32 %v1045_v35, %v926_v43  ;;  %v1060_v36 = vadd.f32 %v1044_v12, %v925_v63  ;;  %v1052_v54 = vmul.f32 %v9293_v7, %v11253_v39  ;;  %v1055_v40 = vmul.f32 %v6201_v49, %v11254_v34  ;;  %v11255_v43 = vld [vmem:[#allocation52_spill] sm:$0xff]  ;;  %v11257_v12 = vld [vmem:[#allocation54_spill] sm:$0xff] }
 0x767   : > { %4700 = vperm.xlu1 %6191, %v6039_v58   ;;  %4695 = vperm.xlu0 %6190, %v6038_v45   ;;  %v9354_v1 = vadd.f32 %v1180_v8, %v1059_v44  ;;  %v1063_v18 = vadd.f32 %v1047_v10, %v928_v33  ;;  %v1062_v11 = vadd.f32 %v1046_v4, %v927_v37  ;;  %v6043_v33 = vld [vmem:[%s10694_s0 + $0xf48] sm:$0xff]  ;;  %v6042_v10 = vld [vmem:[%s10694_s0 + $0xf40] sm:$0xff] }
 0x768   : > { %v1065_v29 = vadd.f32 %v1049_v52, %v930_v14  ;;  %v9356_v46 = vadd.f32 %v1179_v2, %v1058_v61  ;;  %v1064_v51 = vadd.f32 %v1048_v13, %v929_v48  ;;  %v1067_v58 = vadd.f32 %v1051_v20, %v932_v53  ;;  %v11256_v37 = vld [vmem:[#allocation62_spill] sm:$0xff]  ;;  %v11260_v45 = vld [vmem:[#allocation65_spill] sm:$0xff]  ;;  %v11264_v61 = vld [vmem:[#allocation91_spill] sm:$0xff] }
 0x769   : > { %v1054_v63 = vmul.f32 %v9293_v7, %v11255_v43  ;;  %v9360_v16 = vadd.f32 %v1182_v59, %v1061_v21  ;;  %v9362_v49 = vadd.f32 %v1181_v62, %v1060_v36  ;;  %v1066_v35 = vadd.f32 %v1050_v27, %v931_v56  ;;  %v11265_v2 = vld [vmem:[#allocation69_spill] sm:$0xff]  ;;  %v11266_v13 = vld [vmem:[#allocation70_spill] sm:$0xff]  ;;  %v11267_v20 = vld [vmem:[#allocation71_spill] sm:$0xff] }
 0x76a   : > { %v1069_v9 = vadd.f32 %v1053_v0, %v934_v41  ;;  %v1184_v14 = vmul.f32 %v11243_v30, %v11256_v37  ;;  %v1068_v48 = vadd.f32 %v1052_v54, %v933_v55  ;;  %v1071_v53 = vadd.f32 %v1055_v40, %v936_v6  ;;  %v11259_v41 = vld [vmem:[#allocation64_spill] sm:$0xff]  ;;  %v11262_v6 = vld [vmem:[#allocation67_spill] sm:$0xff]  ;;  %v11269_v27 = vld [vmem:[#allocation73_spill] sm:$0xff] }
 0x76b   : > { %4710 = vperm.xlu1 %6191, %v6041_v31   ;;  %4705 = vperm.xlu0 %6190, %v6040_v15   ;;  %v1056_v60 = vmul.f32 %v9293_v7, %v11257_v12  ;;  %v1183_v56 = vmul.f32 %v11246_v26, %v11258_v5  ;;  %v1186_v4 = vmul.f32 %v11243_v30, %v11259_v41  ;;  %v11263_v7 = vld [vmem:[#allocation68_spill] sm:$0xff]  ;;  %v6206_v50 = vunpack.i.h.bf16 %v11264_v61  ;;  %v6044_v31 = vld [vmem:[%s10694_s0 + $0xf50] sm:$0xff]  ;;  %v11274_v37 = vld [vmem:[#allocation77_spill] sm:$0xff] }
 0x76c   : > { %v1185_v44 = vmul.f32 %v11246_v26, %v11260_v45  ;;  %v1188_v55 = vmul.f32 %v11243_v30, %v11261_v47  ;;  %v1187_v8 = vmul.f32 %v11246_v26, %v11262_v6  ;;  %v1190_v25 = vmul.f32 %v11243_v30, %v11263_v7  ;;  %v11268_v59 = vld [vmem:[#allocation72_spill] sm:$0xff]  ;;  %v11279_v47 = vld [vmem:[#allocation81_spill] sm:$0xff]  ;;  %v11280_v6 = vld [vmem:[#allocation82_spill] sm:$0xff] }
 0x76d   : > { %v1070_v52 = vadd.f32 %v1054_v63, %v935_v32  ;;  %v1189_v3 = vmul.f32 %v11246_v26, %v11265_v2  ;;  %v1192_v19 = vmul.f32 %v11243_v30, %v11266_v13  ;;  %v1191_v23 = vmul.f32 %v11246_v26, %v11267_v20  ;;  %v6045_v32 = vld [vmem:[%s10694_s0 + $0xf58] sm:$0xff]  ;;  %v11281_v7 = vld [vmem:[#allocation83_spill] sm:$0xff]  ;;  %v11283_v2 = vld [vmem:[#allocation85_spill] sm:$0xff] }
 0x76e   : > { %v1194_v22 = vmul.f32 %v11243_v30, %v11268_v59  ;;  %v1200_v62 = vadd.f32 %v1184_v14, %v1063_v18  ;;  %v1072_v24 = vadd.f32 %v1056_v60, %v9314_v57  ;;  %v1193_v28 = vmul.f32 %v11246_v26, %v11269_v27  ;;  %v11270_v40 = vld [vmem:[#allocation88_spill] sm:$0xff]  ;;  %v11271_v18 = vld [vmem:[#allocation74_spill] sm:$0xff] }
 0x76f   : > { %4720 = vperm.xlu1 %6191, %v6043_v33   ;;  %4715 = vperm.xlu0 %6190, %v6042_v10   ;;  %v6205_v0 = vunpack.i.l.bf16 %v11264_v61  ;;  %v1199_v21 = vadd.f32 %v1183_v56, %v1062_v11  ;;  %v1202_v36 = vadd.f32 %v1186_v4, %v1065_v29  ;;  %v1201_v30 = vadd.f32 %v1185_v44, %v1064_v51  ;;  %v6047_v11 = vld [vmem:[%s10694_s0 + $0xf68] sm:$0xff]  ;;  %v11272_v51 = vld [vmem:[#allocation75_spill] sm:$0xff]  ;;  %v11278_v56 = vld [vmem:[#allocation80_spill] sm:$0xff] }
 0x770   : > { %v1204_v39 = vadd.f32 %v1188_v55, %v1067_v58  ;;  %v1203_v54 = vadd.f32 %v1187_v8, %v1066_v35  ;;  %v1206_v34 = vadd.f32 %v1190_v25, %v1069_v9  ;;  %v1329_v15 = vmul.f32 %v6206_v50, %v11270_v40  ;;  %v11273_v35 = vld [vmem:[#allocation76_spill] sm:$0xff]  ;;  %v11277_v10 = vld [vmem:[#allocation79_spill] sm:$0xff]  ;;  %v11286_v40 = vld [vmem:[#allocation90_spill] sm:$0xff] }
 0x771   : > { %v1315_v43 = vmul.f32 %v6206_v50, %v11271_v18  ;;  %v1205_v57 = vadd.f32 %v1189_v3, %v1068_v48  ;;  %v1208_v63 = vadd.f32 %v1192_v19, %v1071_v53  ;;  %v1207_v26 = vadd.f32 %v1191_v23, %v1070_v52  ;;  %v6046_v48 = vld [vmem:[%s10694_s0 + $0xf60] sm:$0xff]  ;;  %v11275_v53 = vld [vmem:[#allocation106_spill] sm:$0xff]  ;;  %v11282_v52 = vld [vmem:[#allocation84_spill] sm:$0xff] }
 0x772   : > { %v1210_v33 = vadd.f32 %v1194_v22, %v9328_v17  ;;  %v9411_v29 = vadd.f32 %v1193_v28, %v1072_v24  ;;  %v1314_v58 = vmul.f32 %v6205_v0, %v11272_v51  ;;  %v1317_v9 = vmul.f32 %v6206_v50, %v11273_v35  ;;  %v11276_v17 = vld [vmem:[#allocation78_spill] sm:$0xff]  ;;  %v6049_v13 = vld [vmem:[%s10694_s0 + $0xf78] sm:$0xff]  ;;  %v6048_v22 = vld [vmem:[%s10694_s0 + $0xf70] sm:$0xff] }
 0x773   : > { %4730 = vperm.xlu1 %6191, %v6045_v32   ;;  %4725 = vperm.xlu0 %6190, %v6044_v31   ;;  %v1316_v14 = vmul.f32 %v6205_v0, %v11274_v37  ;;  %v9420_v12 = vunpack.i.h.bf16 %v11275_v53  ;;  %v1319_v60 = vmul.f32 %v6206_v50, %v11276_v17  ;;  %v1318_v5 = vmul.f32 %v6205_v0, %v11277_v10  ;;  %v11284_v23 = vld [vmem:[#allocation86_spill] sm:$0xff]  ;;  %v11285_v32 = vld [vmem:[#allocation93_spill] sm:$0xff]  ;;  %v11287_v18 = vld [vmem:[#allocation87_spill] sm:$0xff] }
 0x774   : > { %v1321_v41 = vmul.f32 %v6206_v50, %v11278_v56  ;;  %v9426_v4 = vunpack.i.l.bf16 %v11275_v53  ;;  %v1345_v45 = vadd.f32 %v1329_v15, %v1210_v33  ;;  %v1331_v44 = vadd.f32 %v1315_v43, %v9354_v1  ;;  %v11288_v43 = vld [vmem:[#allocation89_spill] sm:$0xff]  ;;  %v11291_v35 = vld [vmem:[#allocation92_spill] sm:$0xff]  ;;  %v11295_v53 = vld [vmem:[#allocation94_spill] sm:$0xff] }
 0x775   : > { %v1320_v55 = vmul.f32 %v6205_v0, %v11279_v47  ;;  %v1323_v8 = vmul.f32 %v6206_v50, %v11280_v6  ;;  %v1322_v25 = vmul.f32 %v6205_v0, %v11281_v7  ;;  %v1325_v61 = vmul.f32 %v6206_v50, %v11282_v52  ;;  %v11297_v10 = vld [vmem:[#allocation109_spill] sm:$0xff]  ;;  %v11299_v47 = vld [vmem:[#allocation96_spill] sm:$0xff] }
 0x776   : > { %v1324_v3 = vmul.f32 %v6205_v0, %v11283_v2  ;;  %v1330_v19 = vadd.f32 %v1314_v58, %v9356_v46  ;;  %v1333_v1 = vadd.f32 %v1317_v9, %v9360_v16  ;;  %v1332_v20 = vadd.f32 %v1316_v14, %v9362_v49  ;;  %v11290_v58 = vld [vmem:[#allocation95_spill] sm:$0xff]  ;;  %v11294_v14 = vld [vmem:[#allocation97_spill] sm:$0xff]  ;;  %v6053_v2 = vld [vmem:[%s10694_s0 + $0xf98] sm:$0xff] }
 0x777   : > { %4740 = vperm.xlu1 %6191, %v6047_v11   ;;  %4735 = vperm.xlu0 %6190, %v6046_v48   ;;  %v1327_v59 = vmul.f32 %v6206_v50, %v11284_v23  ;;  %v1450_v24 = vmul.f32 %v9420_v12, %v11285_v32  ;;  %v1335_v27 = vadd.f32 %v1319_v60, %v1200_v62  ;;  %v6051_v62 = vld [vmem:[%s10694_s0 + $0xf88] sm:$0xff]  ;;  %v11296_v60 = vld [vmem:[#allocation125_spill] sm:$0xff]  ;;  %v11304_v23 = vld [vmem:[#allocation111_spill] sm:$0xff] }
 0x778   : > { %v1334_v28 = vadd.f32 %v1318_v5, %v1199_v21  ;;  %v1337_v31 = vadd.f32 %v1321_v41, %v1202_v36  ;;  %v1449_v15 = vmul.f32 %v9426_v4, %v11286_v40  ;;  %v1336_v46 = vadd.f32 %v1320_v55, %v1201_v30  ;;  %v11289_v21 = vld [vmem:[#allocation107_spill] sm:$0xff]  ;;  %v11300_v6 = vld [vmem:[#allocation101_spill] sm:$0xff] }
 0x779   : > { %v1326_v16 = vmul.f32 %v6205_v0, %v11287_v18  ;;  %v1328_v49 = vmul.f32 %v6205_v0, %v11288_v43  ;;  %v1339_v50 = vadd.f32 %v1323_v8, %v1204_v39  ;;  %v1338_v33 = vadd.f32 %v1322_v25, %v1203_v54  ;;  %v6050_v39 = vld [vmem:[%s10694_s0 + $0xf80] sm:$0xff]  ;;  %v11292_v54 = vld [vmem:[#allocation124_spill] sm:$0xff]  ;;  %v11298_v41 = vld [vmem:[#allocation99_spill] sm:$0xff] }
 0x77a   : > { %v1341_v11 = vadd.f32 %v1325_v61, %v1206_v34  ;;  %v9450_v51 = vadd.f32 %v1324_v3, %v1205_v57  ;;  %v1464_v36 = vmul.f32 %v9420_v12, %v11289_v21  ;;  %v1452_v30 = vmul.f32 %v9420_v12, %v11290_v58  ;;  %v11293_v34 = vld [vmem:[#allocation108_spill] sm:$0xff]  ;;  %v11301_v8 = vld [vmem:[#allocation98_spill] sm:$0xff]  ;;  %v11302_v25 = vld [vmem:[#allocation103_spill] sm:$0xff] }
 0x77b   : > { %4750 = vperm.xlu1 %6191, %v6049_v13   ;;  %4745 = vperm.xlu0 %6190, %v6048_v22   ;;  %v1451_v0 = vmul.f32 %v9426_v4, %v11291_v35  ;;  %v1343_v9 = vadd.f32 %v1327_v59, %v1208_v63  ;;  %v1579_v57 = vmul.f32 %v11293_v34, %v11292_v54  ;;  %v11303_v13 = vld [vmem:[#allocation110_spill] sm:$0xff]  ;;  %v6052_v32 = vld [vmem:[%s10694_s0 + $0xf90] sm:$0xff]  ;;  %v11305_v58 = vld [vmem:[#allocation100_spill] sm:$0xff] }
 0x77c   : > { %v1466_v37 = vadd.f32 %v1450_v24, %v1331_v44  ;;  %v1454_v48 = vmul.f32 %v9420_v12, %v11294_v14  ;;  %v1453_v17 = vmul.f32 %v9426_v4, %v11295_v53  ;;  %v1578_v5 = vmul.f32 %v11297_v10, %v11296_v60  ;;  %v11311_v34 = vld [vmem:[#allocation104_spill] sm:$0xff]  ;;  %v11314_v53 = vld [vmem:[#allocation117_spill] sm:$0xff]  ;;  %v11315_v10 = vld [vmem:[#allocation118_spill] sm:$0xff] }
 0x77d   : > { %v1465_v56 = vadd.f32 %v1449_v15, %v1330_v19  ;;  %v1456_v63 = vmul.f32 %v9420_v12, %v11298_v41  ;;  %v1455_v55 = vmul.f32 %v9426_v4, %v11299_v47  ;;  %v1458_v44 = vmul.f32 %v9420_v12, %v11300_v6  ;;  %v11313_v14 = vld [vmem:[#allocation116_spill] sm:$0xff]  ;;  %v11319_v6 = vld [vmem:[#allocation122_spill] sm:$0xff] }
 0x77e   : > { %v1457_v7 = vmul.f32 %v9426_v4, %v11301_v8  ;;  %v1460_v52 = vmul.f32 %v9420_v12, %v11302_v25  ;;  %v1342_v61 = vadd.f32 %v1326_v16, %v1207_v26  ;;  %v1480_v3 = vadd.f32 %v1464_v36, %v1345_v45  ;;  %v6057_v8 = vld [vmem:[%s10694_s0 + $0xfb8] sm:$0xff] }
 0x77f   : > { %4819 = vperm.xlu1 %6191, %v6051_v62   ;;  %4814 = vperm.xlu0 %6190, %v6050_v39   ;;  %v1581_v19 = vmul.f32 %v11303_v13, %v11292_v54  ;;  %v1580_v59 = vmul.f32 %v11304_v23, %v11296_v60  ;;  %v1344_v22 = vadd.f32 %v1328_v49, %v9411_v29  ;;  %v6055_v29 = vld [vmem:[%s10694_s0 + $0xfa8] sm:$0xff] }
 0x780   : > { %v1595_v24 = vadd.f32 %v1579_v57, %v1466_v37  ;;  %v1468_v26 = vadd.f32 %v1452_v30, %v1333_v1  ;;  %v1467_v40 = vadd.f32 %v1451_v0, %v1332_v20  ;;  %v1470_v15 = vadd.f32 %v1454_v48, %v1335_v27  ;;  %v11306_v20 = vld [vmem:[#allocation105_spill] sm:$0xff]  ;;  %v11310_v0 = vld [vmem:[#allocation114_spill] sm:$0xff] }
 0x781   : > { %v1594_v18 = vadd.f32 %v1578_v5, %v1465_v56  ;;  %v1469_v16 = vadd.f32 %v1453_v17, %v1334_v28  ;;  %v1472_v43 = vadd.f32 %v1456_v63, %v1337_v31  ;;  %v1471_v45 = vadd.f32 %v1455_v55, %v1336_v46  ;;  %v11307_v28 = vld [vmem:[#allocation102_spill] sm:$0xff]  ;;  %v6054_v46 = vld [vmem:[%s10694_s0 + $0xfa0] sm:$0xff]  ;;  %v11316_v56 = vld [vmem:[#allocation119_spill] sm:$0xff] }
 0x782   : > { %v1474_v62 = vadd.f32 %v1458_v44, %v1339_v50  ;;  %v1473_v21 = vadd.f32 %v1457_v7, %v1338_v33  ;;  %v1476_v36 = vadd.f32 %v1460_v52, %v1341_v11  ;;  %v1459_v35 = vmul.f32 %v9426_v4, %v11305_v58  ;;  %v11308_v50 = vld [vmem:[#allocation112_spill] sm:$0xff]  ;;  %v11309_v11 = vld [vmem:[#allocation113_spill] sm:$0xff]  ;;  %v11320_v7 = vld [vmem:[#allocation123_spill] sm:$0xff] }
 0x783   : > { %4829 = vperm.xlu1 %6191, %v6053_v2   ;;  %4824 = vperm.xlu0 %6190, %v6052_v32   ;;  %v1597_v49 = vadd.f32 %v1581_v19, %v1468_v26  ;;  %v1596_v1 = vadd.f32 %v1580_v59, %v1467_v40  ;;  %v1462_v27 = vmul.f32 %v9420_v12, %v11306_v20  ;;  %v11312_v12 = vld [vmem:[#allocation115_spill] sm:$0xff]  ;;  %v11317_v63 = vld [vmem:[#allocation120_spill] sm:$0xff] }
 0x784   : > { %v1461_v31 = vmul.f32 %v9426_v4, %v11307_v28  ;;  %v1583_v33 = vmul.f32 %v11308_v50, %v11292_v54  ;;  %v1582_v30 = vmul.f32 %v11309_v11, %v11296_v60  ;;  %v1585_v39 = vmul.f32 %v11310_v0, %v11292_v54  ;;  %v6056_v19 = vld [vmem:[%s10694_s0 + $0xfb0] sm:$0xff]  ;;  %v11327_v50 = vld [vmem:[#allocation132_spill] sm:$0xff]  ;;  %v9552_v11 = vld [vmem:[%s6580_s26 + $0x2c] sm:$0x1] }
 0x785   : > { %v1463_v57 = vmul.f32 %v9426_v4, %v11311_v34  ;;  %v1584_v37 = vmul.f32 %v11312_v12, %v11296_v60  ;;  %v1587_v48 = vmul.f32 %v11313_v14, %v11292_v54  ;;  %v1586_v17 = vmul.f32 %v11314_v53, %v11296_v60  ;;  %v11318_v4 = vld [vmem:[#allocation121_spill] sm:$0xff]  ;;  %v11331_v34 = vld [vmem:[#allocation136_spill] sm:$0xff] }
 0x786   : > { %v1589_v5 = vmul.f32 %v11315_v10, %v11292_v54  ;;  %v1588_v41 = vmul.f32 %v11316_v56, %v11296_v60  ;;  %v1591_v47 = vmul.f32 %v11317_v63, %v11292_v54  ;;  %v1590_v55 = vmul.f32 %v11318_v4, %v11296_v60  ;;  %v11332_v12 = vld [vmem:[#allocation137_spill] sm:$0xff]  ;;  %v11337_v63 = vld [vmem:[#allocation144_spill] sm:$0xff] }
 0x787   : > { %4839 = vperm.xlu1 %6191, %v6055_v29   ;;  %v1593_v44 = vmul.f32 %v11319_v6, %v11292_v54  ;;  %4834 = vperm.xlu0 %6190, %v6054_v46   ;;  %v1592_v25 = vmul.f32 %v11320_v7, %v11296_v60  ;;  %v1475_v52 = vadd.f32 %v1459_v35, %v9450_v51  ;;  %v11336_v56 = vld [vmem:[#allocation141_spill] sm:$0xff]  ;;  %v6060_v6 = vld [vmem:[%s10694_s0 + $0xfd0] sm:$0xff] }
 0x788   : > { %v1478_v2 = vadd.f32 %v1462_v27, %v1343_v9  ;;  %v1477_v13 = vadd.f32 %v1461_v31, %v1342_v61  ;;  %v1599_v23 = vadd.f32 %v1583_v33, %v1470_v15  ;;  %v1598_v59 = vadd.f32 %v1582_v30, %v1469_v16  ;;  %v6059_v9 = vld [vmem:[%s10694_s0 + $0xfc8] sm:$0xff]  ;;  %v11322_v16 = vld [vmem:[#allocation127_spill] sm:$0xff]  ;;  %v11338_v4 = vld [vmem:[#allocation145_spill] sm:$0xff] }
 0x789   : > { %v1601_v32 = vadd.f32 %v1585_v39, %v1472_v43  ;;  %v1479_v54 = vadd.f32 %v1463_v57, %v1344_v22  ;;  %v1600_v26 = vadd.f32 %v1584_v37, %v1471_v45  ;;  %v1603_v40 = vadd.f32 %v1587_v48, %v1474_v62  ;;  %v11321_v61 = vld [vmem:[#allocation126_spill] sm:$0xff]  ;;  %v11323_v22 = vld [vmem:[#allocation128_spill] sm:$0xff]  ;;  %v11326_v31 = vld [vmem:[#allocation131_spill] sm:$0xff] }
 0x78a   : > { %v1602_v58 = vadd.f32 %v1586_v17, %v1473_v21  ;;  %v1605_v29 = vadd.f32 %v1589_v5, %v1476_v36  ;;  %v1604_v20 = vadd.f32 %v1588_v41, %v1475_v52  ;;  %v1607_v60 = vadd.f32 %v1591_v47, %v1478_v2  ;;  %v6058_v21 = vld [vmem:[%s10694_s0 + $0xfc0] sm:$0xff]  ;;  %v11325_v27 = vld [vmem:[#allocation130_spill] sm:$0xff]  ;;  %v11334_v48 = vld [vmem:[#allocation139_spill] sm:$0xff] }
 0x78b   : > { %4849 = vperm.xlu1 %6191, %v6057_v8   ;;  %v1606_v28 = vadd.f32 %v1590_v55, %v1477_v13  ;;  %v1609_v51 = vadd.f32 %v1593_v44, %v1480_v3  ;;  %4844 = vperm.xlu0 %6190, %v6056_v19   ;;  %v1788_v15 = vadd.f32 %v11321_v61, %v1595_v24  ;;  %v11324_v36 = vld [vmem:[#allocation129_spill] sm:$0xff]  ;;  %v11335_v17 = vld [vmem:[#allocation140_spill] sm:$0xff]  ;;  %v10740_v44 = vunpack.c.l.bf16 %v9552_v11  ;;  %v11339_v8 = vld [vmem:[#allocation146_spill] sm:$0xff] }
 0x78c   : > { %v1787_v43 = vadd.f32 %v11322_v16, %v1594_v18  ;;  %v1790_v45 = vadd.f32 %v11323_v22, %v1597_v49  ;;  %v1608_v62 = vadd.f32 %v1592_v25, %v1479_v54  ;;  %v1789_v35 = vadd.f32 %v11324_v36, %v1596_v1  ;;  %v11328_v24 = vld [vmem:[#allocation133_spill] sm:$0xff]  ;;  %v11329_v18 = vld [vmem:[#allocation134_spill] sm:$0xff]  ;;  %v11330_v49 = vld [vmem:[#allocation135_spill] sm:$0xff] }
 0x78d   : > { %v1792_v3 = vadd.f32 %v11325_v27, %v1599_v23  ;;  %v1791_v46 = vadd.f32 %v11326_v31, %v1598_v59  ;;  %v1794_v33 = vadd.f32 %v11327_v50, %v1601_v32  ;;  %v1793_v30 = vadd.f32 %v11328_v24, %v1600_v26  ;;  %v11333_v1 = vld [vmem:[#allocation138_spill] sm:$0xff]  ;;  %v6061_v5 = vld [vmem:[%s10694_s0 + $0xfd8] sm:$0xff]  ;;  %v11340_v25 = vld [vmem:[#allocation147_spill] sm:$0xff] }
 0x78e   : > { %v1796_v0 = vadd.f32 %v11329_v18, %v1603_v40  ;;  %v1795_v39 = vadd.f32 %v11330_v49, %v1602_v58  ;;  %v1798_v57 = vadd.f32 %v11331_v34, %v1605_v29  ;;  %v1797_v37 = vadd.f32 %v11332_v12, %v1604_v20  ;;  %v11341_v2 = vld [vmem:[#allocation148_spill] sm:$0xff]  ;;  %v11342_v19 = vld [vmem:[#allocation149_spill] sm:$0xff]  ;;  %v11343_v59 = vld [vmem:[#allocation150_spill] sm:$0xff] }
 0x78f   : > { %4859 = vperm.xlu1 %6191, %v6059_v9   ;;  %v1800_v14 = vadd.f32 %v11333_v1, %v1607_v60  ;;  %v1799_v53 = vadd.f32 %v11334_v48, %v1606_v28  ;;  %v1802_v10 = vadd.f32 %v11335_v17, %v1609_v51  ;;  %4854 = vperm.xlu0 %6190, %v6058_v21   ;;  %v11344_v54 = vld [vmem:[#allocation160_spill] sm:$0xff]  ;;  %v11345_v26 = vld [vmem:[#allocation143_spill] sm:$0xff]  ;;  %v11346_v58 = vld [vmem:[#allocation161_spill] sm:$0xff]  ;;  %v4756_v27 = vrot.slane %v9028_v38, 1 }
 0x790   : > { %v1801_v41 = vadd.f32 %v11336_v56, %v1608_v62  ;;  %v1981_v47 = vadd.f32 %v11337_v63, %v1788_v15  ;;  %v1980_v55 = vadd.f32 %v11338_v4, %v1787_v43  ;;  %v1983_v7 = vadd.f32 %v11339_v8, %v1790_v45  ;;  %v11347_v29 = vld [vmem:[#allocation142_spill] sm:$0xff]  ;;  %v11349_v51 = vld [vmem:[#allocation151_spill] sm:$0xff]  ;;  %v11350_v61 = vld [vmem:[#allocation152_spill] sm:$0xff] }
 0x791   : > { %v1982_v52 = vadd.f32 %v11340_v25, %v1789_v35  ;;  %v1985_v13 = vadd.f32 %v11341_v2, %v1792_v3  ;;  %v1984_v23 = vadd.f32 %v11342_v19, %v1791_v46  ;;  %v1987_v32 = vadd.f32 %v11343_v59, %v1794_v33  ;;  %v11348_v60 = vld [vmem:[#allocation162_spill] sm:$0xff]  ;;  %v11351_v16 = vld [vmem:[#allocation153_spill] sm:$0xff]  ;;  %v11352_v22 = vld [vmem:[#allocation163_spill] sm:$0xff] }
 0x792   : > { %v2104_v40 = vmul.f32 %v11345_v26, %v11344_v54  ;;  %v2103_v20 = vmul.f32 %v11347_v29, %v11346_v58  ;;  %v2106_v28 = vmul.f32 %v11345_v26, %v11348_v60  ;;  %v1986_v9 = vadd.f32 %v11349_v51, %v1793_v30  ;;  %v6063_v62 = vld [vmem:[%s10694_s0 + $0xfe8] sm:$0xff]  ;;  %v6062_v35 = vld [vmem:[%s10694_s0 + $0xfe0] sm:$0xff]  ;;  %v11354_v46 = vld [vmem:[#allocation155_spill] sm:$0xff] }
 0x793   : > { %4869 = vperm.xlu1 %6191, %v6061_v5   ;;  %v1989_v15 = vadd.f32 %v11350_v61, %v1796_v0  ;;  %v1988_v43 = vadd.f32 %v11351_v16, %v1795_v39  ;;  %v2105_v45 = vmul.f32 %v11347_v29, %v11352_v22  ;;  %4864 = vperm.xlu0 %6190, %v6060_v6   ;;  %v11353_v21 = vld [vmem:[#allocation154_spill] sm:$0xff]  ;;  %v4757_v3 = vrot.slane %v9026_v42, 1  ;;  %v11355_v33 = vld [vmem:[#allocation156_spill] sm:$0xff]  ;;  %v11356_v30 = vld [vmem:[#allocation157_spill] sm:$0xff] }
 0x794   : > { %v1991_v36 = vadd.f32 %v11353_v21, %v1798_v57  ;;  %v4759_v31 = vrot.slane %v10740_v44, 1  ;;  %v1990_v50 = vadd.f32 %v11354_v46, %v1797_v37  ;;  %v1993_v24 = vadd.f32 %v11355_v33, %v1800_v14  ;;  %v11357_v0 = vld [vmem:[#allocation158_spill] sm:$0xff]  ;;  %v11358_v39 = vld [vmem:[#allocation159_spill] sm:$0xff]  ;;  %v11359_v17 = vld [vmem:[#allocation164_spill] sm:$0xff] }
 0x795   : > { %v1992_v18 = vadd.f32 %v11356_v30, %v1799_v53  ;;  %v1995_v49 = vadd.f32 %v11357_v0, %v1802_v10  ;;  %v1994_v34 = vadd.f32 %v11358_v39, %v1801_v41  ;;  %v2120_v57 = vadd.f32 %v2104_v40, %v1981_v47  ;;  %v11360_v56 = vld [vmem:[#allocation165_spill] sm:$0xff]  ;;  %v11361_v63 = vld [vmem:[#allocation166_spill] sm:$0xff]  ;;  %v6065_v53 = vld [vmem:[%s10694_s0 + $0xff8] sm:$0xff] }
 0x796   : > { %v2119_v12 = vadd.f32 %v2103_v20, %v1980_v55  ;;  %v2122_v1 = vadd.f32 %v2106_v28, %v1983_v7  ;;  %v9604_v48 = vadd.f32 %v2105_v45, %v1982_v52  ;;  %v2108_v5 = vmul.f32 %v11345_v26, %v11359_v17  ;;  %v11362_v10 = vld [vmem:[#allocation167_spill] sm:$0xff]  ;;  %v11364_v7 = vld [vmem:[#allocation168_spill] sm:$0xff]  ;;  %v11365_v52 = vld [vmem:[#allocation169_spill] sm:$0xff] }
 0x797   : > { %4879 = vperm.xlu1 %6191, %v6063_v62   ;;  %v2107_v37 = vmul.f32 %v11347_v29, %v11360_v56  ;;  %v2110_v14 = vmul.f32 %v11345_v26, %v11361_v63  ;;  %4874 = vperm.xlu0 %6190, %v6062_v35   ;;  %v2109_v41 = vmul.f32 %v11347_v29, %v11362_v10  ;;  %v11363_v47 = vld [vmem:[#allocation195_spill] sm:$0xff]  ;;  %v11366_v19 = vld [vmem:[#allocation170_spill] sm:$0xff]  ;;  %v11368_v58 = vld [vmem:[#allocation172_spill] sm:$0xff] }
 0x798   : > { %v6216_v4 = vunpack.i.h.bf16 %v11363_v47  ;;  %v6064_v55 = vld [vmem:[%s10694_s0 + $0xff0] sm:$0xff]  ;;  %v9622_v6 = vsel %vm764_vm0, %v4756_v27, %v4757_v3  ;;  %v9625_v8 = vsel %vm764_vm0, %v4757_v3, %v4759_v31  ;;  %v2112_v25 = vmul.f32 %v11345_v26, %v11364_v7  ;;  %v11369_v60 = vld [vmem:[#allocation173_spill] sm:$0xff]  ;;  %v11370_v51 = vld [vmem:[#allocation174_spill] sm:$0xff] }
 0x799   : > { %v2111_v2 = vmul.f32 %v11347_v29, %v11365_v52  ;;  %v2114_v59 = vmul.f32 %v11345_v26, %v11366_v19  ;;  %v11367_v54 = vld [vmem:[#allocation171_spill] sm:$0xff]  ;;  %v2116_v20 = vmul.f32 %v11345_v26, %v11368_v58  ;;  %v2115_v28 = vmul.f32 %v11347_v29, %v11369_v60  ;;  %v6066_v35 = vld [vmem:[%s10694_s0 + $0x1000] sm:$0xff]  ;;  %v11373_v33 = vld [vmem:[#allocation176_spill] sm:$0xff] }
 0x79a   : > { %v2113_v40 = vmul.f32 %v11347_v29, %v11367_v54  ;;  %v2118_v61 = vmul.f32 %v11345_v26, %v11370_v51  ;;  %v6215_v16 = vunpack.i.l.bf16 %v11363_v47  ;;  %v2124_v22 = vadd.f32 %v2108_v5, %v1985_v13  ;;  %v11371_v62 = vld [vmem:[#allocation175_spill] sm:$0xff]  ;;  %v11372_v26 = vld [vmem:[#allocation192_spill] sm:$0xff]  ;;  %v11374_v56 = vld [vmem:[#allocation177_spill] sm:$0xff] }
 0x79b   : > { %4889 = vperm.xlu1 %6191, %v6065_v53   ;;  %v2123_v45 = vadd.f32 %v2107_v37, %v1984_v23  ;;  %v2117_v21 = vmul.f32 %v11347_v29, %v11371_v62  ;;  %4884 = vperm.xlu0 %6190, %v6064_v55   ;;  %v9649_v27 = vpack.i.bf16 %v9625_v8, %v9622_v6  ;;  %v11375_v53 = vld [vmem:[#allocation180_spill] sm:$0xff]  ;;  %v11376_v47 = vld [vmem:[#allocation181_spill] sm:$0xff]  ;;  %v11383_v54 = vld [vmem:[#allocation187_spill] sm:$0xff] }
 0x79c   : > { %v2126_v3 = vadd.f32 %v2110_v14, %v1987_v32  ;;  %v2125_v31 = vadd.f32 %v2109_v41, %v1986_v9  ;;  %v2253_v46 = vmul.f32 %v6216_v4, %v11372_v26  ;;  %v2239_v30 = vmul.f32 %v6216_v4, %v11373_v33  ;;  %v11377_v9 = vld [vmem:[#allocation182_spill] sm:$0xff]  ;;  %v11387_v62 = vld [vmem:[#allocation191_spill] sm:$0xff] }
 0x79d   : > { %v2128_v13 = vadd.f32 %v2112_v25, %v1989_v15  ;;  %v2127_v23 = vadd.f32 %v2111_v2, %v1988_v43  ;;  %v2130_v0 = vadd.f32 %v2114_v59, %v1991_v36  ;;  %v2129_v39 = vadd.f32 %v2113_v40, %v1990_v50  ;;  %v6068_v15 = vld [vmem:[%s10694_s0 + $0x1010] sm:$0xff]  ;;  %v11380_v41 = vld [vmem:[#allocation210_spill] sm:$0xff]  ;;  %v11381_v25 = vld [vmem:[#allocation185_spill] sm:$0xff] }
 0x79e   : > { %v2132_v29 = vadd.f32 %v2116_v20, %v1993_v24  ;;  %v2131_v17 = vadd.f32 %v2115_v28, %v1992_v18  ;;  %v2134_v5 = vadd.f32 %v2118_v61, %v1995_v49  ;;  %v2238_v37 = vmul.f32 %v6215_v16, %v11374_v56  ;;  %v11378_v50 = vld [vmem:[#allocation183_spill] sm:$0xff]  ;;  %v11379_v18 = vld [vmem:[#allocation184_spill] sm:$0xff]  ;;  %v11382_v2 = vld [vmem:[#allocation186_spill] sm:$0xff] }
 0x79f   : > { %4949 = vperm.xlu1 %6191, %v6066_v35   ;;  %v2133_v63 = vadd.f32 %v2117_v21, %v1994_v34  ;;  %v2241_v10 = vmul.f32 %v6216_v4, %v11375_v53  ;;  %v2240_v32 = vmul.f32 %v6215_v16, %v11376_v47  ;;  %v2243_v14 = vmul.f32 %v6216_v4, %v11377_v9  ;;  %v6067_v34 = vld [vmem:[%s10694_s0 + $0x1008] sm:$0xff]  ;;  %v11384_v40 = vld [vmem:[#allocation188_spill] sm:$0xff]  ;;  %v11385_v20 = vld [vmem:[#allocation189_spill] sm:$0xff] }
 0x7a0   : > { %6253 = vrot.lane.b32.xlu0 %v9649_v27, %s6335_s27  ;;  %v2269_v43 = vadd.f32 %v2253_v46, %v2134_v5  ;;  %v2255_v36 = vadd.f32 %v2239_v30, %v2120_v57  ;;  %v2242_v24 = vmul.f32 %v6215_v16, %v11378_v50  ;;  %v2245_v49 = vmul.f32 %v6216_v4, %v11379_v18  ;;  %v11386_v51 = vld [vmem:[#allocation190_spill] sm:$0xff]  ;;  %v11388_v35 = vld [vmem:[#allocation193_spill] sm:$0xff]  ;;  %v11391_v47 = vld [vmem:[#allocation211_spill] sm:$0xff] }
 0x7a1   : > { %v6221_v55 = vunpack.i.h.bf16 %v11380_v41  ;;  %v9669_v7 = vunpack.i.l.bf16 %v11380_v41  ;;  %v2244_v52 = vmul.f32 %v6215_v16, %v11381_v25  ;;  %v2247_v19 = vmul.f32 %v6216_v4, %v11382_v2  ;;  %v6070_v46 = vld [vmem:[%s10694_s0 + $0x1020] sm:$0xff]  ;;  %v11398_v41 = vld [vmem:[#allocation179_spill] sm:$0xff] }
 0x7a2   : > { %v2254_v59 = vadd.f32 %v2238_v37, %v2119_v12  ;;  %v2246_v57 = vmul.f32 %v6215_v16, %v11383_v54  ;;  %v2249_v58 = vmul.f32 %v6216_v4, %v11384_v40  ;;  %v2248_v60 = vmul.f32 %v6215_v16, %v11385_v20  ;;  %v11389_v56 = vld [vmem:[#allocation197_spill] sm:$0xff]  ;;  %v11390_v37 = vld [vmem:[#allocation194_spill] sm:$0xff]  ;;  %v11401_v40 = vld [vmem:[#allocation200_spill] sm:$0xff] }
 0x7a3   : > { %4959 = vperm.xlu1 %6191, %v6068_v15   ;;  %v2257_v28 = vadd.f32 %v2241_v10, %v2122_v1  ;;  %v2251_v61 = vmul.f32 %v6216_v4, %v11386_v51  ;;  %v2250_v21 = vmul.f32 %v6215_v16, %v11387_v62  ;;  %v2252_v26 = vmul.f32 %v6215_v16, %v11388_v35  ;;  %v6069_v1 = vld [vmem:[%s10694_s0 + $0x1018] sm:$0xff]  ;;  %v11399_v2 = vld [vmem:[#allocation213_spill] sm:$0xff]  ;;  %v11403_v51 = vld [vmem:[#allocation202_spill] sm:$0xff] }
 0x7a4   : > { %4954 = vperm.xlu0 %6190, %v6067_v34   ;;  %v2256_v12 = vadd.f32 %v2240_v32, %v9604_v48  ;;  %v2259_v33 = vadd.f32 %v2243_v14, %v2124_v22  ;;  %v2258_v30 = vadd.f32 %v2242_v24, %v2123_v45  ;;  %v2261_v5 = vadd.f32 %v2245_v49, %v2126_v3  ;;  %v11392_v48 = vld [vmem:[#allocation199_spill] sm:$0xff]  ;;  %v11393_v24 = vld [vmem:[#allocation196_spill] sm:$0xff]  ;;  %v11402_v20 = vld [vmem:[#allocation205_spill] sm:$0xff] }
 0x7a5   : > { %v2374_v4 = vmul.f32 %v6221_v55, %v11389_v56  ;;  %v2373_v53 = vmul.f32 %v9669_v7, %v11390_v37  ;;  %v2260_v16 = vadd.f32 %v2244_v52, %v2125_v31  ;;  %v2263_v10 = vadd.f32 %v2247_v19, %v2128_v13  ;;  %v6072_v14 = vld [vmem:[%s10694_s0 + $0x1030] sm:$0xff]  ;;  %v11394_v13 = vld [vmem:[#allocation201_spill] sm:$0xff]  ;;  %v11400_v19 = vld [vmem:[#allocation178_spill] sm:$0xff] }
 0x7a6   : > { %v2388_v9 = vmul.f32 %v6221_v55, %v11391_v47  ;;  %v2262_v15 = vadd.f32 %v2246_v57, %v2127_v23  ;;  %v2265_v50 = vadd.f32 %v2249_v58, %v2130_v0  ;;  %v2264_v18 = vadd.f32 %v2248_v60, %v2129_v39  ;;  %v11395_v23 = vld [vmem:[#allocation198_spill] sm:$0xff]  ;;  %v11396_v39 = vld [vmem:[#allocation203_spill] sm:$0xff] }
 0x7a7   : > { %4969 = vperm.xlu1 %6191, %v6070_v46   ;;  %v2376_v22 = vmul.f32 %v6221_v55, %v11392_v48  ;;  %v2267_v45 = vadd.f32 %v2251_v61, %v2132_v29  ;;  %v2266_v3 = vadd.f32 %v2250_v21, %v2131_v17  ;;  %v9691_v32 = vadd.f32 %v2252_v26, %v2133_v63  ;;  %v6071_v29 = vld [vmem:[%s10694_s0 + $0x1028] sm:$0xff]  ;;  %v11397_v63 = vld [vmem:[#allocation212_spill] sm:$0xff]  ;;  %v11405_v21 = vld [vmem:[#allocation207_spill] sm:$0xff] }
 0x7a8   : > { %4964 = vperm.xlu0 %6190, %v6069_v1   ;;  %v2375_v31 = vmul.f32 %v9669_v7, %v11393_v24  ;;  %v2378_v49 = vmul.f32 %v6221_v55, %v11394_v13  ;;  %v2377_v0 = vmul.f32 %v9669_v7, %v11395_v23  ;;  %v2380_v34 = vmul.f32 %v6221_v55, %v11396_v39  ;;  %v11404_v62 = vld [vmem:[#allocation214_spill] sm:$0xff]  ;;  %v11407_v46 = vld [vmem:[#allocation209_spill] sm:$0xff]  ;;  %v11408_v37 = vld [vmem:[#allocation215_spill] sm:$0xff] }
 0x7a9   : > { %v2390_v17 = vadd.f32 %v2374_v4, %v2255_v36  ;;  %v2510_v25 = vmul.f32 %v11398_v41, %v11397_v63  ;;  %v2389_v52 = vadd.f32 %v2373_v53, %v2254_v59  ;;  %v2509_v54 = vmul.f32 %v11400_v19, %v11399_v2  ;;  %v11406_v59 = vld [vmem:[#allocation204_spill] sm:$0xff]  ;;  %v6074_v1 = vld [vmem:[%s10694_s0 + $0x1040] sm:$0xff]  ;;  %v11415_v63 = vld [vmem:[#allocation219_spill] sm:$0xff] }
 0x7aa   : > { %v9709_v57 = vadd.f32 %v2388_v9, %v2269_v43  ;;  %v2379_v58 = vmul.f32 %v9669_v7, %v11401_v40  ;;  %v2382_v60 = vmul.f32 %v6221_v55, %v11402_v20  ;;  %v2381_v61 = vmul.f32 %v9669_v7, %v11403_v51  ;;  %v6073_v9 = vld [vmem:[%s10694_s0 + $0x1038] sm:$0xff] }
 0x7ab   : > { %4979 = vperm.xlu1 %6191, %v6072_v14   ;;  %v2512_v36 = vmul.f32 %v11398_v41, %v11404_v62  ;;  %v2384_v35 = vmul.f32 %v6221_v55, %v11405_v21  ;;  %v2383_v26 = vmul.f32 %v9669_v7, %v11406_v59  ;;  %v2386_v43 = vmul.f32 %v6221_v55, %v11407_v46  ;;  %v11422_v21 = vld [vmem:[#allocation224_spill] sm:$0xff]  ;;  %v11423_v59 = vld [vmem:[#allocation225_spill] sm:$0xff]  ;;  %v11424_v46 = vld [vmem:[#allocation226_spill] sm:$0xff] }
 0x7ac   : > { %4974 = vperm.xlu0 %6190, %v6071_v29   ;;  %v2392_v56 = vadd.f32 %v2376_v22, %v2257_v28  ;;  %v2391_v4 = vadd.f32 %v2375_v31, %v2256_v12  ;;  %v2511_v53 = vmul.f32 %v11400_v19, %v11408_v37  ;;  %v2394_v47 = vadd.f32 %v2378_v49, %v2259_v33  ;;  %v11409_v29 = vld [vmem:[#allocation206_spill] sm:$0xff]  ;;  %v6076_v49 = vld [vmem:[%s10694_s0 + $0x1050] sm:$0xff] }
 0x7ad   : > { %v9730_v48 = vadd.f32 %v2510_v25, %v2390_v17  ;;  %v9732_v14 = vadd.f32 %v2509_v54, %v2389_v52  ;;  %v2393_v55 = vadd.f32 %v2377_v0, %v2258_v30  ;;  %v2396_v24 = vadd.f32 %v2380_v34, %v2261_v5  ;;  %v11410_v30 = vld [vmem:[#allocation216_spill] sm:$0xff]  ;;  %v11417_v54 = vld [vmem:[#allocation245_spill] sm:$0xff] }
 0x7ae   : > { %v2395_v13 = vadd.f32 %v2379_v58, %v2260_v16  ;;  %v2398_v23 = vadd.f32 %v2382_v60, %v2263_v10  ;;  %v2397_v39 = vadd.f32 %v2381_v61, %v2262_v15  ;;  %v2385_v28 = vmul.f32 %v9669_v7, %v11409_v29  ;;  %v11411_v16 = vld [vmem:[#allocation217_spill] sm:$0xff]  ;;  %v11412_v15 = vld [vmem:[#allocation208_spill] sm:$0xff]  ;;  %v11420_v60 = vld [vmem:[#allocation222_spill] sm:$0xff] }
 0x7af   : > { %4989 = vperm.xlu1 %6191, %v6074_v1   ;;  %v9736_v12 = vadd.f32 %v2512_v36, %v2392_v56  ;;  %v2400_v33 = vadd.f32 %v2384_v35, %v2265_v50  ;;  %v2399_v22 = vadd.f32 %v2383_v26, %v2264_v18  ;;  %v2402_v31 = vadd.f32 %v2386_v43, %v2267_v45  ;;  %v6075_v50 = vld [vmem:[%s10694_s0 + $0x1048] sm:$0xff]  ;;  %v11416_v52 = vld [vmem:[#allocation220_spill] sm:$0xff]  ;;  %v11421_v61 = vld [vmem:[#allocation223_spill] sm:$0xff] }
 0x7b0   : > { %4984 = vperm.xlu0 %6190, %v6073_v9   ;;  %v9741_v17 = vadd.f32 %v2511_v53, %v2391_v4  ;;  %v2514_v5 = vmul.f32 %v11398_v41, %v11410_v30  ;;  %v2513_v10 = vmul.f32 %v11400_v19, %v11411_v16  ;;  %v2387_v0 = vmul.f32 %v9669_v7, %v11412_v15  ;;  %v11414_v18 = vld [vmem:[#allocation218_spill] sm:$0xff]  ;;  %v11419_v7 = vld [vmem:[#allocation221_spill] sm:$0xff]  ;;  %v11425_v1 = vld [vmem:[#allocation227_spill] sm:$0xff] }
 0x7b1   : > { %v9749_v34 = vpop.permute.xlu1 %4594  ;;  %v2516_v45 = vmul.f32 %v11398_v41, %v11414_v18  ;;  %v2515_v25 = vmul.f32 %v11400_v19, %v11415_v63  ;;  %v2518_v2 = vmul.f32 %v11398_v41, %v11416_v52  ;;  %v6226_v40 = vunpack.i.h.bf16 %v11417_v54  ;;  %v9761_v58 = vpop.permute.xlu0 %4592  ;;  %v6078_v4 = vld [vmem:[%s10694_s0 + $0x1060] sm:$0xff]  ;;  %v11426_v30 = vld [vmem:[#allocation242_spill] sm:$0xff] }
 0x7b2   : > { %11413 = vst [vmem:[#allocation5_spill] sm:$0xff] %v9749_v34  ;;  %11418 = vst [vmem:[#allocation6_spill] sm:$0xff] %v9761_v58  ;;  %v2517_v20 = vmul.f32 %v11400_v19, %v11419_v7  ;;  %v2520_v51 = vmul.f32 %v11398_v41, %v11420_v60  ;;  %v2519_v62 = vmul.f32 %v11400_v19, %v11421_v61  ;;  %v6225_v9 = vunpack.i.l.bf16 %v11417_v54 }
 0x7b3   : > { %v2401_v36 = vadd.f32 %v2385_v28, %v2266_v3  ;;  %4999 = vperm.xlu1 %6191, %v6076_v49   ;;  %v2522_v35 = vmul.f32 %v11398_v41, %v11422_v21  ;;  %v2521_v26 = vmul.f32 %v11400_v19, %v11423_v59  ;;  %v2524_v43 = vmul.f32 %v11398_v41, %v11424_v46  ;;  %v6077_v41 = vld [vmem:[%s10694_s0 + $0x1058] sm:$0xff] }
 0x7b4   : > { %v2523_v56 = vmul.f32 %v11400_v19, %v11425_v1  ;;  %4994 = vperm.xlu0 %6190, %v6075_v50   ;;  %v2530_v37 = vadd.f32 %v2514_v5, %v2394_v47  ;;  %v2529_v3 = vadd.f32 %v2513_v10, %v2393_v55  ;;  %v2403_v53 = vadd.f32 %v2387_v0, %v9691_v32  ;;  %v11427_v5 = vld [vmem:[#allocation228_spill] sm:$0xff] }
 0x7b5   : > { %v9782_v29 = vpop.permute.xlu1 %4598  ;;  %v2532_v28 = vadd.f32 %v2516_v45, %v2396_v24  ;;  %v2531_v49 = vadd.f32 %v2515_v25, %v2395_v13  ;;  %v2534_v19 = vadd.f32 %v2518_v2, %v2398_v23  ;;  %v2659_v16 = vmul.f32 %v6226_v40, %v11426_v30  ;;  %v9788_v15 = vpop.permute.xlu0 %4596  ;;  %v6080_v24 = vld [vmem:[%s10694_s0 + $0x1070] sm:$0xff]  ;;  %v11428_v13 = vld [vmem:[#allocation229_spill] sm:$0xff]  ;;  %v11429_v45 = vld [vmem:[#allocation230_spill] sm:$0xff] }
 0x7b6   : > { %v2533_v50 = vadd.f32 %v2517_v20, %v2397_v39  ;;  %v2536_v47 = vadd.f32 %v2520_v51, %v2400_v33  ;;  %v2535_v55 = vadd.f32 %v2519_v62, %v2399_v22  ;;  %v2645_v32 = vmul.f32 %v6226_v40, %v11427_v5  ;;  %v11430_v33 = vld [vmem:[#allocation231_spill] sm:$0xff]  ;;  %v11431_v25 = vld [vmem:[#allocation232_spill] sm:$0xff]  ;;  %v11433_v20 = vld [vmem:[#allocation233_spill] sm:$0xff] }
 0x7b7   : > { %5009 = vperm.xlu1 %6191, %v6078_v4   ;;  %v2538_v10 = vadd.f32 %v2522_v35, %v2402_v31  ;;  %v9791_v0 = vadd.f32 %v2521_v26, %v2401_v36  ;;  %v2540_v18 = vadd.f32 %v2524_v43, %v9709_v57  ;;  %v2539_v63 = vadd.f32 %v2523_v56, %v2403_v53  ;;  %v6079_v57 = vld [vmem:[%s10694_s0 + $0x1068] sm:$0xff]  ;;  %v11432_v31 = vld [vmem:[#allocation260_spill] sm:$0xff]  ;;  %v11435_v35 = vld [vmem:[#allocation235_spill] sm:$0xff] }
 0x7b8   : > { %5004 = vperm.xlu0 %6190, %v6077_v41   ;;  %v2644_v23 = vmul.f32 %v6225_v9, %v11428_v13  ;;  %v2647_v39 = vmul.f32 %v6226_v40, %v11429_v45  ;;  %v2646_v22 = vmul.f32 %v6225_v9, %v11430_v33  ;;  %v2649_v52 = vmul.f32 %v6226_v40, %v11431_v25  ;;  %v11434_v51 = vld [vmem:[#allocation234_spill] sm:$0xff]  ;;  %v11436_v26 = vld [vmem:[#allocation236_spill] sm:$0xff]  ;;  %v11437_v43 = vld [vmem:[#allocation237_spill] sm:$0xff] }
 0x7b9   : > { %v9801_v2 = vpop.permute.xlu1 %4602  ;;  %v9807_v54 = vunpack.i.h.bf16 %v11432_v31  ;;  %v2675_v7 = vadd.f32 %v2659_v16, %v2540_v18  ;;  %v2648_v60 = vmul.f32 %v6225_v9, %v11433_v20  ;;  %v2651_v61 = vmul.f32 %v6226_v40, %v11434_v51  ;;  %v9811_v62 = vpop.permute.xlu0 %4600  ;;  %v11438_v56 = vld [vmem:[#allocation238_spill] sm:$0xff]  ;;  %v11439_v53 = vld [vmem:[#allocation239_spill] sm:$0xff]  ;;  %v11440_v18 = vld [vmem:[#allocation240_spill] sm:$0xff] }
 0x7ba   : > { %v9814_v36 = vunpack.i.l.bf16 %v11432_v31  ;;  %v2661_v21 = vadd.f32 %v2645_v32, %v9730_v48  ;;  %v2650_v59 = vmul.f32 %v6225_v9, %v11435_v35  ;;  %v2653_v46 = vmul.f32 %v6226_v40, %v11436_v26  ;;  %v6081_v32 = vld [vmem:[%s10694_s0 + $0x1078] sm:$0xff]  ;;  %v11450_v26 = vld [vmem:[#allocation251_spill] sm:$0xff] }
 0x7bb   : > { %5019 = vperm.xlu1 %6191, %v6080_v24   ;;  %v2652_v1 = vmul.f32 %v6225_v9, %v11437_v43  ;;  %v2655_v4 = vmul.f32 %v6226_v40, %v11438_v56  ;;  %v2654_v41 = vmul.f32 %v6225_v9, %v11439_v53  ;;  %v2660_v30 = vadd.f32 %v2644_v23, %v9732_v14  ;;  %v11441_v24 = vld [vmem:[#allocation247_spill] sm:$0xff]  ;;  %v11443_v23 = vld [vmem:[#allocation241_spill] sm:$0xff]  ;;  %v11451_v43 = vld [vmem:[#allocation248_spill] sm:$0xff] }
 0x7bc   : > { %5014 = vperm.xlu0 %6190, %v6079_v57   ;;  %v2663_v16 = vadd.f32 %v2647_v39, %v9736_v12  ;;  %v2662_v5 = vadd.f32 %v2646_v22, %v9741_v17  ;;  %v2657_v48 = vmul.f32 %v6226_v40, %v11440_v18  ;;  %v2780_v13 = vmul.f32 %v9807_v54, %v11441_v24  ;;  %v11442_v57 = vld [vmem:[#allocation244_spill] sm:$0xff]  ;;  %v11444_v39 = vld [vmem:[#allocation243_spill] sm:$0xff] }
 0x7bd   : > { %v2665_v45 = vadd.f32 %v2649_v52, %v2530_v37  ;;  %v2664_v33 = vadd.f32 %v2648_v60, %v2529_v3  ;;  %v2667_v25 = vadd.f32 %v2651_v61, %v2532_v28  ;;  %v9831_v31 = vpop.permute.xlu1 %4606  ;;  %v2779_v14 = vmul.f32 %v9814_v36, %v11442_v57  ;;  %v9837_v22 = vpop.permute.xlu0 %4604  ;;  %v6083_v28 = vld [vmem:[%s10694_s0 + $0x1088] sm:$0xff]  ;;  %v11445_v52 = vld [vmem:[#allocation261_spill] sm:$0xff]  ;;  %v11452_v56 = vld [vmem:[#allocation263_spill] sm:$0xff] }
 0x7be   : > { %v2666_v12 = vadd.f32 %v2650_v59, %v2531_v49  ;;  %v2656_v17 = vmul.f32 %v6225_v9, %v11443_v23  ;;  %v2658_v40 = vmul.f32 %v6225_v9, %v11444_v39  ;;  %v2669_v20 = vadd.f32 %v2653_v46, %v2534_v19  ;;  %v11446_v60 = vld [vmem:[#allocation249_spill] sm:$0xff]  ;;  %v11447_v61 = vld [vmem:[#allocation246_spill] sm:$0xff]  ;;  %v11456_v24 = vld [vmem:[#allocation255_spill] sm:$0xff] }
 0x7bf   : > { %6258 = vrot.lane.b32.xlu1 %v9649_v27, %s6336_s28  ;;  %v2668_v51 = vadd.f32 %v2652_v1, %v2533_v50  ;;  %v2671_v37 = vadd.f32 %v2655_v4, %v2536_v47  ;;  %v2670_v3 = vadd.f32 %v2654_v41, %v2535_v55  ;;  %v2794_v49 = vmul.f32 %v9807_v54, %v11445_v52  ;;  %v6082_v27 = vld [vmem:[%s10694_s0 + $0x1080] sm:$0xff]  ;;  %v11448_v19 = vld [vmem:[#allocation262_spill] sm:$0xff]  ;;  %v11453_v4 = vld [vmem:[#allocation279_spill] sm:$0xff] }
 0x7c0   : > { %5024 = vperm.xlu0 %6190, %v6081_v32   ;;  %v2782_v9 = vmul.f32 %v9807_v54, %v11446_v60  ;;  %v2781_v35 = vmul.f32 %v9814_v36, %v11447_v61  ;;  %v9850_v59 = vadd.f32 %v2657_v48, %v2538_v10  ;;  %v11449_v50 = vld [vmem:[#allocation278_spill] sm:$0xff]  ;;  %v2796_v55 = vadd.f32 %v2780_v13, %v2661_v21  ;;  %v11454_v10 = vld [vmem:[#allocation253_spill] sm:$0xff]  ;;  %v11457_v13 = vld [vmem:[#allocation252_spill] sm:$0xff] }
 0x7c1   : > { %v2909_v47 = vmul.f32 %v11449_v50, %v11448_v19  ;;  %v2784_v46 = vmul.f32 %v9807_v54, %v11450_v26  ;;  %v2783_v1 = vmul.f32 %v9814_v36, %v11451_v43  ;;  %v2908_v53 = vmul.f32 %v11453_v4, %v11452_v56  ;;  %v11455_v48 = vld [vmem:[#allocation250_spill] sm:$0xff]  ;;  %v9872_v52 = vpop.permute.xlu1 %4610  ;;  %v11458_v60 = vld [vmem:[#allocation264_spill] sm:$0xff]  ;;  %v11459_v61 = vld [vmem:[#allocation257_spill] sm:$0xff]  ;;  %v9883_v56 = vpop.permute.xlu0 %4608 }
 0x7c2   : > { %v2795_v41 = vadd.f32 %v2779_v14, %v2660_v30  ;;  %v2786_v18 = vmul.f32 %v9807_v54, %v11454_v10  ;;  %v2785_v32 = vmul.f32 %v9814_v36, %v11455_v48  ;;  %v2788_v21 = vmul.f32 %v9807_v54, %v11456_v24  ;;  %v6085_v30 = vld [vmem:[%s10694_s0 + $0x1098] sm:$0xff]  ;;  %v11460_v26 = vld [vmem:[#allocation254_spill] sm:$0xff]  ;;  %v11461_v24 = vld [vmem:[#allocation265_spill] sm:$0xff] }
 0x7c3   : > { %5089 = vperm.xlu1 %6191, %v6083_v28   ;;  %v2787_v57 = vmul.f32 %v9814_v36, %v11457_v13  ;;  %v2672_v23 = vadd.f32 %v2656_v17, %v9791_v0  ;;  %v2674_v39 = vadd.f32 %v2658_v40, %v2539_v63  ;;  %v2810_v14 = vadd.f32 %v2794_v49, %v2675_v7  ;;  %v6084_v0 = vld [vmem:[%s10694_s0 + $0x1090] sm:$0xff] }
 0x7c4   : > { %5084 = vperm.xlu0 %6190, %v6082_v27   ;;  %v2911_v28 = vmul.f32 %v11449_v50, %v11458_v60  ;;  %v2790_v19 = vmul.f32 %v9807_v54, %v11459_v61  ;;  %v2789_v43 = vmul.f32 %v9814_v36, %v11460_v26  ;;  %v2925_v63 = vadd.f32 %v2909_v47, %v2796_v55  ;;  %v11462_v26 = vld [vmem:[#allocation259_spill] sm:$0xff]  ;;  %v11466_v47 = vld [vmem:[#allocation268_spill] sm:$0xff] }
 0x7c5   : > { %v2798_v17 = vadd.f32 %v2782_v9, %v2663_v16  ;;  %v2797_v40 = vadd.f32 %v2781_v35, %v2662_v5  ;;  %v2800_v27 = vadd.f32 %v2784_v46, %v2665_v45  ;;  %v2924_v7 = vadd.f32 %v2908_v53, %v2795_v41  ;;  %v6087_v16 = vld [vmem:[%s10694_s0 + $0x10a8] sm:$0xff]  ;;  %v11465_v35 = vld [vmem:[#allocation267_spill] sm:$0xff] }
 0x7c6   : > { %v2799_v49 = vadd.f32 %v2783_v1, %v2664_v33  ;;  %v2802_v10 = vadd.f32 %v2786_v18, %v2667_v25  ;;  %v2801_v48 = vadd.f32 %v2785_v32, %v2666_v12  ;;  %v2910_v13 = vmul.f32 %v11453_v4, %v11461_v24  ;;  %v11463_v33 = vld [vmem:[#allocation256_spill] sm:$0xff]  ;;  %v6086_v12 = vld [vmem:[%s10694_s0 + $0x10a0] sm:$0xff]  ;;  %v11467_v46 = vld [vmem:[#allocation258_spill] sm:$0xff] }
 0x7c7   : > { %5099 = vperm.xlu1 %6191, %v6085_v30   ;;  %v2804_v60 = vadd.f32 %v2788_v21, %v2669_v20  ;;  %v2803_v61 = vadd.f32 %v2787_v57, %v2668_v51  ;;  %v2792_v44 = vmul.f32 %v9807_v54, %v11462_v26  ;;  %v2927_v5 = vadd.f32 %v2911_v28, %v2798_v17  ;;  %v11464_v20 = vld [vmem:[#allocation266_spill] sm:$0xff]  ;;  %v11468_v1 = vld [vmem:[#allocation269_spill] sm:$0xff]  ;;  %v11470_v32 = vld [vmem:[#allocation271_spill] sm:$0xff]  ;;  %v9918_v28 = vpop.permute.xlu0 %4612 }
 0x7c8   : > { %5094 = vperm.xlu0 %6190, %v6084_v0   ;;  %v2806_v45 = vadd.f32 %v2790_v19, %v2671_v37  ;;  %v2805_v9 = vadd.f32 %v2789_v43, %v2670_v3  ;;  %v2791_v25 = vmul.f32 %v9814_v36, %v11463_v33  ;;  %v2913_v51 = vmul.f32 %v11449_v50, %v11464_v20  ;;  %v9908_v3 = vpop.permute.xlu1 %4614  ;;  %v11469_v41 = vld [vmem:[#allocation270_spill] sm:$0xff]  ;;  %v11471_v57 = vld [vmem:[#allocation272_spill] sm:$0xff]  ;;  %v11472_v19 = vld [vmem:[#allocation273_spill] sm:$0xff] }
 0x7c9   : > { %v2912_v54 = vmul.f32 %v11453_v4, %v11465_v35  ;;  %v2915_v55 = vmul.f32 %v11449_v50, %v11466_v47  ;;  %v2793_v37 = vmul.f32 %v9814_v36, %v11467_v46  ;;  %v2914_v53 = vmul.f32 %v11453_v4, %v11468_v1  ;;  %v11473_v43 = vld [vmem:[#allocation274_spill] sm:$0xff]  ;;  %v11474_v17 = vld [vmem:[#allocation275_spill] sm:$0xff]  ;;  %v11475_v26 = vld [vmem:[#allocation276_spill] sm:$0xff] }
 0x7ca   : > { %v2917_v18 = vmul.f32 %v11449_v50, %v11469_v41  ;;  %v2916_v21 = vmul.f32 %v11453_v4, %v11470_v32  ;;  %v2919_v30 = vmul.f32 %v11449_v50, %v11471_v57  ;;  %v2918_v36 = vmul.f32 %v11453_v4, %v11472_v19  ;;  %v6089_v20 = vld [vmem:[%s10694_s0 + $0x10b8] sm:$0xff]  ;;  %v11476_v35 = vld [vmem:[#allocation277_spill] sm:$0xff]  ;;  %v6088_v41 = vld [vmem:[%s10694_s0 + $0x10b0] sm:$0xff] }
 0x7cb   : > { %5109 = vperm.xlu1 %6191, %v6087_v16   ;;  %v2921_v0 = vmul.f32 %v11449_v50, %v11473_v43  ;;  %v2920_v24 = vmul.f32 %v11453_v4, %v11474_v17  ;;  %v2923_v33 = vmul.f32 %v11449_v50, %v11475_v26  ;;  %v2922_v16 = vmul.f32 %v11453_v4, %v11476_v35  ;;  %v11492_v35 = vld [vmem:[#allocation293_spill] sm:$0xff] }
 0x7cc   : > { %5104 = vperm.xlu0 %6190, %v6086_v12   ;;  %v2926_v47 = vadd.f32 %v2910_v13, %v2797_v40  ;;  %v2808_v46 = vadd.f32 %v2792_v44, %v9850_v59  ;;  %v2807_v1 = vadd.f32 %v2791_v25, %v2672_v23  ;;  %v2929_v32 = vadd.f32 %v2913_v51, %v2800_v27  ;;  %v9937_v13 = vpop.permute.xlu1 %4618  ;;  %v6091_v44 = vld [vmem:[%s10694_s0 + $0x10c8] sm:$0xff]  ;;  %v11478_v59 = vld [vmem:[#allocation280_spill] sm:$0xff]  ;;  %v11479_v27 = vld [vmem:[#allocation281_spill] sm:$0xff] }
 0x7cd   : > { %v2928_v57 = vadd.f32 %v2912_v54, %v2799_v49  ;;  %v2931_v19 = vadd.f32 %v2915_v55, %v2802_v10  ;;  %v2809_v50 = vadd.f32 %v2793_v37, %v2674_v39  ;;  %v2930_v12 = vadd.f32 %v2914_v53, %v2801_v48  ;;  %11477 = vst [vmem:[#allocation7_spill] sm:$0xff] %v9937_v13  ;;  %v11480_v49 = vld [vmem:[#allocation282_spill] sm:$0xff]  ;;  %v11484_v51 = vld [vmem:[#allocation285_spill] sm:$0xff] }
 0x7ce   : > { %v2933_v43 = vadd.f32 %v2917_v18, %v2804_v60  ;;  %v2932_v17 = vadd.f32 %v2916_v21, %v2803_v61  ;;  %v2935_v26 = vadd.f32 %v2919_v30, %v2806_v45  ;;  %v2934_v58 = vadd.f32 %v2918_v36, %v2805_v9  ;;  %v9945_v60 = vpop.permute.xlu0 %4616  ;;  %v11482_v61 = vld [vmem:[#allocation283_spill] sm:$0xff]  ;;  %v11483_v9 = vld [vmem:[#allocation284_spill] sm:$0xff]  ;;  %v11485_v55 = vld [vmem:[#allocation286_spill] sm:$0xff] }
 0x7cf   : > { %5119 = vperm.xlu1 %6191, %v6089_v20   ;;  %v2937_v34 = vadd.f32 %v2921_v0, %v2808_v46  ;;  %v2936_v4 = vadd.f32 %v2920_v24, %v2807_v1  ;;  %v2939_v40 = vadd.f32 %v2923_v33, %v2810_v14  ;;  %v3118_v23 = vadd.f32 %v11478_v59, %v2925_v63  ;;  %v6090_v14 = vld [vmem:[%s10694_s0 + $0x10c0] sm:$0xff]  ;;  %v11486_v63 = vld [vmem:[#allocation287_spill] sm:$0xff]  ;;  %v11489_v30 = vld [vmem:[#allocation290_spill] sm:$0xff] }
 0x7d0   : > { %5114 = vperm.xlu0 %6190, %v6088_v41   ;;  %v3117_v39 = vadd.f32 %v11479_v27, %v2924_v7  ;;  %v3120_v10 = vadd.f32 %v11480_v49, %v2927_v5  ;;  %v2938_v48 = vadd.f32 %v2922_v16, %v2809_v50  ;;  %11481 = vst [vmem:[#allocation10_spill] sm:$0xff] %v9945_v60  ;;  %v11487_v7 = vld [vmem:[#allocation288_spill] sm:$0xff]  ;;  %v11488_v5 = vld [vmem:[#allocation289_spill] sm:$0xff]  ;;  %v11490_v0 = vld [vmem:[#allocation291_spill] sm:$0xff] }
 0x7d1   : > { %v3119_v45 = vadd.f32 %v11482_v61, %v2926_v47  ;;  %v3122_v25 = vadd.f32 %v11483_v9, %v2929_v32  ;;  %v3121_v54 = vadd.f32 %v11484_v51, %v2928_v57  ;;  %v3124_v37 = vadd.f32 %v11485_v55, %v2931_v19  ;;  %v11491_v33 = vld [vmem:[#allocation292_spill] sm:$0xff]  ;;  %v11493_v47 = vld [vmem:[#allocation294_spill] sm:$0xff]  ;;  %v11494_v41 = vld [vmem:[#allocation295_spill] sm:$0xff]  ;;  %v9978_v61 = vpop.permute.xlu1 %4622 }
 0x7d2   : > { %v3123_v53 = vadd.f32 %v11486_v63, %v2930_v12  ;;  %v3126_v18 = vadd.f32 %v11487_v7, %v2933_v43  ;;  %v3125_v21 = vadd.f32 %v11488_v5, %v2932_v17  ;;  %v3128_v36 = vadd.f32 %v11489_v30, %v2935_v26  ;;  %v6093_v1 = vld [vmem:[%s10694_s0 + $0x10d8] sm:$0xff]  ;;  %v11495_v57 = vld [vmem:[#allocation298_spill] sm:$0xff]  ;;  %v11496_v50 = vld [vmem:[#allocation299_spill] sm:$0xff]  ;;  %11504 = vst [vmem:[#allocation8_spill] sm:$0xff] %v9978_v61  ;;  %v9984_v30 = vpop.permute.xlu0 %4620 }
 0x7d3   : > { %5129 = vperm.xlu1 %6191, %v6091_v44   ;;  %v3127_v24 = vadd.f32 %v11490_v0, %v2934_v58  ;;  %v3130_v20 = vadd.f32 %v11491_v33, %v2937_v34  ;;  %v3129_v16 = vadd.f32 %v11492_v35, %v2936_v4  ;;  %v3132_v46 = vadd.f32 %v11493_v47, %v2939_v40  ;;  %v11497_v43 = vld [vmem:[#allocation314_spill] sm:$0xff]  ;;  %v11498_v17 = vld [vmem:[#allocation297_spill] sm:$0xff]  ;;  %v6092_v34 = vld [vmem:[%s10694_s0 + $0x10d0] sm:$0xff] }
 0x7d4   : > { %5124 = vperm.xlu0 %6190, %v6090_v14   ;;  %v3131_v32 = vadd.f32 %v11494_v41, %v2938_v48  ;;  %v3311_v19 = vadd.f32 %v11495_v57, %v3118_v23  ;;  %v3310_v12 = vadd.f32 %v11496_v50, %v3117_v39  ;;  %v3434_v58 = vmul.f32 %v11498_v17, %v11497_v43  ;;  %v11499_v26 = vld [vmem:[#allocation300_spill] sm:$0xff]  ;;  %v11500_v40 = vld [vmem:[#allocation301_spill] sm:$0xff]  ;;  %v11501_v59 = vld [vmem:[#allocation302_spill] sm:$0xff] }
 0x7d5   : > { %v3313_v4 = vadd.f32 %v11499_v26, %v3120_v10  ;;  %v3312_v44 = vadd.f32 %v11500_v40, %v3119_v45  ;;  %v3315_v27 = vadd.f32 %v11501_v59, %v3122_v25  ;;  %v11502_v49 = vld [vmem:[#allocation315_spill] sm:$0xff]  ;;  %v11503_v14 = vld [vmem:[#allocation296_spill] sm:$0xff]  ;;  %v11507_v55 = vld [vmem:[#allocation305_spill] sm:$0xff]  ;;  %11509 = vst [vmem:[#allocation9_spill] sm:$0xff] %v9984_v30 }
 0x7d6   : > { %v3433_v48 = vmul.f32 %v11503_v14, %v11502_v49  ;;  %v11505_v23 = vld [vmem:[#allocation303_spill] sm:$0xff]  ;;  %v11506_v9 = vld [vmem:[#allocation304_spill] sm:$0xff]  ;;  %v3316_v63 = vadd.f32 %v11507_v55, %v3123_v53  ;;  %v11508_v7 = vld [vmem:[#allocation306_spill] sm:$0xff] }
 0x7d7   : > { %v3314_v39 = vadd.f32 %v11505_v23, %v3121_v54  ;;  %v3317_v51 = vadd.f32 %v11506_v9, %v3124_v37  ;;  %v3319_v5 = vadd.f32 %v11508_v7, %v3126_v18  ;;  %5139 = vperm.xlu1 %6191, %v6093_v1   ;;  %v11510_v10 = vld [vmem:[#allocation307_spill] sm:$0xff]  ;;  %v11511_v0 = vld [vmem:[#allocation308_spill] sm:$0xff]  ;;  %v11512_v33 = vld [vmem:[#allocation309_spill] sm:$0xff]  ;;  %v9996_v1 = vadd.f32 %v3434_v58, %v3311_v19 }
 0x7d8   : > { %v3318_v45 = vadd.f32 %v11510_v10, %v3125_v21  ;;  %v3321_v25 = vadd.f32 %v11511_v0, %v3128_v36  ;;  %v3320_v35 = vadd.f32 %v11512_v33, %v3127_v24  ;;  %v11513_v47 = vld [vmem:[#allocation310_spill] sm:$0xff]  ;;  %5134 = vperm.xlu0 %6190, %v6092_v34   ;;  %v11514_v37 = vld [vmem:[#allocation311_spill] sm:$0xff]  ;;  %v11515_v57 = vld [vmem:[#allocation312_spill] sm:$0xff]  ;;  %v10001_v36 = vadd.f32 %v3433_v48, %v3310_v12 }
 0x7d9   : > { %v3323_v41 = vadd.f32 %v11513_v47, %v3130_v20  ;;  %v6095_v54 = vld [vmem:[%s10694_s0 + $0x10e8] sm:$0xff]  ;;  %v3322_v53 = vadd.f32 %v11514_v37, %v3129_v16  ;;  %v3325_v18 = vadd.f32 %v11515_v57, %v3132_v46  ;;  %v11516_v50 = vld [vmem:[#allocation313_spill] sm:$0xff]  ;;  %11517 = vst [vmem:[#allocation11_spill] sm:$0xff] %v9996_v1  ;;  %v11519_v24 = vld [vmem:[#allocation316_spill] sm:$0xff] }
 0x7da   : > { %v3324_v43 = vadd.f32 %v11516_v50, %v3131_v32  ;;  %v6094_v21 = vld [vmem:[%s10694_s0 + $0x10e0] sm:$0xff]  ;;  %11518 = vst [vmem:[#allocation12_spill] sm:$0xff] %v10001_v36  ;;  %v3436_v20 = vmul.f32 %v11498_v17, %v11519_v24  ;;  %v11521_v40 = vld [vmem:[#allocation318_spill] sm:$0xff]  ;;  %v10009_v46 = vpop.permute.xlu1 %4680  ;;  %v11523_v32 = vld [vmem:[#allocation319_spill] sm:$0xff]  ;;  %v10019_v9 = vpop.permute.xlu0 %4675 }
 0x7db   : > { %v11520_v34 = vld [vmem:[#allocation317_spill] sm:$0xff]  ;;  %v3438_v16 = vmul.f32 %v11498_v17, %v11521_v40  ;;  %11522 = vst [vmem:[#allocation13_spill] sm:$0xff] %v10009_v46  ;;  %v3437_v19 = vmul.f32 %v11503_v14, %v11523_v32  ;;  %v11524_v58 = vld [vmem:[#allocation320_spill] sm:$0xff]  ;;  %v11526_v48 = vld [vmem:[#allocation322_spill] sm:$0xff]  ;;  %5149 = vperm.xlu1 %6191, %v6095_v54  }
 0x7dc   : > { %v3435_v26 = vmul.f32 %v11503_v14, %v11520_v34  ;;  %v3440_v59 = vmul.f32 %v11498_v17, %v11524_v58  ;;  %v11525_v49 = vld [vmem:[#allocation321_spill] sm:$0xff]  ;;  %v3442_v23 = vmul.f32 %v11498_v17, %v11526_v48  ;;  %11527 = vst [vmem:[#allocation14_spill] sm:$0xff] %v10019_v9  ;;  %v11528_v55 = vld [vmem:[#allocation323_spill] sm:$0xff]  ;;  %v11529_v10 = vld [vmem:[#allocation324_spill] sm:$0xff]  ;;  %5144 = vperm.xlu0 %6190, %v6094_v21  }
 0x7dd   : > { %v3439_v12 = vmul.f32 %v11503_v14, %v11525_v49  ;;  %v3441_v7 = vmul.f32 %v11503_v14, %v11528_v55  ;;  %v3444_v0 = vmul.f32 %v11498_v17, %v11529_v10  ;;  %v11530_v33 = vld [vmem:[#allocation325_spill] sm:$0xff]  ;;  %v11531_v37 = vld [vmem:[#allocation326_spill] sm:$0xff]  ;;  %v6097_v50 = vld [vmem:[%s10694_s0 + $0x10f8] sm:$0xff]  ;;  %v3452_v21 = vadd.f32 %v3436_v20, %v3313_v4 }
 0x7de   : > { %v3443_v47 = vmul.f32 %v11503_v14, %v11530_v33  ;;  %v3446_v57 = vmul.f32 %v11498_v17, %v11531_v37  ;;  %v11532_v24 = vld [vmem:[#allocation327_spill] sm:$0xff]  ;;  %v11533_v34 = vld [vmem:[#allocation328_spill] sm:$0xff]  ;;  %v11534_v32 = vld [vmem:[#allocation329_spill] sm:$0xff]  ;;  %v3451_v10 = vadd.f32 %v3435_v26, %v3312_v44  ;;  %v3454_v33 = vadd.f32 %v3438_v16, %v3315_v27  ;;  %v10043_v9 = vpop.permute.xlu1 %4690 }
 0x7df   : > { %v3445_v54 = vmul.f32 %v11503_v14, %v11532_v24  ;;  %v3448_v40 = vmul.f32 %v11498_v17, %v11533_v34  ;;  %v3447_v58 = vmul.f32 %v11503_v14, %v11534_v32  ;;  %v11535_v49 = vld [vmem:[#allocation349_spill] sm:$0xff]  ;;  %v6096_v55 = vld [vmem:[%s10694_s0 + $0x10f0] sm:$0xff]  ;;  %v3453_v24 = vadd.f32 %v3437_v19, %v3314_v39  ;;  %v10045_v34 = vpop.permute.xlu0 %4685  ;;  %5159 = vperm.xlu1 %6191, %v6097_v50   ;;  %v6099_v4 = vld [vmem:[%s10694_s0 + $0x1108] sm:$0xff] }
 0x7e0   : > { %v6236_v48 = vunpack.i.h.bf16 %v11535_v49  ;;  %v6235_v37 = vunpack.i.l.bf16 %v11535_v49  ;;  %v3456_v46 = vadd.f32 %v3440_v59, %v3317_v51  ;;  %v3455_v36 = vadd.f32 %v3439_v12, %v3316_v63  ;;  %5154 = vperm.xlu0 %6190, %v6096_v55   ;;  %v11536_v26 = vld [vmem:[#allocation346_spill] sm:$0xff]  ;;  %v6098_v51 = vld [vmem:[%s10694_s0 + $0x1100] sm:$0xff]  ;;  %v11542_v16 = vld [vmem:[#allocation335_spill] sm:$0xff] }
 0x7e1   : > { %v3458_v17 = vadd.f32 %v3442_v23, %v3319_v5  ;;  %v3457_v14 = vadd.f32 %v3441_v7, %v3318_v45  ;;  %v3460_v32 = vadd.f32 %v3444_v0, %v3321_v25  ;;  %v3459_v1 = vadd.f32 %v3443_v47, %v3320_v35  ;;  %v11537_v63 = vld [vmem:[#allocation330_spill] sm:$0xff]  ;;  %v11539_v45 = vld [vmem:[#allocation331_spill] sm:$0xff]  ;;  %v11548_v50 = vld [vmem:[#allocation340_spill] sm:$0xff] }
 0x7e2   : > { %v3462_v30 = vadd.f32 %v3446_v57, %v3323_v41  ;;  %v3461_v44 = vadd.f32 %v3445_v54, %v3322_v53  ;;  %v3464_v27 = vadd.f32 %v3448_v40, %v3325_v18  ;;  %v3463_v20 = vadd.f32 %v3447_v58, %v3324_v43  ;;  %v11541_v35 = vld [vmem:[#allocation334_spill] sm:$0xff]  ;;  %v10062_v59 = vpop.permute.xlu1 %4700  ;;  %v11543_v53 = vld [vmem:[#allocation336_spill] sm:$0xff]  ;;  %v11544_v43 = vld [vmem:[#allocation337_spill] sm:$0xff] }
 0x7e3   : > { %v3583_v39 = vmul.f32 %v6236_v48, %v11536_v26  ;;  %v10055_v5 = vmul.f32 %v6236_v48, %v11537_v63  ;;  %v10058_v25 = vmul.f32 %v6235_v37, %v11539_v45  ;;  %v3571_v41 = vmul.f32 %v6236_v48, %v11541_v35  ;;  %v11545_v23 = vld [vmem:[#allocation338_spill] sm:$0xff]  ;;  %v11546_v0 = vld [vmem:[#allocation339_spill] sm:$0xff]  ;;  %v10068_v57 = vpop.permute.xlu0 %4695  ;;  %5225 = vperm.xlu1 %6191, %v6099_v4   ;;  %v11549_v40 = vld [vmem:[#allocation341_spill] sm:$0xff] }
 0x7e4   : > { %v3570_v19 = vmul.f32 %v6235_v37, %v11542_v16  ;;  %v3573_v18 = vmul.f32 %v6236_v48, %v11543_v53  ;;  %v3572_v12 = vmul.f32 %v6235_v37, %v11544_v43  ;;  %v3575_v7 = vmul.f32 %v6236_v48, %v11545_v23  ;;  %11547 = vst [vmem:[#allocation16_spill] sm:$0xff] %v10068_v57  ;;  %v11550_v49 = vld [vmem:[#allocation342_spill] sm:$0xff]  ;;  %v11551_v26 = vld [vmem:[#allocation343_spill] sm:$0xff]  ;;  %v6101_v45 = vld [vmem:[%s10694_s0 + $0x1118] sm:$0xff] }
 0x7e5   : > { %11538 = vst [vmem:[#allocation41_spill] sm:$0xff] %v10055_v5  ;;  %11540 = vst [vmem:[#allocation15_spill] sm:$0xff] %v10058_v25  ;;  %v3574_v47 = vmul.f32 %v6235_v37, %v11546_v0  ;;  %v3577_v54 = vmul.f32 %v6236_v48, %v11548_v50  ;;  %v3576_v58 = vmul.f32 %v6235_v37, %v11549_v40  ;;  %5220 = vperm.xlu0 %6190, %v6098_v51   ;;  %v11552_v35 = vld [vmem:[#allocation364_spill] sm:$0xff]  ;;  %v6100_v0 = vld [vmem:[%s10694_s0 + $0x1110] sm:$0xff] }
 0x7e6   : > { %v3579_v55 = vmul.f32 %v6236_v48, %v11550_v49  ;;  %v3578_v63 = vmul.f32 %v6235_v37, %v11551_v26  ;;  %v6241_v16 = vunpack.i.h.bf16 %v11552_v35  ;;  %v10079_v53 = vunpack.i.l.bf16 %v11552_v35  ;;  %v11553_v4 = vld [vmem:[#allocation344_spill] sm:$0xff]  ;;  %v11554_v49 = vld [vmem:[#allocation345_spill] sm:$0xff]  ;;  %v11555_v26 = vld [vmem:[#allocation347_spill] sm:$0xff]  ;;  %v10087_v5 = vpop.permute.xlu1 %4710 }
 0x7e7   : > { %v3599_v43 = vadd.f32 %v3583_v39, %v3464_v27  ;;  %v3581_v23 = vmul.f32 %v6236_v48, %v11553_v4  ;;  %v3587_v50 = vadd.f32 %v3571_v41, %v3452_v21  ;;  %v3586_v40 = vadd.f32 %v3570_v19, %v3451_v10  ;;  %11556 = vst [vmem:[#allocation17_spill] sm:$0xff] %v10087_v5  ;;  %v10089_v57 = vpop.permute.xlu0 %4705  ;;  %v6103_v21 = vld [vmem:[%s10694_s0 + $0x1128] sm:$0xff]  ;;  %v11558_v10 = vld [vmem:[#allocation365_spill] sm:$0xff] }
 0x7e8   : > { %v3580_v51 = vmul.f32 %v6235_v37, %v11554_v49  ;;  %v3582_v25 = vmul.f32 %v6235_v37, %v11555_v26  ;;  %v3589_v61 = vadd.f32 %v3573_v18, %v3454_v33  ;;  %v3588_v60 = vadd.f32 %v3572_v12, %v3453_v24  ;;  %11557 = vst [vmem:[#allocation18_spill] sm:$0xff] %v10089_v57  ;;  %v11559_v41 = vld [vmem:[#allocation353_spill] sm:$0xff]  ;;  %v11560_v33 = vld [vmem:[#allocation350_spill] sm:$0xff]  ;;  %v11570_v49 = vld [vmem:[#allocation368_spill] sm:$0xff] }
 0x7e9   : > { %v3591_v13 = vadd.f32 %v3575_v7, %v3456_v46  ;;  %v3590_v35 = vadd.f32 %v3574_v47, %v3455_v36  ;;  %5235 = vperm.xlu1 %6191, %v6101_v45   ;;  %v3593_v48 = vadd.f32 %v3577_v54, %v3458_v17  ;;  %v3592_v27 = vadd.f32 %v3576_v58, %v3457_v14  ;;  %v6102_v24 = vld [vmem:[%s10694_s0 + $0x1120] sm:$0xff]  ;;  %v11561_v17 = vld [vmem:[#allocation355_spill] sm:$0xff] }
 0x7ea   : > { %v3595_v39 = vadd.f32 %v3579_v55, %v3460_v32  ;;  %v3594_v4 = vadd.f32 %v3578_v63, %v3459_v1  ;;  %5230 = vperm.xlu0 %6190, %v6100_v0   ;;  %v3718_v37 = vmul.f32 %v6241_v16, %v11558_v10  ;;  %v3706_v19 = vmul.f32 %v6241_v16, %v11559_v41  ;;  %v11562_v1 = vld [vmem:[#allocation352_spill] sm:$0xff]  ;;  %v10104_v7 = vpop.permute.xlu1 %4720  ;;  %v11564_v47 = vld [vmem:[#allocation351_spill] sm:$0xff]  ;;  %v11566_v58 = vld [vmem:[#allocation357_spill] sm:$0xff] }
 0x7eb   : > { %v3705_v46 = vmul.f32 %v10079_v53, %v11560_v33  ;;  %v3597_v36 = vadd.f32 %v3581_v23, %v3462_v30  ;;  %v3708_v14 = vmul.f32 %v6241_v16, %v11561_v17  ;;  %v3707_v32 = vmul.f32 %v10079_v53, %v11562_v1  ;;  %11563 = vst [vmem:[#allocation20_spill] sm:$0xff] %v10104_v7  ;;  %v11567_v63 = vld [vmem:[#allocation354_spill] sm:$0xff]  ;;  %v11568_v45 = vld [vmem:[#allocation359_spill] sm:$0xff]  ;;  %v10113_v0 = vpop.permute.xlu0 %4715  ;;  %v11571_v26 = vld [vmem:[#allocation333_spill] sm:$0xff] }
 0x7ec   : > { %v3596_v18 = vadd.f32 %v3580_v51, %v3461_v44  ;;  %v3598_v12 = vadd.f32 %v3582_v25, %v3463_v20  ;;  %v10107_v54 = vmul.f32 %v6241_v16, %v11564_v47  ;;  %v3710_v55 = vmul.f32 %v6241_v16, %v11566_v58  ;;  %11569 = vst [vmem:[#allocation21_spill] sm:$0xff] %v10113_v0  ;;  %v11572_v44 = vld [vmem:[#allocation356_spill] sm:$0xff]  ;;  %v11573_v25 = vld [vmem:[#allocation361_spill] sm:$0xff]  ;;  %v11574_v41 = vld [vmem:[#allocation358_spill] sm:$0xff] }
 0x7ed   : > { %v3709_v30 = vmul.f32 %v10079_v53, %v11567_v63  ;;  %v3712_v23 = vmul.f32 %v6241_v16, %v11568_v45  ;;  %5245 = vperm.xlu1 %6191, %v6103_v21   ;;  %v3842_v10 = vmul.f32 %v11571_v26, %v11570_v49  ;;  %v3711_v20 = vmul.f32 %v10079_v53, %v11572_v44  ;;  %v6105_v17 = vld [vmem:[%s10694_s0 + $0x1138] sm:$0xff]  ;;  %v6104_v45 = vld [vmem:[%s10694_s0 + $0x1130] sm:$0xff]  ;;  %v11577_v49 = vld [vmem:[#allocation369_spill] sm:$0xff] }
 0x7ee   : > { %11565 = vst [vmem:[#allocation19_spill] sm:$0xff] %v10107_v54  ;;  %v3714_v51 = vmul.f32 %v6241_v16, %v11573_v25  ;;  %v3713_v33 = vmul.f32 %v10079_v53, %v11574_v41  ;;  %5240 = vperm.xlu0 %6190, %v6102_v24   ;;  %v3734_v1 = vadd.f32 %v3718_v37, %v3599_v43  ;;  %v11575_v47 = vld [vmem:[#allocation348_spill] sm:$0xff]  ;;  %v11579_v54 = vld [vmem:[#allocation363_spill] sm:$0xff]  ;;  %v10135_v7 = vpop.permute.xlu1 %4730 }
 0x7ef   : > { %v10127_v21 = vmul.f32 %v10079_v53, %v11575_v47  ;;  %v3722_v58 = vadd.f32 %v3706_v19, %v3587_v50  ;;  %v3721_v63 = vadd.f32 %v3705_v46, %v3586_v40  ;;  %v11578_v44 = vld [vmem:[#allocation332_spill] sm:$0xff]  ;;  %v3724_v41 = vadd.f32 %v3708_v14, %v3589_v61  ;;  %v10139_v40 = vpop.permute.xlu0 %4725  ;;  %v11581_v61 = vld [vmem:[#allocation370_spill] sm:$0xff] }
 0x7f0   : > { %v3841_v25 = vmul.f32 %v11578_v44, %v11577_v49  ;;  %v3723_v24 = vadd.f32 %v3707_v32, %v3588_v60  ;;  %v3716_v0 = vmul.f32 %v6241_v16, %v11579_v54  ;;  %v3726_v43 = vadd.f32 %v3710_v55, %v3591_v13  ;;  %v11580_v47 = vld [vmem:[#allocation360_spill] sm:$0xff]  ;;  %v6107_v60 = vld [vmem:[%s10694_s0 + $0x1148] sm:$0xff]  ;;  %v11582_v16 = vld [vmem:[#allocation371_spill] sm:$0xff] }
 0x7f1   : > { %11576 = vst [vmem:[#allocation38_spill] sm:$0xff] %v10127_v21  ;;  %v3725_v37 = vadd.f32 %v3709_v30, %v3590_v35  ;;  %v3728_v57 = vadd.f32 %v3712_v23, %v3593_v48  ;;  %v3715_v50 = vmul.f32 %v10079_v53, %v11580_v47  ;;  %5255 = vperm.xlu1 %6191, %v6105_v17   ;;  %v11583_v48 = vld [vmem:[#allocation372_spill] sm:$0xff]  ;;  %v11584_v32 = vld [vmem:[#allocation362_spill] sm:$0xff] }
 0x7f2   : > { %v3858_v19 = vadd.f32 %v3842_v10, %v3722_v58  ;;  %v3727_v46 = vadd.f32 %v3711_v20, %v3592_v27  ;;  %v3730_v21 = vadd.f32 %v3714_v51, %v3595_v39  ;;  %v3729_v5 = vadd.f32 %v3713_v33, %v3594_v4  ;;  %5250 = vperm.xlu0 %6190, %v6104_v45   ;;  %v6106_v27 = vld [vmem:[%s10694_s0 + $0x1140] sm:$0xff]  ;;  %v11586_v30 = vld [vmem:[#allocation374_spill] sm:$0xff]  ;;  %v10159_v20 = vpop.permute.xlu1 %4740  ;;  %v11587_v51 = vld [vmem:[#allocation375_spill] sm:$0xff] }
 0x7f3   : > { %v3844_v13 = vmul.f32 %v11571_v26, %v11581_v61  ;;  %v3843_v35 = vmul.f32 %v11578_v44, %v11582_v16  ;;  %v3846_v14 = vmul.f32 %v11571_v26, %v11583_v48  ;;  %v3717_v54 = vmul.f32 %v10079_v53, %v11584_v32  ;;  %v11585_v4 = vld [vmem:[#allocation373_spill] sm:$0xff]  ;;  %v11588_v17 = vld [vmem:[#allocation376_spill] sm:$0xff]  ;;  %v11589_v45 = vld [vmem:[#allocation399_spill] sm:$0xff] }
 0x7f4   : > { %v3857_v39 = vadd.f32 %v3841_v25, %v3721_v63  ;;  %v3845_v55 = vmul.f32 %v11578_v44, %v11585_v4  ;;  %v3848_v23 = vmul.f32 %v11571_v26, %v11586_v30  ;;  %v3732_v10 = vadd.f32 %v3716_v0, %v3597_v36  ;;  %v10168_v63 = vpop.permute.xlu0 %4735  ;;  %v11592_v25 = vld [vmem:[#allocation377_spill] sm:$0xff]  ;;  %v11593_v61 = vld [vmem:[#allocation378_spill] sm:$0xff]  ;;  %v11594_v0 = vld [vmem:[#allocation380_spill] sm:$0xff] }
 0x7f5   : > { %v3847_v33 = vmul.f32 %v11578_v44, %v11587_v51  ;;  %v3850_v53 = vmul.f32 %v11571_v26, %v11588_v17  ;;  %v3731_v58 = vadd.f32 %v3715_v50, %v3596_v18  ;;  %v10166_v49 = vunpack.i.h.bf16 %v11589_v45  ;;  %11591 = vst [vmem:[#allocation23_spill] sm:$0xff] %v10168_v63  ;;  %5265 = vperm.xlu1 %6191, %v6107_v60   ;;  %v6109_v18 = vld [vmem:[%s10694_s0 + $0x1158] sm:$0xff]  ;;  %v6108_v30 = vld [vmem:[%s10694_s0 + $0x1150] sm:$0xff] }
 0x7f6   : > { %v3849_v47 = vmul.f32 %v11578_v44, %v11592_v25  ;;  %v3852_v36 = vmul.f32 %v11571_v26, %v11593_v61  ;;  %v3854_v16 = vmul.f32 %v11571_v26, %v11594_v0  ;;  %v10177_v48 = vunpack.i.l.bf16 %v11589_v45  ;;  %5260 = vperm.xlu0 %6190, %v6106_v27   ;;  %v11596_v25 = vld [vmem:[#allocation379_spill] sm:$0xff]  ;;  %v11597_v45 = vld [vmem:[#allocation381_spill] sm:$0xff]  ;;  %v10189_v0 = vpop.permute.xlu1 %4750 }
 0x7f7   : > { %11590 = vst [vmem:[#allocation22_spill] sm:$0xff] %v10166_v49  ;;  %v3860_v50 = vadd.f32 %v3844_v13, %v3724_v41  ;;  %v3859_v32 = vadd.f32 %v3843_v35, %v3723_v24  ;;  %v3862_v60 = vadd.f32 %v3846_v14, %v3726_v43  ;;  %v3733_v4 = vadd.f32 %v3717_v54, %v3598_v12  ;;  %v11599_v41 = vld [vmem:[#allocation396_spill] sm:$0xff]  ;;  %v11602_v14 = vld [vmem:[#allocation385_spill] sm:$0xff] }
 0x7f8   : > { %11595 = vst [vmem:[#allocation26_spill] sm:$0xff] %v10177_v48  ;;  %v3861_v51 = vadd.f32 %v3845_v55, %v3725_v37  ;;  %v3864_v17 = vadd.f32 %v3848_v23, %v3728_v57  ;;  %v3851_v61 = vmul.f32 %v11578_v44, %v11596_v25  ;;  %v3853_v27 = vmul.f32 %v11578_v44, %v11597_v45  ;;  %v11600_v12 = vld [vmem:[#allocation384_spill] sm:$0xff]  ;;  %v10195_v13 = vpop.permute.xlu0 %4745  ;;  %v6110_v23 = vld [vmem:[%s10694_s0 + $0x1160] sm:$0xff] }
 0x7f9   : > { %11598 = vst [vmem:[#allocation27_spill] sm:$0xff] %v10189_v0  ;;  %v3863_v26 = vadd.f32 %v3847_v33, %v3727_v46  ;;  %v3866_v63 = vadd.f32 %v3850_v53, %v3730_v21  ;;  %v3989_v24 = vmul.f32 %v10166_v49, %v11599_v41  ;;  %v3977_v43 = vmul.f32 %v10166_v49, %v11600_v12  ;;  %v6111_v21 = vld [vmem:[%s10694_s0 + $0x1168] sm:$0xff]  ;;  %v11608_v12 = vld [vmem:[#allocation389_spill] sm:$0xff] }
 0x7fa   : > { %11601 = vst [vmem:[#allocation28_spill] sm:$0xff] %v10195_v13  ;;  %5275 = vperm.xlu1 %6191, %v6109_v18   ;;  %v3865_v57 = vadd.f32 %v3849_v47, %v3729_v5  ;;  %v3868_v37 = vadd.f32 %v3852_v36, %v3732_v10  ;;  %v3870_v35 = vadd.f32 %v3854_v16, %v3734_v1  ;;  %v11603_v46 = vld [vmem:[#allocation386_spill] sm:$0xff]  ;;  %v5162_v33 = vrot.slane %v9028_v38, 2  ;;  %v11605_v36 = vld [vmem:[#allocation387_spill] sm:$0xff]  ;;  %v11606_v18 = vld [vmem:[#allocation388_spill] sm:$0xff]  ;;  %v10215_v25 = vpop.permute.xlu1 %4819 }
 0x7fb   : > { %v3976_v54 = vmul.f32 %v10177_v48, %v11602_v14  ;;  %5270 = vperm.xlu0 %6190, %v6108_v30   ;;  %v3979_v55 = vmul.f32 %v10166_v49, %v11603_v46  ;;  %v5163_v5 = vrot.slane %v9026_v42, 2  ;;  %v11604_v1 = vunpack.c.l.bf16 %v9552_v11  ;;  %11607 = vst [vmem:[#allocation29_spill] sm:$0xff] %v10215_v25  ;;  %v11609_v46 = vld [vmem:[#allocation390_spill] sm:$0xff] }
 0x7fc   : > { %v3867_v53 = vadd.f32 %v3851_v61, %v3731_v58  ;;  %v3869_v47 = vadd.f32 %v3853_v27, %v3733_v4  ;;  %v3978_v16 = vmul.f32 %v10177_v48, %v11605_v36  ;;  %v3981_v30 = vmul.f32 %v10166_v49, %v11606_v18  ;;  %v10221_v11 = vpop.permute.xlu0 %4814  ;;  %v11611_v58 = vld [vmem:[#allocation414_spill] sm:$0xff]  ;;  %v11613_v27 = vld [vmem:[#allocation391_spill] sm:$0xff]  ;;  %v11614_v36 = vld [vmem:[#allocation392_spill] sm:$0xff] }
 0x7fd   : > { %v5165_v10 = vrot.slane %v11604_v1, 2  ;;  %v4005_v45 = vadd.f32 %v3989_v24, %v3870_v35  ;;  %v3993_v41 = vadd.f32 %v3977_v43, %v3858_v19  ;;  %v3980_v14 = vmul.f32 %v10177_v48, %v11608_v12  ;;  %11610 = vst [vmem:[#allocation30_spill] sm:$0xff] %v10221_v11  ;;  %v6113_v19 = vld [vmem:[%s10694_s0 + $0x1178] sm:$0xff]  ;;  %v11618_v12 = vld [vmem:[#allocation393_spill] sm:$0xff]  ;;  %v11621_v11 = vld [vmem:[#allocation395_spill] sm:$0xff] }
 0x7fe   : > { %v3983_v44 = vmul.f32 %v10166_v49, %v11609_v46  ;;  %5285 = vperm.xlu1 %6191, %v6111_v21   ;;  %v10224_v4 = vunpack.i.h.bf16 %v11611_v58  ;;  %v3992_v61 = vadd.f32 %v3976_v54, %v3857_v39  ;;  %v3982_v1 = vmul.f32 %v10177_v48, %v11613_v27  ;;  %v6112_v21 = vld [vmem:[%s10694_s0 + $0x1170] sm:$0xff]  ;;  %v11619_v27 = vld [vmem:[#allocation394_spill] sm:$0xff] }
 0x7ff   : > { %v3985_v24 = vmul.f32 %v10166_v49, %v11614_v36  ;;  %5280 = vperm.xlu0 %6190, %v6110_v23   ;;  %v10234_v43 = vunpack.i.l.bf16 %v11611_v58  ;;  %v3995_v35 = vadd.f32 %v3979_v55, %v3860_v50  ;;  %v10240_v39 = vsel %vm1171_vm1, %v5162_v33, %v5163_v5  ;;  %v10249_v36 = vpop.permute.xlu1 %4829  ;;  %v11622_v33 = vld [vmem:[#allocation397_spill] sm:$0xff] }
 0x800   : > { %11612 = vst [vmem:[#allocation56_spill] sm:$0xff] %v10224_v4  ;;  %11616 = vst [vmem:[#allocation32_spill] sm:$0xff] %v10240_v39  ;;  %v10243_v54 = vsel %vm1171_vm1, %v5163_v5, %v5165_v10  ;;  %v3994_v18 = vadd.f32 %v3978_v16, %v3859_v32  ;;  %v3997_v23 = vadd.f32 %v3981_v30, %v3862_v60  ;;  %v10255_v5 = vpop.permute.xlu0 %4824  ;;  %v11624_v32 = vld [vmem:[#allocation415_spill] sm:$0xff] }
 0x801   : > { %11615 = vst [vmem:[#allocation31_spill] sm:$0xff] %v10234_v43  ;;  %11617 = vst [vmem:[#allocation33_spill] sm:$0xff] %v10243_v54  ;;  %v3984_v46 = vmul.f32 %v10177_v48, %v11618_v12  ;;  %v3987_v58 = vmul.f32 %v10166_v49, %v11619_v27  ;;  %v3996_v50 = vadd.f32 %v3980_v14, %v3861_v51  ;;  %v6114_v51 = vld [vmem:[%s10694_s0 + $0x1180] sm:$0xff]  ;;  %v11627_v14 = vld [vmem:[#allocation400_spill] sm:$0xff] }
 0x802   : > { %11620 = vst [vmem:[#allocation34_spill] sm:$0xff] %v10249_v36  ;;  %v3999_v55 = vadd.f32 %v3983_v44, %v3864_v17  ;;  %v3986_v25 = vmul.f32 %v10177_v48, %v11621_v11  ;;  %v3988_v13 = vmul.f32 %v10177_v48, %v11622_v33  ;;  %11623 = vst [vmem:[#allocation35_spill] sm:$0xff] %v10255_v5  ;;  %5295 = vperm.xlu1 %6191, %v6113_v19   ;;  %v11626_v17 = vld [vmem:[#allocation403_spill] sm:$0xff]  ;;  %v11628_v19 = vld [vmem:[#allocation405_spill] sm:$0xff] }
 0x803   : > { %v4124_v60 = vmul.f32 %v10224_v4, %v11624_v32  ;;  %v3998_v10 = vadd.f32 %v3982_v1, %v3863_v26  ;;  %v4001_v16 = vadd.f32 %v3985_v24, %v3866_v63  ;;  %5290 = vperm.xlu0 %6190, %v6112_v21   ;;  %v10264_v44 = vpack.i.bf16 %v10243_v54, %v10240_v39  ;;  %v11629_v26 = vld [vmem:[#allocation402_spill] sm:$0xff]  ;;  %v11630_v1 = vld [vmem:[#allocation407_spill] sm:$0xff]  ;;  %v11631_v21 = vld [vmem:[#allocation404_spill] sm:$0xff]  ;;  %v10278_v39 = vpop.permute.xlu1 %4839 }
 0x804   : > { %v4112_v30 = vmul.f32 %v10224_v4, %v11626_v17  ;;  %v4111_v11 = vmul.f32 %v10234_v43, %v11627_v14  ;;  %v4114_v12 = vmul.f32 %v10224_v4, %v11628_v19  ;;  %v4113_v63 = vmul.f32 %v10234_v43, %v11629_v26  ;;  %11632 = vst [vmem:[#allocation37_spill] sm:$0xff] %v10278_v39  ;;  %v11633_v17 = vld [vmem:[#allocation418_spill] sm:$0xff]  ;;  %v11634_v14 = vld [vmem:[#allocation409_spill] sm:$0xff]  ;;  %v11636_v26 = vld [vmem:[#allocation411_spill] sm:$0xff] }
 0x805   : > { %11625 = vst [vmem:[#allocation36_spill] sm:$0xff] %v10264_v44  ;;  %v4116_v24 = vmul.f32 %v10224_v4, %v11630_v1  ;;  %v4115_v27 = vmul.f32 %v10234_v43, %v11631_v21  ;;  %v4000_v33 = vadd.f32 %v3984_v46, %v3865_v57  ;;  %v4003_v32 = vadd.f32 %v3987_v58, %v3868_v37  ;;  %v11635_v19 = vld [vmem:[#allocation406_spill] sm:$0xff]  ;;  %v10288_v1 = vpop.permute.xlu0 %4834  ;;  %v11638_v57 = vld [vmem:[#allocation408_spill] sm:$0xff] }
 0x806   : > { %v4241_v54 = vmul.f32 %v11633_v17, %v9026_v42  ;;  %v4118_v48 = vmul.f32 %v10224_v4, %v11634_v14  ;;  %v4117_v49 = vmul.f32 %v10234_v43, %v11635_v19  ;;  %v4120_v5 = vmul.f32 %v10224_v4, %v11636_v26  ;;  %11637 = vst [vmem:[#allocation39_spill] sm:$0xff] %v10288_v1  ;;  %v6116_v17 = vld [vmem:[%s10694_s0 + $0x1190] sm:$0xff] }
 0x807   : > { %5355 = vperm.xlu1 %6191, %v6114_v51   ;;  %v4140_v21 = vadd.f32 %v4124_v60, %v4005_v45  ;;  %v4119_v37 = vmul.f32 %v10234_v43, %v11638_v57  ;;  %v4002_v46 = vadd.f32 %v3986_v25, %v3867_v53  ;;  %v4004_v58 = vadd.f32 %v3988_v13, %v3869_v47  ;;  %v6115_v45 = vld [vmem:[%s10694_s0 + $0x1188] sm:$0xff]  ;;  %v11639_v60 = vld [vmem:[#allocation419_spill] sm:$0xff]  ;;  %v11640_v47 = vld [vmem:[#allocation413_spill] sm:$0xff]  ;;  %v10304_v57 = vpop.permute.xlu1 %4849 }
 0x808   : > { %6263 = vrot.lane.b32.xlu0 %v10264_v44, %s6335_s27  ;;  %v4128_v14 = vadd.f32 %v4112_v30, %v3993_v41  ;;  %v4127_v19 = vadd.f32 %v4111_v11, %v3992_v61  ;;  %v4130_v39 = vadd.f32 %v4114_v12, %v3995_v35  ;;  %v4129_v26 = vadd.f32 %v4113_v63, %v3994_v18  ;;  %v11643_v18 = vld [vmem:[#allocation420_spill] sm:$0xff]  ;;  %v11644_v12 = vld [vmem:[#allocation410_spill] sm:$0xff]  ;;  %s6278_s27 = scalar_lea.vmem %s6277_s24, 4096 }
 0x809   : > { %v4240_v51 = vmul.f32 %v11639_v60, %v9028_v38  ;;  %v4132_v53 = vadd.f32 %v4116_v24, %v3997_v23  ;;  %v4131_v13 = vadd.f32 %v4115_v27, %v3996_v50  ;;  %v4122_v25 = vmul.f32 %v10224_v4, %v11640_v47  ;;  %11641 = vst [vmem:[#allocation57_spill] sm:$0xff] %v10304_v57  ;;  %v10306_v35 = vpop.permute.xlu0 %4844  ;;  %v11645_v50 = vld [vmem:[#allocation412_spill] sm:$0xff]  ;;  %v11652_v60 = vld [vmem:[#allocation427_spill] sm:$0xff] }
 0x80a   : > { %v4257_v44 = vadd.f32 %v4241_v54, %v4128_v14  ;;  %v4134_v1 = vadd.f32 %v4118_v48, %v3999_v55  ;;  %v4133_v41 = vadd.f32 %v4117_v49, %v3998_v10  ;;  %v4136_v61 = vadd.f32 %v4120_v5, %v4001_v16  ;;  %11642 = vst [vmem:[#allocation43_spill] sm:$0xff] %v10306_v35  ;;  %v6118_v48 = vld [vmem:[%s10694_s0 + $0x11a0] sm:$0xff]  ;;  %v11647_v55 = vld [vmem:[#allocation422_spill] sm:$0xff]  ;;  %v11648_v10 = vld [vmem:[#allocation423_spill] sm:$0xff] }
 0x80b   : > { %5365 = vperm.xlu1 %6191, %v6116_v17   ;;  %v4243_v30 = vmul.f32 %v11643_v18, %v9026_v42  ;;  %v4135_v11 = vadd.f32 %v4119_v37, %v4000_v33  ;;  %v4121_v23 = vmul.f32 %v10234_v43, %v11644_v12  ;;  %v4123_v63 = vmul.f32 %v10234_v43, %v11645_v50  ;;  %v11646_v49 = vld [vmem:[#allocation421_spill] sm:$0xff]  ;;  %v11649_v24 = vld [vmem:[#allocation424_spill] sm:$0xff]  ;;  %v11651_v14 = vld [vmem:[#allocation426_spill] sm:$0xff]  ;;  %v10336_v50 = vpop.permute.xlu1 %4859 }
 0x80c   : > { %5360 = vperm.xlu0 %6190, %v6115_v45   ;;  %v4242_v54 = vmul.f32 %v11646_v49, %v9028_v38  ;;  %v4245_v5 = vmul.f32 %v11647_v55, %v9026_v42  ;;  %v4244_v16 = vmul.f32 %v11648_v10, %v9028_v38  ;;  %v4247_v27 = vmul.f32 %v11649_v24, %v9026_v42  ;;  %v6117_v33 = vld [vmem:[%s10694_s0 + $0x1198] sm:$0xff]  ;;  %v11650_v37 = vld [vmem:[#allocation425_spill] sm:$0xff]  ;;  %v11656_v10 = vld [vmem:[#allocation430_spill] sm:$0xff] }
 0x80d   : > { %v4246_v17 = vmul.f32 %v11650_v37, %v9028_v38  ;;  %v4249_v45 = vmul.f32 %v11651_v14, %v9026_v42  ;;  %v4248_v47 = vmul.f32 %v11652_v60, %v9028_v38  ;;  %v11653_v18 = vld [vmem:[#allocation428_spill] sm:$0xff]  ;;  %11654 = vst [vmem:[#allocation40_spill] sm:$0xff] %v10336_v50  ;;  %v11655_v49 = vld [vmem:[#allocation429_spill] sm:$0xff]  ;;  %v4253_v24 = vmul.f32 %v11656_v10, %v9026_v42  ;;  %v11657_v43 = vld [vmem:[#allocation431_spill] sm:$0xff]  ;;  %v10344_v35 = vpop.permute.xlu0 %4854 }
 0x80e   : > { %v4251_v12 = vmul.f32 %v11653_v18, %v9026_v42  ;;  %v4250_v55 = vmul.f32 %v11655_v49, %v9028_v38  ;;  %v4252_v37 = vmul.f32 %v11657_v43, %v9028_v38  ;;  %v4138_v4 = vadd.f32 %v4122_v25, %v4003_v32  ;;  %v6120_v18 = vld [vmem:[%s10694_s0 + $0x11b0] sm:$0xff]  ;;  %v6119_v43 = vld [vmem:[%s10694_s0 + $0x11a8] sm:$0xff] }
 0x80f   : > { %5375 = vperm.xlu1 %6191, %v6118_v48   ;;  %v4256_v14 = vadd.f32 %v4240_v51, %v4127_v19  ;;  %v4259_v60 = vadd.f32 %v4243_v30, %v4130_v39  ;;  %v4137_v57 = vadd.f32 %v4121_v23, %v4002_v46  ;;  %v4139_v36 = vadd.f32 %v4123_v63, %v4004_v58  ;;  %v10352_v39 = vpop.permute.xlu1 %4869  ;;  %v11658_v46 = vld [vmem:[#allocation434_spill] sm:$0xff] }
 0x810   : > { %5370 = vperm.xlu0 %6190, %v6117_v33   ;;  %v4258_v49 = vadd.f32 %v4242_v54, %v4129_v26  ;;  %v4261_v50 = vadd.f32 %v4245_v5, %v4132_v53  ;;  %v4260_v0 = vadd.f32 %v4244_v16, %v4131_v13  ;;  %v4263_v10 = vadd.f32 %v4247_v27, %v4134_v1  ;;  %v11659_v26 = vld [vmem:[#allocation435_spill] sm:$0xff]  ;;  %v11660_v53 = vld [vmem:[#allocation436_spill] sm:$0xff]  ;;  %v11661_v54 = vld [vmem:[#allocation437_spill] sm:$0xff] }
 0x811   : > { %v4262_v32 = vadd.f32 %v4246_v17, %v4133_v41  ;;  %v4265_v25 = vadd.f32 %v4249_v45, %v4136_v61  ;;  %v4264_v48 = vadd.f32 %v4248_v47, %v4135_v11  ;;  %v4267_v19 = vadd.f32 %v4251_v12, %v4138_v4  ;;  %v10355_v63 = vpop.permute.xlu0 %4864  ;;  %v11662_v41 = vld [vmem:[#allocation438_spill] sm:$0xff]  ;;  %v6122_v4 = vld [vmem:[%s10694_s0 + $0x11c0] sm:$0xff]  ;;  %v6121_v17 = vld [vmem:[%s10694_s0 + $0x11b8] sm:$0xff] }
 0x812   : > { %v4450_v58 = vadd.f32 %v11658_v46, %v4257_v44  ;;  %v4266_v51 = vadd.f32 %v4250_v55, %v4137_v57  ;;  %v4269_v30 = vadd.f32 %v4253_v24, %v4140_v21  ;;  %v4268_v23 = vadd.f32 %v4252_v37, %v4139_v36  ;;  %v11663_v44 = vld [vmem:[#allocation439_spill] sm:$0xff]  ;;  %v11664_v21 = vld [vmem:[#allocation440_spill] sm:$0xff]  ;;  %v11665_v11 = vld [vmem:[#allocation441_spill] sm:$0xff] }
 0x813   : > { %5385 = vperm.xlu1 %6191, %v6120_v18   ;;  %v4449_v1 = vadd.f32 %v11659_v26, %v4256_v14  ;;  %v4452_v13 = vadd.f32 %v11660_v53, %v4259_v60  ;;  %v4451_v5 = vadd.f32 %v11661_v54, %v4258_v49  ;;  %v4454_v61 = vadd.f32 %v11662_v41, %v4261_v50  ;;  %v11666_v27 = vld [vmem:[#allocation442_spill] sm:$0xff]  ;;  %v11667_v45 = vld [vmem:[#allocation443_spill] sm:$0xff]  ;;  %v11668_v12 = vld [vmem:[#allocation444_spill] sm:$0xff]  ;;  %v10375_v60 = vpop.permute.xlu1 %4879 }
 0x814   : > { %5380 = vperm.xlu0 %6190, %v6119_v43   ;;  %v4453_v57 = vadd.f32 %v11663_v44, %v4260_v0  ;;  %v4456_v36 = vadd.f32 %v11664_v21, %v4263_v10  ;;  %v4455_v16 = vadd.f32 %v11665_v11, %v4262_v32  ;;  %v4458_v33 = vadd.f32 %v11666_v27, %v4265_v25  ;;  %v11669_v55 = vld [vmem:[#allocation445_spill] sm:$0xff]  ;;  %v11670_v37 = vld [vmem:[#allocation446_spill] sm:$0xff]  ;;  %v11671_v0 = vld [vmem:[#allocation447_spill] sm:$0xff] }
 0x815   : > { %v4457_v47 = vadd.f32 %v11667_v45, %v4264_v48  ;;  %v4460_v50 = vadd.f32 %v11668_v12, %v4267_v19  ;;  %v4459_v24 = vadd.f32 %v11669_v55, %v4266_v51  ;;  %v4462_v14 = vadd.f32 %v11670_v37, %v4269_v30  ;;  %v10380_v43 = vpop.permute.xlu0 %4874  ;;  %v6124_v46 = vld [vmem:[%s10694_s0 + $0x11d0] sm:$0xff]  ;;  %v11680_v44 = vld [vmem:[#allocation9_spill] sm:$0xff] }
 0x816   : > { %v4461_v18 = vadd.f32 %v11671_v0, %v4268_v23  ;;  %v4643_v49 = vadd.f32 %v9782_v29, %v4450_v58  ;;  %v4642_v10 = vadd.f32 %v9788_v15, %v4449_v1  ;;  %v4645_v32 = vadd.f32 %v9801_v2, %v4452_v13  ;;  %v6123_v2 = vld [vmem:[%s10694_s0 + $0x11c8] sm:$0xff]  ;;  %v11675_v1 = vld [vmem:[#allocation20_spill] sm:$0xff]  ;;  %v6126_v21 = vld [vmem:[%s10694_s0 + $0x11e0] sm:$0xff] }
 0x817   : > { %5395 = vperm.xlu1 %6191, %v6122_v4   ;;  %v4644_v25 = vadd.f32 %v9811_v62, %v4451_v5  ;;  %v4647_v48 = vadd.f32 %v9831_v31, %v4454_v61  ;;  %v4646_v19 = vadd.f32 %v9837_v22, %v4453_v57  ;;  %v4649_v29 = vadd.f32 %v9872_v52, %v4456_v36  ;;  %v11672_v52 = vld [vmem:[#allocation16_spill] sm:$0xff]  ;;  %v4890_v30 = vpop.permute.xlu1 %4889  ;;  %v11674_v23 = vld [vmem:[#allocation18_spill] sm:$0xff]  ;;  %v11681_v27 = vld [vmem:[#allocation27_spill] sm:$0xff] }
 0x818   : > { %5390 = vperm.xlu0 %6190, %v6121_v17   ;;  %v4648_v15 = vadd.f32 %v9883_v56, %v4455_v16  ;;  %v4651_v58 = vadd.f32 %v9908_v3, %v4458_v33  ;;  %v4650_v51 = vadd.f32 %v9918_v28, %v4457_v47  ;;  %v4766_v62 = vmul.f32 %v9625_v8, %v10043_v9  ;;  %v11673_v3 = vld [vmem:[#allocation17_spill] sm:$0xff]  ;;  %v11678_v5 = vld [vmem:[#allocation10_spill] sm:$0xff]  ;;  %v11679_v61 = vld [vmem:[#allocation8_spill] sm:$0xff] }
 0x819   : > { %v4765_v31 = vmul.f32 %v9622_v6, %v10045_v34  ;;  %v4768_v22 = vmul.f32 %v9625_v8, %v10062_v59  ;;  %v4767_v56 = vmul.f32 %v9622_v6, %v11672_v52  ;;  %v4770_v28 = vmul.f32 %v9625_v8, %v11673_v3  ;;  %v11676_v9 = vld [vmem:[#allocation21_spill] sm:$0xff]  ;;  %v10412_v34 = vpop.permute.xlu0 %4884  ;;  %v11677_v59 = vld [vmem:[#allocation7_spill] sm:$0xff]  ;;  %v6125_v17 = vld [vmem:[%s10694_s0 + $0x11d8] sm:$0xff] }
 0x81a   : > { %v4769_v26 = vmul.f32 %v9622_v6, %v11674_v23  ;;  %v4772_v53 = vmul.f32 %v9625_v8, %v11675_v1  ;;  %v4771_v13 = vmul.f32 %v9622_v6, %v11676_v9  ;;  %v4653_v54 = vadd.f32 %v11677_v59, %v4460_v50  ;;  %v11686_v3 = vld [vmem:[#allocation34_spill] sm:$0xff] }
 0x81b   : > { %5405 = vperm.xlu1 %6191, %v6124_v46   ;;  %v4652_v41 = vadd.f32 %v11678_v5, %v4459_v24  ;;  %v4655_v4 = vadd.f32 %v11679_v61, %v4462_v14  ;;  %v4654_v57 = vadd.f32 %v11680_v44, %v4461_v18  ;;  %v4774_v36 = vmul.f32 %v9625_v8, %v10135_v7  ;;  %v10432_v55 = vpop.permute.xlu1 %4949  ;;  %v11683_v18 = vld [vmem:[#allocation28_spill] sm:$0xff] }
 0x81c   : > { %5400 = vperm.xlu0 %6190, %v6123_v2   ;;  %v4773_v11 = vmul.f32 %v9622_v6, %v10139_v40  ;;  %v4776_v16 = vmul.f32 %v9625_v8, %v10159_v20  ;;  %v4778_v33 = vmul.f32 %v9625_v8, %v11681_v27  ;;  %v4782_v45 = vadd.f32 %v4766_v62, %v4643_v49  ;;  %v11682_v20 = vld [vmem:[#allocation23_spill] sm:$0xff]  ;;  %v11684_v62 = vld [vmem:[#allocation29_spill] sm:$0xff]  ;;  %v11692_v27 = vld [vmem:[#allocation40_spill] sm:$0xff] }
 0x81d   : > { %v4781_v47 = vadd.f32 %v4765_v31, %v4642_v10  ;;  %v4784_v12 = vadd.f32 %v4768_v22, %v4645_v32  ;;  %v4783_v50 = vadd.f32 %v4767_v56, %v4644_v25  ;;  %v4786_v7 = vadd.f32 %v4770_v28, %v4647_v48  ;;  %v6254_v14 = vpop.permute.xlu0 %6253  ;;  %v6128_v49 = vld [vmem:[%s10694_s0 + $0x11f0] sm:$0xff]  ;;  %v11685_v22 = vld [vmem:[#allocation30_spill] sm:$0xff] }
 0x81e   : > { %v4785_v24 = vadd.f32 %v4769_v26, %v4646_v19  ;;  %v4788_v37 = vadd.f32 %v4772_v53, %v4649_v29  ;;  %v4787_v40 = vadd.f32 %v4771_v13, %v4648_v15  ;;  %v4775_v0 = vmul.f32 %v9622_v6, %v11682_v20  ;;  %v6127_v19 = vld [vmem:[%s10694_s0 + $0x11e8] sm:$0xff]  ;;  %v11688_v26 = vld [vmem:[#allocation37_spill] sm:$0xff]  ;;  %v11689_v53 = vld [vmem:[#allocation39_spill] sm:$0xff] }
 0x81f   : > { %5415 = vperm.xlu1 %6191, %v6126_v21   ;;  %v4777_v46 = vmul.f32 %v9622_v6, %v11683_v18  ;;  %v6256_v2 = vunpack.i.h.bf16 %v6254_v14  ;;  %v6255_v52 = vunpack.i.l.bf16 %v6254_v14  ;;  %v4790_v10 = vadd.f32 %v4774_v36, %v4651_v58  ;;  %v10444_v29 = vpop.permute.xlu1 %4959  ;;  %v11687_v58 = vld [vmem:[#allocation35_spill] sm:$0xff]  ;;  %v11690_v13 = vld [vmem:[#allocation57_spill] sm:$0xff] }
 0x820   : > { %5410 = vperm.xlu0 %6190, %v6125_v17   ;;  %v4789_v32 = vadd.f32 %v4773_v11, %v4650_v51  ;;  %v4792_v25 = vadd.f32 %v4776_v16, %v4653_v54  ;;  %v4794_v48 = vadd.f32 %v4778_v33, %v4655_v4  ;;  %v6129_v4 = vld [vmem:[%s10694_s0 + $0x11f8] sm:$0xff] }
 0x821   : > { %v4913_v15 = vmul.f32 %v6256_v2, %v4890_v30  ;;  %v10447_v31 = vmul.f32 %v6256_v2, %v11684_v62  ;;  %v10450_v56 = vmul.f32 %v6255_v52, %v11685_v22  ;;  %v4901_v28 = vmul.f32 %v6256_v2, %v11686_v3  ;;  %v10453_v23 = vpop.permute.xlu0 %4954  ;;  %v11702_v3 = vld [vmem:[#allocation367_spill] sm:$0xff] }
 0x822   : > { %v4900_v51 = vmul.f32 %v6255_v52, %v11687_v58  ;;  %v4903_v1 = vmul.f32 %v6256_v2, %v11688_v26  ;;  %v4902_v9 = vmul.f32 %v6255_v52, %v11689_v53  ;;  %v4905_v59 = vmul.f32 %v6256_v2, %v11690_v13  ;;  %v11705_v26 = vld [vmem:[#allocation22_spill] sm:$0xff]  ;;  %v11706_v53 = vld [vmem:[#allocation383_spill] sm:$0xff] }
 0x823   : > { %5425 = vperm.xlu1 %6191, %v6128_v49   ;;  %v4791_v30 = vadd.f32 %v4775_v0, %v4652_v41  ;;  %v4793_v54 = vadd.f32 %v4777_v46, %v4654_v57  ;;  %v10459_v5 = vadd.f32 %v4913_v15, %v4794_v48  ;;  %v10461_v61 = vadd.f32 %v4901_v28, %v4782_v45  ;;  %v10474_v16 = vpop.permute.xlu1 %4969  ;;  %v11691_v41 = vld [vmem:[#allocation43_spill] sm:$0xff]  ;;  %v11699_v15 = vld [vmem:[#allocation366_spill] sm:$0xff]  ;;  %v11703_v28 = vld [vmem:[#allocation332_spill] sm:$0xff] }
 0x824   : > { %5420 = vperm.xlu0 %6190, %v6127_v19   ;;  %v10466_v44 = vadd.f32 %v4900_v51, %v4781_v47  ;;  %v10468_v21 = vadd.f32 %v4903_v1, %v4784_v12  ;;  %v10470_v36 = vadd.f32 %v4902_v9, %v4783_v50  ;;  %v10472_v11 = vadd.f32 %v4905_v59, %v4786_v7  ;;  %v11693_v47 = vld [vmem:[#allocation36_spill] sm:$0xff]  ;;  %v11698_v19 = vld [vmem:[#allocation19_spill] sm:$0xff]  ;;  %v11704_v51 = vld [vmem:[#allocation382_spill] sm:$0xff] }
 0x825   : > { %v4904_v57 = vmul.f32 %v6255_v52, %v11691_v41  ;;  %v4907_v33 = vmul.f32 %v6256_v2, %v11692_v27  ;;  %v4906_v17 = vmul.f32 %v6255_v52, %v10344_v35  ;;  %v4909_v45 = vmul.f32 %v6256_v2, %v10352_v39  ;;  %v4965_v14 = vpop.permute.xlu0 %4964  ;;  %v11707_v9 = vld [vmem:[#allocation26_spill] sm:$0xff]  ;;  %v11708_v41 = vld [vmem:[#allocation401_spill] sm:$0xff] }
 0x826   : > { %v4908_v12 = vmul.f32 %v6255_v52, %v10355_v63  ;;  %v4911_v50 = vmul.f32 %v6256_v2, %v10375_v60  ;;  %v4910_v7 = vmul.f32 %v6255_v52, %v10380_v43  ;;  %v4912_v20 = vmul.f32 %v6255_v52, %v10412_v34  ;;  %v11694_v43 = vld [vmem:[#allocation11_spill] sm:$0xff]  ;;  %v11695_v2 = vld [vmem:[#allocation41_spill] sm:$0xff]  ;;  %v11696_v52 = vld [vmem:[#allocation12_spill] sm:$0xff] }
 0x827   : > { %6268 = vrot.lane.b32.xlu1 %v11693_v47, %s6336_s28  ;;  %v10486_v0 = vadd.f32 %v4904_v57, %v4785_v24  ;;  %v10488_v18 = vadd.f32 %v4907_v33, %v4788_v37  ;;  %v10490_v35 = vadd.f32 %v4906_v17, %v4787_v40  ;;  %v10492_v39 = vadd.f32 %v4909_v45, %v4790_v10  ;;  %v11697_v24 = vld [vmem:[#allocation15_spill] sm:$0xff]  ;;  %v10506_v37 = vpop.permute.xlu1 %4979  ;;  %v11709_v57 = vld [vmem:[#allocation56_spill] sm:$0xff]  ;;  %v11710_v33 = vld [vmem:[#allocation398_spill] sm:$0xff]  ;;  %s134_s28 = sand.u32 1, %s6324_s10  }
 0x828   : > { %5430 = vperm.xlu0 %6190, %v6129_v4   ;;  %v10494_v46 = vadd.f32 %v4908_v12, %v4789_v32  ;;  %v10496_v49 = vadd.f32 %v4911_v50, %v4792_v25  ;;  %v10498_v63 = vadd.f32 %v4910_v7, %v4791_v30  ;;  %v10500_v60 = vadd.f32 %v4912_v20, %v4793_v54  ;;  %v11700_v32 = vld [vmem:[#allocation333_spill] sm:$0xff]  ;;  %v11701_v25 = vld [vmem:[#allocation38_spill] sm:$0xff]  ;;  %v11711_v17 = vld [vmem:[#allocation31_spill] sm:$0xff]  ;;  %s5568_s6 = sshll.u32 %s134_s28, 7  ;;  %s10654_s21 = scalar_lea.sflag [#allocation3], %s134_s28 }
 0x829   : > { %v3585_v34 = vadd.f32 %v11695_v2, %v11694_v43  ;;  %v3584_v48 = vadd.f32 %v11697_v24, %v11696_v52  ;;  %v4975_v40 = vpop.permute.xlu0 %4974  ;;  %v3840_v62 = vmul.f32 %v11700_v32, %v11699_v15  ;;  %v3839_v58 = vmul.f32 %v11703_v28, %v11702_v3  ;;  %v11712_v20 = vld [vmem:[#allocation416_spill] sm:$0xff]  ;;  %v11713_v2 = vld [vmem:[#allocation417_spill] sm:$0xff]  ;;  %s136_s7 = scalar_lea.vmem [#allocation2], %s5568_s6 }
 0x82a   : > { %v3975_v1 = vmul.f32 %v11705_v26, %v11704_v51  ;;  %v3974_v13 = vmul.f32 %v11707_v9, %v11706_v53  ;;  %v4110_v27 = vmul.f32 %v11709_v57, %v11708_v41  ;;  %v4109_v45 = vmul.f32 %v11711_v17, %v11710_v33  ;;  %v11714_v32 = vld [vmem:[#allocation432_spill] sm:$0xff]  ;;  %v11716_v3 = vld [vmem:[#allocation13_spill] sm:$0xff]  ;;  %v11719_v53 = vld [vmem:[#allocation6_spill] sm:$0xff]  ;;  %s5502_s14 = sshll.u32 %s136_s7, 4  ;;  %s10647_s14 = int_to_ptr.vmem [resolvable:$true] %s5502_s14 }
 0x82b   : > { %v3720_v10 = vadd.f32 %v11698_v19, %v3585_v34  ;;  %v3719_v22 = vadd.f32 %v11701_v25, %v3584_v48  ;;  %v4990_v59 = vpop.permute.xlu1 %4989  ;;  %v4239_v43 = vmul.f32 %v11712_v20, %v9026_v42  ;;  %v4238_v34 = vmul.f32 %v11713_v2, %v9028_v38  ;;  %v11715_v25 = vld [vmem:[#allocation433_spill] sm:$0xff]  ;;  %s6272_s22 = scalar_lea.vmem %s10647_s14, 2048  ;;  %p6279_p0 = scmp.lt.s32.totalorder %s10647_s14, %s6277_s24 }
 0x82c   : > { %v4764_v28 = vmul.f32 %v9625_v8, %v11716_v3  ;;  %p6273_p11 = scmp.ne.s32.totalorder %s10647_s14, %s6272_s22  ;;  %p6280_p1 = scmp.lt.s32.totalorder %s6278_s27, %s6272_s22 }
 0x82d   : > { %v4985_v30 = vpop.permute.xlu0 %4984  ;;  %v3856_v54 = vadd.f32 %v3840_v62, %v3720_v10  ;;  %v3855_v4 = vadd.f32 %v3839_v58, %v3719_v22  ;;  %v11717_v58 = vld [vmem:[#allocation14_spill] sm:$0xff] }
 0x82e   : > { %v4763_v51 = vmul.f32 %v9622_v6, %v11717_v58  ;;  %p6274_p12 = pnand %p6273_p11, %p6393_p5  ;;  %p6281_p2 = por %p6280_p1, %p6279_p0 }
 0x82f   : > { %v3991_v47 = vadd.f32 %v3975_v1, %v3856_v54  ;;  %v3990_v12 = vadd.f32 %v3974_v13, %v3855_v4  ;;  %v5000_v50 = vpop.permute.xlu1 %4999  ;;  %v11718_v1 = vld [vmem:[#allocation5_spill] sm:$0xff] }
 0x830   : > { %p6275_p13 = pneg %p6274_p12 }
 0x831   : > { %v4995_v7 = vpop.permute.xlu0 %4994  ;;  %v4126_v52 = vadd.f32 %v4110_v27, %v3991_v47  ;;  %v4125_v24 = vadd.f32 %v4109_v45, %v3990_v12 }
 0x832   : > { %p6282_p3 = pnand %p6281_p2, %p6275_p13 }
 0x833   : > { %v5010_v48 = vpop.permute.xlu1 %5009  ;;  %v4255_v10 = vadd.f32 %v4239_v43, %v4126_v52  ;;  %v4254_v15 = vadd.f32 %v4238_v34, %v4125_v24 }
 0x835   : > { %v5005_v19 = vpop.permute.xlu0 %5004  ;;  %v4448_v62 = vadd.f32 %v11714_v32, %v4255_v10  ;;  %v4447_v22 = vadd.f32 %v11715_v25, %v4254_v15  ;;  %v11721_v32 = vld [vmem:[#allocation32_spill] sm:$0xff] }
 0x837   : > { %v5020_v42 = vpop.permute.xlu1 %5019  ;;  %v4641_v38 = vadd.f32 %v11718_v1, %v4448_v62  ;;  %v4640_v9 = vadd.f32 %v11719_v53, %v4447_v22 }
 0x839   : > { %v5015_v26 = vpop.permute.xlu0 %5014  ;;  %v4780_v13 = vadd.f32 %v4764_v28, %v4641_v38  ;;  %v4779_v54 = vadd.f32 %v4763_v51, %v4640_v9 }
 0x83b   : > { %v6259_v4 = vpop.permute.xlu1 %6258  ;;  %v4915_v33 = vadd.f32 %v10447_v31, %v4780_v13  ;;  %v4914_v17 = vadd.f32 %v10450_v56, %v4779_v54  ;;  %v11720_v31 = vld [vmem:[#allocation33_spill] sm:$0xff] }
 0x83c   : > { %v6261_v41 = vunpack.i.h.bf16 %v6259_v4  ;;  %v6260_v57 = vunpack.i.l.bf16 %v6259_v4 }
 0x83d   : > { %v5025_v27 = vpop.permute.xlu0 %5024 }
 0x83e   : > { %v5048_v8 = vmul.f32 %v6261_v41, %v5025_v27  ;;  %v5034_v45 = vmul.f32 %v6261_v41, %v10453_v23  ;;  %v5033_v6 = vmul.f32 %v6260_v57, %v10432_v55  ;;  %v5036_v47 = vmul.f32 %v6261_v41, %v4965_v14 }
 0x83f   : > { %v5090_v12 = vpop.permute.xlu1 %5089  ;;  %v5035_v20 = vmul.f32 %v6260_v57, %v10444_v29  ;;  %v5038_v43 = vmul.f32 %v6261_v41, %v4975_v40  ;;  %v5037_v2 = vmul.f32 %v6260_v57, %v10474_v16  ;;  %v5040_v34 = vmul.f32 %v6261_v41, %v4985_v30 }
 0x840   : > { %v10541_v52 = vadd.f32 %v5048_v8, %v10459_v5  ;;  %v5050_v24 = vadd.f32 %v5034_v45, %v4915_v33  ;;  %v5170_v10 = vmul.f32 %v11720_v31, %v5090_v12  ;;  %v5049_v15 = vadd.f32 %v5033_v6, %v4914_v17 }
 0x841   : > { %v5085_v56 = vpop.permute.xlu0 %5084  ;;  %v5052_v55 = vadd.f32 %v5036_v47, %v10461_v61  ;;  %v5051_v14 = vadd.f32 %v5035_v20, %v10466_v44  ;;  %v5054_v29 = vadd.f32 %v5038_v43, %v10468_v21  ;;  %v5053_v16 = vadd.f32 %v5037_v2, %v10470_v36 }
 0x842   : > { %v5169_v23 = vmul.f32 %v11721_v32, %v5085_v56  ;;  %v10548_v40 = vadd.f32 %v5170_v10, %v5050_v24  ;;  %v5056_v5 = vadd.f32 %v5040_v34, %v10472_v11  ;;  %v5039_v30 = vmul.f32 %v6260_v57, %v10506_v37 }
 0x843   : > { %v5100_v25 = vpop.permute.xlu1 %5099  ;;  %v5042_v22 = vmul.f32 %v6261_v41, %v4995_v7  ;;  %v5041_v3 = vmul.f32 %v6260_v57, %v4990_v59  ;;  %v5044_v28 = vmul.f32 %v6261_v41, %v5005_v19  ;;  %v5043_v21 = vmul.f32 %v6260_v57, %v5000_v50 }
 0x844   : > { %v10553_v62 = vadd.f32 %v5169_v23, %v5049_v15  ;;  %v5172_v61 = vmul.f32 %v11720_v31, %v5100_v25  ;;  %v5055_v44 = vadd.f32 %v5039_v30, %v10486_v0  ;;  %v5046_v51 = vmul.f32 %v6261_v41, %v5015_v26 }
 0x845   : > { %v5095_v58 = vpop.permute.xlu0 %5094  ;;  %v5058_v36 = vadd.f32 %v5042_v22, %v10488_v18  ;;  %v5057_v11 = vadd.f32 %v5041_v3, %v10490_v35  ;;  %v5060_v37 = vadd.f32 %v5044_v28, %v10492_v39  ;;  %v5059_v59 = vadd.f32 %v5043_v21, %v10494_v46 }
 0x846   : > { %v5171_v1 = vmul.f32 %v11721_v32, %v5095_v58  ;;  %v10561_v38 = vadd.f32 %v5172_v61, %v5052_v55  ;;  %v5062_v7 = vadd.f32 %v5046_v51, %v10496_v49  ;;  %v5045_v19 = vmul.f32 %v6260_v57, %v5010_v48 }
 0x847   : > { %v5110_v0 = vpop.permute.xlu1 %5109  ;;  %v5047_v50 = vmul.f32 %v6260_v57, %v5020_v42 }
 0x848   : > { %v10565_v53 = vadd.f32 %v5171_v1, %v5051_v14  ;;  %v5174_v26 = vmul.f32 %v11720_v31, %v5110_v0  ;;  %v5061_v18 = vadd.f32 %v5045_v19, %v10498_v63 }
 0x849   : > { %v5105_v9 = vpop.permute.xlu0 %5104  ;;  %v10571_v39 = vadd.f32 %v5047_v50, %v10500_v60 }
 0x84a   : > { %v5173_v35 = vmul.f32 %v11721_v32, %v5105_v9  ;;  %v10573_v13 = vadd.f32 %v5174_v26, %v5054_v29 }
 0x84b   : > { %v5120_v49 = vpop.permute.xlu1 %5119 }
 0x84c   : > { %v10575_v46 = vadd.f32 %v5173_v35, %v5053_v16  ;;  %v5176_v48 = vmul.f32 %v11720_v31, %v5120_v49 }
 0x84d   : > { %v5115_v54 = vpop.permute.xlu0 %5114 }
 0x84e   : > { %v5175_v42 = vmul.f32 %v11721_v32, %v5115_v54  ;;  %v10579_v4 = vadd.f32 %v5176_v48, %v5056_v5 }
 0x84f   : > { %v5130_v63 = vpop.permute.xlu1 %5129 }
 0x850   : > { %v10581_v41 = vadd.f32 %v5175_v42, %v5055_v44  ;;  %v5178_v57 = vmul.f32 %v11720_v31, %v5130_v63 }
 0x851   : > { %v5125_v27 = vpop.permute.xlu0 %5124 }
 0x852   : > { %v5177_v60 = vmul.f32 %v11721_v32, %v5125_v27  ;;  %v10585_v33 = vadd.f32 %v5178_v57, %v5058_v36 }
 0x853   : > { %v5140_v8 = vpop.permute.xlu1 %5139 }
 0x854   : > { %v10587_v17 = vadd.f32 %v5177_v60, %v5057_v11  ;;  %v5180_v45 = vmul.f32 %v11720_v31, %v5140_v8 }
 0x855   : > { %v5135_v6 = vpop.permute.xlu0 %5134 }
 0x856   : > { %v5179_v47 = vmul.f32 %v11721_v32, %v5135_v6  ;;  %v10591_v12 = vadd.f32 %v5180_v45, %v5060_v37 }
 0x857   : > { %v5150_v43 = vpop.permute.xlu1 %5149 }
 0x858   : > { %v10593_v20 = vadd.f32 %v5179_v47, %v5059_v59  ;;  %v5182_v2 = vmul.f32 %v11720_v31, %v5150_v43 }
 0x859   : > { %v5145_v34 = vpop.permute.xlu0 %5144 }
 0x85a   : > { %v5181_v24 = vmul.f32 %v11721_v32, %v5145_v34  ;;  %v10597_v10 = vadd.f32 %v5182_v2, %v5062_v7 }
 0x85b   : > { %v5160_v15 = vpop.permute.xlu1 %5159 }
 0x85c   : > { %v10599_v56 = vadd.f32 %v5181_v24, %v5061_v18  ;;  %v5184_v23 = vmul.f32 %v11720_v31, %v5160_v15 }
 0x85d   : > { %v5155_v55 = vpop.permute.xlu0 %5154 }
 0x85e   : > { %v10603_v14 = vadd.f32 %v5184_v23, %v10541_v52  ;;  %v5183_v57 = vmul.f32 %v11721_v32, %v5155_v55 }
 0x85f   : > { %v5226_v29 = vpop.permute.xlu1 %5225 }
 0x860   : > { %v5199_v24 = vadd.f32 %v5183_v57, %v10571_v39 }
 0x861   : > { %v5221_v16 = vpop.permute.xlu0 %5220 }
 0x864   : > { %v5236_v5 = vpop.permute.xlu1 %5235 }
 0x865   : > { %v5231_v30 = vpop.permute.xlu0 %5230 }
 0x868   : > { %v5246_v25 = vpop.permute.xlu1 %5245 }
 0x869   : > { %v5241_v22 = vpop.permute.xlu0 %5240 }
 0x86c   : > { %v5256_v3 = vpop.permute.xlu1 %5255 }
 0x86d   : > { %v5251_v28 = vpop.permute.xlu0 %5250 }
 0x870   : > { %v5266_v61 = vpop.permute.xlu1 %5265 }
 0x871   : > { %v5261_v58 = vpop.permute.xlu0 %5260 }
 0x875   : > { %v5276_v44 = vpop.permute.xlu1 %5275 }
 0x876   : > { %v5271_v21 = vpop.permute.xlu0 %5270 }
 0x879   : > { %v5286_v51 = vpop.permute.xlu1 %5285 }
 0x87a   : > { %v5281_v1 = vpop.permute.xlu0 %5280 }
 0x87d   : > { %v5296_v36 = vpop.permute.xlu1 %5295 }
 0x87e   : > { %v5291_v31 = vpop.permute.xlu0 %5290 }
 0x882   : > { %v5356_v11 = vpop.permute.xlu1 %5355  ;;  %v6264_v37 = vpop.permute.xlu0 %6263 }
 0x883   : > { %v6266_v52 = vunpack.i.h.bf16 %v6264_v37  ;;  %v6265_v54 = vunpack.i.l.bf16 %v6264_v37 }
 0x885   : > { %v5305_v59 = vmul.f32 %v6266_v52, %v5226_v29  ;;  %v5304_v27 = vmul.f32 %v6265_v54, %v5221_v16  ;;  %v5307_v60 = vmul.f32 %v6266_v52, %v5236_v5  ;;  %v5309_v8 = vmul.f32 %v6266_v52, %v5246_v25 }
 0x886   : > { %v5366_v7 = vpop.permute.xlu1 %5365  ;;  %v5306_v45 = vmul.f32 %v6265_v54, %v5231_v30  ;;  %v5308_v6 = vmul.f32 %v6265_v54, %v5241_v22  ;;  %v5311_v47 = vmul.f32 %v6266_v52, %v5256_v3  ;;  %v5310_v43 = vmul.f32 %v6265_v54, %v5251_v28 }
 0x887   : > { %v5361_v19 = vpop.permute.xlu0 %5360  ;;  %v10606_v0 = vadd.f32 %v5305_v59, %v10548_v40  ;;  %v5313_v40 = vmul.f32 %v6266_v52, %v5266_v61  ;;  %v5312_v2 = vmul.f32 %v6265_v54, %v5261_v58  ;;  %v5315_v15 = vmul.f32 %v6266_v52, %v5276_v44 }
 0x888   : > { %v5314_v23 = vmul.f32 %v6265_v54, %v5271_v21  ;;  %v5317_v37 = vmul.f32 %v6266_v52, %v5286_v51  ;;  %v5316_v59 = vmul.f32 %v6265_v54, %v5281_v1  ;;  %v5318_v32 = vmul.f32 %v6265_v54, %v5291_v31 }
 0x889   : > { %v5320_v55 = vadd.f32 %v5304_v27, %v10553_v62  ;;  %v5322_v16 = vadd.f32 %v5306_v45, %v10565_v53  ;;  %v5323_v5 = vadd.f32 %v5307_v60, %v10561_v38  ;;  %v5324_v30 = vadd.f32 %v5308_v6, %v10575_v46 }
 0x88a   : > { %v5376_v50 = vpop.permute.xlu1 %5375  ;;  %v5325_v25 = vadd.f32 %v5309_v8, %v10573_v13  ;;  %v5326_v39 = vadd.f32 %v5310_v43, %v10581_v41  ;;  %v5327_v22 = vadd.f32 %v5311_v47, %v10579_v4  ;;  %v5328_v3 = vadd.f32 %v5312_v2, %v10587_v17 }
 0x88b   : > { %v5371_v26 = vpop.permute.xlu0 %5370  ;;  %v5329_v28 = vadd.f32 %v5313_v40, %v10585_v33  ;;  %v5330_v62 = vadd.f32 %v5314_v23, %v10593_v20  ;;  %v5331_v53 = vadd.f32 %v5315_v15, %v10591_v12  ;;  %v5332_v46 = vadd.f32 %v5316_v59, %v10599_v56 }
 0x88c   : > { %v5333_v13 = vadd.f32 %v5317_v37, %v10597_v10  ;;  %v5334_v44 = vadd.f32 %v5318_v32, %v5199_v24  ;;  %v5319_v41 = vmul.f32 %v6266_v52, %v5296_v36 }
 0x88e   : > { %v5386_v9 = vpop.permute.xlu1 %5385  ;;  %v5335_v6 = vadd.f32 %v5319_v41, %v10603_v14 }
 0x88f   : > { %v5381_v18 = vpop.permute.xlu0 %5380 }
 0x892   : > { %v5396_v35 = vpop.permute.xlu1 %5395 }
 0x893   : > { %v5391_v49 = vpop.permute.xlu0 %5390 }
 0x896   : > { %v5406_v48 = vpop.permute.xlu1 %5405 }
 0x897   : > { %v5401_v42 = vpop.permute.xlu0 %5400 }
 0x89a   : > { %v5416_v63 = vpop.permute.xlu1 %5415 }
 0x89b   : > { %v5411_v29 = vpop.permute.xlu0 %5410 }
 0x89e   : > { %v5426_v34 = vpop.permute.xlu1 %5425 }
 0x89f   : > { %v5421_v4 = vpop.permute.xlu0 %5420 }
 0x8a2   : > { %v6269_v61 = vpop.permute.xlu1 %6268 }
 0x8a3   : > { %v6271_v38 = vunpack.i.h.bf16 %v6269_v61  ;;  %v6270_v58 = vunpack.i.l.bf16 %v6269_v61 }
 0x8a5   : > { %v5439_v21 = vmul.f32 %v6270_v58, %v5356_v11  ;;  %v5440_v17 = vmul.f32 %v6271_v38, %v5361_v19  ;;  %v5441_v51 = vmul.f32 %v6270_v58, %v5366_v7  ;;  %v5442_v33 = vmul.f32 %v6271_v38, %v5371_v26 }
 0x8a6   : > { %v5443_v1 = vmul.f32 %v6270_v58, %v5376_v50  ;;  %v5444_v31 = vmul.f32 %v6271_v38, %v5381_v18  ;;  %v5445_v20 = vmul.f32 %v6270_v58, %v5386_v9  ;;  %v5446_v54 = vmul.f32 %v6271_v38, %v5391_v49 }
 0x8a7   : > { %v5447_v12 = vmul.f32 %v6270_v58, %v5396_v35  ;;  %v5448_v57 = vmul.f32 %v6271_v38, %v5401_v42  ;;  %v5449_v27 = vmul.f32 %v6270_v58, %v5406_v48  ;;  %v5450_v56 = vmul.f32 %v6271_v38, %v5411_v29 }
 0x8a8   : > { %v5451_v60 = vmul.f32 %v6270_v58, %v5416_v63  ;;  %v5452_v10 = vmul.f32 %v6271_v38, %v5421_v4  ;;  %v5453_v8 = vmul.f32 %v6270_v58, %v5426_v34  ;;  %v5455_v45 = vadd.f32 %v5439_v21, %v5320_v55 }
 0x8a9   : > { %v5456_v36 = vadd.f32 %v5440_v17, %v10606_v0  ;;  %v5457_v52 = vadd.f32 %v5441_v51, %v5322_v16  ;;  %v5458_v11 = vadd.f32 %v5442_v33, %v5323_v5  ;;  %v5459_v19 = vadd.f32 %v5443_v1, %v5324_v30  ;;  %v5431_v0 = vpop.permute.xlu0 %5430 }
 0x8aa   : > { %v5460_v7 = vadd.f32 %v5444_v31, %v5325_v25  ;;  %v5461_v26 = vadd.f32 %v5445_v20, %v5326_v39  ;;  %v5462_v50 = vadd.f32 %v5446_v54, %v5327_v22  ;;  %v5463_v18 = vadd.f32 %v5447_v12, %v5328_v3  ;;  %5472 = vst.msk [vmem:[%s136_s7] sm:$0xff] %vm5471_vm2, %v5455_v45 }
 0x8ab   : > { %v5464_v9 = vadd.f32 %v5448_v57, %v5329_v28  ;;  %v5465_v35 = vadd.f32 %v5449_v27, %v5330_v62  ;;  %v5466_v49 = vadd.f32 %v5450_v56, %v5331_v53  ;;  %v5467_v48 = vadd.f32 %v5451_v60, %v5332_v46  ;;  %5473 = vst.msk [vmem:[%s136_s7 + $0x8] sm:$0xff] %vm5471_vm2, %v5456_v36 }
 0x8ac   : > { %5474 = vst.msk [vmem:[%s136_s7 + $0x10] sm:$0xff] %vm5471_vm2, %v5457_v52  ;;  %5475 = vst.msk [vmem:[%s136_s7 + $0x18] sm:$0xff] %vm5471_vm2, %v5458_v11  ;;  %v5468_v42 = vadd.f32 %v5452_v10, %v5333_v13  ;;  %v5469_v63 = vadd.f32 %v5453_v8, %v5334_v44  ;;  %v5454_v47 = vmul.f32 %v6271_v38, %v5431_v0 }
 0x8ad   : > { %5476 = vst.msk [vmem:[%s136_s7 + $0x20] sm:$0xff] %vm5471_vm2, %v5459_v19  ;;  %5477 = vst.msk [vmem:[%s136_s7 + $0x28] sm:$0xff] %vm5471_vm2, %v5460_v7 }
 0x8ae   : > { %5478 = vst.msk [vmem:[%s136_s7 + $0x30] sm:$0xff] %vm5471_vm2, %v5461_v26  ;;  %5479 = vst.msk [vmem:[%s136_s7 + $0x38] sm:$0xff] %vm5471_vm2, %v5462_v50  ;;  %v5470_v14 = vadd.f32 %v5454_v47, %v5335_v6 }
 0x8af   : > { %5480 = vst.msk [vmem:[%s136_s7 + $0x40] sm:$0xff] %vm5471_vm2, %v5463_v18  ;;  %5481 = vst.msk [vmem:[%s136_s7 + $0x48] sm:$0xff] %vm5471_vm2, %v5464_v9 }
 0x8b0   : > { %5482 = vst.msk [vmem:[%s136_s7 + $0x50] sm:$0xff] %vm5471_vm2, %v5465_v35  ;;  %5483 = vst.msk [vmem:[%s136_s7 + $0x58] sm:$0xff] %vm5471_vm2, %v5466_v49 }
 0x8b1   : > { %5484 = vst.msk [vmem:[%s136_s7 + $0x60] sm:$0xff] %vm5471_vm2, %v5467_v48  ;;  %5485 = vst.msk [vmem:[%s136_s7 + $0x68] sm:$0xff] %vm5471_vm2, %v5468_v42 }
 0x8b2   : > { %5486 = vst.msk [vmem:[%s136_s7 + $0x70] sm:$0xff] %vm5471_vm2, %v5469_v63  ;;  %5487 = vst.msk [vmem:[%s136_s7 + $0x78] sm:$0xff] %vm5471_vm2, %v5470_v14 }
 0x8b3   : > { %6285 = shalt.err (!%p6282_p3)
}
 0x8b4   : > { %s6286_s25 = scalar_lea.hbm %s10645_s17, 2048  ;;  %s6290_s3 = scalar_lea.hbm %s10696_s2, 4096 }
 0x8b5   : > { %p6287_p4 = scmp.ne.s32.totalorder %s10645_s17, %s6286_s25  ;;  %p6291_p9 = scmp.lt.s32.totalorder %s10645_s17, %s10696_s2 }
 0x8b6   : > { %p6292_p10 = scmp.lt.s32.totalorder %s6290_s3, %s6286_s25 }
 0x8b7   : > { %p6288_p7 = pnand %p6287_p4, %p6393_p5 }
 0x8b8   : > { %p6293_p11 = por %p6292_p10, %p6291_p9 }
 0x8b9   : > { %p6289_p8 = pneg %p6288_p7 }
 0x8bb   : > { %p6294_p12 = pnand %p6293_p11, %p6289_p8 }
 0x8bd   : > { %6297 = shalt.err (!%p6294_p12)
}
 0x8be   : > { %s6338_s5 = smov 128   ;;  %s6339_s28 = smov 8  }
 0x8bf   : > { %6146 = dma.vmem_to_hbm [thread:$0]  (%p6393_p5), %s10647_s14, 2048, %s10645_s17, %s10654_s21, %s6338_s5, %s6338_s5, %s6339_s28  }
 0x8c0 PF: > { %p6152_p13 = scmp.ge.s32.totalorder %s6332_s12, 2  ;;  %s5517_s6 = sand.u32 1, %s6320_s9  }
 0x8c1   : > { %s5518_s7 = scalar_lea.sflag [#allocation3], %s5517_s6 }
 0x8c2   : > { %p6149_p0 = pnand %p6152_p13, %p6397_p6 }
 0x8c4   : > { %p6150_p1 = pneg %p6149_p0 }
 0x8c6   : > { %6315 = dma.done.wait (%p6150_p1), %s5518_s7, 2048  }
 0x8c7   : > { %6317 = vsyncadd (%p6150_p1), %s5518_s7, 4294965248  ;;  %p12_p2 = scmp.ge.s32.totalorder %s6380_s15, 4   ;;  %s11722_s9 = smov %s6324_s10 }
 0x8c8   : > { %s11723_s10 = smov %s6328_s11  ;;  %s11724_s11 = smov %s6391_s18 }
 0x8c9   : > { %s11725_s12 = smov %s6380_s15  ;;  %14 = sbr.rel (!%p12_p2) target bundleno = 3 (0x3), region = 98 }
 0x8ce   :  { %5523 = vsyncpa [#allocation3], 1 }
 0x8cf   :  { %5525 = vsyncpa [#allocation3 + $0x1], 1 }

</bundles_post_ra>
